<compile_context>
chip_gen: v5e
topology: v5e:2x2
jax: 0.10.0
libtpu: 0.0.40
codegen_flags: <defaults>
</compile_context>

<pallas_src>
import jax
import jax.numpy as jnp
from jax import lax
from jax.experimental import pallas as pl
from jax.experimental.pallas import tpu as pltpu

ADAIN_EPS = 1e-5
LEAKY_SLOPE = 0.01   # nn.LeakyReLU() default


# ----------------------------------------------------------------------------
# Kernel
# ----------------------------------------------------------------------------
def adain_module_kernel(x_ref, s_ref, w1_ref, b1_ref, w2_ref, b2_ref,
                        wc_ref, scale_ref, bias_ref, wmix_ref,
                        o_ref, sp_scr, mp_scr):
    """One batch tile (bt samples) per grid step.

    x_ref:     (bt, H, W, Cin)   f32   content features (NHWC)
    s_ref:     (bt, H, W, 64)    bf16  style features   (NHWC)
    w1_ref:    (9, 64, Cin)      bf16  mlp conv3x3 weight, tap-major
    b1_ref:    (1, Cin)          f32
    w2_ref:    (Cin, Cin)        bf16  mlp conv1x1 weight
    b2_ref:    (1, Cin)          f32
    wc_ref:    (9, Cin, Cout)    bf16  main conv3x3 weight, tap-major
    scale_ref: (1, Cout)         f32   folded BN scale  gamma/sqrt(var+eps)
    bias_ref:  (1, Cout)         f32   folded BN bias   (conv_b - mean)*scale + beta
    wmix_ref:  (1, 1)  SMEM      f32   sigmoid(self.w)
    o_ref:     (bt, Cout, H*W)   f32   channel-major output (lane-dense store)
    sp_scr:    (bt, H+2, W+2, 64)  bf16 VMEM  zero-padded style
    mp_scr:    (bt, H+2, W+2, Cin) bf16 VMEM  zero-padded blended feature
    """
    bt, H, W, cin = x_ref.shape
    cs = s_ref.shape[-1]
    cout = o_ref.shape[1]
    hw = H * W
    m = bt * hw
    inv_hw = 1.0 / float(hw)

    # --- in-kernel zero padding.  Only the 1-pixel border needs zeroing; the
    #     interior is fully rewritten every step.  Re-zero the border each step
    #     so nothing depends on which TensorCore ran the "first" program.
    def zero_border(scr, c, dt):
        zr = jnp.zeros((bt, 1, W + 2, c), dt)
        zc = jnp.zeros((bt, H, 1, c), dt)
        scr[:, 0:1, :, :] = zr
        scr[:, H + 1:H + 2, :, :] = zr
        scr[:, 1:H + 1, 0:1, :] = zc
        scr[:, 1:H + 1, W + 1:W + 2, :] = zc

    zero_border(sp_scr, cs, jnp.bfloat16)
    zero_border(mp_scr, cin, jnp.bfloat16)
    sp_scr[:, 1:H + 1, 1:W + 1, :] = s_ref[...]

    # --- style MLP: conv3x3(64->Cin) as 9 shift-tap accumulated MXU dots ----
    sacc = jnp.zeros((m, cin), jnp.float32)
    for k in range(9):
        dh, dw = k // 3, k % 3
        tap = sp_scr[:, dh:dh + H, dw:dw + W, :].reshape(m, cs)      # bf16
        sacc = sacc + jnp.dot(tap, w1_ref[k],
                              preferred_element_type=jnp.float32)
    s_act = sacc + b1_ref[...]
    s_act = jnp.where(s_act > 0, s_act, LEAKY_SLOPE * s_act)         # LeakyReLU
    style_mlp = jnp.dot(s_act.astype(jnp.bfloat16), w2_ref[...],
                        preferred_element_type=jnp.float32) + b2_ref[...]

    # --- AdaIN statistics (per sample, per channel), single-pass variance ----
    xf = x_ref[...].reshape(bt, hw, cin)                             # f32
    sm = style_mlp.reshape(bt, hw, cin)                              # f32
    mean_x = jnp.sum(xf, axis=1, keepdims=True) * inv_hw
    var_x = jnp.maximum(
        jnp.sum(xf * xf, axis=1, keepdims=True) * inv_hw - mean_x * mean_x, 0.0)
    mean_s = jnp.sum(sm, axis=1, keepdims=True) * inv_hw
    var_s = jnp.maximum(
        jnp.sum(sm * sm, axis=1, keepdims=True) * inv_hw - mean_s * mean_s, 0.0)
    ratio = jnp.sqrt(var_s + ADAIN_EPS) * lax.rsqrt(var_x + ADAIN_EPS)  # (bt,1,cin)

    # --- blend:  w*adain(x) + (1-w)*x  ==  x*A + B (per-sample/channel affine)
    wmix = wmix_ref[0, 0]
    a = wmix * ratio + (1.0 - wmix)                                  # (bt,1,cin)
    b = wmix * (mean_s - mean_x * ratio)                             # (bt,1,cin)
    mix = xf * a + b                                                 # (bt,hw,cin)
    mp_scr[:, 1:H + 1, 1:W + 1, :] = (
        mix.reshape(bt, H, W, cin).astype(jnp.bfloat16))

    # --- main conv3x3(Cin->Cout) as 9 accumulated dots + folded BN + ReLU ----
    yacc = jnp.zeros((m, cout), jnp.float32)
    for k in range(9):
        dh, dw = k // 3, k % 3
        tap = mp_scr[:, dh:dh + H, dw:dw + W, :].reshape(m, cin)     # bf16
        yacc = yacc + jnp.dot(tap, wc_ref[k],
                              preferred_element_type=jnp.float32)
    y = jnp.maximum(yacc * scale_ref[...] + bias_ref[...], 0.0)      # (m, cout)

    # --- lane-dense, channel-major store: (Cout, bt*H*W); H*W is a multiple of
    #     128 so every vst is unmasked.  One XLU transpose instead of W masked
    #     32-lane partial stores per row.
    yT = jnp.transpose(y)                                            # (cout, m)
    for bb in range(bt):
        o_ref[bb] = yT[:, bb * hw:(bb + 1) * hw].astype(o_ref.dtype)


# ----------------------------------------------------------------------------
# Wrapper (NCHW in / NCHW out, like the PyTorch module)
# ----------------------------------------------------------------------------
def _pick_batch_tile(n, cap=8):
    # Largest divisor of n (capped) that still leaves >= 2 grid steps so both
    # v7x TensorCores get work; larger tiles amortize per-step overhead on the
    # single-TC v5e/v6e chips.
    best = 1
    for bt in range(1, min(n, cap) + 1):
        if n % bt == 0 and n // bt >= 2:
            best = bt
    return best


def adain_module_forward(x_nchw, style_nchw, params, batch_tile=None):
    N, cin, H, W = x_nchw.shape
    cs = style_nchw.shape[1]
    cout = params["conv_w"].shape[-1]
    hw = H * W

    bt = _pick_batch_tile(N) if batch_tile is None else batch_tile
    assert N % bt == 0

    # NHWC activations for the kernel. The style transpose fuses with its bf16
    # cast; padding now happens inside the kernel (no jnp.pad HBM round trip),
    # and the output comes back channel-major so no output transpose is needed.
    x = jnp.transpose(x_nchw, (0, 2, 3, 1)).astype(jnp.float32)
    st = jnp.transpose(style_nchw, (0, 2, 3, 1)).astype(jnp.bfloat16)

    w1 = params["mlp_w1"].reshape(9, cs, cin).astype(jnp.bfloat16)
    b1 = params["mlp_b1"].reshape(1, cin).astype(jnp.float32)
    w2 = params["mlp_w2"].reshape(cin, cin).astype(jnp.bfloat16)
    b2 = params["mlp_b2"].reshape(1, cin).astype(jnp.float32)
    wc = params["conv_w"].reshape(9, cin, cout).astype(jnp.bfloat16)
    scale = params["conv_scale"].reshape(1, cout).astype(jnp.float32)
    bias = params["conv_bias"].reshape(1, cout).astype(jnp.float32)
    wmix = jax.nn.sigmoid(params["m"]).reshape(1, 1).astype(jnp.float32)

    flops = 2 * N * hw * (9 * cs * cin + cin * cin + 9 * cin * cout)
    bytes_accessed = (4 * x.size + 2 * st.size
                      + 2 * (w1.size + w2.size + wc.size)
                      + 4 * N * hw * cout)

    out_cm = pl.pallas_call(
        adain_module_kernel,
        out_shape=jax.ShapeDtypeStruct((N, cout, hw), jnp.float32),
        grid=(N // bt,),
        in_specs=[
            pl.BlockSpec((bt, H, W, cin), lambda n: (n, 0, 0, 0)),
            pl.BlockSpec((bt, H, W, cs), lambda n: (n, 0, 0, 0)),
            pl.BlockSpec((9, cs, cin), lambda n: (0, 0, 0)),
            pl.BlockSpec((1, cin), lambda n: (0, 0)),
            pl.BlockSpec((cin, cin), lambda n: (0, 0)),
            pl.BlockSpec((1, cin), lambda n: (0, 0)),
            pl.BlockSpec((9, cin, cout), lambda n: (0, 0, 0)),
            pl.BlockSpec((1, cout), lambda n: (0, 0)),
            pl.BlockSpec((1, cout), lambda n: (0, 0)),
            pl.BlockSpec((1, 1), lambda n: (0, 0),
                         memory_space=pltpu.MemorySpace.SMEM),
        ],
        out_specs=pl.BlockSpec((bt, cout, hw), lambda n: (n, 0, 0)),
        scratch_shapes=[
            pltpu.VMEM((bt, H + 2, W + 2, cs), jnp.bfloat16),
            pltpu.VMEM((bt, H + 2, W + 2, cin), jnp.bfloat16),
        ],
        compiler_params=pltpu.CompilerParams(
            dimension_semantics=("parallel",),
            vmem_limit_bytes=32 * 1024 * 1024),
        cost_estimate=pl.CostEstimate(
            flops=flops, transcendentals=2 * N * cin,
            bytes_accessed=bytes_accessed),
    )(x, st, w1, b1, w2, b2, wc, scale, bias, wmix)

    # channel-major (N, Cout, H*W) -> NCHW is a pure view reshape (no copy).
    return out_cm.reshape(N, cout, H, W)


# ----------------------------------------------------------------------------
# Deterministic parameters (conv bias + inference-mode BN folded)
# ----------------------------------------------------------------------------
def make_params(key, cin, cout, m=-0.8, eps=1e-5):
    ks = jax.random.split(key, 10)
    n = jax.random.normal
    mlp_w1 = 0.1 * n(ks[0], (3, 3, 64, cin), jnp.float32)
    mlp_b1 = 0.05 * n(ks[1], (cin,), jnp.float32)
    mlp_w2 = 0.1 * n(ks[2], (1, 1, cin, cin), jnp.float32)
    mlp_b2 = 0.05 * n(ks[3], (cin,), jnp.float32)
    conv_w = 0.1 * n(ks[4], (3, 3, cin, cout), jnp.float32)
    conv_b = 0.05 * n(ks[5], (cout,), jnp.float32)
    gamma = 1.0 + 0.1 * n(ks[6], (cout,), jnp.float32)
    beta = 0.05 * n(ks[7], (cout,), jnp.float32)
    rmean = 0.05 * n(ks[8], (cout,), jnp.float32)
    rvar = 1.0 + 0.1 * jax.random.uniform(ks[9], (cout,), jnp.float32)
    scale = gamma / jnp.sqrt(rvar + eps)
    return {
        "mlp_w1": mlp_w1, "mlp_b1": mlp_b1,
        "mlp_w2": mlp_w2, "mlp_b2": mlp_b2,
        "conv_w": conv_w,
        "conv_scale": scale,
        "conv_bias": (conv_b - rmean) * scale + beta,
        "m": jnp.array([m], jnp.float32),
    }


# ----------------------------------------------------------------------------
# Pure-JAX f32 reference (for a sanity check)
# ----------------------------------------------------------------------------
def ref_forward(x_nchw, style_nchw, params):
    dn = ("NHWC", "HWIO", "NHWC")
    x = jnp.transpose(x_nchw, (0, 2, 3, 1))
    st = jnp.transpose(style_nchw, (0, 2, 3, 1))

    s = lax.conv_general_dilated(st, params["mlp_w1"], (1, 1), "SAME",
                                 dimension_numbers=dn) + params["mlp_b1"]
    s = jnp.where(s > 0, s, LEAKY_SLOPE * s)
    s = lax.conv_general_dilated(s, params["mlp_w2"], (1, 1), "SAME",
                                 dimension_numbers=dn) + params["mlp_b2"]

    mean_x = jnp.mean(x, axis=(1, 2), keepdims=True)
    std_x = jnp.sqrt(jnp.var(x, axis=(1, 2), keepdims=True) + ADAIN_EPS)
    mean_s = jnp.mean(s, axis=(1, 2), keepdims=True)
    std_s = jnp.sqrt(jnp.var(s, axis=(1, 2), keepdims=True) + ADAIN_EPS)
    s_f = (x - mean_x) / std_x * std_s + mean_s

    w = jax.nn.sigmoid(params["m"]).reshape(1, 1, 1, 1)
    mix = w * s_f + (1.0 - w) * x

    y = lax.conv_general_dilated(mix, params["conv_w"], (1, 1), "SAME",
                                 dimension_numbers=dn)
    y = jnp.maximum(y * params["conv_scale"] + params["conv_bias"], 0.0)
    return jnp.transpose(y, (0, 3, 1, 2))


# ----------------------------------------------------------------------------
if __name__ == "__main__":
    key = jax.random.PRNGKey(0)
    pkey, xkey, skey = jax.random.split(key, 3)

    fea_in_c, fea_out_c = 16, 32
    params = make_params(pkey, fea_in_c, fea_out_c)

    # PyTorch-style NCHW inputs: content x (N, Cin, H, W), style (N, 64, H, W).
    x = jax.random.normal(xkey, (2, fea_in_c, 16, 16), jnp.float32)
    style = jax.random.normal(skey, (2, 64, 16, 16), jnp.float32)

    fwd = jax.jit(adain_module_forward)
    out = fwd(x, style, params)
    jax.block_until_ready(out)

    assert out.shape == (2, fea_out_c, 16, 16), out.shape

    out_ref = ref_forward(x, style, params)
    max_err = float(jnp.max(jnp.abs(out - out_ref)))
    # bf16 MXU operands vs. the pure-f32 reference need a slightly wider
    # absolute tolerance near the ReLU boundary.
    assert jnp.allclose(out, out_ref, rtol=2e-2, atol=4e-2), max_err

    print("KERNEL_OK")
</pallas_src>

<mosaic_0001>
module attributes {stable_mosaic.version = 11 : i64} {
  func.func @adain_module_kernel(%arg0: i32, %arg1: memref<1x16x16x16xf32, #tpu.memory_space<vmem>>, %arg2: memref<1x16x16x64xbf16, #tpu.memory_space<vmem>>, %arg3: memref<9x64x16xbf16, #tpu.memory_space<vmem>>, %arg4: memref<1x16xf32, #tpu.memory_space<vmem>>, %arg5: memref<16x16xbf16, #tpu.memory_space<vmem>>, %arg6: memref<1x16xf32, #tpu.memory_space<vmem>>, %arg7: memref<9x16x32xbf16, #tpu.memory_space<vmem>>, %arg8: memref<1x32xf32, #tpu.memory_space<vmem>>, %arg9: memref<1x32xf32, #tpu.memory_space<vmem>>, %arg10: memref<1x1xf32, #tpu.memory_space<smem>>, %arg11: memref<1x32x256xf32, #tpu.memory_space<vmem>>, %arg12: memref<1x18x18x64xbf16, #tpu.memory_space<vmem>>, %arg13: memref<1x18x18x16xbf16, #tpu.memory_space<vmem>>) attributes {dimension_semantics = [#tpu.dimension_semantics<parallel>], iteration_bounds = array<i64: 2>, scalar_prefetch = 0 : i64, scratch_operands = 2 : i64, tpu.core_type = #tpu.core_type<tc>, window_params = [{transform_indices = @transform_0, window_bounds = array<i64: 1, 16, 16, 16>}, {transform_indices = @transform_1, window_bounds = array<i64: 1, 16, 16, 64>}, {pipeline_mode = #tpu.pipeline_mode<synchronous>, transform_indices = @transform_2, window_bounds = array<i64: 9, 64, 16>}, {pipeline_mode = #tpu.pipeline_mode<synchronous>, transform_indices = @transform_3, window_bounds = array<i64: 1, 16>}, {pipeline_mode = #tpu.pipeline_mode<synchronous>, transform_indices = @transform_4, window_bounds = array<i64: 16, 16>}, {pipeline_mode = #tpu.pipeline_mode<synchronous>, transform_indices = @transform_5, window_bounds = array<i64: 1, 16>}, {pipeline_mode = #tpu.pipeline_mode<synchronous>, transform_indices = @transform_6, window_bounds = array<i64: 9, 16, 32>}, {pipeline_mode = #tpu.pipeline_mode<synchronous>, transform_indices = @transform_7, window_bounds = array<i64: 1, 32>}, {pipeline_mode = #tpu.pipeline_mode<synchronous>, transform_indices = @transform_8, window_bounds = array<i64: 1, 32>}, {transform_indices = @transform_9, window_bounds = array<i64: 1, 1>}, {transform_indices = @transform_10, window_bounds = array<i64: 1, 32, 256>}]} {
    %cst = arith.constant 0.000000e+00 : bf16
    %0 = vector.broadcast %cst : bf16 to vector<1x1x18x64xbf16>
    %cst_0 = arith.constant 0.000000e+00 : bf16
    %1 = vector.broadcast %cst_0 : bf16 to vector<1x16x1x64xbf16>
    %c0 = arith.constant 0 : index
    %c0_1 = arith.constant 0 : index
    %c0_2 = arith.constant 0 : index
    %c0_3 = arith.constant 0 : index
    %2 = vector.load %arg12[%c0, %c0_1, %c0_2, %c0_3] : memref<1x18x18x64xbf16, #tpu.memory_space<vmem>>, vector<1x1x18x64xbf16>
    tpu.vector_store %arg12[%c0, %c0_1, %c0_2, %c0_3], %0 {strides = array<i32>} : memref<1x18x18x64xbf16, #tpu.memory_space<vmem>>, vector<1x1x18x64xbf16>,
    %c0_4 = arith.constant 0 : index
    %c17 = arith.constant 17 : index
    %c0_5 = arith.constant 0 : index
    %c0_6 = arith.constant 0 : index
    %3 = vector.load %arg12[%c0_4, %c17, %c0_5, %c0_6] : memref<1x18x18x64xbf16, #tpu.memory_space<vmem>>, vector<1x1x18x64xbf16>
    tpu.vector_store %arg12[%c0_4, %c17, %c0_5, %c0_6], %0 {strides = array<i32>} : memref<1x18x18x64xbf16, #tpu.memory_space<vmem>>, vector<1x1x18x64xbf16>,
    %c0_7 = arith.constant 0 : index
    %c1 = arith.constant 1 : index
    %c0_8 = arith.constant 0 : index
    %c0_9 = arith.constant 0 : index
    %4 = vector.load %arg12[%c0_7, %c1, %c0_8, %c0_9] : memref<1x18x18x64xbf16, #tpu.memory_space<vmem>>, vector<1x16x1x64xbf16>
    tpu.vector_store %arg12[%c0_7, %c1, %c0_8, %c0_9], %1 {strides = array<i32>} : memref<1x18x18x64xbf16, #tpu.memory_space<vmem>>, vector<1x16x1x64xbf16>,
    %c0_10 = arith.constant 0 : index
    %c1_11 = arith.constant 1 : index
    %c17_12 = arith.constant 17 : index
    %c0_13 = arith.constant 0 : index
    %5 = vector.load %arg12[%c0_10, %c1_11, %c17_12, %c0_13] : memref<1x18x18x64xbf16, #tpu.memory_space<vmem>>, vector<1x16x1x64xbf16>
    tpu.vector_store %arg12[%c0_10, %c1_11, %c17_12, %c0_13], %1 {strides = array<i32>} : memref<1x18x18x64xbf16, #tpu.memory_space<vmem>>, vector<1x16x1x64xbf16>,
    %cst_14 = arith.constant 0.000000e+00 : bf16
    %6 = vector.broadcast %cst_14 : bf16 to vector<1x1x18x16xbf16>
    %cst_15 = arith.constant 0.000000e+00 : bf16
    %7 = vector.broadcast %cst_15 : bf16 to vector<1x16x1x16xbf16>
    %c0_16 = arith.constant 0 : index
    %c0_17 = arith.constant 0 : index
    %c0_18 = arith.constant 0 : index
    %c0_19 = arith.constant 0 : index
    %8 = vector.load %arg13[%c0_16, %c0_17, %c0_18, %c0_19] : memref<1x18x18x16xbf16, #tpu.memory_space<vmem>>, vector<1x1x18x16xbf16>
    tpu.vector_store %arg13[%c0_16, %c0_17, %c0_18, %c0_19], %6 {strides = array<i32>} : memref<1x18x18x16xbf16, #tpu.memory_space<vmem>>, vector<1x1x18x16xbf16>,
    %c0_20 = arith.constant 0 : index
    %c17_21 = arith.constant 17 : index
    %c0_22 = arith.constant 0 : index
    %c0_23 = arith.constant 0 : index
    %9 = vector.load %arg13[%c0_20, %c17_21, %c0_22, %c0_23] : memref<1x18x18x16xbf16, #tpu.memory_space<vmem>>, vector<1x1x18x16xbf16>
    tpu.vector_store %arg13[%c0_20, %c17_21, %c0_22, %c0_23], %6 {strides = array<i32>} : memref<1x18x18x16xbf16, #tpu.memory_space<vmem>>, vector<1x1x18x16xbf16>,
    %c0_24 = arith.constant 0 : index
    %c1_25 = arith.constant 1 : index
    %c0_26 = arith.constant 0 : index
    %c0_27 = arith.constant 0 : index
    %10 = vector.load %arg13[%c0_24, %c1_25, %c0_26, %c0_27] : memref<1x18x18x16xbf16, #tpu.memory_space<vmem>>, vector<1x16x1x16xbf16>
    tpu.vector_store %arg13[%c0_24, %c1_25, %c0_26, %c0_27], %7 {strides = array<i32>} : memref<1x18x18x16xbf16, #tpu.memory_space<vmem>>, vector<1x16x1x16xbf16>,
    %c0_28 = arith.constant 0 : index
    %c1_29 = arith.constant 1 : index
    %c17_30 = arith.constant 17 : index
    %c0_31 = arith.constant 0 : index
    %11 = vector.load %arg13[%c0_28, %c1_29, %c17_30, %c0_31] : memref<1x18x18x16xbf16, #tpu.memory_space<vmem>>, vector<1x16x1x16xbf16>
    tpu.vector_store %arg13[%c0_28, %c1_29, %c17_30, %c0_31], %7 {strides = array<i32>} : memref<1x18x18x16xbf16, #tpu.memory_space<vmem>>, vector<1x16x1x16xbf16>,
    %c0_32 = arith.constant 0 : index
    %c0_33 = arith.constant 0 : index
    %c0_34 = arith.constant 0 : index
    %c0_35 = arith.constant 0 : index
    %12 = vector.load %arg2[%c0_32, %c0_33, %c0_34, %c0_35] : memref<1x16x16x64xbf16, #tpu.memory_space<vmem>>, vector<1x16x16x64xbf16>
    %c0_36 = arith.constant 0 : index
    %c1_37 = arith.constant 1 : index
    %c1_38 = arith.constant 1 : index
    %c0_39 = arith.constant 0 : index
    %13 = vector.load %arg12[%c0_36, %c1_37, %c1_38, %c0_39] : memref<1x18x18x64xbf16, #tpu.memory_space<vmem>>, vector<1x16x16x64xbf16>
    tpu.vector_store %arg12[%c0_36, %c1_37, %c1_38, %c0_39], %12 {strides = array<i32>} : memref<1x18x18x64xbf16, #tpu.memory_space<vmem>>, vector<1x16x16x64xbf16>,
    %cst_40 = arith.constant 0.000000e+00 : f32
    %14 = vector.broadcast %cst_40 : f32 to vector<256x16xf32>
    %c0_41 = arith.constant 0 : index
    %c0_42 = arith.constant 0 : index
    %c0_43 = arith.constant 0 : index
    %c0_44 = arith.constant 0 : index
    %15 = vector.load %arg12[%c0_41, %c0_42, %c0_43, %c0_44] : memref<1x18x18x64xbf16, #tpu.memory_space<vmem>>, vector<1x16x16x64xbf16>
    %16 = vector.shape_cast %15 : vector<1x16x16x64xbf16> to vector<256x64xbf16>
    %c0_45 = arith.constant 0 : index
    %c0_46 = arith.constant 0 : index
    %c0_47 = arith.constant 0 : index
    %17 = vector.load %arg3[%c0_45, %c0_46, %c0_47] : memref<9x64x16xbf16, #tpu.memory_space<vmem>>, vector<1x64x16xbf16>
    %18 = vector.shape_cast %17 : vector<1x64x16xbf16> to vector<64x16xbf16>
    %cst_48 = arith.constant dense<0.000000e+00> : vector<256x16xf32>
    %19 = tpu.matmul %16, %18, %cst_48 {dimension_numbers = #tpu.dot_dimension_numbers<[1], [0], [0], [1], [0, 0, 1, 1], [], []>} : vector<256x64xbf16>, vector<64x16xbf16>, vector<256x16xf32> -> vector<256x16xf32>
    %20 = arith.addf %14, %19 : vector<256x16xf32>
    %c0_49 = arith.constant 0 : index
    %c0_50 = arith.constant 0 : index
    %c1_51 = arith.constant 1 : index
    %c0_52 = arith.constant 0 : index
    %21 = vector.load %arg12[%c0_49, %c0_50, %c1_51, %c0_52] : memref<1x18x18x64xbf16, #tpu.memory_space<vmem>>, vector<1x16x16x64xbf16>
    %22 = vector.shape_cast %21 : vector<1x16x16x64xbf16> to vector<256x64xbf16>
    %c1_53 = arith.constant 1 : index
    %c0_54 = arith.constant 0 : index
    %c0_55 = arith.constant 0 : index
    %23 = vector.load %arg3[%c1_53, %c0_54, %c0_55] : memref<9x64x16xbf16, #tpu.memory_space<vmem>>, vector<1x64x16xbf16>
    %24 = vector.shape_cast %23 : vector<1x64x16xbf16> to vector<64x16xbf16>
    %cst_56 = arith.constant dense<0.000000e+00> : vector<256x16xf32>
    %25 = tpu.matmul %22, %24, %cst_56 {dimension_numbers = #tpu.dot_dimension_numbers<[1], [0], [0], [1], [0, 0, 1, 1], [], []>} : vector<256x64xbf16>, vector<64x16xbf16>, vector<256x16xf32> -> vector<256x16xf32>
    %26 = arith.addf %20, %25 : vector<256x16xf32>
    %c0_57 = arith.constant 0 : index
    %c0_58 = arith.constant 0 : index
    %c2 = arith.constant 2 : index
    %c0_59 = arith.constant 0 : index
    %27 = vector.load %arg12[%c0_57, %c0_58, %c2, %c0_59] : memref<1x18x18x64xbf16, #tpu.memory_space<vmem>>, vector<1x16x16x64xbf16>
    %28 = vector.shape_cast %27 : vector<1x16x16x64xbf16> to vector<256x64xbf16>
    %c2_60 = arith.constant 2 : index
    %c0_61 = arith.constant 0 : index
    %c0_62 = arith.constant 0 : index
    %29 = vector.load %arg3[%c2_60, %c0_61, %c0_62] : memref<9x64x16xbf16, #tpu.memory_space<vmem>>, vector<1x64x16xbf16>
    %30 = vector.shape_cast %29 : vector<1x64x16xbf16> to vector<64x16xbf16>
    %cst_63 = arith.constant dense<0.000000e+00> : vector<256x16xf32>
    %31 = tpu.matmul %28, %30, %cst_63 {dimension_numbers = #tpu.dot_dimension_numbers<[1], [0], [0], [1], [0, 0, 1, 1], [], []>} : vector<256x64xbf16>, vector<64x16xbf16>, vector<256x16xf32> -> vector<256x16xf32>
    %32 = arith.addf %26, %31 : vector<256x16xf32>
    %c0_64 = arith.constant 0 : index
    %c1_65 = arith.constant 1 : index
    %c0_66 = arith.constant 0 : index
    %c0_67 = arith.constant 0 : index
    %33 = vector.load %arg12[%c0_64, %c1_65, %c0_66, %c0_67] : memref<1x18x18x64xbf16, #tpu.memory_space<vmem>>, vector<1x16x16x64xbf16>
    %34 = vector.shape_cast %33 : vector<1x16x16x64xbf16> to vector<256x64xbf16>
    %c3 = arith.constant 3 : index
    %c0_68 = arith.constant 0 : index
    %c0_69 = arith.constant 0 : index
    %35 = vector.load %arg3[%c3, %c0_68, %c0_69] : memref<9x64x16xbf16, #tpu.memory_space<vmem>>, vector<1x64x16xbf16>
    %36 = vector.shape_cast %35 : vector<1x64x16xbf16> to vector<64x16xbf16>
    %cst_70 = arith.constant dense<0.000000e+00> : vector<256x16xf32>
    %37 = tpu.matmul %34, %36, %cst_70 {dimension_numbers = #tpu.dot_dimension_numbers<[1], [0], [0], [1], [0, 0, 1, 1], [], []>} : vector<256x64xbf16>, vector<64x16xbf16>, vector<256x16xf32> -> vector<256x16xf32>
    %38 = arith.addf %32, %37 : vector<256x16xf32>
    %c0_71 = arith.constant 0 : index
    %c1_72 = arith.constant 1 : index
    %c1_73 = arith.constant 1 : index
    %c0_74 = arith.constant 0 : index
    %39 = vector.load %arg12[%c0_71, %c1_72, %c1_73, %c0_74] : memref<1x18x18x64xbf16, #tpu.memory_space<vmem>>, vector<1x16x16x64xbf16>
    %40 = vector.shape_cast %39 : vector<1x16x16x64xbf16> to vector<256x64xbf16>
    %c4 = arith.constant 4 : index
    %c0_75 = arith.constant 0 : index
    %c0_76 = arith.constant 0 : index
    %41 = vector.load %arg3[%c4, %c0_75, %c0_76] : memref<9x64x16xbf16, #tpu.memory_space<vmem>>, vector<1x64x16xbf16>
    %42 = vector.shape_cast %41 : vector<1x64x16xbf16> to vector<64x16xbf16>
    %cst_77 = arith.constant dense<0.000000e+00> : vector<256x16xf32>
    %43 = tpu.matmul %40, %42, %cst_77 {dimension_numbers = #tpu.dot_dimension_numbers<[1], [0], [0], [1], [0, 0, 1, 1], [], []>} : vector<256x64xbf16>, vector<64x16xbf16>, vector<256x16xf32> -> vector<256x16xf32>
    %44 = arith.addf %38, %43 : vector<256x16xf32>
    %c0_78 = arith.constant 0 : index
    %c1_79 = arith.constant 1 : index
    %c2_80 = arith.constant 2 : index
    %c0_81 = arith.constant 0 : index
    %45 = vector.load %arg12[%c0_78, %c1_79, %c2_80, %c0_81] : memref<1x18x18x64xbf16, #tpu.memory_space<vmem>>, vector<1x16x16x64xbf16>
    %46 = vector.shape_cast %45 : vector<1x16x16x64xbf16> to vector<256x64xbf16>
    %c5 = arith.constant 5 : index
    %c0_82 = arith.constant 0 : index
    %c0_83 = arith.constant 0 : index
    %47 = vector.load %arg3[%c5, %c0_82, %c0_83] : memref<9x64x16xbf16, #tpu.memory_space<vmem>>, vector<1x64x16xbf16>
    %48 = vector.shape_cast %47 : vector<1x64x16xbf16> to vector<64x16xbf16>
    %cst_84 = arith.constant dense<0.000000e+00> : vector<256x16xf32>
    %49 = tpu.matmul %46, %48, %cst_84 {dimension_numbers = #tpu.dot_dimension_numbers<[1], [0], [0], [1], [0, 0, 1, 1], [], []>} : vector<256x64xbf16>, vector<64x16xbf16>, vector<256x16xf32> -> vector<256x16xf32>
    %50 = arith.addf %44, %49 : vector<256x16xf32>
    %c0_85 = arith.constant 0 : index
    %c2_86 = arith.constant 2 : index
    %c0_87 = arith.constant 0 : index
    %c0_88 = arith.constant 0 : index
    %51 = vector.load %arg12[%c0_85, %c2_86, %c0_87, %c0_88] : memref<1x18x18x64xbf16, #tpu.memory_space<vmem>>, vector<1x16x16x64xbf16>
    %52 = vector.shape_cast %51 : vector<1x16x16x64xbf16> to vector<256x64xbf16>
    %c6 = arith.constant 6 : index
    %c0_89 = arith.constant 0 : index
    %c0_90 = arith.constant 0 : index
    %53 = vector.load %arg3[%c6, %c0_89, %c0_90] : memref<9x64x16xbf16, #tpu.memory_space<vmem>>, vector<1x64x16xbf16>
    %54 = vector.shape_cast %53 : vector<1x64x16xbf16> to vector<64x16xbf16>
    %cst_91 = arith.constant dense<0.000000e+00> : vector<256x16xf32>
    %55 = tpu.matmul %52, %54, %cst_91 {dimension_numbers = #tpu.dot_dimension_numbers<[1], [0], [0], [1], [0, 0, 1, 1], [], []>} : vector<256x64xbf16>, vector<64x16xbf16>, vector<256x16xf32> -> vector<256x16xf32>
    %56 = arith.addf %50, %55 : vector<256x16xf32>
    %c0_92 = arith.constant 0 : index
    %c2_93 = arith.constant 2 : index
    %c1_94 = arith.constant 1 : index
    %c0_95 = arith.constant 0 : index
    %57 = vector.load %arg12[%c0_92, %c2_93, %c1_94, %c0_95] : memref<1x18x18x64xbf16, #tpu.memory_space<vmem>>, vector<1x16x16x64xbf16>
    %58 = vector.shape_cast %57 : vector<1x16x16x64xbf16> to vector<256x64xbf16>
    %c7 = arith.constant 7 : index
    %c0_96 = arith.constant 0 : index
    %c0_97 = arith.constant 0 : index
    %59 = vector.load %arg3[%c7, %c0_96, %c0_97] : memref<9x64x16xbf16, #tpu.memory_space<vmem>>, vector<1x64x16xbf16>
    %60 = vector.shape_cast %59 : vector<1x64x16xbf16> to vector<64x16xbf16>
    %cst_98 = arith.constant dense<0.000000e+00> : vector<256x16xf32>
    %61 = tpu.matmul %58, %60, %cst_98 {dimension_numbers = #tpu.dot_dimension_numbers<[1], [0], [0], [1], [0, 0, 1, 1], [], []>} : vector<256x64xbf16>, vector<64x16xbf16>, vector<256x16xf32> -> vector<256x16xf32>
    %62 = arith.addf %56, %61 : vector<256x16xf32>
    %c0_99 = arith.constant 0 : index
    %c2_100 = arith.constant 2 : index
    %c2_101 = arith.constant 2 : index
    %c0_102 = arith.constant 0 : index
    %63 = vector.load %arg12[%c0_99, %c2_100, %c2_101, %c0_102] : memref<1x18x18x64xbf16, #tpu.memory_space<vmem>>, vector<1x16x16x64xbf16>
    %64 = vector.shape_cast %63 : vector<1x16x16x64xbf16> to vector<256x64xbf16>
    %c8 = arith.constant 8 : index
    %c0_103 = arith.constant 0 : index
    %c0_104 = arith.constant 0 : index
    %65 = vector.load %arg3[%c8, %c0_103, %c0_104] : memref<9x64x16xbf16, #tpu.memory_space<vmem>>, vector<1x64x16xbf16>
    %66 = vector.shape_cast %65 : vector<1x64x16xbf16> to vector<64x16xbf16>
    %cst_105 = arith.constant dense<0.000000e+00> : vector<256x16xf32>
    %67 = tpu.matmul %64, %66, %cst_105 {dimension_numbers = #tpu.dot_dimension_numbers<[1], [0], [0], [1], [0, 0, 1, 1], [], []>} : vector<256x64xbf16>, vector<64x16xbf16>, vector<256x16xf32> -> vector<256x16xf32>
    %68 = arith.addf %62, %67 : vector<256x16xf32>
    %c0_106 = arith.constant 0 : index
    %c0_107 = arith.constant 0 : index
    %69 = vector.load %arg4[%c0_106, %c0_107] : memref<1x16xf32, #tpu.memory_space<vmem>>, vector<1x16xf32>
    %70 = vector.broadcast %69 : vector<1x16xf32> to vector<256x16xf32>
    %71 = arith.addf %68, %70 : vector<256x16xf32>
    %cst_108 = arith.constant 0.000000e+00 : f32
    %72 = vector.broadcast %cst_108 : f32 to vector<256x16xf32>
    %73 = arith.cmpf ogt, %71, %72 : vector<256x16xf32>
    %cst_109 = arith.constant 0.00999999977 : f32
    %74 = vector.broadcast %cst_109 : f32 to vector<256x16xf32>
    %75 = arith.mulf %74, %71 : vector<256x16xf32>
    %76 = arith.select %73, %71, %75 : vector<256x16xi1>, vector<256x16xf32>
    %77 = arith.truncf %76 : vector<256x16xf32> to vector<256x16xbf16>
    %c0_110 = arith.constant 0 : index
    %c0_111 = arith.constant 0 : index
    %78 = vector.load %arg5[%c0_110, %c0_111] : memref<16x16xbf16, #tpu.memory_space<vmem>>, vector<16x16xbf16>
    %cst_112 = arith.constant dense<0.000000e+00> : vector<256x16xf32>
    %79 = tpu.matmul %77, %78, %cst_112 {dimension_numbers = #tpu.dot_dimension_numbers<[1], [0], [0], [1], [0, 0, 1, 1], [], []>} : vector<256x16xbf16>, vector<16x16xbf16>, vector<256x16xf32> -> vector<256x16xf32>
    %c0_113 = arith.constant 0 : index
    %c0_114 = arith.constant 0 : index
    %80 = vector.load %arg6[%c0_113, %c0_114] : memref<1x16xf32, #tpu.memory_space<vmem>>, vector<1x16xf32>
    %81 = vector.broadcast %80 : vector<1x16xf32> to vector<256x16xf32>
    %82 = arith.addf %79, %81 : vector<256x16xf32>
    %c0_115 = arith.constant 0 : index
    %c0_116 = arith.constant 0 : index
    %c0_117 = arith.constant 0 : index
    %c0_118 = arith.constant 0 : index
    %83 = vector.load %arg1[%c0_115, %c0_116, %c0_117, %c0_118] : memref<1x16x16x16xf32, #tpu.memory_space<vmem>>, vector<1x16x16x16xf32>
    %84 = vector.shape_cast %83 : vector<1x16x16x16xf32> to vector<1x256x16xf32>
    %85 = vector.shape_cast %82 : vector<256x16xf32> to vector<1x256x16xf32>
    %cst_119 = arith.constant dense<0.000000e+00> : vector<1x16xf32>
    %86 = vector.multi_reduction <add>, %84, %cst_119 [1] : vector<1x256x16xf32> to vector<1x16xf32>
    %87 = vector.shape_cast %86 : vector<1x16xf32> to vector<1x1x16xf32>
    %cst_120 = arith.constant 3.906250e-03 : f32
    %88 = vector.broadcast %cst_120 : f32 to vector<1x1x16xf32>
    %89 = arith.mulf %87, %88 : vector<1x1x16xf32>
    %90 = arith.mulf %84, %84 : vector<1x256x16xf32>
    %cst_121 = arith.constant dense<0.000000e+00> : vector<1x16xf32>
    %91 = vector.multi_reduction <add>, %90, %cst_121 [1] : vector<1x256x16xf32> to vector<1x16xf32>
    %92 = vector.shape_cast %91 : vector<1x16xf32> to vector<1x1x16xf32>
    %cst_122 = arith.constant 3.906250e-03 : f32
    %93 = vector.broadcast %cst_122 : f32 to vector<1x1x16xf32>
    %94 = arith.mulf %92, %93 : vector<1x1x16xf32>
    %95 = arith.mulf %89, %89 : vector<1x1x16xf32>
    %96 = arith.subf %94, %95 : vector<1x1x16xf32>
    %cst_123 = arith.constant 0.000000e+00 : f32
    %97 = vector.broadcast %cst_123 : f32 to vector<1x1x16xf32>
    %98 = arith.maximumf %96, %97 : vector<1x1x16xf32>
    %cst_124 = arith.constant dense<0.000000e+00> : vector<1x16xf32>
    %99 = vector.multi_reduction <add>, %85, %cst_124 [1] : vector<1x256x16xf32> to vector<1x16xf32>
    %100 = vector.shape_cast %99 : vector<1x16xf32> to vector<1x1x16xf32>
    %cst_125 = arith.constant 3.906250e-03 : f32
    %101 = vector.broadcast %cst_125 : f32 to vector<1x1x16xf32>
    %102 = arith.mulf %100, %101 : vector<1x1x16xf32>
    %103 = arith.mulf %85, %85 : vector<1x256x16xf32>
    %cst_126 = arith.constant dense<0.000000e+00> : vector<1x16xf32>
    %104 = vector.multi_reduction <add>, %103, %cst_126 [1] : vector<1x256x16xf32> to vector<1x16xf32>
    %105 = vector.shape_cast %104 : vector<1x16xf32> to vector<1x1x16xf32>
    %cst_127 = arith.constant 3.906250e-03 : f32
    %106 = vector.broadcast %cst_127 : f32 to vector<1x1x16xf32>
    %107 = arith.mulf %105, %106 : vector<1x1x16xf32>
    %108 = arith.mulf %102, %102 : vector<1x1x16xf32>
    %109 = arith.subf %107, %108 : vector<1x1x16xf32>
    %cst_128 = arith.constant 0.000000e+00 : f32
    %110 = vector.broadcast %cst_128 : f32 to vector<1x1x16xf32>
    %111 = arith.maximumf %109, %110 : vector<1x1x16xf32>
    %cst_129 = arith.constant 9.99999974E-6 : f32
    %112 = vector.broadcast %cst_129 : f32 to vector<1x1x16xf32>
    %113 = arith.addf %111, %112 : vector<1x1x16xf32>
    %114 = math.sqrt %113 : vector<1x1x16xf32>
    %cst_130 = arith.constant 9.99999974E-6 : f32
    %115 = vector.broadcast %cst_130 : f32 to vector<1x1x16xf32>
    %116 = arith.addf %98, %115 : vector<1x1x16xf32>
    %117 = math.rsqrt %116 : vector<1x1x16xf32>
    %118 = arith.mulf %114, %117 : vector<1x1x16xf32>
    %c0_131 = arith.constant 0 : index
    %c0_132 = arith.constant 0 : index
    %119 = memref.load %arg10[%c0_131, %c0_132] : memref<1x1xf32, #tpu.memory_space<smem>>
    %120 = vector.broadcast %119 : f32 to vector<1x1x16xf32>
    %121 = arith.mulf %120, %118 : vector<1x1x16xf32>
    %cst_133 = arith.constant 1.000000e+00 : f32
    %122 = arith.subf %cst_133, %119 : f32
    %123 = vector.broadcast %122 : f32 to vector<1x1x16xf32>
    %124 = arith.addf %121, %123 : vector<1x1x16xf32>
    %125 = arith.mulf %89, %118 : vector<1x1x16xf32>
    %126 = arith.subf %102, %125 : vector<1x1x16xf32>
    %127 = vector.broadcast %119 : f32 to vector<1x1x16xf32>
    %128 = arith.mulf %127, %126 : vector<1x1x16xf32>
    %129 = vector.broadcast %124 : vector<1x1x16xf32> to vector<1x256x16xf32>
    %130 = arith.mulf %84, %129 : vector<1x256x16xf32>
    %131 = vector.broadcast %128 : vector<1x1x16xf32> to vector<1x256x16xf32>
    %132 = arith.addf %130, %131 : vector<1x256x16xf32>
    %133 = vector.shape_cast %132 : vector<1x256x16xf32> to vector<1x16x16x16xf32>
    %134 = arith.truncf %133 : vector<1x16x16x16xf32> to vector<1x16x16x16xbf16>
    %c0_134 = arith.constant 0 : index
    %c1_135 = arith.constant 1 : index
    %c1_136 = arith.constant 1 : index
    %c0_137 = arith.constant 0 : index
    %135 = vector.load %arg13[%c0_134, %c1_135, %c1_136, %c0_137] : memref<1x18x18x16xbf16, #tpu.memory_space<vmem>>, vector<1x16x16x16xbf16>
    tpu.vector_store %arg13[%c0_134, %c1_135, %c1_136, %c0_137], %134 {strides = array<i32>} : memref<1x18x18x16xbf16, #tpu.memory_space<vmem>>, vector<1x16x16x16xbf16>,
    %cst_138 = arith.constant 0.000000e+00 : f32
    %136 = vector.broadcast %cst_138 : f32 to vector<256x32xf32>
    %c0_139 = arith.constant 0 : index
    %c0_140 = arith.constant 0 : index
    %c0_141 = arith.constant 0 : index
    %c0_142 = arith.constant 0 : index
    %137 = vector.load %arg13[%c0_139, %c0_140, %c0_141, %c0_142] : memref<1x18x18x16xbf16, #tpu.memory_space<vmem>>, vector<1x16x16x16xbf16>
    %138 = vector.shape_cast %137 : vector<1x16x16x16xbf16> to vector<256x16xbf16>
    %c0_143 = arith.constant 0 : index
    %c0_144 = arith.constant 0 : index
    %c0_145 = arith.constant 0 : index
    %139 = vector.load %arg7[%c0_143, %c0_144, %c0_145] : memref<9x16x32xbf16, #tpu.memory_space<vmem>>, vector<1x16x32xbf16>
    %140 = vector.shape_cast %139 : vector<1x16x32xbf16> to vector<16x32xbf16>
    %cst_146 = arith.constant dense<0.000000e+00> : vector<256x32xf32>
    %141 = tpu.matmul %138, %140, %cst_146 {dimension_numbers = #tpu.dot_dimension_numbers<[1], [0], [0], [1], [0, 0, 1, 1], [], []>} : vector<256x16xbf16>, vector<16x32xbf16>, vector<256x32xf32> -> vector<256x32xf32>
    %142 = arith.addf %136, %141 : vector<256x32xf32>
    %c0_147 = arith.constant 0 : index
    %c0_148 = arith.constant 0 : index
    %c1_149 = arith.constant 1 : index
    %c0_150 = arith.constant 0 : index
    %143 = vector.load %arg13[%c0_147, %c0_148, %c1_149, %c0_150] : memref<1x18x18x16xbf16, #tpu.memory_space<vmem>>, vector<1x16x16x16xbf16>
    %144 = vector.shape_cast %143 : vector<1x16x16x16xbf16> to vector<256x16xbf16>
    %c1_151 = arith.constant 1 : index
    %c0_152 = arith.constant 0 : index
    %c0_153 = arith.constant 0 : index
    %145 = vector.load %arg7[%c1_151, %c0_152, %c0_153] : memref<9x16x32xbf16, #tpu.memory_space<vmem>>, vector<1x16x32xbf16>
    %146 = vector.shape_cast %145 : vector<1x16x32xbf16> to vector<16x32xbf16>
    %cst_154 = arith.constant dense<0.000000e+00> : vector<256x32xf32>
    %147 = tpu.matmul %144, %146, %cst_154 {dimension_numbers = #tpu.dot_dimension_numbers<[1], [0], [0], [1], [0, 0, 1, 1], [], []>} : vector<256x16xbf16>, vector<16x32xbf16>, vector<256x32xf32> -> vector<256x32xf32>
    %148 = arith.addf %142, %147 : vector<256x32xf32>
    %c0_155 = arith.constant 0 : index
    %c0_156 = arith.constant 0 : index
    %c2_157 = arith.constant 2 : index
    %c0_158 = arith.constant 0 : index
    %149 = vector.load %arg13[%c0_155, %c0_156, %c2_157, %c0_158] : memref<1x18x18x16xbf16, #tpu.memory_space<vmem>>, vector<1x16x16x16xbf16>
    %150 = vector.shape_cast %149 : vector<1x16x16x16xbf16> to vector<256x16xbf16>
    %c2_159 = arith.constant 2 : index
    %c0_160 = arith.constant 0 : index
    %c0_161 = arith.constant 0 : index
    %151 = vector.load %arg7[%c2_159, %c0_160, %c0_161] : memref<9x16x32xbf16, #tpu.memory_space<vmem>>, vector<1x16x32xbf16>
    %152 = vector.shape_cast %151 : vector<1x16x32xbf16> to vector<16x32xbf16>
    %cst_162 = arith.constant dense<0.000000e+00> : vector<256x32xf32>
    %153 = tpu.matmul %150, %152, %cst_162 {dimension_numbers = #tpu.dot_dimension_numbers<[1], [0], [0], [1], [0, 0, 1, 1], [], []>} : vector<256x16xbf16>, vector<16x32xbf16>, vector<256x32xf32> -> vector<256x32xf32>
    %154 = arith.addf %148, %153 : vector<256x32xf32>
    %c0_163 = arith.constant 0 : index
    %c1_164 = arith.constant 1 : index
    %c0_165 = arith.constant 0 : index
    %c0_166 = arith.constant 0 : index
    %155 = vector.load %arg13[%c0_163, %c1_164, %c0_165, %c0_166] : memref<1x18x18x16xbf16, #tpu.memory_space<vmem>>, vector<1x16x16x16xbf16>
    %156 = vector.shape_cast %155 : vector<1x16x16x16xbf16> to vector<256x16xbf16>
    %c3_167 = arith.constant 3 : index
    %c0_168 = arith.constant 0 : index
    %c0_169 = arith.constant 0 : index
    %157 = vector.load %arg7[%c3_167, %c0_168, %c0_169] : memref<9x16x32xbf16, #tpu.memory_space<vmem>>, vector<1x16x32xbf16>
    %158 = vector.shape_cast %157 : vector<1x16x32xbf16> to vector<16x32xbf16>
    %cst_170 = arith.constant dense<0.000000e+00> : vector<256x32xf32>
    %159 = tpu.matmul %156, %158, %cst_170 {dimension_numbers = #tpu.dot_dimension_numbers<[1], [0], [0], [1], [0, 0, 1, 1], [], []>} : vector<256x16xbf16>, vector<16x32xbf16>, vector<256x32xf32> -> vector<256x32xf32>
    %160 = arith.addf %154, %159 : vector<256x32xf32>
    %c0_171 = arith.constant 0 : index
    %c1_172 = arith.constant 1 : index
    %c1_173 = arith.constant 1 : index
    %c0_174 = arith.constant 0 : index
    %161 = vector.load %arg13[%c0_171, %c1_172, %c1_173, %c0_174] : memref<1x18x18x16xbf16, #tpu.memory_space<vmem>>, vector<1x16x16x16xbf16>
    %162 = vector.shape_cast %161 : vector<1x16x16x16xbf16> to vector<256x16xbf16>
    %c4_175 = arith.constant 4 : index
    %c0_176 = arith.constant 0 : index
    %c0_177 = arith.constant 0 : index
    %163 = vector.load %arg7[%c4_175, %c0_176, %c0_177] : memref<9x16x32xbf16, #tpu.memory_space<vmem>>, vector<1x16x32xbf16>
    %164 = vector.shape_cast %163 : vector<1x16x32xbf16> to vector<16x32xbf16>
    %cst_178 = arith.constant dense<0.000000e+00> : vector<256x32xf32>
    %165 = tpu.matmul %162, %164, %cst_178 {dimension_numbers = #tpu.dot_dimension_numbers<[1], [0], [0], [1], [0, 0, 1, 1], [], []>} : vector<256x16xbf16>, vector<16x32xbf16>, vector<256x32xf32> -> vector<256x32xf32>
    %166 = arith.addf %160, %165 : vector<256x32xf32>
    %c0_179 = arith.constant 0 : index
    %c1_180 = arith.constant 1 : index
    %c2_181 = arith.constant 2 : index
    %c0_182 = arith.constant 0 : index
    %167 = vector.load %arg13[%c0_179, %c1_180, %c2_181, %c0_182] : memref<1x18x18x16xbf16, #tpu.memory_space<vmem>>, vector<1x16x16x16xbf16>
    %168 = vector.shape_cast %167 : vector<1x16x16x16xbf16> to vector<256x16xbf16>
    %c5_183 = arith.constant 5 : index
    %c0_184 = arith.constant 0 : index
    %c0_185 = arith.constant 0 : index
    %169 = vector.load %arg7[%c5_183, %c0_184, %c0_185] : memref<9x16x32xbf16, #tpu.memory_space<vmem>>, vector<1x16x32xbf16>
    %170 = vector.shape_cast %169 : vector<1x16x32xbf16> to vector<16x32xbf16>
    %cst_186 = arith.constant dense<0.000000e+00> : vector<256x32xf32>
    %171 = tpu.matmul %168, %170, %cst_186 {dimension_numbers = #tpu.dot_dimension_numbers<[1], [0], [0], [1], [0, 0, 1, 1], [], []>} : vector<256x16xbf16>, vector<16x32xbf16>, vector<256x32xf32> -> vector<256x32xf32>
    %172 = arith.addf %166, %171 : vector<256x32xf32>
    %c0_187 = arith.constant 0 : index
    %c2_188 = arith.constant 2 : index
    %c0_189 = arith.constant 0 : index
    %c0_190 = arith.constant 0 : index
    %173 = vector.load %arg13[%c0_187, %c2_188, %c0_189, %c0_190] : memref<1x18x18x16xbf16, #tpu.memory_space<vmem>>, vector<1x16x16x16xbf16>
    %174 = vector.shape_cast %173 : vector<1x16x16x16xbf16> to vector<256x16xbf16>
    %c6_191 = arith.constant 6 : index
    %c0_192 = arith.constant 0 : index
    %c0_193 = arith.constant 0 : index
    %175 = vector.load %arg7[%c6_191, %c0_192, %c0_193] : memref<9x16x32xbf16, #tpu.memory_space<vmem>>, vector<1x16x32xbf16>
    %176 = vector.shape_cast %175 : vector<1x16x32xbf16> to vector<16x32xbf16>
    %cst_194 = arith.constant dense<0.000000e+00> : vector<256x32xf32>
    %177 = tpu.matmul %174, %176, %cst_194 {dimension_numbers = #tpu.dot_dimension_numbers<[1], [0], [0], [1], [0, 0, 1, 1], [], []>} : vector<256x16xbf16>, vector<16x32xbf16>, vector<256x32xf32> -> vector<256x32xf32>
    %178 = arith.addf %172, %177 : vector<256x32xf32>
    %c0_195 = arith.constant 0 : index
    %c2_196 = arith.constant 2 : index
    %c1_197 = arith.constant 1 : index
    %c0_198 = arith.constant 0 : index
    %179 = vector.load %arg13[%c0_195, %c2_196, %c1_197, %c0_198] : memref<1x18x18x16xbf16, #tpu.memory_space<vmem>>, vector<1x16x16x16xbf16>
    %180 = vector.shape_cast %179 : vector<1x16x16x16xbf16> to vector<256x16xbf16>
    %c7_199 = arith.constant 7 : index
    %c0_200 = arith.constant 0 : index
    %c0_201 = arith.constant 0 : index
    %181 = vector.load %arg7[%c7_199, %c0_200, %c0_201] : memref<9x16x32xbf16, #tpu.memory_space<vmem>>, vector<1x16x32xbf16>
    %182 = vector.shape_cast %181 : vector<1x16x32xbf16> to vector<16x32xbf16>
    %cst_202 = arith.constant dense<0.000000e+00> : vector<256x32xf32>
    %183 = tpu.matmul %180, %182, %cst_202 {dimension_numbers = #tpu.dot_dimension_numbers<[1], [0], [0], [1], [0, 0, 1, 1], [], []>} : vector<256x16xbf16>, vector<16x32xbf16>, vector<256x32xf32> -> vector<256x32xf32>
    %184 = arith.addf %178, %183 : vector<256x32xf32>
    %c0_203 = arith.constant 0 : index
    %c2_204 = arith.constant 2 : index
    %c2_205 = arith.constant 2 : index
    %c0_206 = arith.constant 0 : index
    %185 = vector.load %arg13[%c0_203, %c2_204, %c2_205, %c0_206] : memref<1x18x18x16xbf16, #tpu.memory_space<vmem>>, vector<1x16x16x16xbf16>
    %186 = vector.shape_cast %185 : vector<1x16x16x16xbf16> to vector<256x16xbf16>
    %c8_207 = arith.constant 8 : index
    %c0_208 = arith.constant 0 : index
    %c0_209 = arith.constant 0 : index
    %187 = vector.load %arg7[%c8_207, %c0_208, %c0_209] : memref<9x16x32xbf16, #tpu.memory_space<vmem>>, vector<1x16x32xbf16>
    %188 = vector.shape_cast %187 : vector<1x16x32xbf16> to vector<16x32xbf16>
    %cst_210 = arith.constant dense<0.000000e+00> : vector<256x32xf32>
    %189 = tpu.matmul %186, %188, %cst_210 {dimension_numbers = #tpu.dot_dimension_numbers<[1], [0], [0], [1], [0, 0, 1, 1], [], []>} : vector<256x16xbf16>, vector<16x32xbf16>, vector<256x32xf32> -> vector<256x32xf32>
    %190 = arith.addf %184, %189 : vector<256x32xf32>
    %c0_211 = arith.constant 0 : index
    %c0_212 = arith.constant 0 : index
    %191 = vector.load %arg8[%c0_211, %c0_212] : memref<1x32xf32, #tpu.memory_space<vmem>>, vector<1x32xf32>
    %192 = vector.broadcast %191 : vector<1x32xf32> to vector<256x32xf32>
    %193 = arith.mulf %190, %192 : vector<256x32xf32>
    %c0_213 = arith.constant 0 : index
    %c0_214 = arith.constant 0 : index
    %194 = vector.load %arg9[%c0_213, %c0_214] : memref<1x32xf32, #tpu.memory_space<vmem>>, vector<1x32xf32>
    %195 = vector.broadcast %194 : vector<1x32xf32> to vector<256x32xf32>
    %196 = arith.addf %193, %195 : vector<256x32xf32>
    %cst_215 = arith.constant 0.000000e+00 : f32
    %197 = vector.broadcast %cst_215 : f32 to vector<256x32xf32>
    %198 = arith.maximumf %196, %197 : vector<256x32xf32>
    %199 = tpu.transpose %198, [1, 0] : vector<256x32xf32> -> vector<32x256xf32>
    %c0_216 = arith.constant 0 : index
    %c0_217 = arith.constant 0 : index
    %c0_218 = arith.constant 0 : index
    %200 = vector.load %arg11[%c0_216, %c0_217, %c0_218] : memref<1x32x256xf32, #tpu.memory_space<vmem>>, vector<1x32x256xf32>
    %201 = vector.shape_cast %200 : vector<1x32x256xf32> to vector<32x256xf32>
    %202 = vector.shape_cast %199 : vector<32x256xf32> to vector<1x32x256xf32>
    tpu.vector_store %arg11[%c0_216, %c0_217, %c0_218], %202 {strides = array<i32>} : memref<1x32x256xf32, #tpu.memory_space<vmem>>, vector<1x32x256xf32>,
    return
  }
  func.func @transform_0(%arg0: i32) -> (i32, i32, i32, i32) {
    %c0_i32 = arith.constant 0 : i32
    %c0_i32_0 = arith.constant 0 : i32
    %c0_i32_1 = arith.constant 0 : i32
    %c0_i32_2 = arith.constant 0 : i32
    return %arg0, %c0_i32, %c0_i32_0, %c0_i32_1 : i32, i32, i32, i32
  }
  func.func @transform_1(%arg0: i32) -> (i32, i32, i32, i32) {
    %c0_i32 = arith.constant 0 : i32
    %c0_i32_0 = arith.constant 0 : i32
    %c0_i32_1 = arith.constant 0 : i32
    %c0_i32_2 = arith.constant 0 : i32
    return %arg0, %c0_i32, %c0_i32_0, %c0_i32_1 : i32, i32, i32, i32
  }
  func.func @transform_2(%arg0: i32) -> (i32, i32, i32) {
    %c0_i32 = arith.constant 0 : i32
    %c0_i32_0 = arith.constant 0 : i32
    %c0_i32_1 = arith.constant 0 : i32
    %c0_i32_2 = arith.constant 0 : i32
    return %c0_i32, %c0_i32_0, %c0_i32_1 : i32, i32, i32
  }
  func.func @transform_3(%arg0: i32) -> (i32, i32) {
    %c0_i32 = arith.constant 0 : i32
    %c0_i32_0 = arith.constant 0 : i32
    %c0_i32_1 = arith.constant 0 : i32
    return %c0_i32, %c0_i32_0 : i32, i32
  }
  func.func @transform_4(%arg0: i32) -> (i32, i32) {
    %c0_i32 = arith.constant 0 : i32
    %c0_i32_0 = arith.constant 0 : i32
    %c0_i32_1 = arith.constant 0 : i32
    return %c0_i32, %c0_i32_0 : i32, i32
  }
  func.func @transform_5(%arg0: i32) -> (i32, i32) {
    %c0_i32 = arith.constant 0 : i32
    %c0_i32_0 = arith.constant 0 : i32
    %c0_i32_1 = arith.constant 0 : i32
    return %c0_i32, %c0_i32_0 : i32, i32
  }
  func.func @transform_6(%arg0: i32) -> (i32, i32, i32) {
    %c0_i32 = arith.constant 0 : i32
    %c0_i32_0 = arith.constant 0 : i32
    %c0_i32_1 = arith.constant 0 : i32
    %c0_i32_2 = arith.constant 0 : i32
    return %c0_i32, %c0_i32_0, %c0_i32_1 : i32, i32, i32
  }
  func.func @transform_7(%arg0: i32) -> (i32, i32) {
    %c0_i32 = arith.constant 0 : i32
    %c0_i32_0 = arith.constant 0 : i32
    %c0_i32_1 = arith.constant 0 : i32
    return %c0_i32, %c0_i32_0 : i32, i32
  }
  func.func @transform_8(%arg0: i32) -> (i32, i32) {
    %c0_i32 = arith.constant 0 : i32
    %c0_i32_0 = arith.constant 0 : i32
    %c0_i32_1 = arith.constant 0 : i32
    return %c0_i32, %c0_i32_0 : i32, i32
  }
  func.func @transform_9(%arg0: i32) -> (i32, i32) {
    %c0_i32 = arith.constant 0 : i32
    %c0_i32_0 = arith.constant 0 : i32
    %c0_i32_1 = arith.constant 0 : i32
    return %c0_i32, %c0_i32_0 : i32, i32
  }
  func.func @transform_10(%arg0: i32) -> (i32, i32, i32) {
    %c0_i32 = arith.constant 0 : i32
    %c0_i32_0 = arith.constant 0 : i32
    %c0_i32_1 = arith.constant 0 : i32
    return %arg0, %c0_i32, %c0_i32_0 : i32, i32, i32
  }
}

</mosaic_0001>

<bundles_post_ra>
// kernel: adain_module_forward.1
= control target key start
LH: loop header
LB: loop body
LE: loop exit
PB: predicated region body
PF: predicated region fallthrough
CT: control target
= control target key end

     0   :  { %s12011_s15 = smov 0   ;;  %s15655_s0 = inlined_call_operand.vmem [shape: f32[2,16,16,16], index: 0, kind: input, shape index: {}]   ;;  %s15656_s1 = inlined_call_operand.vmem [shape: bf16[2,16,16,64], index: 1, kind: input, shape index: {}]   ;;  %s15657_s2 = inlined_call_operand.vmem [shape: bf16[9,64,16], index: 2, kind: input, shape index: {}]   ;;  %s15658_s3 = inlined_call_operand.vmem [shape: f32[1,16], index: 3, kind: input, shape index: {}]   ;;  %s15659_s4 = inlined_call_operand.vmem [shape: bf16[16,16], index: 4, kind: input, shape index: {}]   ;;  %s15660_s5 = inlined_call_operand.vmem [shape: f32[1,16], index: 5, kind: input, shape index: {}]   ;;  %s15661_s6 = inlined_call_operand.vmem [shape: bf16[9,16,32], index: 6, kind: input, shape index: {}]   ;;  %s15662_s7 = inlined_call_operand.vmem [shape: f32[1,32], index: 7, kind: input, shape index: {}]   ;;  %s15663_s8 = inlined_call_operand.vmem [shape: f32[1,32], index: 8, kind: input, shape index: {}]   ;;  %s15664_s9 = inlined_call_operand.<no memory space> [shape: f32[1,1], index: 9, kind: input, shape index: {}]   ;;  %s15665_s10 = inlined_call_operand.vmem [shape: f32[2,32,256], index: 10, kind: output, shape index: {}]  }
   0x1   :  { %15 = sst [smem:[#allocation4]] %s15664_s9 }
   0x2 LB: > { %s10656_s16 = sadd.s32 4294967295, %s11950_s15   ;;  %p10660_p0 = scmp.ge.s32.totalorder %s11950_s15, 1  ;;  %s11950_s15 = sphi %s12011_s15, %s21_s15  }
   0x3   : > { %p323_p1 = scmp.lt.s32.totalorder %s11950_s15, 3 }
   0x5   : > { %p324_p2 = pnand %p10660_p0, %p323_p1 }
   0x7   : > { %327 = sbr.rel (%p324_p2) target bundleno = 2092 (0x82c), region = 60 }
   0xc   : > { %v12022_v0 = vld [vmem:[%s15657_s2 + $0x58] sm:$0xff]  ;;  %vm382_vm0 = vcmask 519168   ;;  %v11952_v3 = vmov 0   ;;  %v12038_v4 = vld [vmem:[%s15657_s2 + $0x50] sm:$0xff]  ;;  %vm385_vm1 = vcmask 516096   ;;  %v12056_v7 = vld [vmem:[%s15657_s2 + $0x48] sm:$0xff] }
   0xd   : > { %v11743_v1 = vld [vmem:[%s15657_s2 + $0x38] sm:$0xff]  ;;  %383 = vst.msk [vmem:[#allocation2] sm:$0xf] %vm382_vm0, %v11952_v3  ;;  %2269 = vmatpush.bf16.msra.mxu2 %v12022_v0  ;;  %v11742_v5 = vld [vmem:[%s15657_s2 + $0x30] sm:$0xff]  ;;  %v11741_v8 = vld [vmem:[%s15657_s2 + $0x28] sm:$0xff]  ;;  %vm493_vm2 = vcmask 125952  }
   0xe   : > { %v12030_v2 = vld [vmem:[%s15657_s2 + $0x18] sm:$0xff]  ;;  %1647 = vmatpush.bf16.msra.mxu0 %v11743_v1  ;;  %384 = vst.msk [vmem:[#allocation2 + $0x4] sm:$0xf] %vm382_vm0, %v11952_v3  ;;  %11862 = vmatpush.bf16.msra.mxu3 %v11743_v1  ;;  %v12049_v6 = vld [vmem:[%s15657_s2 + $0x10] sm:$0xff]  ;;  %vm496_vm3 = vcmask 122880   ;;  %v15672_v9 = vmov 0 }
   0xf   : > { %1888 = vmatpush.bf16.msra.mxu1 %v12030_v2  ;;  %386 = vst.msk [vmem:[#allocation2 + $0x8] sm:$0x1] %vm385_vm1, %v11952_v3  ;;  %vm393_vm4 = vsmask.f32 256  ;;  %vm443_vm5 = vsmask.f32 7938 }
  0x10   : > { %388 = vst.msk [vmem:[#allocation2 + $0xcc] sm:$0xf] %vm382_vm0, %v11952_v3  ;;  %vm12068_vm6 = vmand %vm496_vm3, %vm393_vm4  ;;  %vm2021_vm7 = vcmask 1042432   ;;  %vm2022_vm8 = vcmask 1046532   ;;  %vm1126_vm9 = vsmask.f32 3328 }
  0x11   : > { %389 = vst.msk [vmem:[#allocation2 + $0xd0] sm:$0xf] %vm382_vm0, %v11952_v3  ;;  %2270 = vmatpush.bf16.msra.mxu2 %v12038_v4  ;;  %v15673_v9 = vsel %vm12068_vm6, 4294967295, %v15672_v9  ;;  %v12078_v10 = vld [vmem:[%s15657_s2 + $0x8] sm:$0xff]  ;;  %vm12082_vm10 = vmand %vm496_vm3, %vm443_vm5  ;;  %v15675_v11 = vmov 0  ;;  %p12090_p3 = scmp.lt.s32.totalorder %s10656_s16, 1 }
  0x12   : > { %1648 = vmatpush.bf16.msra.mxu0 %v11742_v5  ;;  %15674 = vst [vmem:[#allocation5_spill] sm:$0xff] %v15673_v9  ;;  %11863 = vmatpush.bf16.msra.mxu3 %v11742_v5  ;;  %v15676_v11 = vsel %vm12082_vm10, 4294967295, %v15675_v11  ;;  %vm1127_vm11 = vsmask.f32 7440  ;;  %v12097_v12 = vld [vmem:[%s15657_s2 + $0x40] sm:$0xff]  ;;  %vm12106_vm12 = vmor %vm2021_vm7, %vm2022_vm8  ;;  %v11771_v46 = vld [vmem:[%s15657_s2 + $0x98] sm:$0xff] }
  0x13   : > { %390 = vst.msk [vmem:[#allocation2 + $0xd4] sm:$0x1] %vm385_vm1, %v11952_v3  ;;  %1889 = vmatpush.bf16.msra.mxu1 %v12049_v6  ;;  %v11740_v14 = vld [vmem:[%s15657_s2 + $0x20] sm:$0xff]  ;;  %v428_v16 = vld [vmem:[#allocation2 + $0x90] sm:$0x1]  ;;  %vm12120_vm13 = vmand %vm385_vm1, %vm393_vm4  ;;  %s15836_s16 = smov (!%p12090_p3, %s10656_s16), 1 }
  0x14   : > { %15677 = vst [vmem:[#allocation6_spill] sm:$0xff] %v15676_v11  ;;  %v1973_v13 = vld [vmem:[#allocation2] sm:$0xe]  ;;  %v478_v22 = vld [vmem:[#allocation2 + $0x98] sm:$0x1]  ;;  %vm12129_vm14 = vmand %vm385_vm1, %vm443_vm5  ;;  %v429_v39 = vsel %vm12120_vm13, 0, %v428_v16 }
  0x15   : > { %494 = vst.msk [vmem:[#allocation3] sm:$0xf] %vm493_vm2, %v11952_v3  ;;  %v1070_v15 = vld [vmem:[#allocation2] sm:$0xf]  ;;  %v1071_v17 = vld [vmem:[#allocation2 + $0x4] sm:$0xf]  ;;  %2271 = vmatpush.bf16.msra.mxu2 %v12056_v7  ;;  %vm12159_vm15 = vmor %vm1126_vm9, %vm1127_vm11 }
  0x16   : > { %495 = vst.msk [vmem:[#allocation3 + $0x4] sm:$0xf] %vm493_vm2, %v11952_v3  ;;  %v10803_v19 = vrot.slane %v1973_v13, 9  ;;  %v12115_v20 = vld [vmem:[%s15657_s2] sm:$0xff]  ;;  %v1130_v21 = vshrl.u32 %v1070_v15, 16  ;;  %1649 = vmatpush.bf16.msra.mxu0 %v11741_v8  ;;  %v2026_v25 = vrot.slane %v1071_v17, 5  ;;  %11864 = vmatpush.bf16.msra.mxu3 %v11741_v8  ;;  %vm12185_vm7 = vmand %vm382_vm0, %vm443_vm5 }
  0x17   : > { %497 = vst.msk [vmem:[#allocation3 + $0x8] sm:$0x1] %vm496_vm3, %v11952_v3  ;;  %v1110_v24 = vld [vmem:[#allocation2 + $0x8] sm:$0x1]  ;;  %v1133_v26 = vshll.u32 %v1070_v15, 16  ;;  %1890 = vmatpush.bf16.msra.mxu1 %v12078_v10  ;;  %v1139_v30 = vshll.u32 %v1071_v17, 16 }
  0x18   : > { %499 = vst.msk [vmem:[#allocation3 + $0xcc] sm:$0xf] %vm493_vm2, %v11952_v3  ;;  %v2029_v28 = vrot.slane %v1110_v24, 5  ;;  %v1132_v29 = vrot.slane %v1130_v21, 4  ;;  %v1143_v31 = vshrl.u32 %v1071_v17, 16  ;;  %v2027_v32 = vsel %vm12106_vm12, %v10803_v19, %v2026_v25  ;;  %v11720_v40 = vld [vmem:[#allocation2] sm:$0xff] }
  0x19   : > { %500 = vst.msk [vmem:[#allocation3 + $0xd0] sm:$0xf] %vm493_vm2, %v11952_v3  ;;  %v2028_v33 = vrot.slane %v2026_v25, 4  ;;  %v1135_v34 = vrot.slane %v1133_v26, 5  ;;  %v1149_v35 = vshll.u32 %v1110_v24, 16  ;;  %v2145_v36 = vunpack.c.l.b16 %v2027_v32  ;;  %2272 = vmatpush.bf16.msra.mxu2 %v12097_v12  ;;  %s11718_s22 = sshll.u32 %s15836_s16, 7 }
  0x1a   : > { %501 = vst.msk [vmem:[#allocation3 + $0xd4] sm:$0x1] %vm496_vm3, %v11952_v3  ;;  %v1141_v37 = vrot.slane %v1139_v30, 5  ;;  %v1145_v38 = vrot.slane %v1143_v31, 4  ;;  %v395_v41 = vld [vmem:[#allocation2 + $0xc] sm:$0x1]  ;;  %1650 = vmatpush.bf16.msra.mxu0 %v11740_v14  ;;  %11865 = vmatpush.bf16.msra.mxu3 %v11740_v14  ;;  %s12166_s27 = scalar_lea.vmem %s15656_s1, %s11718_s22 }
  0x1b   : > { %v2030_v42 = vsel %vm12106_vm12, %v2028_v33, %v2029_v28  ;;  %v1136_v43 = vor.u32 %v1135_v34, %v1132_v29  ;;  %v1151_v44 = vrot.slane %v1149_v35, 5  ;;  %430 = vst [vmem:[#allocation2 + $0x90] sm:$0x1] %v429_v39  ;;  %v479_v45 = vsel %vm12129_vm14, 0, %v478_v22  ;;  %1891 = vmatpush.bf16.msra.mxu1 %v12115_v20  ;;  %v624_v52 = vld [vmem:[%s12166_s27 + $0x58] sm:$0xf] }
  0x1c   : > { %v2146_v47 = vunpack.c.l.b16 %v2030_v42  ;;  %v1146_v49 = vor.u32 %v1145_v38, %v1141_v37  ;;  %480 = vst [vmem:[#allocation2 + $0x98] sm:$0x1] %v479_v45  ;;  %vm634_vm1 = vsmask.f32 4368  ;;  %v396_v50 = vsel %vm12120_vm13, 0, %v395_v41  ;;  %s11717_s29 = sshll.u32 %s15836_s16, 8 }
  0x1d   : > { %vm1594_vm3 = vcmask 523264   ;;  %v1137_v51 = vrot.slane %v1136_v43, 4  ;;  %v625_v53 = vld [vmem:[%s12166_s27 + $0x5c] sm:$0xf]  ;;  %v824_v56 = vshrl.u32 %v624_v52, 16  ;;  %v827_v57 = vshll.u32 %v624_v52, 16  ;;  %vm12192_vm8 = vmor %vm393_vm4, %vm634_vm1  ;;  %s13571_s12 = scalar_lea.vmem %s15655_s0, %s11717_s29 }
  0x1e   : > { %11866 = vmatpush.bf16.msrb.mxu3 %v12030_v2  ;;  %3265 = vmatpush.bf16.msrb.mxu0 %v11771_v46  ;;  %v2177_v54 = vpack.c.b16 %v2146_v47, %v2145_v36  ;;  %v1147_v55 = vrot.slane %v1146_v49, 4  ;;  %397 = vst [vmem:[#allocation2 + $0xc] sm:$0x1] %v396_v50  ;;  %v832_v59 = vshrl.u32 %v625_v53, 16  ;;  %v835_v60 = vshll.u32 %v625_v53, 16  ;;  %s13836_s9 = sld [smem:[#allocation4]] }
  0x1f   : > { %v1142_v58 = vsel %vm12159_vm15, %v1137_v51, %v1141_v37  ;;  %10787 = vmatmul.msk.bf16.vlgmr.msra.gmra.mxu1 %vm1594_vm3, %v11720_v40  ;;  %v445_v61 = vld [vmem:[#allocation2 + $0x14] sm:$0x1]  ;;  %v602_v62 = vld [vmem:[%s12166_s27] sm:$0xf]  ;;  %v826_v2 = vrot.slane %v824_v56, 7  ;;  %v15689_v17 = vmov 0 }
  0x20   : > { %10843 = vmatmul.msk.bf16.vlgmr.msra.gmra.mxu2 %vm1594_vm3, %v2177_v54  ;;  %v1152_v63 = vsel %vm12159_vm15, %v1147_v55, %v1151_v44  ;;  %v1522_v1 = vunpack.c.l.b16 %v1142_v58  ;;  %v446_v3 = vsel %vm12129_vm14, 0, %v445_v61  ;;  %v603_v5 = vld [vmem:[%s12166_s27 + $0x4] sm:$0xf]  ;;  %v834_v14 = vrot.slane %v832_v59, 7  ;;  %v431_v32 = vld [vmem:[#allocation2 + $0x9c] sm:$0x1] }
  0x21   : > { %v1523_v13 = vunpack.c.l.b16 %v1152_v63  ;;  %447 = vst [vmem:[#allocation2 + $0x14] sm:$0x1] %v446_v3  ;;  %v637_v15 = vshrl.u32 %v602_v62, 16  ;;  %v640_v16 = vshll.u32 %v602_v62, 16  ;;  %v15690_v17 = vsel %vm12192_vm8, 4294967295, %v15689_v17  ;;  %s11719_s19 = sshll.u32 %s15836_s16, 6 }
  0x22   : > { %11867 = vmatpush.bf16.msrb.mxu3 %v12049_v6  ;;  %15691 = vst [vmem:[#allocation7_spill] sm:$0xff] %v15690_v17  ;;  %v829_v19 = vor.u32 %v827_v57, %v826_v2  ;;  %v830_v21 = vrot.slane %v826_v2, 4  ;;  %v1035_v22 = vld [vmem:[#allocation2 + $0x90] sm:$0xf]  ;;  %v645_v24 = vshrl.u32 %v603_v5, 16  ;;  %v648_v25 = vshll.u32 %v603_v5, 16  ;;  %s15632_s21 = scalar_lea.vmem %s15665_s10, %s11719_s19 }
  0x23   : > { %v1554_v26 = vpack.c.b16 %v1523_v13, %v1522_v1  ;;  %v837_v28 = vor.u32 %v835_v60, %v834_v14  ;;  %v839_v29 = vrot.slane %v834_v14, 4  ;;  %v1039_v30 = vld [vmem:[#allocation2 + $0x98] sm:$0x1]  ;;  %v639_v31 = vrot.slane %v637_v15, 7  ;;  %v481_v34 = vld [vmem:[#allocation2 + $0xa4] sm:$0x1] }
  0x24   : > { %v1036_v6 = vsel %vm12185_vm7, %v829_v19, %v1035_v22  ;;  %v647_v33 = vrot.slane %v645_v24, 7  ;;  %v12199_v35 = vld [vmem:[%s12166_s27 + $0x60] sm:$0xf]  ;;  %v627_v43 = vld [vmem:[%s12166_s27 + $0x64] sm:$0xf]  ;;  %v432_v51 = vsel %vm12120_vm13, 0, %v431_v32 }
  0x25   : > { %10691 = vmatmul.msk.bf16.vlgmr.msra.gmra.mxu0 %vm1594_vm3, %v1554_v26  ;;  %v838_v36 = vsel %vm12192_vm8, %v830_v21, %v837_v28  ;;  %1037 = vst [vmem:[#allocation2 + $0x90] sm:$0xf] %v1036_v6  ;;  %v1040_v37 = vsel %vm12120_vm13, %v839_v29, %v1039_v30  ;;  %v642_v38 = vor.u32 %v640_v16, %v639_v31  ;;  %v643_v39 = vrot.slane %v639_v31, 4  ;;  %v958_v40 = vld [vmem:[#allocation2 + $0xc] sm:$0xf] }
  0x26   : > { %1038 = vst.msk [vmem:[#allocation2 + $0x94] sm:$0xf] %vm382_vm0, %v838_v36  ;;  %v650_v41 = vor.u32 %v648_v25, %v647_v33  ;;  %v652_v42 = vrot.slane %v647_v33, 4  ;;  %v841_v44 = vshrl.u32 %v12199_v35, 16  ;;  %11868 = vmatpush.bf16.msrb.mxu3 %v12078_v10  ;;  %v849_v46 = vshrl.u32 %v627_v43, 16 }
  0x27   : > { %1041 = vst [vmem:[#allocation2 + $0x98] sm:$0x1] %v1040_v37  ;;  %v959_v45 = vsel %vm12185_vm7, %v642_v38, %v958_v40  ;;  %v852_v47 = vshll.u32 %v627_v43, 16  ;;  %v482_v53 = vsel %vm12129_vm14, 0, %v481_v34  ;;  %v398_v55 = vld [vmem:[#allocation2 + $0x18] sm:$0x1] }
  0x28   : > { %v651_v49 = vsel %vm12192_vm8, %v643_v39, %v650_v41  ;;  %960 = vst [vmem:[#allocation2 + $0xc] sm:$0xf] %v959_v45  ;;  %v962_v50 = vld [vmem:[#allocation2 + $0x14] sm:$0x1]  ;;  %v843_v52 = vrot.slane %v841_v44, 7  ;;  %v12221_v54 = vrot.slane %v849_v46, 7 }
  0x29   : > { %961 = vst.msk [vmem:[#allocation2 + $0x10] sm:$0xf] %vm382_vm0, %v651_v49  ;;  %v963_v10 = vsel %vm12120_vm13, %v652_v42, %v962_v50  ;;  %v399_v56 = vsel %vm12120_vm13, 0, %v398_v55  ;;  %v844_v57 = vshll.u32 %v12199_v35, 16  ;;  %v448_v60 = vld [vmem:[#allocation2 + $0x20] sm:$0x1] }
  0x2a   : > { %964 = vst [vmem:[#allocation2 + $0x14] sm:$0x1] %v963_v10  ;;  %11869 = vmatpush.bf16.msrb.mxu3 %v12115_v20  ;;  %v847_v58 = vrot.slane %v843_v52, 4  ;;  %v854_v59 = vor.u32 %v852_v47, %v12221_v54  ;;  %v12229_v62 = vld [vmem:[%s12166_s27 + $0x8] sm:$0xf]  ;;  %v856_v20 = vrot.slane %v12221_v54, 4 }
  0x2b   : > { %433 = vst [vmem:[#allocation2 + $0x9c] sm:$0x1] %v432_v51  ;;  %v449_v14 = vsel %vm12129_vm14, 0, %v448_v60  ;;  %v654_v29 = vshrl.u32 %v12229_v62, 16  ;;  %v846_v34 = vor.u32 %v844_v57, %v843_v52  ;;  %vm5391_vm4 = vcmask 130048  }
  0x2c   : > { %v1094_v61 = vld [vmem:[#allocation2 + $0x90] sm:$0xf]  ;;  %483 = vst [vmem:[#allocation2 + $0xa4] sm:$0x1] %v482_v53  ;;  %v855_v22 = vsel %vm12192_vm8, %v847_v58, %v854_v59 }
  0x2d   : > { %v1095_v63 = vld [vmem:[#allocation2 + $0x94] sm:$0xf]  ;;  %v1418_v1 = vshrl.u32 %v1094_v61, 16  ;;  %v1421_v2 = vshll.u32 %v1094_v61, 16  ;;  %400 = vst [vmem:[#allocation2 + $0x18] sm:$0x1] %v399_v56 }
  0x2e   : > { %v1122_v3 = vld [vmem:[#allocation2 + $0x98] sm:$0x1]  ;;  %v1427_v5 = vshll.u32 %v1095_v63, 16  ;;  %v1431_v13 = vshrl.u32 %v1095_v63, 16  ;;  %1045 = vst.msk [vmem:[#allocation2 + $0xa0] sm:$0xf] %vm382_vm0, %v855_v22 }
  0x2f   : > { %v1420_v15 = vrot.slane %v1418_v1, 4  ;;  %v1423_v16 = vrot.slane %v1421_v2, 5  ;;  %v1437_v19 = vshll.u32 %v1122_v3, 16  ;;  %v1974_v21 = vld [vmem:[#allocation2 + $0xc] sm:$0xe] }
  0x30   : > { %v1429_v24 = vrot.slane %v1427_v5, 5  ;;  %v1433_v25 = vrot.slane %v1431_v13, 4  ;;  %v1073_v26 = vld [vmem:[#allocation2 + $0x10] sm:$0xf]  ;;  %v10804_v28 = vrot.slane %v1974_v21, 9  ;;  %v656_v13 = vrot.slane %v654_v29, 7 }
  0x31   : > { %v1424_v30 = vor.u32 %v1423_v16, %v1420_v15  ;;  %v1439_v31 = vrot.slane %v1437_v19, 5  ;;  %v1111_v32 = vld [vmem:[#allocation2 + $0x14] sm:$0x1]  ;;  %v2033_v6 = vrot.slane %v1073_v26, 5  ;;  %v1072_v33 = vld [vmem:[#allocation2 + $0xc] sm:$0xf] }
  0x32   : > { %v1434_v35 = vor.u32 %v1433_v25, %v1429_v24  ;;  %v2036_v36 = vrot.slane %v1111_v32, 5  ;;  %v1154_v37 = vshrl.u32 %v1072_v33, 16  ;;  %v1157_v38 = vshll.u32 %v1072_v33, 16  ;;  %v11721_v39 = vld [vmem:[#allocation2 + $0xc] sm:$0xff]  ;;  %v1042_v49 = vld [vmem:[#allocation2 + $0x9c] sm:$0xf] }
  0x33   : > { %v1425_v40 = vrot.slane %v1424_v30, 4  ;;  %v2034_v41 = vsel %vm12106_vm12, %v10804_v28, %v2033_v6  ;;  %v2035_v42 = vrot.slane %v2033_v6, 4  ;;  %v1163_v43 = vshll.u32 %v1073_v26, 16  ;;  %10788 = vmatmul.msk.bf16.gmra.mxu1 %vm1594_vm3, %v11721_v39  ;;  %v1046_v53 = vld [vmem:[#allocation2 + $0xa4] sm:$0x1] }
  0x34   : > { %v1435_v44 = vrot.slane %v1434_v35, 4  ;;  %v2147_v45 = vunpack.c.l.b16 %v2034_v41  ;;  %v1156_v46 = vrot.slane %v1154_v37, 4  ;;  %v1159_v47 = vrot.slane %v1157_v38, 5  ;;  %450 = vst [vmem:[#allocation2 + $0x20] sm:$0x1] %v449_v14 }
  0x35   : > { %v1430_v50 = vsel %vm12159_vm15, %v1425_v40, %v1429_v24  ;;  %v2037_v51 = vsel %vm12106_vm12, %v2035_v42, %v2036_v36  ;;  %v1165_v52 = vrot.slane %v1163_v43, 5  ;;  %v1167_v10 = vshrl.u32 %v1073_v26, 16  ;;  %v605_v63 = vld [vmem:[%s12166_s27 + $0xc] sm:$0xf]  ;;  %v434_v1 = vld [vmem:[#allocation2 + $0xa8] sm:$0x1] }
  0x36   : > { %v1440_v54 = vsel %vm12159_vm15, %v1435_v44, %v1439_v31  ;;  %v1546_v55 = vunpack.c.l.b16 %v1430_v50  ;;  %v2148_v56 = vunpack.c.l.b16 %v2037_v51  ;;  %v1160_v57 = vor.u32 %v1159_v47, %v1156_v46  ;;  %v484_v14 = vld [vmem:[#allocation2 + $0xb0] sm:$0x1]  ;;  %v628_v22 = vld [vmem:[%s12166_s27 + $0x68] sm:$0xf]  ;;  %v1097_v25 = vld [vmem:[#allocation2 + $0xa0] sm:$0xf] }
  0x37   : > { %v1547_v58 = vunpack.c.l.b16 %v1440_v54  ;;  %v1169_v59 = vrot.slane %v1167_v10, 4  ;;  %v1173_v60 = vshll.u32 %v1111_v32, 16  ;;  %v1043_v61 = vsel %vm12185_vm7, %v846_v34, %v1042_v49  ;;  %v965_v6 = vld [vmem:[#allocation2 + $0x18] sm:$0xf]  ;;  %v629_v39 = vld [vmem:[%s12166_s27 + $0x6c] sm:$0xf] }
  0x38   : > { %v2178_v2 = vpack.c.b16 %v2148_v56, %v2147_v45  ;;  %v1161_v3 = vrot.slane %v1160_v57, 4  ;;  %1044 = vst [vmem:[#allocation2 + $0x9c] sm:$0xf] %v1043_v61  ;;  %v1047_v5 = vsel %vm12120_vm13, %v856_v20, %v1046_v53  ;;  %v657_v21 = vshll.u32 %v12229_v62, 16  ;;  %v401_v46 = vld [vmem:[#allocation2 + $0x24] sm:$0x1] }
  0x39   : > { %v1566_v15 = vpack.c.b16 %v1547_v58, %v1546_v55  ;;  %v1170_v16 = vor.u32 %v1169_v59, %v1165_v52  ;;  %v1175_v19 = vrot.slane %v1173_v60, 5  ;;  %1048 = vst [vmem:[#allocation2 + $0xa4] sm:$0x1] %v1047_v5  ;;  %v660_v26 = vrot.slane %v656_v13, 4  ;;  %v12274_v56 = vld [vmem:[%s12166_s27 + $0x10] sm:$0xf] }
  0x3a   : > { %10844 = vmatmul.msk.bf16.gmra.mxu2 %vm1594_vm3, %v2178_v2  ;;  %v1166_v24 = vsel %vm12159_vm15, %v1161_v3, %v1165_v52  ;;  %v662_v28 = vshrl.u32 %v605_v63, 16  ;;  %v665_v30 = vshll.u32 %v605_v63, 16  ;;  %v1451_v31 = vshll.u32 %v1097_v25, 16  ;;  %v12281_v61 = vld [vmem:[%s12166_s27 + $0x14] sm:$0xf] }
  0x3b   : > { %10703 = vmatmul.msk.bf16.vlgmr.msra.gmra.mxu3 %vm1594_vm3, %v1566_v15  ;;  %v1171_v20 = vrot.slane %v1170_v16, 4  ;;  %v1524_v29 = vunpack.c.l.b16 %v1166_v24  ;;  %v1455_v32 = vshrl.u32 %v1097_v25, 16  ;;  %v659_v33 = vor.u32 %v657_v21, %v656_v13  ;;  %v969_v45 = vld [vmem:[#allocation2 + $0x20] sm:$0x1] }
  0x3c   : > { %v664_v62 = vrot.slane %v662_v28, 7  ;;  %v435_v34 = vsel %vm12120_vm13, 0, %v434_v1  ;;  %v485_v35 = vsel %vm12129_vm14, 0, %v484_v14  ;;  %11870 = vmatpush.bf16.msra.mxu3 %v12022_v0  ;;  %v12265_v37 = vrot.slane %v1451_v31, 5  ;;  %v451_v0 = vld [vmem:[#allocation2 + $0x2c] sm:$0x1] }
  0x3d   : > { %v1176_v36 = vsel %vm12159_vm15, %v1171_v20, %v1175_v19  ;;  %v1457_v38 = vrot.slane %v1455_v32, 4  ;;  %436 = vst [vmem:[#allocation2 + $0xa8] sm:$0x1] %v435_v34  ;;  %v858_v40 = vshrl.u32 %v628_v22, 16  ;;  %v966_v44 = vsel %vm12185_vm7, %v659_v33, %v965_v6 }
  0x3e   : > { %v1525_v41 = vunpack.c.l.b16 %v1176_v36  ;;  %v667_v42 = vor.u32 %v665_v30, %v664_v62  ;;  %v669_v43 = vrot.slane %v664_v62, 4  ;;  %486 = vst [vmem:[#allocation2 + $0xb0] sm:$0x1] %v485_v35  ;;  %v861_v51 = vshll.u32 %v628_v22, 16 }
  0x3f   : > { %v1096_v47 = vld [vmem:[#allocation2 + $0x9c] sm:$0xf]  ;;  %v1458_v49 = vor.u32 %v1457_v38, %v12265_v37  ;;  %967 = vst [vmem:[#allocation2 + $0x18] sm:$0xf] %v966_v44  ;;  %v860_v50 = vrot.slane %v858_v40, 7  ;;  %v866_v3 = vshrl.u32 %v629_v39, 16 }
  0x40   : > { %v1555_v52 = vpack.c.b16 %v1525_v41, %v1524_v29  ;;  %v1123_v10 = vld [vmem:[#allocation2 + $0xa4] sm:$0x1]  ;;  %v1442_v53 = vshrl.u32 %v1096_v47, 16  ;;  %v1445_v54 = vshll.u32 %v1096_v47, 16  ;;  %v668_v55 = vsel %vm12192_vm8, %v660_v26, %v667_v42  ;;  %11871 = vmatpush.bf16.msra.mxu3 %v12038_v4 }
  0x41   : > { %v1459_v57 = vrot.slane %v1458_v49, 4  ;;  %v1461_v58 = vshll.u32 %v1123_v10, 16  ;;  %968 = vst.msk [vmem:[#allocation2 + $0x1c] sm:$0xf] %vm382_vm0, %v668_v55  ;;  %v970_v59 = vsel %vm12120_vm13, %v669_v43, %v969_v45  ;;  %v863_v60 = vor.u32 %v861_v51, %v860_v50 }
  0x42   : > { %10692 = vmatmul.msk.bf16.gmra.mxu0 %vm1594_vm3, %v1555_v52  ;;  %v1444_v63 = vrot.slane %v1442_v53, 4  ;;  %v1447_v1 = vrot.slane %v1445_v54, 5  ;;  %971 = vst [vmem:[#allocation2 + $0x20] sm:$0x1] %v970_v59  ;;  %v864_v2 = vrot.slane %v860_v50, 4  ;;  %v869_v13 = vshll.u32 %v629_v39, 16 }
  0x43   : > { %v1463_v5 = vrot.slane %v1461_v58, 5  ;;  %v402_v4 = vsel %vm12120_vm13, 0, %v401_v46  ;;  %v452_v14 = vsel %vm12129_vm14, 0, %v451_v0  ;;  %v868_v16 = vrot.slane %v866_v3, 7 }
  0x44   : > { %v1448_v15 = vor.u32 %v1447_v1, %v1444_v63  ;;  %v1049_v19 = vld [vmem:[#allocation2 + $0xa8] sm:$0xf]  ;;  %403 = vst [vmem:[#allocation2 + $0x24] sm:$0x1] %v402_v4  ;;  %v671_v21 = vshrl.u32 %v12274_v56, 16  ;;  %11872 = vmatpush.bf16.msra.mxu3 %v12056_v7  ;;  %v674_v26 = vshll.u32 %v12274_v56, 16 }
  0x45   : > { %v1464_v22 = vsel %vm12159_vm15, %v1459_v57, %v1463_v5  ;;  %v1050_v24 = vsel %vm12185_vm7, %v863_v60, %v1049_v19  ;;  %v1053_v25 = vld [vmem:[#allocation2 + $0xb0] sm:$0x1]  ;;  %453 = vst [vmem:[#allocation2 + $0x2c] sm:$0x1] %v452_v14  ;;  %v679_v28 = vshrl.u32 %v12281_v61, 16  ;;  %v871_v32 = vor.u32 %v869_v13, %v868_v16 }
  0x46   : > { %v1449_v30 = vrot.slane %v1448_v15, 4  ;;  %v1549_v20 = vunpack.c.l.b16 %v1464_v22  ;;  %v1975_v29 = vld [vmem:[#allocation2 + $0x18] sm:$0xe]  ;;  %v873_v6 = vrot.slane %v868_v16, 4  ;;  %1051 = vst [vmem:[#allocation2 + $0xa8] sm:$0xf] %v1050_v24 }
  0x47   : > { %v1074_v31 = vld [vmem:[#allocation2 + $0x18] sm:$0xf]  ;;  %v10805_v33 = vrot.slane %v1975_v29, 9  ;;  %v12296_v34 = vrot.slane %v671_v21, 7  ;;  %v872_v38 = vsel %vm12192_vm8, %v864_v2, %v871_v32  ;;  %v681_v41 = vrot.slane %v679_v28, 7 }
  0x48   : > { %v1178_v7 = vshrl.u32 %v1074_v31, 16  ;;  %v1181_v62 = vshll.u32 %v1074_v31, 16  ;;  %v1454_v35 = vsel %vm12159_vm15, %v1449_v30, %v12265_v37  ;;  %v1075_v36 = vld [vmem:[#allocation2 + $0x1c] sm:$0xf]  ;;  %v1054_v39 = vsel %vm12120_vm13, %v873_v6, %v1053_v25  ;;  %11873 = vmatpush.bf16.msra.mxu3 %v12097_v12  ;;  %1052 = vst.msk [vmem:[#allocation2 + $0xac] sm:$0xf] %vm382_vm0, %v872_v38 }
  0x49   : > { %v11722_v40 = vld [vmem:[#allocation2 + $0x18] sm:$0xff]  ;;  %v1548_v42 = vunpack.c.l.b16 %v1454_v35  ;;  %v1112_v43 = vld [vmem:[#allocation2 + $0x20] sm:$0x1]  ;;  %v2040_v44 = vrot.slane %v1075_v36, 5  ;;  %v1187_v47 = vshll.u32 %v1075_v36, 16  ;;  %v1191_v49 = vshrl.u32 %v1075_v36, 16 }
  0x4a   : > { %v1180_v45 = vrot.slane %v1178_v7, 4  ;;  %v1183_v46 = vrot.slane %v1181_v62, 5  ;;  %v2043_v0 = vrot.slane %v1112_v43, 5  ;;  %v1197_v37 = vshll.u32 %v1112_v43, 16  ;;  %10789 = vmatmul.msk.bf16.gmra.mxu1 %vm1594_vm3, %v11722_v40  ;;  %1055 = vst [vmem:[#allocation2 + $0xb0] sm:$0x1] %v1054_v39 }
  0x4b   : > { %v1567_v50 = vpack.c.b16 %v1549_v20, %v1548_v42  ;;  %v2041_v51 = vsel %vm12106_vm12, %v10805_v33, %v2040_v44  ;;  %v2042_v52 = vrot.slane %v2040_v44, 4  ;;  %v1189_v53 = vrot.slane %v1187_v47, 5  ;;  %v972_v56 = vld [vmem:[#allocation2 + $0x24] sm:$0xf]  ;;  %v437_v63 = vld [vmem:[#allocation2 + $0xb4] sm:$0x1] }
  0x4c   : > { %v1184_v10 = vor.u32 %v1183_v46, %v1180_v45  ;;  %v2149_v12 = vunpack.c.l.b16 %v2041_v51  ;;  %v1193_v54 = vrot.slane %v1191_v49, 4  ;;  %v1199_v55 = vrot.slane %v1197_v37, 5  ;;  %v976_v4 = vld [vmem:[#allocation2 + $0x2c] sm:$0x1]  ;;  %v487_v14 = vld [vmem:[#allocation2 + $0xbc] sm:$0x1] }
  0x4d   : > { %10704 = vmatmul.msk.bf16.gmra.mxu3 %vm1594_vm3, %v1567_v50  ;;  %v2044_v57 = vsel %vm12106_vm12, %v2042_v52, %v2043_v0  ;;  %v676_v59 = vor.u32 %v674_v26, %v12296_v34  ;;  %v677_v60 = vrot.slane %v12296_v34, 4  ;;  %v1098_v3 = vld [vmem:[#allocation2 + $0xa8] sm:$0xf]  ;;  %v682_v5 = vshll.u32 %v12281_v61, 16  ;;  %v630_v22 = vld [vmem:[%s12166_s27 + $0x70] sm:$0xf] }
  0x4e   : > { %v1185_v58 = vrot.slane %v1184_v10, 4  ;;  %v2150_v1 = vunpack.c.l.b16 %v2044_v57  ;;  %v1194_v2 = vor.u32 %v1193_v54, %v1189_v53  ;;  %v686_v13 = vrot.slane %v681_v41, 4  ;;  %v631_v30 = vld [vmem:[%s12166_s27 + $0x74] sm:$0xf]  ;;  %v404_v6 = vld [vmem:[#allocation2 + $0x30] sm:$0x1] }
  0x4f   : > { %v1466_v16 = vshrl.u32 %v1098_v3, 16  ;;  %v1469_v19 = vshll.u32 %v1098_v3, 16  ;;  %v973_v21 = vsel %vm12185_vm7, %v676_v59, %v972_v56  ;;  %v684_v28 = vor.u32 %v682_v5, %v681_v41  ;;  %v1099_v20 = vld [vmem:[#allocation2 + $0xac] sm:$0xf]  ;;  %v454_v36 = vld [vmem:[#allocation2 + $0x38] sm:$0x1] }
  0x50   : > { %v1190_v15 = vsel %vm12159_vm15, %v1185_v58, %v1189_v53  ;;  %v2179_v24 = vpack.c.b16 %v2150_v1, %v2149_v12  ;;  %v1195_v25 = vrot.slane %v1194_v2, 4  ;;  %974 = vst [vmem:[#allocation2 + $0x24] sm:$0xf] %v973_v21  ;;  %v977_v31 = vsel %vm12120_vm13, %v686_v13, %v976_v4  ;;  %v11770_v37 = vld [vmem:[%s15657_s2 + $0x90] sm:$0xff]  ;;  %v608_v21 = vld [vmem:[%s12166_s27 + $0x18] sm:$0xf] }
  0x51   : > { %v1526_v26 = vunpack.c.l.b16 %v1190_v15  ;;  %v1468_v61 = vrot.slane %v1466_v16, 4  ;;  %v1471_v29 = vrot.slane %v1469_v19, 5  ;;  %v438_v32 = vsel %vm12120_vm13, 0, %v437_v63  ;;  %v1124_v7 = vld [vmem:[#allocation2 + $0xb0] sm:$0x1]  ;;  %3266 = vmatpush.bf16.msrb.mxu0 %v11770_v37 }
  0x52   : > { %10845 = vmatmul.msk.bf16.gmra.mxu2 %vm1594_vm3, %v2179_v24  ;;  %v1200_v33 = vsel %vm12159_vm15, %v1195_v25, %v1199_v55  ;;  %v1475_v62 = vshll.u32 %v1099_v20, 16  ;;  %v1479_v34 = vshrl.u32 %v1099_v20, 16  ;;  %v685_v35 = vsel %vm12192_vm8, %v677_v60, %v684_v28  ;;  %978 = vst [vmem:[#allocation2 + $0x2c] sm:$0x1] %v977_v31 }
  0x53   : > { %v1527_v38 = vunpack.c.l.b16 %v1200_v33  ;;  %v1472_v39 = vor.u32 %v1471_v29, %v1468_v61  ;;  %v1485_v40 = vshll.u32 %v1124_v7, 16  ;;  %975 = vst.msk [vmem:[#allocation2 + $0x28] sm:$0xf] %vm382_vm0, %v685_v35  ;;  %v488_v41 = vsel %vm12129_vm14, 0, %v487_v14 }
  0x54   : > { %v1477_v42 = vrot.slane %v1475_v62, 5  ;;  %v1481_v43 = vrot.slane %v1479_v34, 4  ;;  %439 = vst [vmem:[#allocation2 + $0xb4] sm:$0x1] %v438_v32  ;;  %v875_v44 = vshrl.u32 %v630_v22, 16  ;;  %v878_v45 = vshll.u32 %v630_v22, 16 }
  0x55   : > { %v1556_v46 = vpack.c.b16 %v1527_v38, %v1526_v26  ;;  %v1473_v0 = vrot.slane %v1472_v39, 4  ;;  %v1487_v47 = vrot.slane %v1485_v40, 5  ;;  %489 = vst [vmem:[#allocation2 + $0xbc] sm:$0x1] %v488_v41  ;;  %v883_v49 = vshrl.u32 %v631_v30, 16 }
  0x56   : > { %v1482_v50 = vor.u32 %v1481_v43, %v1477_v42  ;;  %v877_v51 = vrot.slane %v875_v44, 7  ;;  %v886_v52 = vshll.u32 %v631_v30, 16  ;;  %v405_v10 = vsel %vm12120_vm13, 0, %v404_v6  ;;  %v609_v62 = vld [vmem:[%s12166_s27 + $0x1c] sm:$0xf] }
  0x57   : > { %10693 = vmatmul.msk.bf16.gmra.mxu0 %vm1594_vm3, %v1556_v46  ;;  %v1478_v12 = vsel %vm12159_vm15, %v1473_v0, %v1477_v42  ;;  %v1976_v53 = vld [vmem:[#allocation2 + $0x24] sm:$0xe]  ;;  %v885_v55 = vrot.slane %v883_v49, 7  ;;  %v455_v56 = vsel %vm12129_vm14, 0, %v454_v36  ;;  %406 = vst [vmem:[#allocation2 + $0x30] sm:$0x1] %v405_v10 }
  0x58   : > { %v1076_v54 = vld [vmem:[#allocation2 + $0x24] sm:$0xf]  ;;  %v1483_v57 = vrot.slane %v1482_v50, 4  ;;  %v1550_v58 = vunpack.c.l.b16 %v1478_v12  ;;  %v10806_v59 = vrot.slane %v1976_v53, 9  ;;  %v880_v2 = vor.u32 %v878_v45, %v877_v51  ;;  %456 = vst [vmem:[#allocation2 + $0x38] sm:$0x1] %v455_v56 }
  0x59   : > { %v1202_v60 = vshrl.u32 %v1076_v54, 16  ;;  %v1113_v63 = vld [vmem:[#allocation2 + $0x2c] sm:$0x1]  ;;  %v1205_v1 = vshll.u32 %v1076_v54, 16  ;;  %v881_v3 = vrot.slane %v877_v51, 4  ;;  %v888_v5 = vor.u32 %v886_v52, %v885_v55 }
  0x5a   : > { %v1488_v13 = vsel %vm12159_vm15, %v1483_v57, %v1487_v47  ;;  %v1077_v4 = vld [vmem:[#allocation2 + $0x28] sm:$0xf]  ;;  %v2050_v14 = vrot.slane %v1113_v63, 5  ;;  %v1221_v16 = vshll.u32 %v1113_v63, 16  ;;  %v890_v29 = vrot.slane %v885_v55, 4 }
  0x5b   : > { %v1204_v15 = vrot.slane %v1202_v60, 4  ;;  %v11723_v19 = vld [vmem:[#allocation2 + $0x24] sm:$0xff]  ;;  %v1551_v22 = vunpack.c.l.b16 %v1488_v13  ;;  %v2047_v24 = vrot.slane %v1077_v4, 5  ;;  %v1207_v25 = vrot.slane %v1205_v1, 5  ;;  %v1056_v28 = vld [vmem:[#allocation2 + $0xb4] sm:$0xf] }
  0x5c   : > { %v1211_v26 = vshll.u32 %v1077_v4, 16  ;;  %v1215_v30 = vshrl.u32 %v1077_v4, 16  ;;  %v1223_v20 = vrot.slane %v1221_v16, 5  ;;  %v889_v61 = vsel %vm12192_vm8, %v881_v3, %v888_v5  ;;  %v1060_v31 = vld [vmem:[#allocation2 + $0xbc] sm:$0x1]  ;;  %10790 = vmatmul.msk.bf16.gmra.mxu1 %vm1594_vm3, %v11723_v19 }
  0x5d   : > { %v1568_v32 = vpack.c.b16 %v1551_v22, %v1550_v58  ;;  %v2048_v6 = vsel %vm12106_vm12, %v10806_v59, %v2047_v24  ;;  %v2049_v33 = vrot.slane %v2047_v24, 4  ;;  %v1208_v7 = vor.u32 %v1207_v25, %v1204_v15  ;;  %1059 = vst.msk [vmem:[#allocation2 + $0xb8] sm:$0xf] %vm382_vm0, %v889_v61  ;;  %v407_v39 = vld [vmem:[#allocation2 + $0x3c] sm:$0x1] }
  0x5e   : > { %v2151_v34 = vunpack.c.l.b16 %v2048_v6  ;;  %v1213_v35 = vrot.slane %v1211_v26, 5  ;;  %v1217_v36 = vrot.slane %v1215_v30, 4  ;;  %v1057_v38 = vsel %vm12185_vm7, %v880_v2, %v1056_v28  ;;  %v457_v44 = vld [vmem:[#allocation2 + $0x44] sm:$0x1]  ;;  %v610_v49 = vld [vmem:[%s12166_s27 + $0x20] sm:$0xf] }
  0x5f   : > { %10705 = vmatmul.msk.bf16.gmra.mxu3 %vm1594_vm3, %v1568_v32  ;;  %v2051_v40 = vsel %vm12106_vm12, %v2049_v33, %v2050_v14  ;;  %v1209_v41 = vrot.slane %v1208_v7, 4  ;;  %1058 = vst [vmem:[#allocation2 + $0xb4] sm:$0xf] %v1057_v38  ;;  %v1061_v42 = vsel %vm12120_vm13, %v890_v29, %v1060_v31  ;;  %v688_v43 = vshrl.u32 %v608_v21, 16  ;;  %v979_v52 = vld [vmem:[#allocation2 + $0x30] sm:$0xf] }
  0x60   : > { %v2152_v45 = vunpack.c.l.b16 %v2051_v40  ;;  %v1218_v46 = vor.u32 %v1217_v36, %v1213_v35  ;;  %1062 = vst [vmem:[#allocation2 + $0xbc] sm:$0x1] %v1061_v42  ;;  %v691_v0 = vshll.u32 %v608_v21, 16  ;;  %v696_v47 = vshrl.u32 %v609_v62, 16  ;;  %v983_v56 = vld [vmem:[#allocation2 + $0x38] sm:$0x1] }
  0x61   : > { %v1214_v37 = vsel %vm12159_vm15, %v1209_v41, %v1213_v35  ;;  %v690_v50 = vrot.slane %v688_v43, 7  ;;  %v699_v51 = vshll.u32 %v609_v62, 16  ;;  %v408_v10 = vsel %vm12120_vm13, 0, %v407_v39  ;;  %v611_v60 = vld [vmem:[%s12166_s27 + $0x24] sm:$0xf] }
  0x62   : > { %v2180_v12 = vpack.c.b16 %v2152_v45, %v2151_v34  ;;  %v1219_v53 = vrot.slane %v1218_v46, 4  ;;  %v1528_v54 = vunpack.c.l.b16 %v1214_v37  ;;  %v698_v55 = vrot.slane %v696_v47, 7  ;;  %409 = vst [vmem:[#allocation2 + $0x3c] sm:$0x1] %v408_v10  ;;  %v410_v19 = vld [vmem:[#allocation2 + $0x48] sm:$0x1] }
  0x63   : > { %v693_v57 = vor.u32 %v691_v0, %v690_v50  ;;  %v694_v58 = vrot.slane %v690_v50, 4  ;;  %v458_v59 = vsel %vm12129_vm14, 0, %v457_v44  ;;  %v705_v63 = vshrl.u32 %v610_v49, 16  ;;  %v460_v41 = vld [vmem:[#allocation2 + $0x50] sm:$0x1] }
  0x64   : > { %10846 = vmatmul.msk.bf16.gmra.mxu2 %vm1594_vm3, %v2180_v12  ;;  %v1224_v1 = vsel %vm12159_vm15, %v1219_v53, %v1223_v20  ;;  %v1101_v2 = vld [vmem:[#allocation2 + $0xb8] sm:$0xf]  ;;  %v701_v3 = vor.u32 %v699_v51, %v698_v55  ;;  %v703_v5 = vrot.slane %v698_v55, 4  ;;  %459 = vst [vmem:[#allocation2 + $0x44] sm:$0x1] %v458_v59  ;;  %v708_v13 = vshll.u32 %v610_v49, 16 }
  0x65   : > { %v1529_v4 = vunpack.c.l.b16 %v1224_v1  ;;  %v1499_v14 = vshll.u32 %v1101_v2, 16  ;;  %v1503_v15 = vshrl.u32 %v1101_v2, 16  ;;  %v980_v16 = vsel %vm12185_vm7, %v693_v57, %v979_v52  ;;  %v12385_v47 = vld [vmem:[%s12166_s27 + $0x28] sm:$0xf] }
  0x66   : > { %v1100_v21 = vld [vmem:[#allocation2 + $0xb4] sm:$0xf]  ;;  %v702_v22 = vsel %vm12192_vm8, %v694_v58, %v701_v3  ;;  %981 = vst [vmem:[#allocation2 + $0x30] sm:$0xf] %v980_v16  ;;  %v984_v24 = vsel %vm12120_vm13, %v703_v5, %v983_v56  ;;  %v707_v25 = vrot.slane %v705_v63, 7  ;;  %v713_v26 = vshrl.u32 %v611_v60, 16 }
  0x67   : > { %v1557_v28 = vpack.c.b16 %v1529_v4, %v1528_v54  ;;  %v1125_v30 = vld [vmem:[#allocation2 + $0xbc] sm:$0x1]  ;;  %v1490_v20 = vshrl.u32 %v1100_v21, 16  ;;  %v1493_v61 = vshll.u32 %v1100_v21, 16  ;;  %v1501_v29 = vrot.slane %v1499_v14, 5 }
  0x68   : > { %v1505_v31 = vrot.slane %v1503_v15, 4  ;;  %v1509_v32 = vshll.u32 %v1125_v30, 16  ;;  %982 = vst.msk [vmem:[#allocation2 + $0x34] sm:$0xf] %vm382_vm0, %v702_v22  ;;  %v710_v6 = vor.u32 %v708_v13, %v707_v25  ;;  %v711_v33 = vrot.slane %v707_v25, 4 }
  0x69   : > { %10694 = vmatmul.msk.bf16.gmra.mxu0 %vm1594_vm3, %v1557_v28  ;;  %v1492_v7 = vrot.slane %v1490_v20, 4  ;;  %v1495_v62 = vrot.slane %v1493_v61, 5  ;;  %985 = vst [vmem:[#allocation2 + $0x38] sm:$0x1] %v984_v24  ;;  %v715_v34 = vrot.slane %v713_v26, 7  ;;  %v716_v35 = vshll.u32 %v611_v60, 16 }
  0x6a   : > { %v1506_v36 = vor.u32 %v1505_v31, %v1501_v29  ;;  %v1511_v38 = vrot.slane %v1509_v32, 5  ;;  %v986_v39 = vld [vmem:[#allocation2 + $0x3c] sm:$0xf]  ;;  %v411_v40 = vsel %vm12120_vm13, 0, %v410_v19  ;;  %v461_v10 = vsel %vm12129_vm14, 0, %v460_v41 }
  0x6b   : > { %v1496_v42 = vor.u32 %v1495_v62, %v1492_v7  ;;  %v718_v43 = vor.u32 %v716_v35, %v715_v34  ;;  %v720_v44 = vrot.slane %v715_v34, 4  ;;  %v987_v45 = vsel %vm12185_vm7, %v710_v6, %v986_v39  ;;  %v990_v46 = vld [vmem:[#allocation2 + $0x44] sm:$0x1]  ;;  %412 = vst [vmem:[#allocation2 + $0x48] sm:$0x1] %v411_v40 }
  0x6c   : > { %v1507_v0 = vrot.slane %v1506_v36, 4  ;;  %988 = vst [vmem:[#allocation2 + $0x3c] sm:$0xf] %v987_v45  ;;  %v722_v60 = vshrl.u32 %v12385_v47, 16 }
  0x6d   : > { %v1497_v49 = vrot.slane %v1496_v42, 4  ;;  %v1977_v37 = vld [vmem:[#allocation2 + $0x30] sm:$0xe]  ;;  %v719_v51 = vsel %vm12192_vm8, %v711_v33, %v718_v43  ;;  %v991_v52 = vsel %vm12120_vm13, %v720_v44, %v990_v46  ;;  %462 = vst [vmem:[#allocation2 + $0x50] sm:$0x1] %v461_v10  ;;  %v725_v44 = vshll.u32 %v12385_v47, 16 }
  0x6e   : > { %v1078_v50 = vld [vmem:[#allocation2 + $0x30] sm:$0xf]  ;;  %v1512_v12 = vsel %vm12159_vm15, %v1507_v0, %v1511_v38  ;;  %v10807_v53 = vrot.slane %v1977_v37, 9  ;;  %989 = vst.msk [vmem:[#allocation2 + $0x40] sm:$0xf] %vm382_vm0, %v719_v51  ;;  %v12402_v30 = vrot.slane %v722_v60, 7 }
  0x6f   : > { %v1226_v54 = vshrl.u32 %v1078_v50, 16  ;;  %v1229_v55 = vshll.u32 %v1078_v50, 16  ;;  %v1502_v56 = vsel %vm12159_vm15, %v1497_v49, %v1501_v29  ;;  %v1553_v57 = vunpack.c.l.b16 %v1512_v12  ;;  %v1079_v58 = vld [vmem:[#allocation2 + $0x34] sm:$0xf]  ;;  %992 = vst [vmem:[#allocation2 + $0x44] sm:$0x1] %v991_v52 }
  0x70   : > { %v11724_v59 = vld [vmem:[#allocation2 + $0x30] sm:$0xff]  ;;  %v1552_v63 = vunpack.c.l.b16 %v1502_v56  ;;  %v1114_v1 = vld [vmem:[#allocation2 + $0x38] sm:$0x1]  ;;  %v2054_v2 = vrot.slane %v1079_v58, 5  ;;  %v1235_v4 = vshll.u32 %v1079_v58, 16  ;;  %v1239_v14 = vshrl.u32 %v1079_v58, 16 }
  0x71   : > { %v1228_v3 = vrot.slane %v1226_v54, 4  ;;  %v1231_v5 = vrot.slane %v1229_v55, 5  ;;  %v2057_v13 = vrot.slane %v1114_v1, 5  ;;  %v1245_v15 = vshll.u32 %v1114_v1, 16  ;;  %10791 = vmatmul.msk.bf16.gmra.mxu1 %vm1594_vm3, %v11724_v59  ;;  %v613_v52 = vld [vmem:[%s12166_s27 + $0x2c] sm:$0xf] }
  0x72   : > { %v1569_v16 = vpack.c.b16 %v1553_v57, %v1552_v63  ;;  %v2055_v19 = vsel %vm12106_vm12, %v10807_v53, %v2054_v2  ;;  %v2056_v21 = vrot.slane %v2054_v2, 4  ;;  %v1237_v25 = vrot.slane %v1235_v4, 5  ;;  %v993_v54 = vld [vmem:[#allocation2 + $0x48] sm:$0xf]  ;;  %v413_v57 = vld [vmem:[#allocation2 + $0x54] sm:$0x1] }
  0x73   : > { %v1232_v22 = vor.u32 %v1231_v5, %v1228_v3  ;;  %v2153_v24 = vunpack.c.l.b16 %v2055_v19  ;;  %v1241_v26 = vrot.slane %v1239_v14, 4  ;;  %v1978_v28 = vld [vmem:[#allocation2 + $0x3c] sm:$0xe]  ;;  %v1247_v29 = vrot.slane %v1245_v15, 5  ;;  %v463_v58 = vld [vmem:[#allocation2 + $0x5c] sm:$0x1] }
  0x74   : > { %10706 = vmatmul.msk.bf16.gmra.mxu3 %vm1594_vm3, %v1569_v16  ;;  %v2058_v20 = vsel %vm12106_vm12, %v2056_v21, %v2057_v13  ;;  %v10808_v31 = vrot.slane %v1978_v28, 9  ;;  %v1080_v32 = vld [vmem:[#allocation2 + $0x3c] sm:$0xf]  ;;  %v727_v56 = vor.u32 %v725_v44, %v12402_v30  ;;  %v728_v63 = vrot.slane %v12402_v30, 4  ;;  %v614_v2 = vld [vmem:[%s12166_s27 + $0x30] sm:$0xf] }
  0x75   : > { %v1233_v61 = vrot.slane %v1232_v22, 4  ;;  %v2154_v6 = vunpack.c.l.b16 %v2058_v20  ;;  %v1242_v33 = vor.u32 %v1241_v26, %v1237_v25  ;;  %v1081_v7 = vld [vmem:[#allocation2 + $0x40] sm:$0xf]  ;;  %v1250_v62 = vshrl.u32 %v1080_v32, 16  ;;  %v615_v15 = vld [vmem:[%s12166_s27 + $0x34] sm:$0xf] }
  0x76   : > { %v1253_v34 = vshll.u32 %v1080_v32, 16  ;;  %v1115_v36 = vld [vmem:[#allocation2 + $0x44] sm:$0x1]  ;;  %v2061_v38 = vrot.slane %v1081_v7, 5  ;;  %v1259_v39 = vshll.u32 %v1081_v7, 16  ;;  %v1263_v40 = vshrl.u32 %v1081_v7, 16 }
  0x77   : > { %v1238_v35 = vsel %vm12159_vm15, %v1233_v61, %v1237_v25  ;;  %v2181_v41 = vpack.c.b16 %v2154_v6, %v2153_v24  ;;  %v1243_v42 = vrot.slane %v1242_v33, 4  ;;  %v2064_v46 = vrot.slane %v1115_v36, 5  ;;  %v11725_v13 = vld [vmem:[#allocation2 + $0x3c] sm:$0xff]  ;;  %v997_v24 = vld [vmem:[#allocation2 + $0x50] sm:$0x1] }
  0x78   : > { %v1530_v43 = vunpack.c.l.b16 %v1238_v35  ;;  %v2063_v45 = vrot.slane %v2061_v38, 4  ;;  %v1252_v0 = vrot.slane %v1250_v62, 4  ;;  %v1255_v49 = vrot.slane %v1253_v34, 5  ;;  %v11732_v28 = vld [vmem:[#allocation2 + $0x90] sm:$0xff] }
  0x79   : > { %10847 = vmatmul.msk.bf16.gmra.mxu2 %vm1594_vm3, %v2181_v41  ;;  %v1248_v37 = vsel %vm12159_vm15, %v1243_v42, %v1247_v29  ;;  %v1261_v50 = vrot.slane %v1259_v39, 5  ;;  %v1265_v51 = vrot.slane %v1263_v40, 4  ;;  %v1269_v53 = vshll.u32 %v1115_v36, 16  ;;  %v11769_v39 = vld [vmem:[%s15657_s2 + $0x88] sm:$0xff]  ;;  %v416_v42 = vld [vmem:[#allocation2 + $0x60] sm:$0x1] }
  0x7a   : > { %v1531_v10 = vunpack.c.l.b16 %v1248_v37  ;;  %v1256_v12 = vor.u32 %v1255_v49, %v1252_v0  ;;  %v2062_v47 = vsel %vm12106_vm12, %v10808_v31, %v2061_v38  ;;  %v2065_v60 = vsel %vm12106_vm12, %v2063_v45, %v2064_v46  ;;  %3267 = vmatpush.bf16.msrb.mxu0 %v11769_v39 }
  0x7b   : > { %v1266_v55 = vor.u32 %v1265_v51, %v1261_v50  ;;  %v730_v1 = vshrl.u32 %v613_v52, 16  ;;  %v1271_v5 = vrot.slane %v1269_v53, 5  ;;  %v733_v4 = vshll.u32 %v613_v52, 16  ;;  %v466_v53 = vld [vmem:[#allocation2 + $0x68] sm:$0x1] }
  0x7c   : > { %v1558_v59 = vpack.c.b16 %v1531_v10, %v1530_v43  ;;  %v1257_v3 = vrot.slane %v1256_v12, 4  ;;  %v994_v14 = vsel %vm12185_vm7, %v727_v56, %v993_v54  ;;  %v414_v21 = vsel %vm12120_vm13, 0, %v413_v57  ;;  %v616_v57 = vld [vmem:[%s12166_s27 + $0x38] sm:$0xf] }
  0x7d   : > { %v1267_v16 = vrot.slane %v1266_v55, 4  ;;  %v732_v19 = vrot.slane %v730_v1, 7  ;;  %995 = vst [vmem:[#allocation2 + $0x48] sm:$0xf] %v994_v14  ;;  %v464_v22 = vsel %vm12129_vm14, 0, %v463_v58  ;;  %v739_v25 = vshrl.u32 %v614_v2, 16 }
  0x7e   : > { %10695 = vmatmul.msk.bf16.gmra.mxu0 %vm1594_vm3, %v1558_v59  ;;  %415 = vst [vmem:[#allocation2 + $0x54] sm:$0x1] %v414_v21  ;;  %v742_v26 = vshll.u32 %v614_v2, 16  ;;  %v2155_v30 = vunpack.c.l.b16 %v2062_v47  ;;  %v747_v29 = vshrl.u32 %v615_v15, 16  ;;  %v2156_v31 = vunpack.c.l.b16 %v2065_v60 }
  0x7f   : > { %v735_v20 = vor.u32 %v733_v4, %v732_v19  ;;  %v737_v61 = vrot.slane %v732_v19, 4  ;;  %465 = vst [vmem:[#allocation2 + $0x5c] sm:$0x1] %v464_v22  ;;  %v1262_v32 = vsel %vm12159_vm15, %v1257_v3, %v1261_v50  ;;  %v741_v6 = vrot.slane %v739_v25, 7 }
  0x80   : > { %v750_v33 = vshll.u32 %v615_v15, 16  ;;  %v1272_v7 = vsel %vm12159_vm15, %v1267_v16, %v1271_v5  ;;  %v749_v35 = vrot.slane %v747_v29, 7  ;;  %v2182_v43 = vpack.c.b16 %v2156_v31, %v2155_v30 }
  0x81   : > { %10792 = vmatmul.msk.bf16.gmra.mxu1 %vm1594_vm3, %v11725_v13  ;;  %v736_v62 = vsel %vm12192_vm8, %v728_v63, %v735_v20  ;;  %v998_v34 = vsel %vm12120_vm13, %v737_v61, %v997_v24  ;;  %v744_v36 = vor.u32 %v742_v26, %v741_v6  ;;  %v745_v38 = vrot.slane %v741_v6, 4  ;;  %v12456_v24 = vld [vmem:[#allocation2 + $0x94] sm:$0xf]  ;;  %v12468_v6 = vld [vmem:[#allocation2 + $0x98] sm:$0x1] }
  0x82   : > { %996 = vst.msk [vmem:[#allocation2 + $0x4c] sm:$0xf] %vm382_vm0, %v736_v62  ;;  %v752_v40 = vor.u32 %v750_v33, %v749_v35  ;;  %v754_v41 = vrot.slane %v749_v35, 4  ;;  %v1532_v44 = vunpack.c.l.b16 %v1262_v32  ;;  %v1533_v45 = vunpack.c.l.b16 %v1272_v7  ;;  %v11733_v7 = vld [vmem:[#allocation2 + $0x9c] sm:$0xff] }
  0x83   : > { %999 = vst [vmem:[#allocation2 + $0x50] sm:$0x1] %v998_v34  ;;  %v417_v52 = vsel %vm12120_vm13, 0, %v416_v42  ;;  %v467_v56 = vsel %vm12129_vm14, 0, %v466_v53  ;;  %v756_v1 = vshrl.u32 %v616_v57, 16  ;;  %v2110_v25 = vrot.slane %v12456_v24, 5 }
  0x84   : > { %10799 = vmatmul.msk.bf16.vlgmr.msrb.gmra.mxu3 %vm1594_vm3, %v11732_v28  ;;  %v1979_v46 = vld [vmem:[#allocation2 + $0x48] sm:$0xe]  ;;  %v753_v50 = vsel %vm12192_vm8, %v745_v38, %v752_v40  ;;  %v1559_v58 = vpack.c.b16 %v1533_v45, %v1532_v44  ;;  %418 = vst [vmem:[#allocation2 + $0x60] sm:$0x1] %v417_v52  ;;  %v759_v20 = vshll.u32 %v616_v57, 16  ;;  %v2113_v33 = vrot.slane %v12468_v6, 5 }
  0x85   : > { %v1082_v0 = vld [vmem:[#allocation2 + $0x48] sm:$0xf]  ;;  %v1000_v51 = vld [vmem:[#allocation2 + $0x54] sm:$0xf]  ;;  %1003 = vst.msk [vmem:[#allocation2 + $0x58] sm:$0xf] %vm382_vm0, %v753_v50 }
  0x86   : > { %v1274_v49 = vshrl.u32 %v1082_v0, 16  ;;  %v1277_v37 = vshll.u32 %v1082_v0, 16  ;;  %v1001_v10 = vsel %vm12185_vm7, %v744_v36, %v1000_v51  ;;  %v1004_v12 = vld [vmem:[#allocation2 + $0x5c] sm:$0x1]  ;;  %v10809_v60 = vrot.slane %v1979_v46, 9 }
  0x87   : > { %1002 = vst [vmem:[#allocation2 + $0x54] sm:$0xf] %v1001_v10  ;;  %v1005_v55 = vsel %vm12120_vm13, %v754_v41, %v1004_v12  ;;  %v12464_v30 = vrot.slane %v756_v1, 7  ;;  %v12477_v42 = vrot.slane %v2110_v25, 4  ;;  %v617_v45 = vld [vmem:[%s12166_s27 + $0x3c] sm:$0xf] }
  0x88   : > { %v1276_v54 = vrot.slane %v1274_v49, 4  ;;  %v1279_v47 = vrot.slane %v1277_v37, 5  ;;  %1006 = vst [vmem:[#allocation2 + $0x5c] sm:$0x1] %v1005_v55  ;;  %v767_v57 = vshll.u32 %v617_v45, 16 }
  0x89   : > { %10848 = vmatmul.msk.bf16.gmra.mxu2 %vm1594_vm3, %v2182_v43  ;;  %v1083_v59 = vld [vmem:[#allocation2 + $0x4c] sm:$0xf]  ;;  %468 = vst [vmem:[#allocation2 + $0x68] sm:$0x1] %v467_v56  ;;  %v761_v46 = vor.u32 %v759_v20, %v12464_v30  ;;  %v762_v50 = vrot.slane %v12464_v30, 4  ;;  %v764_v56 = vshrl.u32 %v617_v45, 16 }
  0x8a   : > { %v1280_v63 = vor.u32 %v1279_v47, %v1276_v54  ;;  %v1116_v2 = vld [vmem:[#allocation2 + $0x50] sm:$0x1]  ;;  %v2068_v3 = vrot.slane %v1083_v59, 5  ;;  %v1283_v5 = vshll.u32 %v1083_v59, 16  ;;  %v1287_v13 = vshrl.u32 %v1083_v59, 16  ;;  %v11726_v22 = vld [vmem:[#allocation2 + $0x48] sm:$0xff] }
  0x8b   : > { %v2071_v4 = vrot.slane %v1116_v2, 5  ;;  %v1293_v15 = vshll.u32 %v1116_v2, 16  ;;  %v1007_v51 = vld [vmem:[#allocation2 + $0x60] sm:$0xf]  ;;  %v419_v54 = vld [vmem:[#allocation2 + $0x6c] sm:$0x1] }
  0x8c   : > { %v1281_v14 = vrot.slane %v1280_v63, 4  ;;  %v2070_v16 = vrot.slane %v2068_v3, 4  ;;  %v1285_v19 = vrot.slane %v1283_v5, 5  ;;  %v1289_v21 = vrot.slane %v1287_v13, 4  ;;  %v12462_v28 = vld [vmem:[#allocation2 + $0x58] sm:$0xf] }
  0x8d   : > { %v2069_v26 = vsel %vm12106_vm12, %v10809_v60, %v2068_v3  ;;  %v1295_v31 = vrot.slane %v1293_v15, 5  ;;  %v2075_v35 = vrot.slane %v12462_v28, 5  ;;  %v1307_v44 = vshll.u32 %v12462_v28, 16  ;;  %v469_v1 = vld [vmem:[#allocation2 + $0x74] sm:$0x1] }
  0x8e   : > { %10696 = vmatmul.msk.bf16.gmra.mxu0 %vm1594_vm3, %v1559_v58  ;;  %v2072_v61 = vsel %vm12106_vm12, %v2070_v16, %v2071_v4  ;;  %v1290_v29 = vor.u32 %v1289_v21, %v1285_v19  ;;  %v1084_v32 = vld [vmem:[#allocation2 + $0x54] sm:$0xf]  ;;  %v1286_v62 = vsel %vm12159_vm15, %v1281_v14, %v1285_v19  ;;  %v2157_v38 = vunpack.c.l.b16 %v2069_v26  ;;  %v618_v15 = vld [vmem:[%s12166_s27 + $0x40] sm:$0xf]  ;;  %v619_v21 = vld [vmem:[%s12166_s27 + $0x44] sm:$0xf] }
  0x8f   : > { %v1980_v34 = vld [vmem:[#allocation2 + $0x54] sm:$0xe]  ;;  %v1298_v36 = vshrl.u32 %v1084_v32, 16  ;;  %v2158_v39 = vunpack.c.l.b16 %v2072_v61  ;;  %v1301_v41 = vshll.u32 %v1084_v32, 16  ;;  %v1117_v43 = vld [vmem:[#allocation2 + $0x5c] sm:$0x1]  ;;  %v1534_v49 = vunpack.c.l.b16 %v1286_v62 }
  0x90   : > { %v1291_v40 = vrot.slane %v1290_v29, 4  ;;  %v10810_v37 = vrot.slane %v1980_v34, 9  ;;  %v2077_v52 = vrot.slane %v2075_v35, 4  ;;  %v1311_v53 = vshrl.u32 %v12462_v28, 16  ;;  %v1011_v3 = vld [vmem:[#allocation2 + $0x68] sm:$0x1] }
  0x91   : > { %10793 = vmatmul.msk.bf16.gmra.mxu1 %vm1594_vm3, %v11726_v22  ;;  %v1300_v10 = vrot.slane %v1298_v36, 4  ;;  %v1303_v12 = vrot.slane %v1301_v41, 5  ;;  %v2183_v47 = vpack.c.b16 %v2158_v39, %v2157_v38  ;;  %v2078_v55 = vrot.slane %v1117_v43, 5  ;;  %v1985_v36 = vld [vmem:[#allocation2 + $0x90] sm:$0xe] }
  0x92   : > { %v1296_v0 = vsel %vm12159_vm15, %v1291_v40, %v1295_v31  ;;  %v12487_v59 = vrot.slane %v1307_v44, 5  ;;  %v1313_v60 = vrot.slane %v1311_v53, 4  ;;  %v1008_v63 = vsel %vm12185_vm7, %v761_v46, %v1007_v51  ;;  %v11727_v40 = vld [vmem:[#allocation2 + $0x54] sm:$0xff] }
  0x93   : > { %v1535_v58 = vunpack.c.l.b16 %v1296_v0  ;;  %v766_v2 = vrot.slane %v764_v56, 7  ;;  %1009 = vst [vmem:[#allocation2 + $0x60] sm:$0xf] %v1008_v63  ;;  %v420_v5 = vsel %vm12120_vm13, 0, %v419_v54  ;;  %v1304_v13 = vor.u32 %v1303_v12, %v1300_v10  ;;  %v11734_v10 = vld [vmem:[#allocation2 + $0xa8] sm:$0xff] }
  0x94   : > { %10800 = vmatmul.msk.bf16.gmra.mxu3 %vm1594_vm3, %v11733_v7  ;;  %v1317_v4 = vshll.u32 %v1117_v43, 16  ;;  %421 = vst [vmem:[#allocation2 + $0x6c] sm:$0x1] %v420_v5  ;;  %v470_v14 = vsel %vm12129_vm14, 0, %v469_v1  ;;  %v773_v22 = vshrl.u32 %v618_v15, 16  ;;  %v1314_v28 = vor.u32 %v1313_v60, %v12487_v59 }
  0x95   : > { %v769_v16 = vor.u32 %v767_v57, %v766_v2  ;;  %v771_v19 = vrot.slane %v766_v2, 4  ;;  %471 = vst [vmem:[#allocation2 + $0x74] sm:$0x1] %v470_v14  ;;  %v1560_v26 = vpack.c.b16 %v1535_v58, %v1534_v49  ;;  %v776_v30 = vshll.u32 %v618_v15, 16  ;;  %v11767_v15 = vld [vmem:[%s15657_s2 + $0x78] sm:$0xff] }
  0x96   : > { %v781_v20 = vshrl.u32 %v619_v21, 16  ;;  %v775_v31 = vrot.slane %v773_v22, 7  ;;  %v784_v32 = vshll.u32 %v619_v21, 16  ;;  %v2076_v7 = vsel %vm12106_vm12, %v10810_v37, %v2075_v35  ;;  %2583 = vmatpush.bf16.msrb.mxu3 %v11767_v15 }
  0x97   : > { %v770_v61 = vsel %vm12192_vm8, %v762_v50, %v769_v16  ;;  %v1012_v29 = vsel %vm12120_vm13, %v771_v19, %v1011_v3  ;;  %v2079_v62 = vsel %vm12106_vm12, %v2077_v52, %v2078_v55  ;;  %v1305_v34 = vrot.slane %v1304_v13, 4 }
  0x98   : > { %1010 = vst.msk [vmem:[#allocation2 + $0x64] sm:$0xf] %vm382_vm0, %v770_v61  ;;  %v783_v38 = vrot.slane %v781_v20, 7  ;;  %v1319_v39 = vrot.slane %v1317_v4, 5  ;;  %v10815_v41 = vrot.slane %v1985_v36, 9  ;;  %v778_v43 = vor.u32 %v776_v30, %v775_v31 }
  0x99   : > { %10849 = vmatmul.msk.bf16.gmra.mxu2 %vm1594_vm3, %v2183_v47  ;;  %1013 = vst [vmem:[#allocation2 + $0x68] sm:$0x1] %v1012_v29  ;;  %v779_v44 = vrot.slane %v775_v31, 4  ;;  %v1315_v45 = vrot.slane %v1314_v28, 4  ;;  %v2114_v35 = vsel %vm12106_vm12, %v12477_v42, %v2113_v33  ;;  %v2159_v42 = vunpack.c.l.b16 %v2076_v7  ;;  %v472_v29 = vld [vmem:[#allocation2 + $0x80] sm:$0x1] }
  0x9a   : > { %v1086_v46 = vld [vmem:[#allocation2 + $0x60] sm:$0xf]  ;;  %v786_v0 = vor.u32 %v784_v32, %v783_v38  ;;  %v788_v49 = vrot.slane %v783_v38, 4  ;;  %v2111_v12 = vsel %vm12106_vm12, %v10815_v41, %v2110_v25  ;;  %v2170_v53 = vunpack.c.l.b16 %v2114_v35 }
  0x9b   : > { %v1322_v50 = vshrl.u32 %v1086_v46, 16  ;;  %v1325_v51 = vshll.u32 %v1086_v46, 16  ;;  %v1014_v52 = vld [vmem:[#allocation2 + $0x6c] sm:$0xf]  ;;  %v2160_v47 = vunpack.c.l.b16 %v2079_v62  ;;  %v2169_v55 = vunpack.c.l.b16 %v2111_v12  ;;  %v1981_v1 = vld [vmem:[#allocation2 + $0x60] sm:$0xe] }
  0x9c   : > { %v1893_v37 = vpop.f32.mrf.mxu1  ;;  %v787_v6 = vsel %vm12192_vm8, %v779_v44, %v786_v0  ;;  %v1015_v54 = vsel %vm12185_vm7, %v778_v43, %v1014_v52  ;;  %v1018_v33 = vld [vmem:[#allocation2 + $0x74] sm:$0x1]  ;;  %v1310_v25 = vsel %vm12159_vm15, %v1305_v34, %v12487_v59  ;;  %v1320_v56 = vsel %vm12159_vm15, %v1315_v45, %v1319_v39 }
  0x9d   : > { %1016 = vst [vmem:[#allocation2 + $0x6c] sm:$0xf] %v1015_v54  ;;  %v1019_v24 = vsel %vm12120_vm13, %v788_v49, %v1018_v33  ;;  %v1324_v58 = vrot.slane %v1322_v50, 4  ;;  %v1327_v60 = vrot.slane %v1325_v51, 5  ;;  %v12531_v3 = vpack.c.b16 %v2170_v53, %v2169_v55  ;;  %v620_v51 = vld [vmem:[%s12166_s27 + $0x48] sm:$0xf] }
  0x9e   : > { %10697 = vmatmul.msk.bf16.gmra.mxu0 %vm1594_vm3, %v1560_v26  ;;  %1017 = vst.msk [vmem:[#allocation2 + $0x70] sm:$0xf] %vm382_vm0, %v787_v6  ;;  %v2184_v16 = vpack.c.b16 %v2160_v47, %v2159_v42  ;;  %v1536_v19 = vunpack.c.l.b16 %v1310_v25  ;;  %v1537_v21 = vunpack.c.l.b16 %v1320_v56  ;;  %v422_v26 = vld [vmem:[#allocation2 + $0x78] sm:$0x1]  ;;  %v10811_v28 = vrot.slane %v1981_v1, 9 }
  0x9f   : > { %v1087_v63 = vld [vmem:[#allocation2 + $0x64] sm:$0xf]  ;;  %1020 = vst [vmem:[#allocation2 + $0x74] sm:$0x1] %v1019_v24  ;;  %v1328_v30 = vor.u32 %v1327_v60, %v1324_v58  ;;  %v423_v7 = vsel %vm12120_vm13, 0, %v422_v26  ;;  %v473_v62 = vsel %vm12129_vm14, 0, %v472_v29 }
  0xa0   : > { %v1118_v5 = vld [vmem:[#allocation2 + $0x68] sm:$0x1]  ;;  %v2082_v13 = vrot.slane %v1087_v63, 5  ;;  %v1331_v59 = vshll.u32 %v1087_v63, 16  ;;  %v1335_v14 = vshrl.u32 %v1087_v63, 16  ;;  %v1561_v39 = vpack.c.b16 %v1537_v21, %v1536_v19  ;;  %v11728_v35 = vld [vmem:[#allocation2 + $0x60] sm:$0xff] }
  0xa1   : > { %10794 = vmatmul.msk.bf16.gmra.mxu1 %vm1594_vm3, %v11727_v40  ;;  %v2085_v32 = vrot.slane %v1118_v5, 5  ;;  %424 = vst [vmem:[#allocation2 + $0x78] sm:$0x1] %v423_v7  ;;  %v1341_v36 = vshll.u32 %v1118_v5, 16  ;;  %v1329_v40 = vrot.slane %v1328_v30, 4  ;;  %v11735_v52 = vld [vmem:[#allocation2 + $0xb4] sm:$0xff] }
  0xa2   : > { %v1652_v57 = vpop.f32.mrf.mxu0  ;;  %v1333_v20 = vrot.slane %v1331_v59, 5  ;;  %v1337_v61 = vrot.slane %v1335_v14, 4  ;;  %v2084_v31 = vrot.slane %v2082_v13, 4  ;;  %474 = vst [vmem:[#allocation2 + $0x80] sm:$0x1] %v473_v62  ;;  %v2083_v41 = vsel %vm12106_vm12, %v10811_v28, %v2082_v13  ;;  %v11775_v19 = vld [vmem:[%s15657_s2 + $0xb8] sm:$0xff] }
  0xa3   : > { %v1894_v2 = vadd.f32 %v1893_v37, %v1652_v57  ;;  %v2274_v4 = vpop.f32.mrf.mxu2  ;;  %v1343_v46 = vrot.slane %v1341_v36, 5  ;;  %v2161_v49 = vunpack.c.l.b16 %v2083_v41  ;;  %v621_v33 = vld [vmem:[%s12166_s27 + $0x4c] sm:$0xf]  ;;  %v790_v24 = vshrl.u32 %v620_v51, 16  ;;  %v11768_v21 = vld [vmem:[%s15657_s2 + $0x80] sm:$0xff]  ;;  %3691 = vmatpush.bf16.msrb.mxu1 %v11775_v19 }
  0xa4   : > { %10801 = vmatmul.msk.bf16.gmra.mxu3 %vm1594_vm3, %v11734_v10  ;;  %v1338_v34 = vor.u32 %v1337_v61, %v1333_v20  ;;  %v12544_v38 = vpop.f32.mrf.mxu1  ;;  %v2086_v43 = vsel %vm12106_vm12, %v2084_v31, %v2085_v32  ;;  %v1088_v44 = vld [vmem:[#allocation2 + $0x6c] sm:$0xf]  ;;  %v1334_v50 = vsel %vm12159_vm15, %v1329_v40, %v1333_v20  ;;  %v793_v58 = vshll.u32 %v620_v51, 16  ;;  %v425_v31 = vld [vmem:[#allocation2 + $0x84] sm:$0x1]  ;;  %3268 = vmatpush.bf16.msrb.mxu0 %v11768_v21 }
  0xa5   : > { %v12537_v22 = vadd.f32 %v2274_v4, %v1894_v2  ;;  %v12550_v0 = vld [vmem:[#allocation2 + $0x70] sm:$0xf]  ;;  %v2162_v37 = vunpack.c.l.b16 %v2086_v43  ;;  %v12556_v10 = vld [vmem:[#allocation2 + $0x6c] sm:$0xe]  ;;  %v1346_v12 = vshrl.u32 %v1088_v44, 16  ;;  %v1349_v54 = vshll.u32 %v1088_v44, 16 }
  0xa6   : > { %v1339_v45 = vrot.slane %v1338_v34, 4  ;;  %v12558_v53 = vld [vmem:[#allocation2 + $0x74] sm:$0x1]  ;;  %v2089_v6 = vrot.slane %v12550_v0, 5  ;;  %v12564_v47 = vunpack.c.l.b16 %v1334_v50  ;;  %v1355_v55 = vshll.u32 %v12550_v0, 16 }
  0xa7   : > { %v2185_v25 = vpack.c.b16 %v2162_v37, %v2161_v49  ;;  %v10812_v56 = vrot.slane %v12556_v10, 9  ;;  %v1359_v57 = vshrl.u32 %v12550_v0, 16  ;;  %v2092_v63 = vrot.slane %v12558_v53, 5  ;;  %v475_v34 = vld [vmem:[#allocation2 + $0x8c] sm:$0x1] }
  0xa8   : > { %v1344_v42 = vsel %vm12159_vm15, %v1339_v45, %v1343_v46  ;;  %v1348_v2 = vrot.slane %v1346_v12, 4  ;;  %v792_v5 = vrot.slane %v790_v24, 7  ;;  %v798_v13 = vshrl.u32 %v621_v33, 16  ;;  %v1021_v4 = vld [vmem:[#allocation2 + $0x78] sm:$0xf]  ;;  %v11729_v24 = vld [vmem:[#allocation2 + $0x6c] sm:$0xff] }
  0xa9   : > { %10850 = vmatmul.msk.bf16.gmra.mxu2 %vm1594_vm3, %v2184_v16  ;;  %v1539_v59 = vunpack.c.l.b16 %v1344_v42  ;;  %v2091_v14 = vrot.slane %v2089_v6, 4  ;;  %v1351_v15 = vrot.slane %v1349_v54, 5  ;;  %v11766_v16 = vld [vmem:[%s15657_s2 + $0x70] sm:$0xff]  ;;  %v801_v26 = vshll.u32 %v621_v33, 16  ;;  %v1025_v7 = vld [vmem:[#allocation2 + $0x80] sm:$0x1] }
  0xaa   : > { %v12587_v28 = vpop.f32.mrf.mxu0  ;;  %v12589_v30 = vrot.slane %v1355_v55, 5  ;;  %v795_v20 = vor.u32 %v793_v58, %v792_v5  ;;  %v796_v61 = vrot.slane %v792_v5, 4  ;;  %v800_v29 = vrot.slane %v798_v13, 7  ;;  %2584 = vmatpush.bf16.msrb.mxu3 %v11766_v16  ;;  %v622_v43 = vld [vmem:[%s12166_s27 + $0x50] sm:$0xf] }
  0xab   : > { %v12570_v60 = vpop.f32.mrf.mxu2  ;;  %v1361_v32 = vrot.slane %v1359_v57, 4  ;;  %v426_v62 = vsel %vm12120_vm13, 0, %v425_v31  ;;  %v1365_v36 = vshll.u32 %v12558_v53, 16  ;;  %v1352_v44 = vor.u32 %v1351_v15, %v1348_v2  ;;  %v623_v46 = vld [vmem:[%s12166_s27 + $0x54] sm:$0xf] }
  0xac   : > { %v805_v40 = vrot.slane %v800_v29, 4  ;;  %v1022_v41 = vsel %vm12185_vm7, %v795_v20, %v1021_v4  ;;  %427 = vst [vmem:[#allocation2 + $0x84] sm:$0x1] %v426_v62  ;;  %v476_v45 = vsel %vm12129_vm14, 0, %v475_v34  ;;  %v1562_v49 = vpack.c.b16 %v1539_v59, %v12564_v47  ;;  %v1986_v16 = vld [vmem:[#allocation2 + $0x9c] sm:$0xe] }
  0xad   : > { %1023 = vst [vmem:[#allocation2 + $0x78] sm:$0xf] %v1022_v41  ;;  %v815_v51 = vshrl.u32 %v623_v46, 16  ;;  %v810_v12 = vshll.u32 %v622_v43, 16  ;;  %v818_v53 = vshll.u32 %v623_v46, 16  ;;  %v2090_v47 = vsel %vm12106_vm12, %v10812_v56, %v2089_v6 }
  0xae   : > { %10698 = vmatmul.msk.bf16.gmra.mxu0 %vm1594_vm3, %v1561_v39  ;;  %v803_v39 = vor.u32 %v801_v26, %v800_v29  ;;  %v1026_v50 = vsel %vm12120_vm13, %v805_v40, %v1025_v7  ;;  %477 = vst [vmem:[#allocation2 + $0x8c] sm:$0x1] %v476_v45  ;;  %v2093_v2 = vsel %vm12106_vm12, %v2091_v14, %v2092_v63  ;;  %v1353_v5 = vrot.slane %v1352_v44, 4  ;;  %v11893_v63 = vld [vmem:[#allocation2 + $0xa0] sm:$0xf] }
  0xaf   : > { %1027 = vst [vmem:[#allocation2 + $0x80] sm:$0x1] %v1026_v50  ;;  %v817_v54 = vrot.slane %v815_v51, 7  ;;  %v1367_v4 = vrot.slane %v1365_v36, 5  ;;  %v2163_v21 = vunpack.c.l.b16 %v2090_v47  ;;  %v2164_v26 = vunpack.c.l.b16 %v2093_v2  ;;  %v11894_v40 = vld [vmem:[#allocation2 + $0xa4] sm:$0x1] }
  0xb0   : > { %v12573_v1 = vpop.f32.mrf.mxu1  ;;  %v804_v37 = vsel %vm12192_vm8, %v796_v61, %v803_v39  ;;  %v2117_v14 = vrot.slane %v11893_v63, 5  ;;  %v1358_v29 = vsel %vm12159_vm15, %v1353_v5, %v12589_v30  ;;  %v10816_v39 = vrot.slane %v1986_v16, 9 }
  0xb1   : > { %10795 = vmatmul.msk.bf16.gmra.mxu1 %vm1594_vm3, %v11728_v35  ;;  %v807_v35 = vshrl.u32 %v622_v43, 16  ;;  %1024 = vst.msk [vmem:[#allocation2 + $0x7c] sm:$0xf] %vm382_vm0, %v804_v37  ;;  %v820_v57 = vor.u32 %v818_v53, %v817_v54  ;;  %v822_v31 = vrot.slane %v817_v54, 4  ;;  %v2120_v41 = vrot.slane %v11894_v40, 5  ;;  %v11765_v43 = vld [vmem:[%s15657_s2 + $0x68] sm:$0xff] }
  0xb2   : > { %v1540_v44 = vunpack.c.l.b16 %v1358_v29  ;;  %v2119_v46 = vrot.slane %v2117_v14, 4  ;;  %2585 = vmatpush.bf16.msrb.mxu3 %v11765_v43 }
  0xb3   : > { %v809_v10 = vrot.slane %v807_v35, 7  ;;  %v1028_v59 = vld [vmem:[#allocation2 + $0x84] sm:$0xf] }
  0xb4   : > { %10802 = vmatmul.msk.bf16.gmra.mxu3 %vm1594_vm3, %v11735_v52  ;;  %v1362_v52 = vor.u32 %v1361_v32, %v12589_v30  ;;  %v1090_v19 = vld [vmem:[#allocation2 + $0x78] sm:$0xf]  ;;  %v2186_v30 = vpack.c.b16 %v2164_v26, %v2163_v21 }
  0xb5   : > { %v812_v33 = vor.u32 %v810_v12, %v809_v10  ;;  %v813_v42 = vrot.slane %v809_v10, 4  ;;  %v1370_v32 = vshrl.u32 %v1090_v19, 16  ;;  %v1373_v7 = vshll.u32 %v1090_v19, 16  ;;  %v1032_v36 = vld [vmem:[#allocation2 + $0x8c] sm:$0x1] }
  0xb6   : > { %v1363_v13 = vrot.slane %v1362_v52, 4  ;;  %v1120_v37 = vld [vmem:[#allocation2 + $0x80] sm:$0x1]  ;;  %v1983_v50 = vld [vmem:[#allocation2 + $0x78] sm:$0xe] }
  0xb7   : > { %v821_v0 = vsel %vm12192_vm8, %v813_v42, %v820_v57  ;;  %v1029_v6 = vsel %vm12185_vm7, %v812_v33, %v1028_v59  ;;  %v1372_v12 = vrot.slane %v1370_v32, 4  ;;  %v1375_v53 = vrot.slane %v1373_v7, 5 }
  0xb8   : > { %1030 = vst [vmem:[#allocation2 + $0x84] sm:$0xf] %v1029_v6  ;;  %v1091_v20 = vld [vmem:[#allocation2 + $0x7c] sm:$0xf]  ;;  %v10813_v2 = vrot.slane %v1983_v50, 9 }
  0xb9   : > { %10851 = vmatmul.msk.bf16.gmra.mxu2 %vm1594_vm3, %v2185_v25  ;;  %v1900_v25 = vpop.f32.mrf.mxu1  ;;  %1031 = vst.msk [vmem:[#allocation2 + $0x88] sm:$0xf] %vm382_vm0, %v821_v0  ;;  %v1379_v62 = vshll.u32 %v1091_v20, 16  ;;  %v1383_v34 = vshrl.u32 %v1091_v20, 16  ;;  %v2096_v51 = vrot.slane %v1091_v20, 5 }
  0xbb   : > { %v1381_v54 = vrot.slane %v1379_v62, 5  ;;  %v1385_v33 = vrot.slane %v1383_v34, 4  ;;  %v2098_v5 = vrot.slane %v2096_v51, 4  ;;  %v2097_v16 = vsel %vm12106_vm12, %v10813_v2, %v2096_v51 }
  0xbd   : > { %v2279_v55 = vpop.f32.mrf.mxu2  ;;  %v1386_v59 = vor.u32 %v1385_v33, %v1381_v54 }
  0xbe   : > { %10699 = vmatmul.msk.bf16.gmra.mxu0 %vm1594_vm3, %v1562_v49  ;;  %v12613_v58 = vpop.f32.mrf.mxu3 }
  0xbf   : > { %v1657_v15 = vpop.f32.mrf.mxu0  ;;  %v1387_v63 = vrot.slane %v1386_v59, 4 }
  0xc0   : > { %v1899_v56 = vadd.f32 %v12573_v1, %v1657_v15  ;;  %v1368_v1 = vsel %vm12159_vm15, %v1363_v13, %v1367_v4  ;;  %v2099_v13 = vrot.slane %v1120_v37, 5  ;;  %v1376_v4 = vor.u32 %v1375_v53, %v1372_v12  ;;  %v1093_v21 = vld [vmem:[#allocation2 + $0x88] sm:$0xf] }
  0xc1   : > { %10796 = vmatmul.msk.bf16.gmra.mxu1 %vm1594_vm3, %v11729_v24  ;;  %v1541_v45 = vunpack.c.l.b16 %v1368_v1  ;;  %v2121_v24 = vsel %vm12106_vm12, %v2119_v46, %v2120_v41  ;;  %v1389_v15 = vshll.u32 %v1120_v37, 16  ;;  %v1987_v1 = vld [vmem:[#allocation2 + $0xa8] sm:$0xe]  ;;  %v1403_v40 = vshll.u32 %v1093_v21, 16 }
  0xc2   : > { %v12624_v61 = vadd.f32 %v2279_v55, %v1899_v56  ;;  %v2118_v55 = vsel %vm12106_vm12, %v10816_v39, %v2117_v14  ;;  %v2172_v6 = vunpack.c.l.b16 %v2121_v24  ;;  %v1092_v56 = vld [vmem:[#allocation2 + $0x84] sm:$0xf]  ;;  %v2100_v19 = vsel %vm12106_vm12, %v2098_v5, %v2099_v13  ;;  %v11795_v13 = vld [vmem:[%s15657_s2 + $0xd8] sm:$0xff] }
  0xc3   : > { %v1563_v47 = vpack.c.b16 %v1541_v45, %v1540_v44  ;;  %v2171_v0 = vunpack.c.l.b16 %v2118_v55  ;;  %v1377_v26 = vrot.slane %v1376_v4, 4  ;;  %v1391_v14 = vrot.slane %v1389_v15, 5  ;;  %v1984_v55 = vld [vmem:[#allocation2 + $0x84] sm:$0xe]  ;;  %4006 = vmatpush.bf16.msrb.mxu2 %v11795_v13  ;;  %v11898_v13 = vld [vmem:[#allocation2 + $0xbc] sm:$0x1] }
  0xc4   : > { %10855 = vmatmul.msk.bf16.vlgmr.msra.gmra.mxu3 %vm1594_vm3, %v12531_v3  ;;  %v1033_v3 = vsel %vm12120_vm13, %v822_v31, %v1032_v36  ;;  %v11895_v31 = vld [vmem:[#allocation2 + $0xac] sm:$0xf]  ;;  %v1394_v62 = vshrl.u32 %v1092_v56, 16  ;;  %v1397_v34 = vshll.u32 %v1092_v56, 16  ;;  %v2165_v36 = vunpack.c.l.b16 %v2097_v16 }
  0xc5   : > { %v2281_v49 = vpop.f32.mrf.mxu2  ;;  %1034 = vst [vmem:[#allocation2 + $0x8c] sm:$0x1] %v1033_v3  ;;  %v2190_v20 = vpack.c.b16 %v2172_v6, %v2171_v0  ;;  %v2124_v32 = vrot.slane %v11895_v31, 5  ;;  %v2166_v39 = vunpack.c.l.b16 %v2100_v19  ;;  %v1407_v41 = vshrl.u32 %v1093_v21, 16  ;;  %v11764_v3 = vld [vmem:[%s15657_s2 + $0x60] sm:$0xff] }
  0xc6   : > { %v12636_v35 = vpop.f32.mrf.mxu3  ;;  %v1382_v43 = vsel %vm12159_vm15, %v1377_v26, %v1381_v54  ;;  %v10817_v44 = vrot.slane %v1987_v1, 9  ;;  %v1396_v50 = vrot.slane %v1394_v62, 4  ;;  %v1399_v51 = vrot.slane %v1397_v34, 5  ;;  %2586 = vmatpush.bf16.msrb.mxu3 %v11764_v3 }
  0xc7   : > { %v1659_v52 = vpop.f32.mrf.mxu0  ;;  %v1903_v10 = vpop.f32.mrf.mxu1  ;;  %v2126_v46 = vrot.slane %v2124_v32, 4  ;;  %v1405_v54 = vrot.slane %v1403_v40, 5  ;;  %v1409_v33 = vrot.slane %v1407_v41, 4  ;;  %v2103_v24 = vrot.slane %v1093_v21, 5  ;;  %v2700_v41 = vld [vmem:[#allocation2 + $0xc] sm:$0xf] }
  0xc8   : > { %v1901_v42 = vadd.f32 %v1900_v25, %v1659_v52  ;;  %v11730_v25 = vld [vmem:[#allocation2 + $0x78] sm:$0xff]  ;;  %v2187_v52 = vpack.c.b16 %v2166_v39, %v2165_v36  ;;  %v2125_v4 = vsel %vm12106_vm12, %v10817_v44, %v2124_v32  ;;  %v1400_v59 = vor.u32 %v1399_v51, %v1396_v50  ;;  %v11731_v36 = vld [vmem:[#allocation2 + $0x84] sm:$0xff]  ;;  %v11794_v39 = vld [vmem:[%s15657_s2 + $0xd0] sm:$0xff] }
  0xc9   : > { %10852 = vmatmul.msk.bf16.gmra.mxu2 %vm1594_vm3, %v2186_v30  ;;  %v1392_v30 = vsel %vm12159_vm15, %v1387_v63, %v1391_v14  ;;  %v10814_v0 = vrot.slane %v1984_v55, 9  ;;  %v1410_v6 = vor.u32 %v1409_v33, %v1405_v54  ;;  %v2105_v16 = vrot.slane %v2103_v24, 4  ;;  %v2701_v44 = vld [vmem:[#allocation2 + $0x10] sm:$0xf]  ;;  %v11897_v50 = vld [vmem:[#allocation2 + $0xb8] sm:$0xf] }
  0xca   : > { %v12645_v57 = vadd.f32 %v2281_v49, %v1901_v42  ;;  %v11896_v49 = vld [vmem:[#allocation2 + $0xb0] sm:$0x1]  ;;  %v1542_v42 = vunpack.c.l.b16 %v1382_v43  ;;  %v2173_v26 = vunpack.c.l.b16 %v2125_v4  ;;  %4007 = vmatpush.bf16.msrb.mxu2 %v11794_v39  ;;  %v2131_v51 = vrot.slane %v11897_v50, 5 }
  0xcb   : > { %v2127_v37 = vrot.slane %v11896_v49, 5  ;;  %v2104_v32 = vsel %vm12106_vm12, %v10814_v0, %v2103_v24  ;;  %v1411_v62 = vrot.slane %v1410_v6, 4  ;;  %v2758_v33 = vshll.u32 %v2701_v44, 16 }
  0xcc   : > { %v1121_v5 = vld [vmem:[#allocation2 + $0x8c] sm:$0x1]  ;;  %v2134_v4 = vrot.slane %v11898_v13, 5 }
  0xcd   : > { %v2128_v15 = vsel %vm12106_vm12, %v2126_v46, %v2127_v37  ;;  %v2106_v19 = vrot.slane %v1121_v5, 5  ;;  %v2167_v46 = vunpack.c.l.b16 %v2104_v32  ;;  %v1988_v37 = vld [vmem:[#allocation2 + $0xb4] sm:$0xe] }
  0xce   : > { %10700 = vmatmul.msk.bf16.gmra.mxu0 %vm1594_vm3, %v1563_v47  ;;  %v1543_v47 = vunpack.c.l.b16 %v1392_v30  ;;  %v2174_v63 = vunpack.c.l.b16 %v2128_v15  ;;  %v11793_v30 = vld [vmem:[%s15657_s2 + $0xc8] sm:$0xff]  ;;  %v10818_v55 = vrot.slane %v1988_v37, 9  ;;  %v11799_v15 = vld [vmem:[%s15657_s2 + $0xf8] sm:$0xff] }
  0xcf   : > { %v1905_v7 = vpop.f32.mrf.mxu1  ;;  %v2107_v40 = vsel %vm12106_vm12, %v2105_v16, %v2106_v19  ;;  %4008 = vmatpush.bf16.msrb.mxu2 %v11793_v30  ;;  %v11792_v16 = vld [vmem:[%s15657_s2 + $0xc0] sm:$0xff]  ;;  %v3448_v19 = vrot.slane %v2701_v44, 5  ;;  %4688 = vmatpush.bf16.msra.mxu3 %v11799_v15  ;;  %v2704_v15 = vld [vmem:[#allocation2 + $0x1c] sm:$0xf] }
  0xd0   : > { %v12652_v29 = vpop.f32.mrf.mxu3  ;;  %v1564_v56 = vpack.c.b16 %v1543_v47, %v1542_v42  ;;  %v2168_v3 = vunpack.c.l.b16 %v2107_v40  ;;  %v2762_v42 = vshrl.u32 %v2701_v44, 16  ;;  %v2132_v40 = vsel %vm12106_vm12, %v10818_v55, %v2131_v51 }
  0xd1   : > { %10797 = vmatmul.msk.bf16.gmra.mxu1 %vm1594_vm3, %v11730_v25  ;;  %v1413_v25 = vshll.u32 %v1121_v5, 16  ;;  %v2133_v5 = vrot.slane %v2131_v51, 4 }
  0xd2   : > { %v2188_v0 = vpack.c.b16 %v2168_v3, %v2167_v46  ;;  %v2175_v3 = vunpack.c.l.b16 %v2132_v40  ;;  %v3383_v40 = vld [vmem:[#allocation2 + $0x18] sm:$0xe] }
  0xd3   : > { %v1415_v34 = vrot.slane %v1413_v25, 5  ;;  %4009 = vmatpush.bf16.msrb.mxu2 %v11792_v16 }
  0xd4   : > { %10856 = vmatmul.msk.bf16.gmra.mxu3 %vm1594_vm3, %v2190_v20  ;;  %v1662_v45 = vpop.f32.mrf.mxu0  ;;  %v1401_v20 = vrot.slane %v1400_v59, 4 }
  0xd5   : > { %v1904_v12 = vadd.f32 %v1903_v10, %v1662_v45  ;;  %v2284_v53 = vpop.f32.mrf.mxu2  ;;  %v2191_v45 = vpack.c.b16 %v2174_v63, %v2173_v26  ;;  %v2702_v63 = vld [vmem:[#allocation2 + $0x14] sm:$0x1] }
  0xd6   : > { %v1406_v49 = vsel %vm12159_vm15, %v1401_v20, %v1405_v54  ;;  %v2764_v20 = vrot.slane %v2762_v42, 4  ;;  %v2768_v37 = vshll.u32 %v2702_v63, 16 }
  0xd7   : > { %v12663_v2 = vadd.f32 %v2284_v53, %v1904_v12  ;;  %v2749_v12 = vshrl.u32 %v2700_v41, 16  ;;  %v2752_v53 = vshll.u32 %v2700_v41, 16  ;;  %v1544_v54 = vunpack.c.l.b16 %v1406_v49 }
  0xd8   : > { %v12670_v10 = vpop.f32.mrf.mxu3  ;;  %v2135_v41 = vsel %vm12106_vm12, %v2133_v5, %v2134_v4  ;;  %v2703_v5 = vld [vmem:[#allocation2 + $0x18] sm:$0xf] }
  0xd9   : > { %10853 = vmatmul.msk.bf16.gmra.mxu2 %vm1594_vm3, %v2187_v52  ;;  %v1908_v21 = vpop.f32.mrf.mxu1  ;;  %v1416_v52 = vsel %vm12159_vm15, %v1411_v62, %v1415_v34  ;;  %v2751_v6 = vrot.slane %v2749_v12, 4  ;;  %v2754_v25 = vrot.slane %v2752_v53, 5  ;;  %v3450_v34 = vrot.slane %v3448_v19, 4 }
  0xda   : > { %v1545_v24 = vunpack.c.l.b16 %v1416_v52  ;;  %v2176_v52 = vunpack.c.l.b16 %v2135_v41  ;;  %v2776_v16 = vshll.u32 %v2703_v5, 16 }
  0xdb   : > { %v2755_v44 = vor.u32 %v2754_v25, %v2751_v6 }
  0xdc   : > { %v1664_v14 = vpop.f32.mrf.mxu0  ;;  %v1565_v39 = vpack.c.b16 %v1545_v24, %v1544_v54  ;;  %v2770_v24 = vrot.slane %v2768_v37, 5 }
  0xdd   : > { %v1906_v1 = vadd.f32 %v1905_v7, %v1664_v14  ;;  %v2286_v31 = vpop.f32.mrf.mxu2  ;;  %v11774_v7 = vld [vmem:[%s15657_s2 + $0xb0] sm:$0xff]  ;;  %v2760_v14 = vrot.slane %v2758_v33, 5  ;;  %v2756_v53 = vrot.slane %v2755_v44, 4 }
  0xde   : > { %10701 = vmatmul.msk.bf16.gmra.mxu0 %vm1594_vm3, %v1564_v56  ;;  %3692 = vmatpush.bf16.msrb.mxu1 %v11774_v7  ;;  %v11773_v56 = vld [vmem:[%s15657_s2 + $0xa8] sm:$0xff]  ;;  %v11772_v7 = vld [vmem:[%s15657_s2 + $0xa0] sm:$0xff] }
  0xdf   : > { %v12683_v43 = vadd.f32 %v2286_v31, %v1906_v1  ;;  %v3382_v1 = vld [vmem:[#allocation2 + $0xc] sm:$0xe]  ;;  %v2765_v49 = vor.u32 %v2764_v20, %v2760_v14  ;;  %v2761_v25 = vsel %vm12159_vm15, %v2756_v53, %v2760_v14 }
  0xe0   : > { %v11003_v62 = vrot.slane %v3382_v1, 9  ;;  %v11776_v1 = vld [vmem:[#allocation2 + $0x18] sm:$0xff] }
  0xe1   : > { %10798 = vmatmul.msk.bf16.gmra.mxu1 %vm1594_vm3, %v11731_v36  ;;  %v1910_v59 = vpop.f32.mrf.mxu1  ;;  %v3451_v36 = vrot.slane %v2702_v63, 5  ;;  %v2766_v54 = vrot.slane %v2765_v49, 4  ;;  %v2786_v63 = vshrl.u32 %v2704_v15, 16 }
  0xe2   : > { %v12696_v47 = vpop.f32.mrf.mxu3  ;;  %3693 = vmatpush.bf16.msrb.mxu1 %v11773_v56  ;;  %v2773_v56 = vshrl.u32 %v2703_v5, 16 }
  0xe3   : > { %v3452_v46 = vsel %vm12106_vm12, %v3450_v34, %v3451_v36  ;;  %v2705_v36 = vld [vmem:[#allocation2 + $0x20] sm:$0x1] }
  0xe4   : > { %10857 = vmatmul.msk.bf16.gmra.mxu3 %vm1594_vm3, %v2191_v45  ;;  %v3449_v45 = vsel %vm12106_vm12, %v11003_v62, %v3448_v19  ;;  %v3568_v51 = vunpack.c.l.b16 %v3452_v46  ;;  %v2771_v19 = vsel %vm12159_vm15, %v2766_v54, %v2770_v24  ;;  %v3455_v62 = vrot.slane %v2704_v15, 5 }
  0xe5   : > { %v3567_v50 = vunpack.c.l.b16 %v3449_v45  ;;  %v3142_v20 = vunpack.c.l.b16 %v2771_v19  ;;  %v3458_v44 = vrot.slane %v2705_v36, 5 }
  0xe6   : > { %v1667_v26 = vpop.f32.mrf.mxu0  ;;  %3694 = vmatpush.bf16.msrb.mxu1 %v11772_v7  ;;  %v11004_v7 = vrot.slane %v3383_v40, 9 }
  0xe7   : > { %v1909_v31 = vadd.f32 %v1908_v21, %v1667_v26  ;;  %v2289_v32 = vpop.f32.mrf.mxu2  ;;  %v11803_v21 = vld [vmem:[%s15657_s2 + $0x118] sm:$0xff]  ;;  %v3599_v33 = vpack.c.b16 %v3568_v51, %v3567_v50  ;;  %v2782_v26 = vshll.u32 %v2704_v15, 16  ;;  %v2792_v51 = vshll.u32 %v2705_v36, 16 }
  0xe8   : > { %5114 = vmatpush.bf16.msra.mxu0 %v11803_v21  ;;  %v3457_v21 = vrot.slane %v3455_v62, 4  ;;  %v3456_v49 = vsel %vm12106_vm12, %v11004_v7, %v3455_v62 }
  0xe9   : > { %10854 = vmatmul.msk.bf16.gmra.mxu2 %vm1594_vm3, %v2188_v0  ;;  %v12719_v30 = vadd.f32 %v2289_v32, %v1909_v31  ;;  %v2192_v0 = vpack.c.b16 %v2176_v52, %v2175_v3  ;;  %v2775_v31 = vrot.slane %v2773_v56, 4  ;;  %v2778_v32 = vrot.slane %v2776_v16, 5  ;;  %v2707_v56 = vld [vmem:[#allocation2 + $0x28] sm:$0xf]  ;;  %v11748_v16 = vld [vmem:[#allocation2 + $0xc] sm:$0xff] }
  0xea   : > { %v12725_v12 = vpop.f32.mrf.mxu3  ;;  %v2784_v14 = vrot.slane %v2782_v26, 5  ;;  %v3459_v37 = vsel %vm12106_vm12, %v3457_v21, %v3458_v44  ;;  %v3569_v3 = vunpack.c.l.b16 %v3456_v49  ;;  %v2794_v15 = vrot.slane %v2792_v51, 5 }
  0xeb   : > { %v2779_v46 = vor.u32 %v2778_v32, %v2775_v31  ;;  %v3570_v52 = vunpack.c.l.b16 %v3459_v37  ;;  %v3384_v37 = vld [vmem:[#allocation2 + $0x24] sm:$0xe] }
  0xec   : > { %v11005_v51 = vrot.slane %v3384_v37, 9 }
  0xed   : > { %v2780_v54 = vrot.slane %v2779_v46, 4  ;;  %v3600_v24 = vpack.c.b16 %v3570_v52, %v3569_v3 }
  0xee   : > { %10702 = vmatmul.msk.bf16.gmra.mxu0 %vm1594_vm3, %v1565_v39  ;;  %v1669_v42 = vpop.f32.mrf.mxu0  ;;  %v1913_v55 = vpop.f32.mrf.mxu1  ;;  %v2788_v39 = vrot.slane %v2786_v63, 4 }
  0xef   : > { %v1911_v13 = vadd.f32 %v1910_v59, %v1669_v42  ;;  %v2291_v4 = vpop.f32.mrf.mxu2  ;;  %v3141_v59 = vunpack.c.l.b16 %v2761_v25  ;;  %v2785_v19 = vsel %vm12159_vm15, %v2780_v54, %v2784_v14 }
  0xf0   : > { %v2789_v50 = vor.u32 %v2788_v39, %v2784_v14  ;;  %v3143_v62 = vunpack.c.l.b16 %v2785_v19  ;;  %v11777_v39 = vld [vmem:[#allocation2 + $0x24] sm:$0xff]  ;;  %v3462_v14 = vrot.slane %v2707_v56, 5 }
  0xf1   : > { %v12728_v6 = vadd.f32 %v2291_v4, %v1911_v13  ;;  %11043 = vmatmul.msk.bf16.vlgmr.msrb.gmra.mxu1 %vm1594_vm3, %v3599_v33  ;;  %v3173_v45 = vpack.c.b16 %v3142_v20, %v3141_v59  ;;  %v2806_v59 = vshll.u32 %v2707_v56, 16  ;;  %v2810_v20 = vshrl.u32 %v2707_v56, 16 }
  0xf2   : > { %v2790_v4 = vrot.slane %v2789_v50, 4  ;;  %v3464_v3 = vrot.slane %v3462_v14, 4 }
  0xf3   : > { %v2808_v46 = vrot.slane %v2806_v59, 5  ;;  %v2812_v49 = vrot.slane %v2810_v20, 4 }
  0xf4   : > { %10858 = vmatmul.msk.bf16.gmra.mxu3 %vm1594_vm3, %v2192_v0  ;;  %v2706_v0 = vld [vmem:[#allocation2 + $0x24] sm:$0xf]  ;;  %v2795_v63 = vsel %vm12159_vm15, %v2790_v4, %v2794_v15 }
  0xf5   : > { %v2800_v26 = vshll.u32 %v2706_v0, 16  ;;  %v3144_v36 = vunpack.c.l.b16 %v2795_v63  ;;  %v2813_v54 = vor.u32 %v2812_v49, %v2808_v46 }
  0xf6   : > { %v1915_v34 = vpop.f32.mrf.mxu1 }
  0xf7   : > { %v12736_v41 = vpop.f32.mrf.mxu3  ;;  %v2802_v7 = vrot.slane %v2800_v26, 5  ;;  %v2814_v59 = vrot.slane %v2813_v54, 4  ;;  %v2711_v54 = vld [vmem:[#allocation2 + $0x38] sm:$0x1] }
  0xf9   : > { %11147 = vmatmul.msk.bf16.vlgmr.msrb.gmra.mxu2 %vm1594_vm3, %v11776_v1 }
  0xfb   : > { %v1672_v53 = vpop.f32.mrf.mxu0 }
  0xfc   : > { %v1914_v33 = vadd.f32 %v1913_v55, %v1672_v53  ;;  %v2294_v42 = vpop.f32.mrf.mxu2  ;;  %v2797_v55 = vshrl.u32 %v2706_v0, 16 }
  0xfe   : > { %v12743_v5 = vadd.f32 %v2294_v42, %v1914_v33  ;;  %10987 = vmatmul.msk.bf16.vlgmr.msrb.gmra.mxu0 %vm1594_vm3, %v3173_v45  ;;  %v1918_v13 = vpop.f32.mrf.mxu1  ;;  %v2799_v40 = vrot.slane %v2797_v55, 4  ;;  %v2708_v45 = vld [vmem:[#allocation2 + $0x2c] sm:$0x1]  ;;  %v3463_v33 = vsel %vm12106_vm12, %v11005_v51, %v3462_v14 }
  0xff   : > { %v12746_v25 = vpop.f32.mrf.mxu3  ;;  %v3465_v52 = vrot.slane %v2708_v45, 5  ;;  %v3571_v4 = vunpack.c.l.b16 %v3463_v33 }
 0x100   : > { %v2803_v53 = vor.u32 %v2802_v7, %v2799_v40 }
 0x101   : > { %11044 = vmatmul.msk.bf16.gmra.mxu1 %vm1594_vm3, %v3600_v24  ;;  %v3466_v42 = vsel %vm12106_vm12, %v3464_v3, %v3465_v52  ;;  %v2816_v24 = vshll.u32 %v2708_v45, 16  ;;  %v11778_v52 = vld [vmem:[#allocation2 + $0x30] sm:$0xff] }
 0x102   : > { %v3572_v15 = vunpack.c.l.b16 %v3466_v42  ;;  %v2804_v19 = vrot.slane %v2803_v53, 4 }
 0x103   : > { %v1674_v1 = vpop.f32.mrf.mxu0  ;;  %v2818_v20 = vrot.slane %v2816_v24, 5 }
 0x104   : > { %10947 = vmatmul.msk.bf16.vlgmr.msrb.gmra.mxu3 %vm1594_vm3, %v11748_v16  ;;  %v1916_v31 = vadd.f32 %v1915_v34, %v1674_v1  ;;  %v2296_v32 = vpop.f32.mrf.mxu2  ;;  %v3174_v34 = vpack.c.b16 %v3144_v36, %v3143_v62  ;;  %v3601_v55 = vpack.c.b16 %v3572_v15, %v3571_v4  ;;  %v2709_v1 = vld [vmem:[#allocation2 + $0x30] sm:$0xf]  ;;  %v11749_v36 = vld [vmem:[#allocation2 + $0x18] sm:$0xff] }
 0x105   : > { %v2824_v40 = vshll.u32 %v2709_v1, 16  ;;  %v2819_v7 = vsel %vm12159_vm15, %v2814_v59, %v2818_v20  ;;  %v3385_v15 = vld [vmem:[#allocation2 + $0x30] sm:$0xe] }
 0x106   : > { %v12754_v21 = vadd.f32 %v2296_v32, %v1916_v31  ;;  %v1920_v44 = vpop.f32.mrf.mxu1  ;;  %v2710_v32 = vld [vmem:[#allocation2 + $0x34] sm:$0xf]  ;;  %v3146_v3 = vunpack.c.l.b16 %v2819_v7 }
 0x107   : > { %v12756_v50 = vpop.f32.mrf.mxu3  ;;  %v2830_v14 = vshll.u32 %v2710_v32, 16  ;;  %v2834_v45 = vshrl.u32 %v2710_v32, 16  ;;  %v2826_v53 = vrot.slane %v2824_v40, 5 }
 0x109   : > { %11148 = vmatmul.msk.bf16.gmra.mxu2 %vm1594_vm3, %v11777_v39  ;;  %v2821_v39 = vshrl.u32 %v2709_v1, 16  ;;  %v2832_v24 = vrot.slane %v2830_v14, 5  ;;  %v2836_v4 = vrot.slane %v2834_v45, 4 }
 0x10b   : > { %v1677_v0 = vpop.f32.mrf.mxu0 }
 0x10c   : > { %v1919_v56 = vadd.f32 %v1918_v13, %v1677_v0  ;;  %v2299_v16 = vpop.f32.mrf.mxu2  ;;  %v2809_v13 = vsel %vm12159_vm15, %v2804_v19, %v2808_v46  ;;  %v3469_v46 = vrot.slane %v2710_v32, 5  ;;  %v3472_v19 = vrot.slane %v2711_v54, 5 }
 0x10d   : > { %v2840_v32 = vshll.u32 %v2711_v54, 16 }
 0x10e   : > { %v12763_v26 = vadd.f32 %v2299_v16, %v1919_v56  ;;  %10988 = vmatmul.msk.bf16.gmra.mxu0 %vm1594_vm3, %v3174_v34  ;;  %v1923_v63 = vpop.f32.mrf.mxu1  ;;  %v2823_v34 = vrot.slane %v2821_v39, 4  ;;  %v11006_v56 = vrot.slane %v3385_v15, 9  ;;  %v3471_v16 = vrot.slane %v3469_v46, 4 }
 0x10f   : > { %v1955_v31 = vpop.f32.mrf.mxu3 }
 0x110   : > { %v12767_v62 = vadd.f32 %v1955_v31, %v12636_v35  ;;  %v3145_v35 = vunpack.c.l.b16 %v2809_v13  ;;  %v2827_v59 = vor.u32 %v2826_v53, %v2823_v34  ;;  %v3470_v20 = vsel %vm12106_vm12, %v11006_v56, %v3469_v46  ;;  %v11750_v53 = vld [vmem:[#allocation2 + $0x24] sm:$0xff] }
 0x111   : > { %11045 = vmatmul.msk.bf16.gmra.mxu1 %vm1594_vm3, %v3601_v55  ;;  %v3473_v1 = vsel %vm12106_vm12, %v3471_v16, %v3472_v19  ;;  %v2837_v31 = vor.u32 %v2836_v4, %v2832_v24 }
 0x112   : > { %v3175_v55 = vpack.c.b16 %v3146_v3, %v3145_v35  ;;  %v3574_v13 = vunpack.c.l.b16 %v3473_v1  ;;  %v2828_v14 = vrot.slane %v2827_v59, 4  ;;  %v2712_v35 = vld [vmem:[#allocation2 + $0x3c] sm:$0xf] }
 0x113   : > { %v1679_v49 = vpop.f32.mrf.mxu0  ;;  %v2845_v46 = vshrl.u32 %v2712_v35, 16  ;;  %v2848_v54 = vshll.u32 %v2712_v35, 16  ;;  %v11779_v59 = vld [vmem:[#allocation2 + $0x3c] sm:$0xff]  ;;  %v11802_v35 = vld [vmem:[%s15657_s2 + $0x110] sm:$0xff] }
 0x114   : > { %10948 = vmatmul.msk.bf16.gmra.mxu3 %vm1594_vm3, %v11749_v36  ;;  %v1921_v37 = vadd.f32 %v1920_v44, %v1679_v49  ;;  %v2301_v51 = vpop.f32.mrf.mxu2  ;;  %v3573_v36 = vunpack.c.l.b16 %v3470_v20  ;;  %5115 = vmatpush.bf16.msra.mxu0 %v11802_v35 }
 0x115   : > { %v2847_v20 = vrot.slane %v2845_v46, 4  ;;  %v2850_v1 = vrot.slane %v2848_v54, 5 }
 0x116   : > { %v12775_v33 = vadd.f32 %v2301_v51, %v1921_v37  ;;  %v1925_v42 = vpop.f32.mrf.mxu1  ;;  %v2838_v37 = vrot.slane %v2837_v31, 4  ;;  %v2842_v51 = vrot.slane %v2840_v32, 5 }
 0x117   : > { %v1958_v0 = vpop.f32.mrf.mxu3 }
 0x118   : > { %v12778_v44 = vadd.f32 %v1958_v0, %v12652_v29  ;;  %v3602_v29 = vpack.c.b16 %v3574_v13, %v3573_v36  ;;  %v2843_v4 = vsel %vm12159_vm15, %v2838_v37, %v2842_v51  ;;  %v2714_v13 = vld [vmem:[#allocation2 + $0x44] sm:$0x1] }
 0x119   : > { %11149 = vmatmul.msk.bf16.gmra.mxu2 %vm1594_vm3, %v11778_v52  ;;  %v2713_v52 = vld [vmem:[#allocation2 + $0x40] sm:$0xf]  ;;  %v3479_v37 = vrot.slane %v2714_v13, 5  ;;  %v2864_v54 = vshll.u32 %v2714_v13, 16 }
 0x11a   : > { %v2854_v15 = vshll.u32 %v2713_v52, 16  ;;  %v2858_v0 = vshrl.u32 %v2713_v52, 16  ;;  %v3476_v31 = vrot.slane %v2713_v52, 5  ;;  %v2851_v52 = vor.u32 %v2850_v1, %v2847_v20  ;;  %v2715_v20 = vld [vmem:[#allocation2 + $0x48] sm:$0xf] }
 0x11b   : > { %v1682_v39 = vpop.f32.mrf.mxu0 }
 0x11c   : > { %v1924_v40 = vadd.f32 %v1923_v63, %v1682_v39  ;;  %v2304_v7 = vpop.f32.mrf.mxu2  ;;  %v2833_v63 = vsel %vm12159_vm15, %v2828_v14, %v2832_v24  ;;  %v3148_v24 = vunpack.c.l.b16 %v2843_v4  ;;  %v2856_v39 = vrot.slane %v2854_v15, 5 }
 0x11e   : > { %v12785_v45 = vadd.f32 %v2304_v7, %v1924_v40  ;;  %10989 = vmatmul.msk.bf16.gmra.mxu0 %vm1594_vm3, %v3175_v55  ;;  %v1928_v49 = vpop.f32.mrf.mxu1  ;;  %v11798_v55 = vld [vmem:[%s15657_s2 + $0xf0] sm:$0xff]  ;;  %v2860_v40 = vrot.slane %v2858_v0, 4  ;;  %v3386_v7 = vld [vmem:[#allocation2 + $0x3c] sm:$0xe] }
 0x11f   : > { %v1960_v3 = vpop.f32.mrf.mxu3  ;;  %4689 = vmatpush.bf16.msra.mxu3 %v11798_v55  ;;  %v11007_v14 = vrot.slane %v3386_v7, 9  ;;  %v2869_v7 = vshrl.u32 %v2715_v20, 16 }
 0x120   : > { %v12789_v34 = vadd.f32 %v1960_v3, %v12670_v10  ;;  %v3147_v10 = vunpack.c.l.b16 %v2833_v63  ;;  %v2861_v46 = vor.u32 %v2860_v40, %v2856_v39  ;;  %v11751_v40 = vld [vmem:[#allocation2 + $0x30] sm:$0xff] }
 0x121   : > { %11046 = vmatmul.msk.bf16.gmra.mxu1 %vm1594_vm3, %v3602_v29  ;;  %v3478_v29 = vrot.slane %v3476_v31, 4 }
 0x122   : > { %v3176_v3 = vpack.c.b16 %v3148_v24, %v3147_v10  ;;  %v2862_v24 = vrot.slane %v2861_v46, 4  ;;  %v2871_v46 = vrot.slane %v2869_v7, 4 }
 0x123   : > { %v1684_v56 = vpop.f32.mrf.mxu0  ;;  %v3480_v63 = vsel %vm12106_vm12, %v3478_v29, %v3479_v37 }
 0x124   : > { %10949 = vmatmul.msk.bf16.gmra.mxu3 %vm1594_vm3, %v11750_v53  ;;  %v1926_v16 = vadd.f32 %v1925_v42, %v1684_v56  ;;  %v2306_v19 = vpop.f32.mrf.mxu2  ;;  %v3477_v53 = vsel %vm12106_vm12, %v11007_v14, %v3476_v31  ;;  %v2716_v31 = vld [vmem:[#allocation2 + $0x4c] sm:$0xf] }
 0x125   : > { %v3575_v4 = vunpack.c.l.b16 %v3477_v53  ;;  %v2878_v29 = vshll.u32 %v2716_v31, 16  ;;  %v2882_v37 = vshrl.u32 %v2716_v31, 16 }
 0x126   : > { %v12800_v32 = vadd.f32 %v2306_v19, %v1926_v16  ;;  %v1930_v36 = vpop.f32.mrf.mxu1  ;;  %v2852_v16 = vrot.slane %v2851_v52, 4 }
 0x127   : > { %v1963_v42 = vpop.f32.mrf.mxu3 }
 0x128   : > { %v12803_v51 = vadd.f32 %v1963_v42, %v12696_v47  ;;  %v3576_v47 = vunpack.c.l.b16 %v3480_v63  ;;  %v2872_v42 = vshll.u32 %v2715_v20, 16  ;;  %v11780_v63 = vld [vmem:[#allocation2 + $0x48] sm:$0xff] }
 0x129   : > { %11150 = vmatmul.msk.bf16.gmra.mxu2 %vm1594_vm3, %v11779_v59  ;;  %v2866_v59 = vrot.slane %v2864_v54, 5 }
 0x12a   : > { %v3603_v19 = vpack.c.b16 %v3576_v47, %v3575_v4  ;;  %v2874_v54 = vrot.slane %v2872_v42, 5 }
 0x12b   : > { %v1687_v15 = vpop.f32.mrf.mxu0  ;;  %v2867_v14 = vsel %vm12159_vm15, %v2862_v24, %v2866_v59 }
 0x12c   : > { %v1929_v0 = vadd.f32 %v1928_v49, %v1687_v15  ;;  %v2309_v56 = vpop.f32.mrf.mxu2  ;;  %v2857_v49 = vsel %vm12159_vm15, %v2852_v16, %v2856_v39  ;;  %v3150_v53 = vunpack.c.l.b16 %v2867_v14  ;;  %v3483_v39 = vrot.slane %v2716_v31, 5  ;;  %v2717_v15 = vld [vmem:[#allocation2 + $0x50] sm:$0x1]  ;;  %v3387_v16 = vld [vmem:[#allocation2 + $0x48] sm:$0xe] }
 0x12d   : > { %v11008_v24 = vrot.slane %v3387_v16, 9  ;;  %v3486_v20 = vrot.slane %v2717_v15, 5  ;;  %v2888_v42 = vshll.u32 %v2717_v15, 16  ;;  %v11752_v15 = vld [vmem:[#allocation2 + $0x3c] sm:$0xff] }
 0x12e   : > { %v12813_v10 = vadd.f32 %v2309_v56, %v1929_v0  ;;  %10990 = vmatmul.msk.bf16.gmra.mxu0 %vm1594_vm3, %v3176_v3  ;;  %v1933_v55 = vpop.f32.mrf.mxu1  ;;  %v2880_v0 = vrot.slane %v2878_v29, 5  ;;  %v2884_v56 = vrot.slane %v2882_v37, 4  ;;  %v3485_v59 = vrot.slane %v3483_v39, 4 }
 0x12f   : > { %v1965_v1 = vpop.f32.mrf.mxu3  ;;  %v3484_v31 = vsel %vm12106_vm12, %v11008_v24, %v3483_v39  ;;  %v2719_v39 = vld [vmem:[#allocation2 + $0x58] sm:$0xf] }
 0x130   : > { %v12817_v13 = vadd.f32 %v1965_v1, %v12725_v12  ;;  %v3149_v12 = vunpack.c.l.b16 %v2857_v49  ;;  %v3487_v49 = vsel %vm12106_vm12, %v3485_v59, %v3486_v20  ;;  %v2885_v7 = vor.u32 %v2884_v56, %v2880_v0 }
 0x131   : > { %11047 = vmatmul.msk.bf16.gmra.mxu1 %vm1594_vm3, %v3603_v19  ;;  %v3577_v14 = vunpack.c.l.b16 %v3484_v31  ;;  %v3578_v29 = vunpack.c.l.b16 %v3487_v49  ;;  %v2902_v20 = vshll.u32 %v2719_v39, 16 }
 0x132   : > { %v3177_v1 = vpack.c.b16 %v3150_v53, %v3149_v12  ;;  %v2886_v53 = vrot.slane %v2885_v7, 4 }
 0x133   : > { %v1689_v35 = vpop.f32.mrf.mxu0 }
 0x134   : > { %10950 = vmatmul.msk.bf16.gmra.mxu3 %vm1594_vm3, %v11751_v40  ;;  %v1931_v3 = vadd.f32 %v1930_v36, %v1689_v35  ;;  %v2311_v52 = vpop.f32.mrf.mxu2  ;;  %v2875_v40 = vor.u32 %v2874_v54, %v2871_v46  ;;  %v2718_v46 = vld [vmem:[#allocation2 + $0x54] sm:$0xf] }
 0x135   : > { %v2896_v24 = vshll.u32 %v2718_v46, 16 }
 0x136   : > { %v12825_v4 = vadd.f32 %v2311_v52, %v1931_v3  ;;  %v1935_v47 = vpop.f32.mrf.mxu1  ;;  %v2876_v52 = vrot.slane %v2875_v40, 4 }
 0x137   : > { %v1968_v19 = vpop.f32.mrf.mxu3 }
 0x138   : > { %v12828_v36 = vadd.f32 %v1968_v19, %v12736_v41  ;;  %v3604_v41 = vpack.c.b16 %v3578_v29, %v3577_v14  ;;  %v2893_v19 = vshrl.u32 %v2718_v46, 16  ;;  %v2898_v29 = vrot.slane %v2896_v24, 5 }
 0x139   : > { %11151 = vmatmul.msk.bf16.gmra.mxu2 %vm1594_vm3, %v11780_v63  ;;  %v2890_v63 = vrot.slane %v2888_v42, 5  ;;  %v11781_v42 = vld [vmem:[#allocation2 + $0x54] sm:$0xff] }
 0x13a   : > { %v2895_v14 = vrot.slane %v2893_v19, 4 }
 0x13b   : > { %v1692_v37 = vpop.f32.mrf.mxu0  ;;  %v2891_v59 = vsel %vm12159_vm15, %v2886_v53, %v2890_v63  ;;  %v3388_v63 = vld [vmem:[#allocation2 + $0x54] sm:$0xe] }
 0x13c   : > { %v1934_v35 = vadd.f32 %v1933_v55, %v1692_v37  ;;  %v2314_v3 = vpop.f32.mrf.mxu2  ;;  %v2881_v55 = vsel %vm12159_vm15, %v2876_v52, %v2880_v0  ;;  %v3152_v7 = vunpack.c.l.b16 %v2891_v59  ;;  %v3490_v0 = vrot.slane %v2719_v39, 5  ;;  %v2720_v52 = vld [vmem:[#allocation2 + $0x5c] sm:$0x1] }
 0x13d   : > { %v1954_v37 = vadd.f32 %v12756_v50, %v12613_v58  ;;  %v2912_v24 = vshll.u32 %v2720_v52, 16 }
 0x13e   : > { %v12835_v16 = vadd.f32 %v2314_v3, %v1934_v35  ;;  %10991 = vmatmul.msk.bf16.gmra.mxu0 %vm1594_vm3, %v3177_v1  ;;  %v1938_v12 = vpop.f32.mrf.mxu1  ;;  %v2906_v1 = vshrl.u32 %v2719_v39, 16  ;;  %v2899_v39 = vor.u32 %v2898_v29, %v2895_v14  ;;  %v2721_v14 = vld [vmem:[#allocation2 + $0x60] sm:$0xf] }
 0x13f   : > { %v1970_v54 = vpop.f32.mrf.mxu3 }
 0x140   : > { %v12839_v56 = vadd.f32 %v1970_v54, %v12746_v25  ;;  %v3151_v25 = vunpack.c.l.b16 %v2881_v55  ;;  %v2908_v53 = vrot.slane %v2906_v1, 4  ;;  %v11009_v54 = vrot.slane %v3388_v63, 9 }
 0x141   : > { %11048 = vmatmul.msk.bf16.gmra.mxu1 %vm1594_vm3, %v3604_v41  ;;  %v2904_v41 = vrot.slane %v2902_v20, 5  ;;  %v2900_v63 = vrot.slane %v2899_v39, 4 }
 0x142   : > { %v3178_v59 = vpack.c.b16 %v3152_v7, %v3151_v25  ;;  %v3491_v58 = vsel %vm12106_vm12, %v11009_v54, %v3490_v0  ;;  %v2917_v54 = vshrl.u32 %v2721_v14, 16 }
 0x143   : > { %v1694_v40 = vpop.f32.mrf.mxu0  ;;  %v2909_v19 = vor.u32 %v2908_v53, %v2904_v41  ;;  %v3579_v20 = vunpack.c.l.b16 %v3491_v58 }
 0x144   : > { %10951 = vmatmul.msk.bf16.gmra.mxu3 %vm1594_vm3, %v11752_v15  ;;  %v1936_v31 = vadd.f32 %v1935_v47, %v1694_v40  ;;  %v2316_v49 = vpop.f32.mrf.mxu2  ;;  %v3492_v47 = vrot.slane %v3490_v0, 4  ;;  %v3493_v15 = vrot.slane %v2720_v52, 5  ;;  %v2722_v0 = vld [vmem:[#allocation2 + $0x64] sm:$0xf]  ;;  %v11753_v52 = vld [vmem:[#allocation2 + $0x48] sm:$0xff] }
 0x145   : > { %v2910_v7 = vrot.slane %v2909_v19, 4  ;;  %v2930_v39 = vshrl.u32 %v2722_v0, 16 }
 0x146   : > { %v12849_v35 = vadd.f32 %v2316_v49, %v1936_v31  ;;  %v1940_v3 = vpop.f32.mrf.mxu1  ;;  %v3494_v50 = vsel %vm12106_vm12, %v3492_v47, %v3493_v15  ;;  %v2920_v47 = vshll.u32 %v2721_v14, 16 }
 0x147   : > { %v2334_v46 = vpop.f32.mrf.mxu3  ;;  %v3580_v1 = vunpack.c.l.b16 %v3494_v50  ;;  %v2932_v14 = vrot.slane %v2930_v39, 4 }
 0x148   : > { %v12851_v55 = vadd.f32 %v2334_v46, %v1954_v37 }
 0x149   : > { %11152 = vmatmul.msk.bf16.gmra.mxu2 %vm1594_vm3, %v11781_v42  ;;  %v3605_v37 = vpack.c.b16 %v3580_v1, %v3579_v20  ;;  %v2914_v42 = vrot.slane %v2912_v24, 5  ;;  %v11782_v20 = vld [vmem:[#allocation2 + $0x60] sm:$0xff]  ;;  %v2919_v1 = vrot.slane %v2917_v54, 4 }
 0x14a   : > { %15692 = vst [vmem:[#allocation8_spill] sm:$0xff] %v12851_v55 }
 0x14b   : > { %v1697_v40 = vpop.f32.mrf.mxu0  ;;  %v2915_v15 = vsel %vm12159_vm15, %v2910_v7, %v2914_v42  ;;  %v3389_v7 = vld [vmem:[#allocation2 + $0x60] sm:$0xe] }
 0x14c   : > { %v1939_v31 = vadd.f32 %v1938_v12, %v1697_v40  ;;  %v2319_v49 = vpop.f32.mrf.mxu2  ;;  %v2905_v12 = vsel %vm12159_vm15, %v2900_v63, %v2904_v41  ;;  %v3154_v24 = vunpack.c.l.b16 %v2915_v15  ;;  %v2922_v40 = vrot.slane %v2920_v47, 5  ;;  %v2723_v63 = vld [vmem:[#allocation2 + $0x68] sm:$0x1] }
 0x14d   : > { %v3497_v41 = vrot.slane %v2722_v0, 5  ;;  %v3500_v9 = vrot.slane %v2723_v63, 5  ;;  %v2936_v15 = vshll.u32 %v2723_v63, 16 }
 0x14e   : > { %v12858_v46 = vadd.f32 %v2319_v49, %v1939_v31  ;;  %10992 = vmatmul.msk.bf16.gmra.mxu0 %vm1594_vm3, %v3178_v59  ;;  %v1943_v25 = vpop.f32.mrf.mxu1  ;;  %v2926_v59 = vshll.u32 %v2722_v0, 16 }
 0x14f   : > { %v2336_v29 = vpop.f32.mrf.mxu3  ;;  %v3499_v11 = vrot.slane %v3497_v41, 4 }
 0x150   : > { %v12862_v53 = vadd.f32 %v2336_v29, %v12767_v62  ;;  %v3153_v62 = vunpack.c.l.b16 %v2905_v12  ;;  %v11010_v29 = vrot.slane %v3389_v7, 9  ;;  %v2923_v12 = vor.u32 %v2922_v40, %v2919_v1  ;;  %v2724_v1 = vld [vmem:[#allocation2 + $0x6c] sm:$0xf] }
 0x151   : > { %11049 = vmatmul.msk.bf16.gmra.mxu1 %vm1594_vm3, %v3605_v37  ;;  %v2928_v37 = vrot.slane %v2926_v59, 5  ;;  %v3501_v54 = vsel %vm12106_vm12, %v3499_v11, %v3500_v9  ;;  %v11754_v11 = vld [vmem:[#allocation2 + $0x54] sm:$0xff]  ;;  %v2941_v63 = vshrl.u32 %v2724_v1, 16 }
 0x152   : > { %15693 = vst [vmem:[#allocation9_spill] sm:$0xff] %v12862_v53  ;;  %v3498_v0 = vsel %vm12106_vm12, %v11010_v29, %v3497_v41  ;;  %v3582_v39 = vunpack.c.l.b16 %v3501_v54  ;;  %v2924_v7 = vrot.slane %v2923_v12, 4  ;;  %v2725_v41 = vld [vmem:[#allocation2 + $0x70] sm:$0xf] }
 0x153   : > { %v1699_v58 = vpop.f32.mrf.mxu0  ;;  %v2933_v47 = vor.u32 %v2932_v14, %v2928_v37  ;;  %v3581_v59 = vunpack.c.l.b16 %v3498_v0  ;;  %v2944_v14 = vshll.u32 %v2724_v1, 16  ;;  %v2954_v12 = vshrl.u32 %v2725_v41, 16  ;;  %v3390_v1 = vld [vmem:[#allocation2 + $0x6c] sm:$0xe] }
 0x154   : > { %10952 = vmatmul.msk.bf16.gmra.mxu3 %vm1594_vm3, %v11753_v52  ;;  %v1941_v50 = vadd.f32 %v1940_v3, %v1699_v58  ;;  %v2321_v19 = vpop.f32.mrf.mxu2  ;;  %v3179_v52 = vpack.c.b16 %v3154_v24, %v3153_v62 }
 0x155   : > { %v2934_v24 = vrot.slane %v2933_v47, 4 }
 0x156   : > { %v12870_v31 = vadd.f32 %v2321_v19, %v1941_v50  ;;  %v1945_v49 = vpop.f32.mrf.mxu1 }
 0x157   : > { %v2339_v42 = vpop.f32.mrf.mxu3 }
 0x158   : > { %v12873_v3 = vadd.f32 %v2339_v42, %v12778_v44  ;;  %v3606_v44 = vpack.c.b16 %v3582_v39, %v3581_v59  ;;  %v11783_v59 = vld [vmem:[#allocation2 + $0x6c] sm:$0xff]  ;;  %v2943_v39 = vrot.slane %v2941_v63, 4 }
 0x159   : > { %11153 = vmatmul.msk.bf16.gmra.mxu2 %vm1594_vm3, %v11782_v20  ;;  %v2938_v20 = vrot.slane %v2936_v15, 5  ;;  %v11797_v15 = vld [vmem:[%s15657_s2 + $0xe8] sm:$0xff] }
 0x15a   : > { %15694 = vst [vmem:[#allocation10_spill] sm:$0xff] %v12873_v3  ;;  %4690 = vmatpush.bf16.msra.mxu3 %v11797_v15 }
 0x15b   : > { %v1702_v58 = vpop.f32.mrf.mxu0  ;;  %v2939_v29 = vsel %vm12159_vm15, %v2934_v24, %v2938_v20  ;;  %v2956_v20 = vrot.slane %v2954_v12, 4 }
 0x15c   : > { %v1944_v50 = vadd.f32 %v1943_v25, %v1702_v58  ;;  %v2324_v19 = vpop.f32.mrf.mxu2  ;;  %v2929_v25 = vsel %vm12159_vm15, %v2924_v7, %v2928_v37  ;;  %v3156_v37 = vunpack.c.l.b16 %v2939_v29  ;;  %v2946_v58 = vrot.slane %v2944_v14, 5 }
 0x15e   : > { %v12880_v42 = vadd.f32 %v2324_v19, %v1944_v50  ;;  %10993 = vmatmul.msk.bf16.gmra.mxu0 %vm1594_vm3, %v3179_v52  ;;  %v1948_v62 = vpop.f32.mrf.mxu1  ;;  %v2950_v52 = vshll.u32 %v2725_v41, 16  ;;  %v3504_v50 = vrot.slane %v2725_v41, 5  ;;  %v2947_v63 = vor.u32 %v2946_v58, %v2943_v39 }
 0x15f   : > { %v2341_v40 = vpop.f32.mrf.mxu3 }
 0x160   : > { %v12884_v9 = vadd.f32 %v2341_v40, %v12789_v34  ;;  %v3155_v34 = vunpack.c.l.b16 %v2929_v25  ;;  %v2952_v24 = vrot.slane %v2950_v52, 5  ;;  %v11011_v40 = vrot.slane %v3390_v1, 9 }
 0x161   : > { %11050 = vmatmul.msk.bf16.gmra.mxu1 %vm1594_vm3, %v3606_v44  ;;  %v2726_v44 = vld [vmem:[#allocation2 + $0x74] sm:$0x1] }
 0x162   : > { %15695 = vst [vmem:[#allocation11_spill] sm:$0xff] %v12884_v9  ;;  %v3507_v25 = vrot.slane %v2726_v44, 5  ;;  %v3180_v29 = vpack.c.b16 %v3156_v37, %v3155_v34  ;;  %v3505_v41 = vsel %vm12106_vm12, %v11011_v40, %v3504_v50  ;;  %v2957_v52 = vor.u32 %v2956_v20, %v2952_v24  ;;  %v11755_v40 = vld [vmem:[#allocation2 + $0x60] sm:$0xff] }
 0x163   : > { %v1704_v0 = vpop.f32.mrf.mxu0  ;;  %v2960_v12 = vshll.u32 %v2726_v44, 16  ;;  %v2948_v34 = vrot.slane %v2947_v63, 4  ;;  %v2727_v44 = vld [vmem:[#allocation2 + $0x78] sm:$0xf] }
 0x164   : > { %10953 = vmatmul.msk.bf16.gmra.mxu3 %vm1594_vm3, %v11754_v11  ;;  %v1946_v54 = vadd.f32 %v1945_v49, %v1704_v0  ;;  %v2326_v47 = vpop.f32.mrf.mxu2  ;;  %v3506_v11 = vrot.slane %v3504_v50, 4  ;;  %v2958_v39 = vrot.slane %v2957_v52, 4 }
 0x165   : > { %v2962_v58 = vrot.slane %v2960_v12, 5 }
 0x166   : > { %v12895_v19 = vadd.f32 %v2326_v47, %v1946_v54  ;;  %v1950_v7 = vpop.f32.mrf.mxu1  ;;  %v3508_v14 = vsel %vm12106_vm12, %v3506_v11, %v3507_v25  ;;  %v3583_v54 = vunpack.c.l.b16 %v3505_v41  ;;  %v2953_v11 = vsel %vm12159_vm15, %v2948_v34, %v2952_v24 }
 0x167   : > { %v2344_v49 = vpop.f32.mrf.mxu3  ;;  %v3584_v47 = vunpack.c.l.b16 %v3508_v14  ;;  %v2963_v25 = vsel %vm12159_vm15, %v2958_v39, %v2962_v58 }
 0x168   : > { %v12898_v0 = vadd.f32 %v2344_v49, %v12803_v51  ;;  %v11801_v51 = vld [vmem:[%s15657_s2 + $0x108] sm:$0xff]  ;;  %v2728_v49 = vld [vmem:[#allocation2 + $0x7c] sm:$0xf] }
 0x169   : > { %11154 = vmatmul.msk.bf16.gmra.mxu2 %vm1594_vm3, %v11783_v59  ;;  %v3607_v37 = vpack.c.b16 %v3584_v47, %v3583_v54  ;;  %5116 = vmatpush.bf16.msra.mxu0 %v11801_v51  ;;  %v2974_v63 = vshll.u32 %v2728_v49, 16  ;;  %v2978_v41 = vshrl.u32 %v2728_v49, 16  ;;  %v3158_v54 = vunpack.c.l.b16 %v2963_v25  ;;  %v11784_v47 = vld [vmem:[#allocation2 + $0x78] sm:$0xff] }
 0x16a   : > { %15696 = vst [vmem:[#allocation12_spill] sm:$0xff] %v12898_v0  ;;  %v3511_v24 = vrot.slane %v2728_v49, 5 }
 0x16b   : > { %v1707_v15 = vpop.f32.mrf.mxu0  ;;  %v2976_v39 = vrot.slane %v2974_v63, 5  ;;  %v2980_v58 = vrot.slane %v2978_v41, 4 }
 0x16c   : > { %v1949_v1 = vadd.f32 %v1948_v62, %v1707_v15  ;;  %v2329_v9 = vpop.f32.mrf.mxu2  ;;  %v2729_v15 = vld [vmem:[#allocation2 + $0x80] sm:$0x1]  ;;  %v3513_v0 = vrot.slane %v3511_v24, 4 }
 0x16d   : > { %v2981_v63 = vor.u32 %v2980_v58, %v2976_v39  ;;  %v11756_v58 = vld [vmem:[#allocation2 + $0x6c] sm:$0xff] }
 0x16e   : > { %v12908_v59 = vadd.f32 %v2329_v9, %v1949_v1  ;;  %10994 = vmatmul.msk.bf16.gmra.mxu0 %vm1594_vm3, %v3180_v29  ;;  %v12911_v50 = vpop.f32.mrf.mxu1  ;;  %v2965_v9 = vshrl.u32 %v2727_v44, 16  ;;  %v2968_v29 = vshll.u32 %v2727_v44, 16  ;;  %v3391_v44 = vld [vmem:[#allocation2 + $0x78] sm:$0xe] }
 0x16f   : > { %v2346_v20 = vpop.f32.mrf.mxu3 }
 0x170   : > { %v12914_v62 = vadd.f32 %v2346_v20, %v12817_v13  ;;  %v3157_v13 = vunpack.c.l.b16 %v2953_v11  ;;  %v2967_v1 = vrot.slane %v2965_v9, 4  ;;  %v2984_v9 = vshll.u32 %v2729_v15, 16 }
 0x171   : > { %11051 = vmatmul.msk.bf16.gmra.mxu1 %vm1594_vm3, %v3607_v37  ;;  %v2970_v37 = vrot.slane %v2968_v29, 5 }
 0x172   : > { %15697 = vst [vmem:[#allocation13_spill] sm:$0xff] %v12914_v62  ;;  %v11012_v62 = vrot.slane %v3391_v44, 9  ;;  %v3181_v11 = vpack.c.b16 %v3158_v54, %v3157_v13 }
 0x173   : > { %v1709_v14 = vpop.f32.mrf.mxu0  ;;  %v2971_v29 = vor.u32 %v2970_v37, %v2967_v1 }
 0x174   : > { %10954 = vmatmul.msk.bf16.gmra.mxu3 %vm1594_vm3, %v11755_v40  ;;  %v1951_v52 = vadd.f32 %v1950_v7, %v1709_v14  ;;  %v2331_v12 = vpop.f32.mrf.mxu2  ;;  %v3514_v40 = vrot.slane %v2729_v15, 5  ;;  %v3512_v49 = vsel %vm12106_vm12, %v11012_v62, %v3511_v24  ;;  %v2986_v15 = vrot.slane %v2984_v9, 5  ;;  %v2731_v24 = vld [vmem:[#allocation2 + $0x88] sm:$0xf] }
 0x175   : > { %v3585_v41 = vunpack.c.l.b16 %v3512_v49  ;;  %v2972_v54 = vrot.slane %v2971_v29, 4  ;;  %v2998_v9 = vshll.u32 %v2731_v24, 16 }
 0x176   : > { %v12922_v51 = vadd.f32 %v2331_v12, %v1951_v52  ;;  %v12924_v34 = vpop.f32.mrf.mxu1  ;;  %v3515_v25 = vsel %vm12106_vm12, %v3513_v0, %v3514_v40  ;;  %v2730_v0 = vld [vmem:[#allocation2 + $0x84] sm:$0xf] }
 0x177   : > { %v2349_v20 = vpop.f32.mrf.mxu3  ;;  %v3586_v14 = vunpack.c.l.b16 %v3515_v25  ;;  %v2989_v44 = vshrl.u32 %v2730_v0, 16  ;;  %v3002_v25 = vshrl.u32 %v2731_v24, 16 }
 0x178   : > { %15698 = vst [vmem:[#allocation14_spill] sm:$0xff] %v12922_v51  ;;  %v12927_v7 = vadd.f32 %v2349_v20, %v12828_v36  ;;  %v11804_v36 = vld [vmem:[%s15659_s4] sm:$0xff]  ;;  %v2977_v20 = vsel %vm12159_vm15, %v2972_v54, %v2976_v39 }
 0x179   : > { %11155 = vmatmul.msk.bf16.gmra.mxu2 %vm1594_vm3, %v11784_v47  ;;  %v3608_v13 = vpack.c.b16 %v3586_v14, %v3585_v41  ;;  %v2982_v47 = vrot.slane %v2981_v63, 4  ;;  %5447 = vmatpush.bf16.msra.mxu1 %v11804_v36  ;;  %v3159_v29 = vunpack.c.l.b16 %v2977_v20  ;;  %v2991_v41 = vrot.slane %v2989_v44, 4  ;;  %v3392_v39 = vld [vmem:[#allocation2 + $0x84] sm:$0xe] }
 0x17a   : > { %15699 = vst [vmem:[#allocation15_spill] sm:$0xff] %v12927_v7  ;;  %v3518_v14 = vrot.slane %v2731_v24, 5 }
 0x17b   : > { %v3270_v52 = vpop.f32.mrf.mxu0  ;;  %v2987_v40 = vsel %vm12159_vm15, %v2982_v47, %v2986_v15  ;;  %v3004_v47 = vrot.slane %v3002_v25, 4  ;;  %v11013_v15 = vrot.slane %v3392_v39, 9 }
 0x17c   : > { %v4011_v12 = vpop.f32.mrf.mxu2  ;;  %v3160_v63 = vunpack.c.l.b16 %v2987_v40 }
 0x17d   : > { %v3519_v24 = vsel %vm12106_vm12, %v11013_v15, %v3518_v14 }
 0x17e   : > { %10995 = vmatmul.msk.bf16.gmra.mxu0 %vm1594_vm3, %v3181_v11  ;;  %v12938_v62 = vpop.f32.mrf.mxu1  ;;  %v2992_v11 = vshll.u32 %v2730_v0, 16  ;;  %v3520_v0 = vrot.slane %v3518_v14, 4  ;;  %v3182_v20 = vpack.c.b16 %v3160_v63, %v3159_v29 }
 0x17f   : > { %v2351_v1 = vpop.f32.mrf.mxu3 }
 0x180   : > { %v12941_v37 = vadd.f32 %v2351_v1, %v12839_v56  ;;  %v11785_v56 = vld [vmem:[#allocation2 + $0x84] sm:$0xff]  ;;  %v2994_v1 = vrot.slane %v2992_v11, 5 }
 0x181   : > { %11052 = vmatmul.msk.bf16.gmra.mxu1 %vm1594_vm3, %v3608_v13  ;;  %v2732_v13 = vld [vmem:[#allocation2 + $0x8c] sm:$0x1] }
 0x182   : > { %15700 = vst [vmem:[#allocation16_spill] sm:$0xff] %v12941_v37  ;;  %v3000_v37 = vrot.slane %v2998_v9, 5  ;;  %v3521_v3 = vrot.slane %v2732_v13, 5  ;;  %v2995_v11 = vor.u32 %v2994_v1, %v2991_v41  ;;  %v3587_v9 = vunpack.c.l.b16 %v3519_v24  ;;  %v2734_v41 = vld [vmem:[#allocation2 + $0x94] sm:$0xf]  ;;  %v11757_v1 = vld [vmem:[#allocation2 + $0x78] sm:$0xff] }
 0x183   : > { %v3272_v49 = vpop.f32.mrf.mxu0  ;;  %v3008_v51 = vshll.u32 %v2732_v13, 16  ;;  %v3022_v15 = vshll.u32 %v2734_v41, 16  ;;  %v11786_v24 = vld [vmem:[#allocation2 + $0x90] sm:$0xff] }
 0x184   : > { %10955 = vmatmul.msk.bf16.gmra.mxu3 %vm1594_vm3, %v11756_v58  ;;  %v4013_v7 = vpop.f32.mrf.mxu2  ;;  %v1896_v58 = vadd.f32 %v12544_v38, %v12587_v28  ;;  %v3522_v44 = vsel %vm12106_vm12, %v3520_v0, %v3521_v3  ;;  %v3005_v55 = vor.u32 %v3004_v47, %v3000_v37  ;;  %v2996_v29 = vrot.slane %v2995_v11, 4  ;;  %v2733_v3 = vld [vmem:[#allocation2 + $0x90] sm:$0xf] }
 0x185   : > { %v3588_v25 = vunpack.c.l.b16 %v3522_v44 }
 0x186   : > { %v12949_v36 = vpop.f32.mrf.mxu1  ;;  %v2355_v38 = vadd.f32 %v12570_v60, %v1896_v58  ;;  %v3001_v60 = vsel %vm12159_vm15, %v2996_v29, %v3000_v37  ;;  %v2735_v37 = vld [vmem:[#allocation2 + $0x98] sm:$0x1] }
 0x187   : > { %v2588_v54 = vpop.f32.mrf.mxu3 }
 0x188   : > { %v2668_v53 = vadd.f32 %v2588_v54, %v12537_v22  ;;  %v3609_v54 = vpack.c.b16 %v3588_v25, %v3587_v9 }
 0x189   : > { %11156 = vmatmul.msk.bf16.gmra.mxu2 %vm1594_vm3, %v11785_v56  ;;  %v3010_v56 = vrot.slane %v3008_v51, 5  ;;  %v3161_v51 = vunpack.c.l.b16 %v3001_v60 }
 0x18a   : > { %v3350_v40 = vadd.f32 %v3270_v52, %v2668_v53  ;;  %v3006_v52 = vrot.slane %v3005_v55, 4 }
 0x18b   : > { %v3275_v39 = vpop.f32.mrf.mxu0 }
 0x18c   : > { %v3776_v22 = vadd.f32 %v12911_v50, %v3350_v40  ;;  %v4016_v13 = vpop.f32.mrf.mxu2  ;;  %v3013_v50 = vshrl.u32 %v2733_v3, 16  ;;  %v3011_v58 = vsel %vm12159_vm15, %v3006_v52, %v3010_v56  ;;  %v3525_v40 = vrot.slane %v2734_v41, 5 }
 0x18e   : > { %v12961_v28 = vadd.f32 %v4011_v12, %v3776_v22  ;;  %10996 = vmatmul.msk.bf16.gmra.mxu0 %vm1594_vm3, %v3182_v20  ;;  %v12964_v63 = vpop.f32.mrf.mxu1  ;;  %v3016_v12 = vshll.u32 %v2733_v3, 16  ;;  %v3026_v20 = vshrl.u32 %v2734_v41, 16  ;;  %v3015_v44 = vrot.slane %v3013_v50, 4 }
 0x18f   : > { %v2590_v53 = vpop.f32.mrf.mxu3  ;;  %v3024_v22 = vrot.slane %v3022_v15, 5 }
 0x190   : > { %v2669_v14 = vadd.f32 %v2590_v53, %v2355_v38  ;;  %v3018_v25 = vrot.slane %v3016_v12, 5  ;;  %v3028_v29 = vrot.slane %v3026_v20, 4  ;;  %v3527_v53 = vrot.slane %v3525_v40, 4 }
 0x191   : > { %11053 = vmatmul.msk.bf16.gmra.mxu1 %vm1594_vm3, %v3609_v54  ;;  %v3393_v54 = vld [vmem:[#allocation2 + $0x90] sm:$0xe] }
 0x192   : > { %v3351_v47 = vadd.f32 %v3272_v49, %v2669_v14  ;;  %v3162_v49 = vunpack.c.l.b16 %v3011_v58  ;;  %v11014_v3 = vrot.slane %v3393_v54, 9  ;;  %v3019_v12 = vor.u32 %v3018_v25, %v3015_v44  ;;  %v2737_v54 = vld [vmem:[#allocation2 + $0xa0] sm:$0xf]  ;;  %v11758_v44 = vld [vmem:[#allocation2 + $0x84] sm:$0xff] }
 0x193   : > { %v3277_v0 = vpop.f32.mrf.mxu0  ;;  %v3029_v15 = vor.u32 %v3028_v29, %v3024_v22  ;;  %v3032_v58 = vshll.u32 %v2735_v37, 16  ;;  %v3050_v29 = vshrl.u32 %v2737_v54, 16 }
 0x194   : > { %v3777_v55 = vadd.f32 %v12924_v34, %v3351_v47  ;;  %10956 = vmatmul.msk.bf16.gmra.mxu3 %vm1594_vm3, %v11757_v1  ;;  %v3528_v34 = vrot.slane %v2735_v37, 5  ;;  %v3183_v14 = vpack.c.b16 %v3162_v49, %v3161_v51  ;;  %v4018_v60 = vpop.f32.mrf.mxu2  ;;  %v3020_v51 = vrot.slane %v3019_v12, 4 }
 0x195   : > { %v3030_v49 = vrot.slane %v3029_v15, 4  ;;  %v3046_v37 = vshll.u32 %v2737_v54, 16  ;;  %v3052_v12 = vrot.slane %v3050_v29, 4  ;;  %v3532_v15 = vrot.slane %v2737_v54, 5 }
 0x196   : > { %v12973_v11 = vadd.f32 %v4013_v7, %v3777_v55  ;;  %v12975_v9 = vpop.f32.mrf.mxu1  ;;  %v3526_v7 = vsel %vm12106_vm12, %v11014_v3, %v3525_v40  ;;  %v3529_v56 = vsel %vm12106_vm12, %v3527_v53, %v3528_v34  ;;  %v2736_v55 = vld [vmem:[#allocation2 + $0x9c] sm:$0xf]  ;;  %v3025_v34 = vsel %vm12159_vm15, %v3020_v51, %v3024_v22 }
 0x197   : > { %v2593_v38 = vpop.f32.mrf.mxu3  ;;  %v3589_v1 = vunpack.c.l.b16 %v3526_v7  ;;  %v3590_v50 = vunpack.c.l.b16 %v3529_v56  ;;  %v3037_v25 = vshrl.u32 %v2736_v55, 16  ;;  %v3534_v51 = vrot.slane %v3532_v15, 4 }
 0x198   : > { %v2670_v52 = vadd.f32 %v2593_v38, %v12624_v61  ;;  %v3034_v38 = vrot.slane %v3032_v58, 5  ;;  %v3163_v58 = vunpack.c.l.b16 %v3025_v34 }
 0x199   : > { %11157 = vmatmul.msk.bf16.gmra.mxu2 %vm1594_vm3, %v11786_v24  ;;  %v3610_v61 = vpack.c.b16 %v3590_v50, %v3589_v1  ;;  %v3039_v56 = vrot.slane %v3037_v25, 4  ;;  %v2738_v1 = vld [vmem:[#allocation2 + $0xa4] sm:$0x1]  ;;  %v3048_v50 = vrot.slane %v3046_v37, 5 }
 0x19a   : > { %v3352_v41 = vadd.f32 %v3275_v39, %v2670_v52  ;;  %v3035_v52 = vsel %vm12159_vm15, %v3030_v49, %v3034_v38  ;;  %v3535_v49 = vrot.slane %v2738_v1, 5 }
 0x19b   : > { %v3280_v47 = vpop.f32.mrf.mxu0  ;;  %v3053_v25 = vor.u32 %v3052_v12, %v3048_v50 }
 0x19c   : > { %v3778_v20 = vadd.f32 %v12938_v62, %v3352_v41  ;;  %v3040_v62 = vshll.u32 %v2736_v55, 16  ;;  %v11796_v41 = vld [vmem:[%s15657_s2 + $0xe0] sm:$0xff]  ;;  %v3536_v54 = vsel %vm12106_vm12, %v3534_v51, %v3535_v49 }
 0x19d   : > { %4691 = vmatpush.bf16.msra.mxu3 %v11796_v41 }
 0x19e   : > { %v12984_v24 = vadd.f32 %v4016_v13, %v3778_v20  ;;  %10997 = vmatmul.msk.bf16.gmra.mxu0 %vm1594_vm3, %v3183_v14  ;;  %v12987_v40 = vpop.f32.mrf.mxu1  ;;  %v4021_v14 = vpop.f32.mrf.mxu2  ;;  %v3164_v20 = vunpack.c.l.b16 %v3035_v52 }
 0x19f   : > { %v2595_v39 = vpop.f32.mrf.mxu3 }
 0x1a0   : > { %v2671_v3 = vadd.f32 %v2595_v39, %v12645_v57  ;;  %v11787_v57 = vld [vmem:[#allocation2 + $0x9c] sm:$0xff]  ;;  %v3184_v37 = vpack.c.b16 %v3164_v20, %v3163_v58  ;;  %v2740_v58 = vld [vmem:[#allocation2 + $0xac] sm:$0xf]  ;;  %v11759_v20 = vld [vmem:[#allocation2 + $0x90] sm:$0xff] }
 0x1a1   : > { %11054 = vmatmul.msk.bf16.gmra.mxu1 %vm1594_vm3, %v3610_v61  ;;  %v3070_v49 = vshll.u32 %v2740_v58, 16 }
 0x1a2   : > { %v3353_v13 = vadd.f32 %v3277_v0, %v2671_v3  ;;  %v3042_v0 = vrot.slane %v3040_v62, 5  ;;  %v3056_v3 = vshll.u32 %v2738_v1, 16 }
 0x1a3   : > { %v3282_v53 = vpop.f32.mrf.mxu0 }
 0x1a4   : > { %v3779_v7 = vadd.f32 %v12949_v36, %v3353_v13  ;;  %10957 = vmatmul.msk.bf16.gmra.mxu3 %vm1594_vm3, %v11758_v44  ;;  %v3394_v36 = vld [vmem:[#allocation2 + $0x9c] sm:$0xe]  ;;  %v3043_v44 = vor.u32 %v3042_v0, %v3039_v56  ;;  %v3592_v13 = vunpack.c.l.b16 %v3536_v54  ;;  %v3058_v56 = vrot.slane %v3056_v3, 5 }
 0x1a5   : > { %v11015_v39 = vrot.slane %v3394_v36, 9  ;;  %v3074_v3 = vshrl.u32 %v2740_v58, 16 }
 0x1a6   : > { %v13000_v22 = vadd.f32 %v4018_v60, %v3779_v7  ;;  %v13002_v61 = vpop.f32.mrf.mxu1  ;;  %v3044_v7 = vrot.slane %v3043_v44, 4 }
 0x1a7   : > { %v2598_v55 = vpop.f32.mrf.mxu3  ;;  %v3533_v60 = vsel %vm12106_vm12, %v11015_v39, %v3532_v15  ;;  %v4023_v15 = vpop.f32.mrf.mxu2 }
 0x1a8   : > { %v2672_v38 = vadd.f32 %v2598_v55, %v12663_v2  ;;  %v3591_v29 = vunpack.c.l.b16 %v3533_v60  ;;  %v11800_v2 = vld [vmem:[%s15657_s2 + $0x100] sm:$0xff]  ;;  %v3049_v36 = vsel %vm12159_vm15, %v3044_v7, %v3048_v50  ;;  %v11788_v50 = vld [vmem:[#allocation2 + $0xa8] sm:$0xff] }
 0x1a9   : > { %11158 = vmatmul.msk.bf16.gmra.mxu2 %vm1594_vm3, %v11787_v57  ;;  %v3054_v57 = vrot.slane %v3053_v25, 4  ;;  %5117 = vmatpush.bf16.msra.mxu0 %v11800_v2  ;;  %v440_v60 = vld [vmem:[#allocation2 + $0xc0] sm:$0x1]  ;;  %v13035_v2 = vrot.slane %v3070_v49, 5 }
 0x1aa   : > { %v3354_v62 = vadd.f32 %v3280_v47, %v2672_v38  ;;  %v3611_v41 = vpack.c.b16 %v3592_v13, %v3591_v29  ;;  %v2739_v47 = vld [vmem:[#allocation2 + $0xa8] sm:$0xf]  ;;  %v2741_v13 = vld [vmem:[#allocation2 + $0xb0] sm:$0x1] }
 0x1ab   : > { %v3285_v34 = vpop.f32.mrf.mxu0  ;;  %v3059_v55 = vsel %vm12159_vm15, %v3054_v57, %v3058_v56  ;;  %v3064_v51 = vshll.u32 %v2739_v47, 16  ;;  %v3076_v57 = vrot.slane %v3074_v3, 4 }
 0x1ac   : > { %v3780_v52 = vadd.f32 %v12964_v63, %v3354_v62  ;;  %v3166_v25 = vunpack.c.l.b16 %v3059_v55  ;;  %v3539_v62 = vrot.slane %v2740_v58, 5 }
 0x1ae   : > { %v13014_v1 = vadd.f32 %v4021_v14, %v3780_v52  ;;  %10998 = vmatmul.msk.bf16.gmra.mxu0 %vm1594_vm3, %v3184_v37  ;;  %v13017_v0 = vpop.f32.mrf.mxu1  ;;  %v3061_v14 = vshrl.u32 %v2739_v47, 16  ;;  %v441_v37 = vsel %vm12120_vm13, 0, %v440_v60  ;;  %v3066_v52 = vrot.slane %v3064_v51, 5 }
 0x1af   : > { %v2600_v12 = vpop.f32.mrf.mxu3  ;;  %v3542_v47 = vrot.slane %v2741_v13, 5  ;;  %442 = vst [vmem:[#allocation2 + $0xc0] sm:$0x1] %v441_v37  ;;  %v490_v37 = vld [vmem:[#allocation2 + $0xc8] sm:$0x1] }
 0x1b0   : > { %v2673_v63 = vadd.f32 %v2600_v12, %v12683_v43  ;;  %v3165_v43 = vunpack.c.l.b16 %v3049_v36  ;;  %v3063_v54 = vrot.slane %v3061_v14, 4 }
 0x1b1   : > { %11055 = vmatmul.msk.bf16.gmra.mxu1 %vm1594_vm3, %v3611_v41  ;;  %v3541_v41 = vrot.slane %v3539_v62, 4 }
 0x1b2   : > { %v3355_v39 = vadd.f32 %v3282_v53, %v2673_v63  ;;  %v3185_v58 = vpack.c.b16 %v3166_v25, %v3165_v43  ;;  %v632_v63 = vld [vmem:[%s12166_s27 + $0x78] sm:$0xf]  ;;  %v3067_v51 = vor.u32 %v3066_v52, %v3063_v54  ;;  %v2742_v52 = vld [vmem:[#allocation2 + $0xb4] sm:$0xf] }
 0x1b3   : > { %v13025_v38 = vpop.f32.mrf.mxu0  ;;  %v3543_v55 = vsel %vm12106_vm12, %v3541_v41, %v3542_v47  ;;  %v892_v14 = vshrl.u32 %v632_v63, 16  ;;  %v3088_v27 = vshll.u32 %v2742_v52, 16 }
 0x1b4   : > { %v3781_v44 = vadd.f32 %v12975_v9, %v3355_v39  ;;  %10958 = vmatmul.msk.bf16.gmra.mxu3 %vm1594_vm3, %v11759_v20  ;;  %v3395_v9 = vld [vmem:[#allocation2 + $0xa8] sm:$0xe]  ;;  %v3080_v20 = vshll.u32 %v2741_v13, 16  ;;  %v3594_v3 = vunpack.c.l.b16 %v3543_v55  ;;  %v11760_v55 = vld [vmem:[#allocation2 + $0x9c] sm:$0xff] }
 0x1b5   : > { %v11016_v56 = vrot.slane %v3395_v9, 9  ;;  %v894_v43 = vrot.slane %v892_v14, 7  ;;  %v3085_v14 = vshrl.u32 %v2742_v52, 16 }
 0x1b6   : > { %v13031_v53 = vadd.f32 %v4023_v15, %v3781_v44  ;;  %v13033_v29 = vpop.f32.mrf.mxu1  ;;  %v4026_v15 = vpop.f32.mrf.mxu2  ;;  %v633_v44 = vld [vmem:[%s12166_s27 + $0x7c] sm:$0xf]  ;;  %v3082_v13 = vrot.slane %v3080_v20, 5  ;;  %v1063_v47 = vld [vmem:[#allocation2 + $0xc0] sm:$0xf]  ;;  %v491_v20 = vsel %vm12129_vm14, 0, %v490_v37 }
 0x1b7   : > { %v2603_v7 = vpop.f32.mrf.mxu3  ;;  %v3540_v36 = vsel %vm12106_vm12, %v11016_v56, %v3539_v62  ;;  %v900_v9 = vshrl.u32 %v633_v44, 16  ;;  %v903_v41 = vshll.u32 %v633_v44, 16  ;;  %492 = vst [vmem:[#allocation2 + $0xc8] sm:$0x1] %v491_v20  ;;  %v3087_v37 = vrot.slane %v3085_v14, 4  ;;  %s5939_s27 = ssub.f32 1.0, %s13836_s9 }
 0x1b8   : > { %v2674_v12 = vadd.f32 %v2603_v7, %v12719_v30  ;;  %v3593_v49 = vunpack.c.l.b16 %v3540_v36  ;;  %v3077_v30 = vor.u32 %v3076_v57, %v13035_v2  ;;  %v2743_v36 = vld [vmem:[#allocation2 + $0xb8] sm:$0xf] }
 0x1b9   : > { %11159 = vmatmul.msk.bf16.gmra.mxu2 %vm1594_vm3, %v11788_v50  ;;  %v895_v50 = vshll.u32 %v632_v63, 16  ;;  %v902_v63 = vrot.slane %v900_v9, 7 }
 0x1ba   : > { %v3356_v39 = vadd.f32 %v3285_v34, %v2674_v12  ;;  %v3612_v62 = vpack.c.b16 %v3594_v3, %v3593_v49  ;;  %v3068_v34 = vrot.slane %v3067_v51, 4  ;;  %v3078_v12 = vrot.slane %v3077_v30, 4 }
 0x1bb   : > { %v13045_v60 = vpop.f32.mrf.mxu0  ;;  %v897_v56 = vor.u32 %v895_v50, %v894_v43  ;;  %v3094_v3 = vshll.u32 %v2743_v36, 16  ;;  %v3098_v30 = vshrl.u32 %v2743_v36, 16 }
 0x1bc   : > { %v3782_v25 = vadd.f32 %v12987_v40, %v3356_v39  ;;  %v898_v40 = vrot.slane %v894_v43, 4  ;;  %v905_v39 = vor.u32 %v903_v41, %v902_v63  ;;  %v3073_v49 = vsel %vm12159_vm15, %v3068_v34, %v13035_v2  ;;  %v11789_v2 = vld [vmem:[#allocation2 + $0xb4] sm:$0xff] }
 0x1bd   : > { %v3083_v8 = vsel %vm12159_vm15, %v3078_v12, %v3082_v13  ;;  %v3167_v50 = vunpack.c.l.b16 %v3073_v49  ;;  %v2744_v13 = vld [vmem:[#allocation2 + $0xbc] sm:$0x1]  ;;  %v3096_v41 = vrot.slane %v3094_v3, 5 }
 0x1be   : > { %v13049_v7 = vadd.f32 %v4026_v15, %v3782_v25  ;;  %10999 = vmatmul.msk.bf16.gmra.mxu0 %vm1594_vm3, %v3185_v58  ;;  %v13052_v54 = vpop.f32.mrf.mxu1  ;;  %v1064_v58 = vsel %vm12185_vm7, %v897_v56, %v1063_v47  ;;  %v4028_v44 = vpop.f32.mrf.mxu2  ;;  %v906_v43 = vsel %vm12192_vm8, %v898_v40, %v905_v39  ;;  %v3168_v34 = vunpack.c.l.b16 %v3083_v8  ;;  %v3396_v47 = vld [vmem:[#allocation2 + $0xb4] sm:$0xe]  ;;  %v1067_v20 = vld [vmem:[#allocation2 + $0xc8] sm:$0x1] }
 0x1bf   : > { %v2605_v57 = vpop.f32.mrf.mxu3  ;;  %1065 = vst [vmem:[#allocation2 + $0xc0] sm:$0xf] %v1064_v58  ;;  %v3090_v56 = vrot.slane %v3088_v27, 5  ;;  %v11017_v12 = vrot.slane %v3396_v47, 9 }
 0x1c0   : > { %v2675_v15 = vadd.f32 %v2605_v57, %v12728_v6  ;;  %1066 = vst.msk [vmem:[#allocation2 + $0xc4] sm:$0xf] %vm382_vm0, %v906_v43  ;;  %v3186_v39 = vpack.c.b16 %v3168_v34, %v3167_v50  ;;  %v11761_v34 = vld [vmem:[#allocation2 + $0xa8] sm:$0xff] }
 0x1c1   : > { %11056 = vmatmul.msk.bf16.gmra.mxu1 %vm1594_vm3, %v3612_v62  ;;  %v3546_v62 = vrot.slane %v2743_v36, 5  ;;  %v3091_v3 = vor.u32 %v3090_v56, %v3087_v37 }
 0x1c2   : > { %v3357_v51 = vadd.f32 %v13025_v38, %v2675_v15  ;;  %v907_v38 = vrot.slane %v902_v63, 4  ;;  %v3549_v63 = vrot.slane %v2744_v13, 5 }
 0x1c3   : > { %v3292_v6 = vpop.f32.mrf.mxu0  ;;  %v3548_v40 = vrot.slane %v3546_v62, 4 }
 0x1c4   : > { %v3783_v25 = vadd.f32 %v13002_v61, %v3357_v51  ;;  %10959 = vmatmul.msk.bf16.gmra.mxu3 %vm1594_vm3, %v11760_v55  ;;  %v3100_v61 = vrot.slane %v3098_v30, 4  ;;  %v1068_v36 = vsel %vm12120_vm13, %v907_v38, %v1067_v20  ;;  %v3547_v55 = vsel %vm12106_vm12, %v11017_v12, %v3546_v62 }
 0x1c5   : > { %v3550_v58 = vsel %vm12106_vm12, %v3548_v40, %v3549_v63  ;;  %1069 = vst [vmem:[#allocation2 + $0xc8] sm:$0x1] %v1068_v36  ;;  %v3595_v51 = vunpack.c.l.b16 %v3547_v55  ;;  %v3092_v38 = vrot.slane %v3091_v3, 4 }
 0x1c6   : > { %v13071_v9 = vadd.f32 %v4028_v44, %v3783_v25  ;;  %v13073_v52 = vpop.f32.mrf.mxu1  ;;  %v3596_v49 = vunpack.c.l.b16 %v3550_v58  ;;  %v3104_v44 = vshll.u32 %v2744_v13, 16  ;;  %v2745_v43 = vld [vmem:[#allocation2 + $0xc0] sm:$0xf] }
 0x1c7   : > { %v2608_v57 = vpop.f32.mrf.mxu3  ;;  %v2746_v50 = vld [vmem:[#allocation2 + $0xc4] sm:$0xf]  ;;  %v3109_v37 = vshrl.u32 %v2745_v43, 16 }
 0x1c8   : > { %v2676_v15 = vadd.f32 %v2608_v57, %v12743_v5  ;;  %v3101_v5 = vor.u32 %v3100_v61, %v3096_v41  ;;  %v3613_v8 = vpack.c.b16 %v3596_v49, %v3595_v51  ;;  %v3118_v56 = vshll.u32 %v2746_v50, 16  ;;  %v11790_v40 = vld [vmem:[#allocation2 + $0xc0] sm:$0xff] }
 0x1c9   : > { %11160 = vmatmul.msk.bf16.gmra.mxu2 %vm1594_vm3, %v11789_v2  ;;  %v3097_v57 = vsel %vm12159_vm15, %v3092_v38, %v3096_v41  ;;  %v3122_v12 = vshrl.u32 %v2746_v50, 16  ;;  %v3553_v63 = vrot.slane %v2746_v50, 5 }
 0x1ca   : > { %v3358_v14 = vadd.f32 %v13045_v60, %v2676_v15  ;;  %v3102_v2 = vrot.slane %v3101_v5, 4  ;;  %v3106_v60 = vrot.slane %v3104_v44, 5  ;;  %v3169_v20 = vunpack.c.l.b16 %v3097_v57 }
 0x1cb   : > { %v3295_v27 = vpop.f32.mrf.mxu0  ;;  %v3120_v58 = vrot.slane %v3118_v56, 5  ;;  %v3124_v51 = vrot.slane %v3122_v12, 4  ;;  %v3555_v49 = vrot.slane %v3553_v63, 4 }
 0x1cc   : > { %v13085_v23 = vadd.f32 %v13017_v0, %v3358_v14  ;;  %v3112_v0 = vshll.u32 %v2745_v43, 16  ;;  %v3107_v61 = vsel %vm12159_vm15, %v3102_v2, %v3106_v60  ;;  %v3397_v14 = vld [vmem:[#allocation2 + $0xc0] sm:$0xe] }
 0x1cd   : > { %v3170_v15 = vunpack.c.l.b16 %v3107_v61  ;;  %v11018_v41 = vrot.slane %v3397_v14, 9 }
 0x1ce   : > { %11000 = vmatmul.msk.bf16.gmra.mxu0 %vm1594_vm3, %v3186_v39  ;;  %v13088_v30 = vpop.f32.mrf.mxu1  ;;  %v3114_v55 = vrot.slane %v3112_v0, 5 }
 0x1cf   : > { %v2610_v25 = vpop.f32.mrf.mxu3  ;;  %v3554_v44 = vsel %vm12106_vm12, %v11018_v41, %v3553_v63 }
 0x1d0   : > { %v2677_v62 = vadd.f32 %v2610_v25, %v12754_v21  ;;  %v3111_v21 = vrot.slane %v3109_v37, 4  ;;  %v3187_v25 = vpack.c.b16 %v3170_v15, %v3169_v20  ;;  %v3597_v38 = vunpack.c.l.b16 %v3554_v44  ;;  %v11791_v15 = vld [vmem:[#allocation2 + $0xcc] sm:$0xff] }
 0x1d1   : > { %11057 = vmatmul.msk.bf16.gmra.mxu1 %vm1594_vm3, %v3613_v8 }
 0x1d2   : > { %v13092_v13 = vadd.f32 %v3292_v6, %v2677_v62  ;;  %v2747_v6 = vld [vmem:[#allocation2 + $0xc8] sm:$0x1]  ;;  %v3115_v50 = vor.u32 %v3114_v55, %v3111_v21  ;;  %v3125_v62 = vor.u32 %v3124_v51, %v3120_v58 }
 0x1d3   : > { %v3297_v47 = vpop.f32.mrf.mxu0  ;;  %v3556_v3 = vrot.slane %v2747_v6, 5 }
 0x1d4   : > { %10960 = vmatmul.msk.bf16.gmra.mxu3 %vm1594_vm3, %v11761_v34  ;;  %v3128_v34 = vshll.u32 %v2747_v6, 16  ;;  %v3116_v57 = vrot.slane %v3115_v50, 4  ;;  %v3126_v61 = vrot.slane %v3125_v62, 4  ;;  %v4123_v6 = vld [vmem:[#allocation2 + $0x18] sm:$0xf] }
 0x1d5   : > { %v3557_v8 = vsel %vm12106_vm12, %v3555_v49, %v3556_v3  ;;  %v4172_v41 = vshrl.u32 %v4123_v6, 16  ;;  %v4175_v49 = vshll.u32 %v4123_v6, 16  ;;  %v4805_v50 = vld [vmem:[#allocation2 + $0x18] sm:$0xe] }
 0x1d6   : > { %v13099_v36 = vpop.f32.mrf.mxu1  ;;  %v3598_v2 = vunpack.c.l.b16 %v3557_v8  ;;  %v3130_v12 = vrot.slane %v3128_v34, 5 }
 0x1d7   : > { %v2613_v39 = vpop.f32.mrf.mxu3 }
 0x1d8   : > { %v2678_v5 = vadd.f32 %v2613_v39, %v12763_v26  ;;  %v3614_v26 = vpack.c.b16 %v3598_v2, %v3597_v38  ;;  %v3131_v20 = vsel %vm12159_vm15, %v3126_v61, %v3130_v12  ;;  %v4174_v38 = vrot.slane %v4172_v41, 4 }
 0x1d9   : > { %11161 = vmatmul.msk.bf16.gmra.mxu2 %vm1594_vm3, %v11790_v40  ;;  %v11762_v40 = vld [vmem:[#allocation2 + $0xb4] sm:$0xff]  ;;  %v3172_v14 = vunpack.c.l.b16 %v3131_v20  ;;  %v4177_v2 = vrot.slane %v4175_v49, 5  ;;  %v4127_v49 = vld [vmem:[#allocation2 + $0x28] sm:$0xf] }
 0x1da   : > { %v3360_v43 = vadd.f32 %v3295_v27, %v2678_v5 }
 0x1db   : > { %v3300_v60 = vpop.f32.mrf.mxu0 }
 0x1dc   : > { %v13108_v37 = vadd.f32 %v13052_v54, %v3360_v43  ;;  %v3121_v54 = vsel %vm12159_vm15, %v3116_v57, %v3120_v58  ;;  %v11203_v57 = vrot.slane %v4805_v50, 9  ;;  %v4209_v50 = vshrl.u32 %v4127_v49, 16 }
 0x1dd   : > { %v3171_v55 = vunpack.c.l.b16 %v3121_v54 }
 0x1de   : > { %11001 = vmatmul.msk.bf16.gmra.mxu0 %vm1594_vm3, %v3187_v25  ;;  %v13111_v0 = vpop.f32.mrf.mxu1 }
 0x1df   : > { %v2615_v56 = vpop.f32.mrf.mxu3  ;;  %v3188_v44 = vpack.c.b16 %v3172_v14, %v3171_v55 }
 0x1e0   : > { %v2679_v27 = vadd.f32 %v2615_v56, %v12775_v33  ;;  %v4124_v33 = vld [vmem:[#allocation2 + $0x1c] sm:$0xf] }
 0x1e1   : > { %11058 = vmatmul.msk.bf16.gmra.mxu1 %vm1594_vm3, %v3614_v26  ;;  %v4181_v58 = vshll.u32 %v4124_v33, 16  ;;  %v4185_v3 = vshrl.u32 %v4124_v33, 16  ;;  %v4871_v43 = vrot.slane %v4124_v33, 5 }
 0x1e2   : > { %v13115_v21 = vadd.f32 %v3297_v47, %v2679_v27  ;;  %v11763_v27 = vld [vmem:[#allocation2 + $0xc0] sm:$0xff] }
 0x1e3   : > { %v3302_v63 = vpop.f32.mrf.mxu0  ;;  %v4183_v62 = vrot.slane %v4181_v58, 5  ;;  %v4187_v34 = vrot.slane %v4185_v3, 4  ;;  %v4873_v61 = vrot.slane %v4871_v43, 4  ;;  %v4872_v6 = vsel %vm12106_vm12, %v11203_v57, %v4871_v43 }
 0x1e4   : > { %10961 = vmatmul.msk.bf16.gmra.mxu3 %vm1594_vm3, %v11762_v40  ;;  %v4178_v40 = vor.u32 %v4177_v2, %v4174_v38  ;;  %v4205_v2 = vshll.u32 %v4127_v49, 16 }
 0x1e6   : > { %v13122_v39 = vpop.f32.mrf.mxu1  ;;  %v4179_v14 = vrot.slane %v4178_v40, 4  ;;  %v4806_v40 = vld [vmem:[#allocation2 + $0x24] sm:$0xe] }
 0x1e7   : > { %v2618_v51 = vpop.f32.mrf.mxu3 }
 0x1e8   : > { %v2680_v47 = vadd.f32 %v2618_v51, %v12785_v45  ;;  %v4125_v45 = vld [vmem:[#allocation2 + $0x20] sm:$0x1] }
 0x1e9   : > { %11162 = vmatmul.msk.bf16.gmra.mxu2 %vm1594_vm3, %v11791_v15  ;;  %v4191_v54 = vshll.u32 %v4125_v45, 16 }
 0x1ea   : > { %v3362_v5 = vadd.f32 %v3300_v60, %v2680_v47  ;;  %v4874_v60 = vrot.slane %v4125_v45, 5  ;;  %v4126_v47 = vld [vmem:[#allocation2 + $0x24] sm:$0xf] }
 0x1eb   : > { %v3305_v8 = vpop.f32.mrf.mxu0  ;;  %v4193_v51 = vrot.slane %v4191_v54, 5  ;;  %v4199_v43 = vshll.u32 %v4126_v47, 16  ;;  %v4128_v54 = vld [vmem:[#allocation2 + $0x2c] sm:$0x1] }
 0x1ec   : > { %v13127_v25 = vadd.f32 %v13088_v30, %v3362_v5  ;;  %v4188_v30 = vor.u32 %v4187_v34, %v4183_v62  ;;  %v4875_v55 = vsel %vm12106_vm12, %v4873_v61, %v4874_v60  ;;  %v4184_v5 = vsel %vm12159_vm15, %v4179_v14, %v4183_v62 }
 0x1ed   : > { %v4991_v41 = vunpack.c.l.b16 %v4875_v55  ;;  %v4564_v57 = vunpack.c.l.b16 %v4184_v5  ;;  %v4878_v61 = vrot.slane %v4127_v49, 5  ;;  %v4207_v62 = vrot.slane %v4205_v2, 5 }
 0x1ee   : > { %11002 = vmatmul.msk.bf16.gmra.mxu0 %vm1594_vm3, %v3188_v44  ;;  %v13130_v26 = vpop.f32.mrf.mxu1  ;;  %v4189_v33 = vrot.slane %v4188_v30, 4  ;;  %v4196_v44 = vshrl.u32 %v4126_v47, 16  ;;  %v4211_v30 = vrot.slane %v4209_v50, 4  ;;  %v11204_v55 = vrot.slane %v4806_v40, 9 }
 0x1ef   : > { %v2620_v56 = vpop.f32.mrf.mxu3  ;;  %v4880_v14 = vrot.slane %v4878_v61, 4 }
 0x1f0   : > { %v2681_v12 = vadd.f32 %v2620_v56, %v12800_v32  ;;  %v4990_v32 = vunpack.c.l.b16 %v4872_v6  ;;  %v4194_v38 = vsel %vm12159_vm15, %v4189_v33, %v4193_v51 }
 0x1f2   : > { %v13133_v20 = vadd.f32 %v3302_v63, %v2681_v12  ;;  %v5022_v45 = vpack.c.b16 %v4991_v41, %v4990_v32  ;;  %v4565_v12 = vunpack.c.l.b16 %v4194_v38  ;;  %v4212_v32 = vor.u32 %v4211_v30, %v4207_v62  ;;  %v4129_v38 = vld [vmem:[#allocation2 + $0x30] sm:$0xf] }
 0x1f3   : > { %v3307_v15 = vpop.f32.mrf.mxu0 }
 0x1f4   : > { %10962 = vmatmul.msk.bf16.gmra.mxu3 %vm1594_vm3, %v11763_v27  ;;  %v4201_v27 = vrot.slane %v4199_v43, 5  ;;  %v4596_v51 = vpack.c.b16 %v4565_v12, %v4564_v57  ;;  %v4213_v43 = vrot.slane %v4212_v32, 4  ;;  %v4220_v12 = vshrl.u32 %v4129_v38, 16 }
 0x1f6   : > { %v13140_v3 = vpop.f32.mrf.mxu1 }
 0x1f7   : > { %v2623_v58 = vpop.f32.mrf.mxu3 }
 0x1f8   : > { %v2682_v63 = vadd.f32 %v2623_v58, %v12813_v10  ;;  %v4198_v10 = vrot.slane %v4196_v44, 4 }
 0x1fa   : > { %v3364_v34 = vadd.f32 %v3305_v8, %v2682_v63  ;;  %v4881_v8 = vrot.slane %v4128_v54, 5  ;;  %v4202_v47 = vor.u32 %v4201_v27, %v4198_v10  ;;  %v4879_v63 = vsel %vm12106_vm12, %v11204_v55, %v4878_v61 }
 0x1fb   : > { %v3310_v56 = vpop.f32.mrf.mxu0  ;;  %v4992_v2 = vunpack.c.l.b16 %v4879_v63  ;;  %v4223_v61 = vshll.u32 %v4129_v38, 16  ;;  %v4131_v63 = vld [vmem:[#allocation2 + $0x38] sm:$0x1] }
 0x1fc   : > { %v13148_v60 = vadd.f32 %v13111_v0, %v3364_v34  ;;  %v4215_v0 = vshll.u32 %v4128_v54, 16  ;;  %v4882_v5 = vsel %vm12106_vm12, %v4880_v14, %v4881_v8  ;;  %v4203_v44 = vrot.slane %v4202_v47, 4  ;;  %v4130_v34 = vld [vmem:[#allocation2 + $0x34] sm:$0xf]  ;;  %v4807_v47 = vld [vmem:[#allocation2 + $0x30] sm:$0xe] }
 0x1fd   : > { %v4993_v50 = vunpack.c.l.b16 %v4882_v5  ;;  %v4229_v27 = vshll.u32 %v4130_v34, 16  ;;  %v4233_v40 = vshrl.u32 %v4130_v34, 16  ;;  %v4885_v8 = vrot.slane %v4130_v34, 5 }
 0x1fe   : > { %11243 = vmatmul.msk.bf16.vlgmr.msra.gmra.mxu0 %vm1594_vm3, %v5022_v45  ;;  %v13152_v41 = vpop.f32.mrf.mxu1  ;;  %v4208_v57 = vsel %vm12159_vm15, %v4203_v44, %v4207_v62  ;;  %v4225_v62 = vrot.slane %v4223_v61, 5 }
 0x1ff   : > { %v2625_v6 = vpop.f32.mrf.mxu3  ;;  %v5023_v54 = vpack.c.b16 %v4993_v50, %v4992_v2  ;;  %v4566_v55 = vunpack.c.l.b16 %v4208_v57  ;;  %v4231_v32 = vrot.slane %v4229_v27, 5  ;;  %v4887_v44 = vrot.slane %v4885_v8, 4 }
 0x200   : > { %v2683_v33 = vadd.f32 %v2625_v6, %v12825_v4  ;;  %v4217_v4 = vrot.slane %v4215_v0, 5  ;;  %v4235_v0 = vrot.slane %v4233_v40, 4 }
 0x202   : > { %v13154_v49 = vadd.f32 %v3307_v15, %v2683_v33  ;;  %v4218_v10 = vsel %vm12159_vm15, %v4213_v43, %v4217_v4  ;;  %v4888_v43 = vrot.slane %v4131_v63, 5  ;;  %v4236_v50 = vor.u32 %v4235_v0, %v4231_v32 }
 0x203   : > { %v3312_v58 = vpop.f32.mrf.mxu0 }
 0x204   : > { %11187 = vmatmul.msk.bf16.vlgmr.msra.gmra.mxu3 %vm1594_vm3, %v4596_v51  ;;  %v4222_v51 = vrot.slane %v4220_v12, 4  ;;  %v4889_v57 = vsel %vm12106_vm12, %v4887_v44, %v4888_v43  ;;  %v4237_v61 = vrot.slane %v4236_v50, 4  ;;  %v4808_v50 = vld [vmem:[#allocation2 + $0x3c] sm:$0xe] }
 0x206   : > { %v13166_v14 = vpop.f32.mrf.mxu1  ;;  %v4226_v2 = vor.u32 %v4225_v62, %v4222_v51 }
 0x207   : > { %v2628_v45 = vpop.f32.mrf.mxu3 }
 0x208   : > { %v2684_v15 = vadd.f32 %v2628_v45, %v12835_v16  ;;  %v4567_v16 = vunpack.c.l.b16 %v4218_v10  ;;  %v4227_v12 = vrot.slane %v4226_v2, 4 }
 0x20a   : > { %v3366_v30 = vadd.f32 %v3310_v56, %v2684_v15  ;;  %v11205_v56 = vrot.slane %v4807_v47, 9  ;;  %v4597_v38 = vpack.c.b16 %v4567_v16, %v4566_v55 }
 0x20b   : > { %v3315_v6 = vpop.f32.mrf.mxu0 }
 0x20c   : > { %v13169_v33 = vadd.f32 %v13130_v26, %v3366_v30  ;;  %v4239_v26 = vshll.u32 %v4131_v63, 16  ;;  %v4886_v15 = vsel %vm12106_vm12, %v11205_v56, %v4885_v8  ;;  %v4995_v30 = vunpack.c.l.b16 %v4889_v57 }
 0x20d   : > { %v4994_v40 = vunpack.c.l.b16 %v4886_v15  ;;  %v4232_v8 = vsel %vm12159_vm15, %v4227_v12, %v4231_v32  ;;  %v4134_v15 = vld [vmem:[#allocation2 + $0x44] sm:$0x1] }
 0x20e   : > { %11244 = vmatmul.msk.bf16.gmra.mxu0 %vm1594_vm3, %v5023_v54  ;;  %v4241_v10 = vrot.slane %v4239_v26, 5  ;;  %v13180_v27 = vpop.f32.mrf.mxu1  ;;  %v4133_v54 = vld [vmem:[#allocation2 + $0x40] sm:$0xf]  ;;  %v4568_v44 = vunpack.c.l.b16 %v4232_v8 }
 0x20f   : > { %v2630_v5 = vpop.f32.mrf.mxu3  ;;  %v4253_v47 = vshll.u32 %v4133_v54, 16  ;;  %v4257_v0 = vshrl.u32 %v4133_v54, 16  ;;  %v4892_v43 = vrot.slane %v4133_v54, 5  ;;  %v4263_v54 = vshll.u32 %v4134_v15, 16 }
 0x210   : > { %v2685_v4 = vadd.f32 %v2630_v5, %v12849_v35  ;;  %v4132_v35 = vld [vmem:[#allocation2 + $0x3c] sm:$0xf]  ;;  %v4242_v62 = vsel %vm12159_vm15, %v4237_v61, %v4241_v10  ;;  %v5024_v5 = vpack.c.b16 %v4995_v30, %v4994_v40  ;;  %v4895_v10 = vrot.slane %v4134_v15, 5 }
 0x211   : > { %v4244_v16 = vshrl.u32 %v4132_v35, 16  ;;  %v4247_v51 = vshll.u32 %v4132_v35, 16  ;;  %v4255_v32 = vrot.slane %v4253_v47, 5  ;;  %v4259_v26 = vrot.slane %v4257_v0, 4  ;;  %v4135_v0 = vld [vmem:[#allocation2 + $0x48] sm:$0xf] }
 0x212   : > { %v13173_v34 = vadd.f32 %v3312_v58, %v2685_v4  ;;  %v4894_v61 = vrot.slane %v4892_v43, 4  ;;  %v4265_v47 = vrot.slane %v4263_v54, 5 }
 0x213   : > { %v3317_v45 = vpop.f32.mrf.mxu0  ;;  %v4249_v2 = vrot.slane %v4247_v51, 5  ;;  %v4260_v30 = vor.u32 %v4259_v26, %v4255_v32 }
 0x214   : > { %11188 = vmatmul.msk.bf16.gmra.mxu3 %vm1594_vm3, %v4597_v38  ;;  %v4569_v38 = vunpack.c.l.b16 %v4242_v62 }
 0x215   : > { %v4261_v62 = vrot.slane %v4260_v30, 4 }
 0x216   : > { %v13191_v12 = vpop.f32.mrf.mxu1  ;;  %v4598_v40 = vpack.c.b16 %v4569_v38, %v4568_v44 }
 0x217   : > { %v2633_v58 = vpop.f32.mrf.mxu3 }
 0x218   : > { %v2686_v55 = vadd.f32 %v2633_v58, %v12858_v46  ;;  %v4246_v46 = vrot.slane %v4244_v16, 4  ;;  %v4896_v16 = vsel %vm12106_vm12, %v4894_v61, %v4895_v10 }
 0x21a   : > { %v3368_v63 = vadd.f32 %v3315_v6, %v2686_v55  ;;  %v11206_v6 = vrot.slane %v4808_v50, 9 }
 0x21b   : > { %v3320_v56 = vpop.f32.mrf.mxu0 }
 0x21c   : > { %v13188_v4 = vadd.f32 %v13152_v41, %v3368_v63  ;;  %v4250_v41 = vor.u32 %v4249_v2, %v4246_v46  ;;  %v4893_v8 = vsel %vm12106_vm12, %v11206_v6, %v4892_v43  ;;  %v4997_v63 = vunpack.c.l.b16 %v4896_v16  ;;  %v4137_v16 = vld [vmem:[#allocation2 + $0x50] sm:$0x1] }
 0x21d   : > { %v4268_v46 = vshrl.u32 %v4135_v0, 16  ;;  %v4271_v43 = vshll.u32 %v4135_v0, 16  ;;  %v4266_v2 = vsel %vm12159_vm15, %v4261_v62, %v4265_v47 }
 0x21e   : > { %11245 = vmatmul.msk.bf16.gmra.mxu0 %vm1594_vm3, %v5024_v5  ;;  %v4251_v51 = vrot.slane %v4250_v41, 4  ;;  %v4136_v5 = vld [vmem:[#allocation2 + $0x4c] sm:$0xf]  ;;  %v3751_v50 = vpop.f32.mrf.mxu1 }
 0x21f   : > { %v2635_v57 = vpop.f32.mrf.mxu3  ;;  %v4277_v26 = vshll.u32 %v4136_v5, 16  ;;  %v4281_v15 = vshrl.u32 %v4136_v5, 16  ;;  %v4270_v41 = vrot.slane %v4268_v46, 4  ;;  %v4273_v30 = vrot.slane %v4271_v43, 5 }
 0x220   : > { %v2687_v35 = vadd.f32 %v2635_v57, %v12870_v31  ;;  %v4996_v31 = vunpack.c.l.b16 %v4893_v8  ;;  %v4256_v38 = vsel %vm12159_vm15, %v4251_v51, %v4255_v32  ;;  %v4809_v32 = vld [vmem:[#allocation2 + $0x48] sm:$0xe] }
 0x221   : > { %v4570_v10 = vunpack.c.l.b16 %v4256_v38  ;;  %v4279_v54 = vrot.slane %v4277_v26, 5  ;;  %v4283_v8 = vrot.slane %v4281_v15, 4  ;;  %v11207_v62 = vrot.slane %v4809_v32, 9  ;;  %v4138_v15 = vld [vmem:[#allocation2 + $0x54] sm:$0xf] }
 0x222   : > { %v13194_v58 = vadd.f32 %v3317_v45, %v2687_v35  ;;  %v5025_v6 = vpack.c.b16 %v4997_v63, %v4996_v31  ;;  %v4899_v35 = vrot.slane %v4136_v5, 5  ;;  %v4274_v63 = vor.u32 %v4273_v30, %v4270_v41 }
 0x223   : > { %v3322_v55 = vpop.f32.mrf.mxu0  ;;  %v4284_v5 = vor.u32 %v4283_v8, %v4279_v54  ;;  %v4292_v30 = vshrl.u32 %v4138_v15, 16 }
 0x224   : > { %11189 = vmatmul.msk.bf16.gmra.mxu3 %vm1594_vm3, %v4598_v40  ;;  %v4901_v47 = vrot.slane %v4899_v35, 4  ;;  %v4900_v46 = vsel %vm12106_vm12, %v11207_v62, %v4899_v35  ;;  %v4295_v35 = vshll.u32 %v4138_v15, 16 }
 0x225   : > { %v4285_v26 = vrot.slane %v4284_v5, 4  ;;  %v4294_v5 = vrot.slane %v4292_v30, 4 }
 0x226   : > { %v13213_v38 = vpop.f32.mrf.mxu1 }
 0x227   : > { %v2638_v44 = vpop.f32.mrf.mxu3  ;;  %15701 = vst [vmem:[#allocation17_spill] sm:$0xff] %v13213_v38 }
 0x228   : > { %v2688_v45 = vadd.f32 %v2638_v44, %v12880_v42  ;;  %v4571_v42 = vunpack.c.l.b16 %v4266_v2  ;;  %v4275_v2 = vrot.slane %v4274_v63, 4 }
 0x22a   : > { %v3370_v57 = vadd.f32 %v3320_v56, %v2688_v45  ;;  %v4902_v56 = vrot.slane %v4137_v16, 5  ;;  %v4599_v31 = vpack.c.b16 %v4571_v42, %v4570_v10  ;;  %v4139_v10 = vld [vmem:[#allocation2 + $0x58] sm:$0xf]  ;;  %v4280_v41 = vsel %vm12159_vm15, %v4275_v2, %v4279_v54  ;;  %v4140_v2 = vld [vmem:[#allocation2 + $0x5c] sm:$0x1] }
 0x22b   : > { %v3325_v61 = vpop.f32.mrf.mxu0  ;;  %v4301_v8 = vshll.u32 %v4139_v10, 16 }
 0x22c   : > { %v13207_v40 = vadd.f32 %v13180_v27, %v3370_v57  ;;  %v4287_v27 = vshll.u32 %v4137_v16, 16  ;;  %v4903_v43 = vsel %vm12106_vm12, %v4901_v47, %v4902_v56  ;;  %v4998_v57 = vunpack.c.l.b16 %v4900_v46 }
 0x22d   : > { %v4305_v16 = vshrl.u32 %v4139_v10, 16  ;;  %v4572_v56 = vunpack.c.l.b16 %v4280_v41  ;;  %v4303_v54 = vrot.slane %v4301_v8, 5 }
 0x22e   : > { %11246 = vmatmul.msk.bf16.gmra.mxu0 %vm1594_vm3, %v5025_v6  ;;  %v4999_v6 = vunpack.c.l.b16 %v4903_v43  ;;  %v3756_v46 = vpop.f32.mrf.mxu1 }
 0x22f   : > { %v2640_v51 = vpop.f32.mrf.mxu3  ;;  %v4307_v43 = vrot.slane %v4305_v16, 4 }
 0x230   : > { %v2689_v0 = vadd.f32 %v2640_v51, %v12895_v19  ;;  %v4289_v19 = vrot.slane %v4287_v27, 5  ;;  %v5026_v62 = vpack.c.b16 %v4999_v6, %v4998_v57  ;;  %v4810_v27 = vld [vmem:[#allocation2 + $0x54] sm:$0xe]  ;;  %v15702_v57 = vld [vmem:[#allocation14_spill] sm:$0xff] }
 0x232   : > { %v13211_v44 = vadd.f32 %v3322_v55, %v2689_v0  ;;  %v4290_v32 = vsel %vm12159_vm15, %v4285_v26, %v4289_v19  ;;  %v4906_v0 = vrot.slane %v4139_v10, 5  ;;  %v11208_v19 = vrot.slane %v4810_v27, 9 }
 0x233   : > { %v3327_v45 = vpop.f32.mrf.mxu0  ;;  %v4573_v63 = vunpack.c.l.b16 %v4290_v32 }
 0x234   : > { %11190 = vmatmul.msk.bf16.gmra.mxu3 %vm1594_vm3, %v4599_v31  ;;  %v4908_v15 = vrot.slane %v4906_v0, 4 }
 0x237   : > { %v2643_v55 = vpop.f32.mrf.mxu3 }
 0x238   : > { %v2690_v42 = vadd.f32 %v2643_v55, %v12908_v59  ;;  %v4297_v59 = vrot.slane %v4295_v35, 5  ;;  %v4600_v55 = vpack.c.b16 %v4573_v63, %v4572_v56  ;;  %v4907_v35 = vsel %vm12106_vm12, %v11208_v19, %v4906_v0  ;;  %v4142_v63 = vld [vmem:[#allocation2 + $0x64] sm:$0xf] }
 0x239   : > { %v5000_v27 = vunpack.c.l.b16 %v4907_v35 }
 0x23a   : > { %v3372_v51 = vadd.f32 %v3325_v61, %v2690_v42  ;;  %v4909_v61 = vrot.slane %v4140_v2, 5  ;;  %v4298_v10 = vor.u32 %v4297_v59, %v4294_v5  ;;  %v4311_v42 = vshll.u32 %v4140_v2, 16  ;;  %v13236_v59 = vpop.f32.mrf.mxu1 }
 0x23b   : > { %v3330_v47 = vpop.f32.mrf.mxu0  ;;  %15704 = vst [vmem:[#allocation18_spill] sm:$0xff] %v13236_v59 }
 0x23c   : > { %v13225_v31 = vadd.f32 %v3751_v50, %v3372_v51  ;;  %v4308_v50 = vor.u32 %v4307_v43, %v4303_v54  ;;  %v4910_v32 = vsel %vm12106_vm12, %v4908_v15, %v4909_v61  ;;  %v4299_v8 = vrot.slane %v4298_v10, 4 }
 0x23d   : > { %v4313_v51 = vrot.slane %v4311_v42, 5  ;;  %v5001_v56 = vunpack.c.l.b16 %v4910_v32  ;;  %v4325_v15 = vshll.u32 %v4142_v63, 16  ;;  %v4329_v61 = vshrl.u32 %v4142_v63, 16 }
 0x23e   : > { %11247 = vmatmul.msk.bf16.gmra.mxu0 %vm1594_vm3, %v5026_v62  ;;  %v4309_v16 = vrot.slane %v4308_v50, 4  ;;  %v4141_v62 = vld [vmem:[#allocation2 + $0x60] sm:$0xf]  ;;  %v4304_v0 = vsel %vm12159_vm15, %v4299_v8, %v4303_v54  ;;  %v4913_v50 = vrot.slane %v4142_v63, 5  ;;  %v4143_v8 = vld [vmem:[#allocation2 + $0x68] sm:$0x1] }
 0x23f   : > { %v2645_v26 = vpop.f32.mrf.mxu3  ;;  %v4316_v2 = vshrl.u32 %v4141_v62, 16  ;;  %v4574_v10 = vunpack.c.l.b16 %v4304_v0  ;;  %v4327_v17 = vrot.slane %v4325_v15, 5  ;;  %v4331_v54 = vrot.slane %v4329_v61, 4 }
 0x240   : > { %v2691_v6 = vadd.f32 %v2645_v26, %v15702_v57  ;;  %v4319_v26 = vshll.u32 %v4141_v62, 16  ;;  %v4314_v19 = vsel %vm12159_vm15, %v4309_v16, %v4313_v51  ;;  %v4915_v51 = vrot.slane %v4913_v50, 4 }
 0x241   : > { %v4575_v35 = vunpack.c.l.b16 %v4314_v19  ;;  %v4318_v32 = vrot.slane %v4316_v2, 4  ;;  %v4916_v59 = vrot.slane %v4143_v8, 5  ;;  %v4335_v0 = vshll.u32 %v4143_v8, 16 }
 0x242   : > { %v13229_v41 = vadd.f32 %v3327_v45, %v2691_v6  ;;  %v15705_v45 = vld [vmem:[#allocation8_spill] sm:$0xff]  ;;  %v5027_v6 = vpack.c.b16 %v5001_v56, %v5000_v27  ;;  %v3761_v63 = vpop.f32.mrf.mxu1 }
 0x243   : > { %v3332_v30 = vpop.f32.mrf.mxu0  ;;  %v4601_v56 = vpack.c.b16 %v4575_v35, %v4574_v10  ;;  %v4917_v15 = vsel %vm12106_vm12, %v4915_v51, %v4916_v59 }
 0x244   : > { %15703 = vst [vmem:[#allocation14_spill] sm:$0xff] %v13229_v41  ;;  %11191 = vmatmul.msk.bf16.gmra.mxu3 %vm1594_vm3, %v4600_v55  ;;  %v5003_v35 = vunpack.c.l.b16 %v4917_v15  ;;  %v4158_v41 = vld [vmem:[#allocation2 + $0xa4] sm:$0x1] }
 0x247   : > { %v2648_v5 = vpop.f32.mrf.mxu3 }
 0x248   : > { %v2692_v43 = vadd.f32 %v2648_v5, %v15705_v45  ;;  %v4321_v5 = vrot.slane %v4319_v26, 5  ;;  %v4811_v45 = vld [vmem:[#allocation2 + $0x60] sm:$0xe] }
 0x249   : > { %v11209_v16 = vrot.slane %v4811_v45, 9  ;;  %v4144_v45 = vld [vmem:[#allocation2 + $0x6c] sm:$0xf] }
 0x24a   : > { %v3374_v57 = vadd.f32 %v3330_v47, %v2692_v43  ;;  %v15707_v47 = vld [vmem:[#allocation9_spill] sm:$0xff]  ;;  %v4322_v43 = vor.u32 %v4321_v5, %v4318_v32 }
 0x24b   : > { %v3335_v55 = vpop.f32.mrf.mxu0  ;;  %v4914_v26 = vsel %vm12106_vm12, %v11209_v16, %v4913_v50  ;;  %v4145_v32 = vld [vmem:[#allocation2 + $0x70] sm:$0xf]  ;;  %v4343_v50 = vshll.u32 %v4144_v45, 16 }
 0x24c   : > { %v13243_v42 = vadd.f32 %v3756_v46, %v3374_v57  ;;  %v4332_v46 = vor.u32 %v4331_v54, %v4327_v17  ;;  %v4323_v61 = vrot.slane %v4322_v43, 4  ;;  %v5002_v10 = vunpack.c.l.b16 %v4914_v26  ;;  %v15709_v54 = vld [vmem:[#allocation10_spill] sm:$0xff]  ;;  %v13259_v43 = vpop.f32.mrf.mxu1 }
 0x24d   : > { %v4349_v16 = vshll.u32 %v4145_v32, 16  ;;  %v4353_v51 = vshrl.u32 %v4145_v32, 16  ;;  %15710 = vst [vmem:[#allocation10_spill] sm:$0xff] %v13259_v43 }
 0x24e   : > { %15706 = vst [vmem:[#allocation8_spill] sm:$0xff] %v13243_v42  ;;  %11248 = vmatmul.msk.bf16.gmra.mxu0 %vm1594_vm3, %v5027_v6  ;;  %v4333_v57 = vrot.slane %v4332_v46, 4  ;;  %v4337_v6 = vrot.slane %v4335_v0, 5  ;;  %v4328_v8 = vsel %vm12159_vm15, %v4323_v61, %v4327_v17  ;;  %v4920_v0 = vrot.slane %v4145_v32, 5  ;;  %v4812_v17 = vld [vmem:[#allocation2 + $0x6c] sm:$0xe] }
 0x24f   : > { %v2650_v62 = vpop.f32.mrf.mxu3  ;;  %v4576_v46 = vunpack.c.l.b16 %v4328_v8  ;;  %v4351_v61 = vrot.slane %v4349_v16, 5 }
 0x250   : > { %v2693_v27 = vadd.f32 %v2650_v62, %v15707_v47  ;;  %v4340_v62 = vshrl.u32 %v4144_v45, 16  ;;  %v4338_v59 = vsel %vm12159_vm15, %v4333_v57, %v4337_v6  ;;  %v4355_v45 = vrot.slane %v4353_v51, 4  ;;  %v4146_v57 = vld [vmem:[#allocation2 + $0x74] sm:$0x1] }
 0x251   : > { %v4577_v15 = vunpack.c.l.b16 %v4338_v59 }
 0x252   : > { %v13247_v19 = vadd.f32 %v3332_v30, %v2693_v27  ;;  %v5028_v27 = vpack.c.b16 %v5003_v35, %v5002_v10  ;;  %v4923_v10 = vrot.slane %v4146_v57, 5  ;;  %v15712_v35 = vld [vmem:[#allocation11_spill] sm:$0xff]  ;;  %v4356_v32 = vor.u32 %v4355_v45, %v4351_v61 }
 0x253   : > { %v3337_v2 = vpop.f32.mrf.mxu0  ;;  %v4602_v43 = vpack.c.b16 %v4577_v15, %v4576_v46 }
 0x254   : > { %15708 = vst [vmem:[#allocation9_spill] sm:$0xff] %v13247_v19  ;;  %11192 = vmatmul.msk.bf16.gmra.mxu3 %vm1594_vm3, %v4601_v56  ;;  %v11210_v19 = vrot.slane %v4812_v17, 9  ;;  %v3766_v51 = vpop.f32.mrf.mxu1 }
 0x257   : > { %v2653_v5 = vpop.f32.mrf.mxu3 }
 0x258   : > { %v2694_v30 = vadd.f32 %v2653_v5, %v15709_v54  ;;  %v4342_v5 = vrot.slane %v4340_v62, 4  ;;  %v4345_v54 = vrot.slane %v4343_v50, 5  ;;  %v4921_v50 = vsel %vm12106_vm12, %v11210_v19, %v4920_v0 }
 0x259   : > { %v5004_v46 = vunpack.c.l.b16 %v4921_v50 }
 0x25a   : > { %v3376_v47 = vadd.f32 %v3335_v55, %v2694_v30  ;;  %v4922_v55 = vrot.slane %v4920_v0, 4  ;;  %v4346_v8 = vor.u32 %v4345_v54, %v4342_v5  ;;  %v4148_v5 = vld [vmem:[#allocation2 + $0x7c] sm:$0xf] }
 0x25b   : > { %v3340_v56 = vpop.f32.mrf.mxu0 }
 0x25c   : > { %v13261_v26 = vadd.f32 %v3761_v63, %v3376_v47  ;;  %v4359_v63 = vshll.u32 %v4146_v57, 16  ;;  %v4924_v59 = vsel %vm12106_vm12, %v4922_v55, %v4923_v10  ;;  %v4347_v16 = vrot.slane %v4346_v8, 4 }
 0x25d   : > { %v5005_v15 = vunpack.c.l.b16 %v4924_v59  ;;  %v4377_v10 = vshrl.u32 %v4148_v5, 16 }
 0x25e   : > { %15711 = vst [vmem:[#allocation19_spill] sm:$0xff] %v13261_v26  ;;  %11249 = vmatmul.msk.bf16.gmra.mxu0 %vm1594_vm3, %v5028_v27  ;;  %v4357_v27 = vrot.slane %v4356_v32, 4  ;;  %v4361_v17 = vrot.slane %v4359_v63, 5  ;;  %v4352_v57 = vsel %vm12159_vm15, %v4347_v16, %v4351_v61  ;;  %v4927_v63 = vrot.slane %v4148_v5, 5  ;;  %v4149_v16 = vld [vmem:[#allocation2 + $0x80] sm:$0x1] }
 0x25f   : > { %v2655_v6 = vpop.f32.mrf.mxu3  ;;  %v4578_v32 = vunpack.c.l.b16 %v4352_v57  ;;  %v4379_v61 = vrot.slane %v4377_v10, 4 }
 0x260   : > { %v2695_v30 = vadd.f32 %v2655_v6, %v15712_v35  ;;  %v4147_v6 = vld [vmem:[#allocation2 + $0x78] sm:$0xf]  ;;  %v4362_v55 = vsel %vm12159_vm15, %v4357_v27, %v4361_v17  ;;  %v13280_v27 = vpop.f32.mrf.mxu1 }
 0x261   : > { %v4364_v19 = vshrl.u32 %v4147_v6, 16  ;;  %v4367_v0 = vshll.u32 %v4147_v6, 16  ;;  %v4579_v59 = vunpack.c.l.b16 %v4362_v55  ;;  %15716 = vst [vmem:[#allocation20_spill] sm:$0xff] %v13280_v27  ;;  %v4383_v55 = vshll.u32 %v4149_v16, 16  ;;  %v4150_v27 = vld [vmem:[#allocation2 + $0x84] sm:$0xf] }
 0x262   : > { %v13265_v47 = vadd.f32 %v3337_v2, %v2695_v30  ;;  %v15714_v2 = vld [vmem:[#allocation12_spill] sm:$0xff]  ;;  %v5029_v30 = vpack.c.b16 %v5005_v15, %v5004_v46  ;;  %v4930_v46 = vrot.slane %v4149_v16, 5  ;;  %v15717_v15 = vld [vmem:[#allocation13_spill] sm:$0xff]  ;;  %v4388_v16 = vshrl.u32 %v4150_v27, 16 }
 0x263   : > { %v3342_v62 = vpop.f32.mrf.mxu0 }
 0x264   : > { %15713 = vst [vmem:[#allocation11_spill] sm:$0xff] %v13265_v47  ;;  %11193 = vmatmul.msk.bf16.gmra.mxu3 %vm1594_vm3, %v4602_v43  ;;  %v4373_v43 = vshll.u32 %v4148_v5, 16  ;;  %v4366_v47 = vrot.slane %v4364_v19, 4  ;;  %v4603_v5 = vpack.c.b16 %v4579_v59, %v4578_v32 }
 0x266   : > { %v4375_v26 = vrot.slane %v4373_v43, 5 }
 0x267   : > { %v2658_v54 = vpop.f32.mrf.mxu3 }
 0x268   : > { %v2696_v45 = vadd.f32 %v2658_v54, %v15714_v2  ;;  %v4369_v54 = vrot.slane %v4367_v0, 5  ;;  %v4813_v2 = vld [vmem:[#allocation2 + $0x78] sm:$0xe]  ;;  %v4380_v57 = vor.u32 %v4379_v61, %v4375_v26 }
 0x269   : > { %v11211_v17 = vrot.slane %v4813_v2, 9  ;;  %v4385_v2 = vrot.slane %v4383_v55, 5 }
 0x26a   : > { %v3378_v35 = vadd.f32 %v3340_v56, %v2696_v45  ;;  %v4929_v56 = vrot.slane %v4927_v63, 4 }
 0x26b   : > { %v3345_v8 = vpop.f32.mrf.mxu0  ;;  %v4928_v43 = vsel %vm12106_vm12, %v11211_v17, %v4927_v63  ;;  %v4391_v63 = vshll.u32 %v4150_v27, 16  ;;  %v3771_v17 = vpop.f32.mrf.mxu1  ;;  %v4152_v27 = vld [vmem:[#allocation2 + $0x8c] sm:$0x1] }
 0x26c   : > { %v13277_v50 = vadd.f32 %v3766_v51, %v3378_v35  ;;  %v4370_v51 = vor.u32 %v4369_v54, %v4366_v47  ;;  %v4931_v10 = vsel %vm12106_vm12, %v4929_v56, %v4930_v46  ;;  %v4151_v47 = vld [vmem:[#allocation2 + $0x88] sm:$0xf]  ;;  %v15719_v54 = vld [vmem:[#allocation15_spill] sm:$0xff]  ;;  %v4937_v42 = vrot.slane %v4152_v27, 5 }
 0x26d   : > { %v5007_v32 = vunpack.c.l.b16 %v4931_v10  ;;  %v4397_v46 = vshll.u32 %v4151_v47, 16  ;;  %v4934_v55 = vrot.slane %v4151_v47, 5 }
 0x26e   : > { %15715 = vst [vmem:[#allocation12_spill] sm:$0xff] %v13277_v50  ;;  %11250 = vmatmul.msk.bf16.gmra.mxu0 %vm1594_vm3, %v5029_v30  ;;  %v4371_v35 = vrot.slane %v4370_v51, 4  ;;  %v4381_v30 = vrot.slane %v4380_v57, 4 }
 0x26f   : > { %v2660_v6 = vpop.f32.mrf.mxu3 }
 0x270   : > { %v2697_v45 = vadd.f32 %v2660_v6, %v15717_v15  ;;  %v5006_v6 = vunpack.c.l.b16 %v4928_v43  ;;  %v4376_v61 = vsel %vm12159_vm15, %v4371_v35, %v4375_v26  ;;  %v4386_v56 = vsel %vm12159_vm15, %v4381_v30, %v4385_v2 }
 0x271   : > { %v4401_v15 = vshrl.u32 %v4151_v47, 16  ;;  %v4580_v57 = vunpack.c.l.b16 %v4376_v61  ;;  %v4581_v10 = vunpack.c.l.b16 %v4386_v56  ;;  %v4399_v26 = vrot.slane %v4397_v46, 5 }
 0x272   : > { %v13283_v19 = vadd.f32 %v3342_v62, %v2697_v45  ;;  %v4936_v2 = vrot.slane %v4934_v55, 4  ;;  %v4407_v61 = vshll.u32 %v4152_v27, 16 }
 0x273   : > { %v3347_v0 = vpop.f32.mrf.mxu0  ;;  %v4403_v35 = vrot.slane %v4401_v15, 4  ;;  %v4154_v15 = vld [vmem:[#allocation2 + $0x94] sm:$0xf] }
 0x274   : > { %15718 = vst [vmem:[#allocation13_spill] sm:$0xff] %v13283_v19  ;;  %11194 = vmatmul.msk.bf16.gmra.mxu3 %vm1594_vm3, %v4603_v5  ;;  %v5030_v5 = vpack.c.b16 %v5007_v32, %v5006_v6  ;;  %v4814_v19 = vld [vmem:[#allocation2 + $0x84] sm:$0xe]  ;;  %v4604_v32 = vpack.c.b16 %v4581_v10, %v4580_v57  ;;  %v4938_v46 = vsel %vm12106_vm12, %v4936_v2, %v4937_v42 }
 0x275   : > { %v11212_v30 = vrot.slane %v4814_v19, 9  ;;  %v4404_v47 = vor.u32 %v4403_v35, %v4399_v26 }
 0x277   : > { %v2663_v59 = vpop.f32.mrf.mxu3  ;;  %v4935_v56 = vsel %vm12106_vm12, %v11212_v30, %v4934_v55 }
 0x278   : > { %v2698_v62 = vadd.f32 %v2663_v59, %v15719_v54  ;;  %v4390_v59 = vrot.slane %v4388_v16, 4  ;;  %v4393_v54 = vrot.slane %v4391_v63, 5  ;;  %v4153_v16 = vld [vmem:[#allocation2 + $0x90] sm:$0xf]  ;;  %v5008_v10 = vunpack.c.l.b16 %v4935_v56 }
 0x279   : > { %v4415_v57 = vshll.u32 %v4153_v16, 16 }
 0x27a   : > { %v3380_v45 = vadd.f32 %v3345_v8, %v2698_v62  ;;  %v15721_v8 = vld [vmem:[#allocation16_spill] sm:$0xff]  ;;  %v4394_v62 = vor.u32 %v4393_v54, %v4390_v59  ;;  %v5009_v59 = vunpack.c.l.b16 %v4938_v46  ;;  %v4425_v54 = vshrl.u32 %v4154_v15, 16  ;;  %v4155_v46 = vld [vmem:[#allocation2 + $0x98] sm:$0x1] }
 0x27b   : > { %v5119_v51 = vpop.f32.mrf.mxu0  ;;  %v4417_v2 = vrot.slane %v4415_v57, 5 }
 0x27c   : > { %v13295_v43 = vadd.f32 %v3771_v17, %v3380_v45  ;;  %v4395_v19 = vrot.slane %v4394_v62, 4  ;;  %v4405_v45 = vrot.slane %v4404_v47, 4  ;;  %v4941_v47 = vrot.slane %v4154_v15, 5 }
 0x27e   : > { %15720 = vst [vmem:[#allocation15_spill] sm:$0xff] %v13295_v43  ;;  %11251 = vmatmul.msk.bf16.gmra.mxu0 %vm1594_vm3, %v5030_v5  ;;  %v4412_v5 = vshrl.u32 %v4153_v16, 16  ;;  %v4400_v55 = vsel %vm12159_vm15, %v4395_v19, %v4399_v26  ;;  %v13314_v16 = vld [vmem:[%s15658_s3] ss:$0 sm:$0xff]  ;;  %v4815_v26 = vld [vmem:[#allocation2 + $0x90] sm:$0xe] }
 0x27f   : > { %v2665_v50 = vpop.f32.mrf.mxu3  ;;  %v11213_v57 = vrot.slane %v4815_v26, 9  ;;  %v4816_v43 = vld [vmem:[#allocation2 + $0x9c] sm:$0xe] }
 0x280   : > { %v2699_v6 = vadd.f32 %v2665_v50, %v15721_v8  ;;  %v4409_v50 = vrot.slane %v4407_v61, 5  ;;  %v4414_v30 = vrot.slane %v4412_v5, 4  ;;  %v5031_v8 = vpack.c.b16 %v5009_v59, %v5008_v10 }
 0x281   : > { %v4431_v5 = vshll.u32 %v4155_v46, 16  ;;  %v4943_v10 = vrot.slane %v4941_v47, 4  ;;  %v4944_v59 = vrot.slane %v4155_v46, 5  ;;  %v4157_v46 = vld [vmem:[#allocation2 + $0xa0] sm:$0xf] }
 0x282   : > { %v13299_v17 = vadd.f32 %v3347_v0, %v2699_v6  ;;  %v4421_v0 = vshll.u32 %v4154_v15, 16  ;;  %v4410_v42 = vsel %vm12159_vm15, %v4405_v45, %v4409_v50  ;;  %v4418_v19 = vor.u32 %v4417_v2, %v4414_v30 }
 0x283   : > { %v5121_v63 = vpop.f32.mrf.mxu0  ;;  %v4583_v56 = vunpack.c.l.b16 %v4410_v42  ;;  %v4433_v42 = vrot.slane %v4431_v5, 5  ;;  %v4942_v30 = vsel %vm12106_vm12, %v11213_v57, %v4941_v47  ;;  %v4945_v2 = vsel %vm12106_vm12, %v4943_v10, %v4944_v59 }
 0x284   : > { %15722 = vst [vmem:[#allocation16_spill] sm:$0xff] %v13299_v17  ;;  %11195 = vmatmul.msk.bf16.gmra.mxu3 %vm1594_vm3, %v4604_v32  ;;  %v4423_v6 = vrot.slane %v4421_v0, 5  ;;  %v4427_v32 = vrot.slane %v4425_v54, 4  ;;  %v4419_v54 = vrot.slane %v4418_v19, 4  ;;  %v5010_v47 = vunpack.c.l.b16 %v4942_v30 }
 0x285   : > { %v4445_v5 = vshll.u32 %v4157_v46, 16  ;;  %v4948_v17 = vrot.slane %v4157_v46, 5 }
 0x286   : > { %v4428_v45 = vor.u32 %v4427_v32, %v4423_v6 }
 0x287   : > { %v4693_v35 = vpop.f32.mrf.mxu3 }
 0x288   : > { %v4773_v27 = vadd.f32 %v4693_v35, %v12961_v28  ;;  %v4582_v28 = vunpack.c.l.b16 %v4400_v55  ;;  %v4429_v55 = vrot.slane %v4428_v45, 4 }
 0x28a   : > { %v5199_v61 = vadd.f32 %v5119_v51, %v4773_v27  ;;  %v4605_v0 = vpack.c.b16 %v4583_v56, %v4582_v28  ;;  %v5011_v56 = vunpack.c.l.b16 %v4945_v2  ;;  %v4434_v19 = vsel %vm12159_vm15, %v4429_v55, %v4433_v42 }
 0x28b   : > { %v5124_v62 = vpop.f32.mrf.mxu0  ;;  %v4585_v30 = vunpack.c.l.b16 %v4434_v19  ;;  %v4447_v42 = vrot.slane %v4445_v5, 5  ;;  %v4159_v5 = vld [vmem:[#allocation2 + $0xa8] sm:$0xf] }
 0x28c   : > { %v5235_v51 = vadd.f32 %v13314_v16, %v5199_v61  ;;  %v4156_v61 = vld [vmem:[#allocation2 + $0x9c] sm:$0xf] }
 0x28d   : > { %v4436_v45 = vshrl.u32 %v4156_v61, 16 }
 0x28e   : > { %11252 = vmatmul.msk.bf16.gmra.mxu0 %vm1594_vm3, %v5031_v8  ;;  %v5299_v8 = vmul.f32 0.01, %v5235_v51  ;;  %vm5267_vm0 = vcmp.gt.f32.partialorder %v5235_v51, 0.0 }
 0x28f   : > { %v4695_v50 = vpop.f32.mrf.mxu3  ;;  %v4438_v2 = vrot.slane %v4436_v45, 4 }
 0x290   : > { %v4774_v15 = vadd.f32 %v4695_v50, %v12973_v11  ;;  %v13325_v11 = vpop.f32.mrf.mxu2  ;;  %v4439_v50 = vshll.u32 %v4156_v61, 16  ;;  %v5331_v57 = vsel %vm5267_vm0, %v5235_v51, %v5299_v8  ;;  %v11214_v51 = vrot.slane %v4816_v43, 9 }
 0x291   : > { %v4951_v8 = vrot.slane %v4158_v41, 5 }
 0x292   : > { %v5200_v35 = vadd.f32 %v5121_v63, %v4774_v15  ;;  %v4424_v63 = vsel %vm12159_vm15, %v4419_v54, %v4423_v6  ;;  %v4449_v15 = vshrl.u32 %v4157_v46, 16  ;;  %v4441_v55 = vrot.slane %v4439_v50, 5 }
 0x293   : > { %v5126_v27 = vpop.f32.mrf.mxu0  ;;  %v4584_v54 = vunpack.c.l.b16 %v4424_v63  ;;  %v4949_v45 = vsel %vm12106_vm12, %v11214_v51, %v4948_v17 }
 0x294   : > { %v5236_v32 = vadd.f32 %v13314_v16, %v5200_v35  ;;  %11196 = vmatmul.msk.bf16.gmra.mxu3 %vm1594_vm3, %v4605_v0  ;;  %v5032_v35 = vpack.c.b16 %v5011_v56, %v5010_v47  ;;  %v4451_v61 = vrot.slane %v4449_v15, 4  ;;  %v4442_v56 = vor.u32 %v4441_v55, %v4438_v2 }
 0x296   : > { %vm5268_vm9 = vcmp.gt.f32.partialorder %v5236_v32, 0.0  ;;  %v5300_v28 = vmul.f32 0.01, %v5236_v32 }
 0x297   : > { %v4698_v26 = vpop.f32.mrf.mxu3 }
 0x298   : > { %v5332_v10 = vsel %vm5268_vm9, %v5236_v32, %v5300_v28  ;;  %v4775_v59 = vadd.f32 %v4698_v26, %v12984_v24  ;;  %v4950_v24 = vrot.slane %v4948_v17, 4  ;;  %v13334_v32 = vpop.f32.mrf.mxu2  ;;  %v4606_v28 = vpack.c.b16 %v4585_v30, %v4584_v54 }
 0x299   : > { %v5363_v0 = vpack.c.bf16 %v5332_v10, %v5331_v57  ;;  %v4452_v26 = vor.u32 %v4451_v61, %v4447_v42  ;;  %v4460_v17 = vshrl.u32 %v4159_v5, 16 }
 0x29a   : > { %v5201_v38 = vadd.f32 %v5124_v62, %v4775_v59  ;;  %v4455_v62 = vshll.u32 %v4158_v41, 16  ;;  %v4952_v43 = vsel %vm12106_vm12, %v4950_v24, %v4951_v8  ;;  %v5012_v41 = vunpack.c.l.b16 %v4949_v45 }
 0x29b   : > { %11263 = vmatmul.msk.bf16.vlgmr.msra.gmra.mxu1 %vm5391_vm4, %v5363_v0  ;;  %v5129_v6 = vpop.f32.mrf.mxu0  ;;  %v4453_v59 = vrot.slane %v4452_v26, 4 }
 0x29c   : > { %v5237_v47 = vadd.f32 %v13314_v16, %v5201_v38  ;;  %v4443_v38 = vrot.slane %v4442_v56, 4  ;;  %v4457_v15 = vrot.slane %v4455_v62, 5  ;;  %v4462_v56 = vrot.slane %v4460_v17, 4 }
 0x29e   : > { %11253 = vmatmul.msk.bf16.gmra.mxu0 %vm1594_vm3, %v5032_v35  ;;  %v5301_v57 = vmul.f32 0.01, %v5237_v47  ;;  %vm5269_vm11 = vcmp.gt.f32.partialorder %v5237_v47, 0.0  ;;  %v4463_v35 = vshll.u32 %v4159_v5, 16 }
 0x29f   : > { %v4700_v46 = vpop.f32.mrf.mxu3 }
 0x2a0   : > { %v4776_v63 = vadd.f32 %v4700_v46, %v13000_v22  ;;  %v4160_v22 = vld [vmem:[#allocation2 + $0xac] sm:$0xf]  ;;  %v5333_v61 = vsel %vm5269_vm11, %v5237_v47, %v5301_v57  ;;  %v13345_v24 = vpop.f32.mrf.mxu2  ;;  %v4448_v46 = vsel %vm12159_vm15, %v4443_v38, %v4447_v42  ;;  %v4465_v26 = vrot.slane %v4463_v35, 5 }
 0x2a1   : > { %v4469_v30 = vshll.u32 %v4160_v22, 16  ;;  %v4473_v2 = vshrl.u32 %v4160_v22, 16  ;;  %v4955_v47 = vrot.slane %v4160_v22, 5  ;;  %v4586_v5 = vunpack.c.l.b16 %v4448_v46 }
 0x2a2   : > { %v5202_v19 = vadd.f32 %v5126_v27, %v4776_v63  ;;  %v5013_v27 = vunpack.c.l.b16 %v4952_v43  ;;  %v4466_v42 = vor.u32 %v4465_v26, %v4462_v56  ;;  %v4163_v26 = vld [vmem:[#allocation2 + $0xb8] sm:$0xf] }
 0x2a3   : > { %v5131_v50 = vpop.f32.mrf.mxu0  ;;  %v4471_v45 = vrot.slane %v4469_v30, 5 }
 0x2a4   : > { %v5238_v10 = vadd.f32 %v13314_v16, %v5202_v19  ;;  %11197 = vmatmul.msk.bf16.gmra.mxu3 %vm1594_vm3, %v4606_v28  ;;  %v4458_v28 = vsel %vm12159_vm15, %v4453_v59, %v4457_v15  ;;  %v5033_v63 = vpack.c.b16 %v5013_v27, %v5012_v41  ;;  %v4161_v19 = vld [vmem:[#allocation2 + $0xb0] sm:$0x1]  ;;  %v4957_v41 = vrot.slane %v4955_v47, 4 }
 0x2a5   : > { %v4587_v57 = vunpack.c.l.b16 %v4458_v28  ;;  %v4479_v38 = vshll.u32 %v4161_v19, 16  ;;  %v4958_v27 = vrot.slane %v4161_v19, 5  ;;  %v4467_v22 = vrot.slane %v4466_v42, 4 }
 0x2a6   : > { %vm5270_vm13 = vcmp.gt.f32.partialorder %v5238_v10, 0.0  ;;  %v5302_v0 = vmul.f32 0.01, %v5238_v10 }
 0x2a7   : > { %v4703_v54 = vpop.f32.mrf.mxu3 }
 0x2a8   : > { %v4777_v55 = vadd.f32 %v4703_v54, %v13014_v1  ;;  %v5334_v51 = vsel %vm5270_vm13, %v5238_v10, %v5302_v0  ;;  %v4475_v1 = vrot.slane %v4473_v2, 4  ;;  %v4817_v10 = vld [vmem:[#allocation2 + $0xa8] sm:$0xe]  ;;  %v4607_v54 = vpack.c.b16 %v4587_v57, %v4586_v5 }
 0x2a9   : > { %v5364_v8 = vpack.c.bf16 %v5334_v51, %v5333_v61  ;;  %v11215_v15 = vrot.slane %v4817_v10, 9  ;;  %v4481_v61 = vrot.slane %v4479_v38, 5 }
 0x2aa   : > { %v5203_v43 = vadd.f32 %v5129_v6, %v4777_v55  ;;  %v4476_v59 = vor.u32 %v4475_v1, %v4471_v45  ;;  %v13355_v6 = vpop.f32.mrf.mxu2  ;;  %v4472_v1 = vsel %vm12159_vm15, %v4467_v22, %v4471_v45  ;;  %v4818_v45 = vld [vmem:[#allocation2 + $0xb4] sm:$0xe] }
 0x2ab   : > { %11264 = vmatmul.msk.bf16.gmra.mxu1 %vm5391_vm4, %v5364_v8  ;;  %v5134_v62 = vpop.f32.mrf.mxu0  ;;  %v4956_v51 = vsel %vm12106_vm12, %v11215_v15, %v4955_v47  ;;  %v4959_v8 = vsel %vm12106_vm12, %v4957_v41, %v4958_v27  ;;  %v4962_v41 = vrot.slane %v4163_v26, 5 }
 0x2ac   : > { %v5239_v17 = vadd.f32 %v13314_v16, %v5203_v43  ;;  %v4477_v55 = vrot.slane %v4476_v59, 4  ;;  %v5015_v56 = vunpack.c.l.b16 %v4959_v8  ;;  %v4497_v59 = vshrl.u32 %v4163_v26, 16 }
 0x2ad   : > { %v11216_v8 = vrot.slane %v4818_v45, 9 }
 0x2ae   : > { %11254 = vmatmul.msk.bf16.gmra.mxu0 %vm1594_vm3, %v5033_v63  ;;  %v5303_v46 = vmul.f32 0.01, %v5239_v17  ;;  %vm5271_vm14 = vcmp.gt.f32.partialorder %v5239_v17, 0.0  ;;  %v5014_v63 = vunpack.c.l.b16 %v4956_v51  ;;  %v4482_v47 = vsel %vm12159_vm15, %v4477_v55, %v4481_v61 }
 0x2af   : > { %v4705_v0 = vpop.f32.mrf.mxu3  ;;  %v4499_v51 = vrot.slane %v4497_v59, 4  ;;  %v4166_v59 = vld [vmem:[#allocation2 + $0xc4] sm:$0xf] }
 0x2b0   : > { %v4778_v35 = vadd.f32 %v4705_v0, %v13031_v53  ;;  %v4162_v53 = vld [vmem:[#allocation2 + $0xb4] sm:$0xf]  ;;  %v5335_v57 = vsel %vm5271_vm14, %v5239_v17, %v5303_v46  ;;  %v4493_v0 = vshll.u32 %v4163_v26, 16  ;;  %v5034_v15 = vpack.c.b16 %v5015_v56, %v5014_v63 }
 0x2b1   : > { %v4484_v43 = vshrl.u32 %v4162_v53, 16  ;;  %v4487_v42 = vshll.u32 %v4162_v53, 16  ;;  %v4964_v46 = vrot.slane %v4962_v41, 4 }
 0x2b2   : > { %v5204_v30 = vadd.f32 %v5131_v50, %v4778_v35  ;;  %v4588_v35 = vunpack.c.l.b16 %v4472_v1  ;;  %v13369_v61 = vpop.f32.mrf.mxu2  ;;  %v4495_v17 = vrot.slane %v4493_v0, 5 }
 0x2b3   : > { %v5136_v2 = vpop.f32.mrf.mxu0  ;;  %v4486_v22 = vrot.slane %v4484_v43, 4  ;;  %v4489_v55 = vrot.slane %v4487_v42, 5 }
 0x2b4   : > { %v5240_v28 = vadd.f32 %v13314_v16, %v5204_v30  ;;  %11198 = vmatmul.msk.bf16.gmra.mxu3 %vm1594_vm3, %v4607_v54  ;;  %v4589_v54 = vunpack.c.l.b16 %v4482_v47  ;;  %v4963_v47 = vsel %vm12106_vm12, %v11216_v8, %v4962_v41 }
 0x2b5   : > { %v4490_v26 = vor.u32 %v4489_v55, %v4486_v22  ;;  %v4521_v22 = vshrl.u32 %v4166_v59, 16 }
 0x2b6   : > { %vm5272_vm1 = vcmp.gt.f32.partialorder %v5240_v28, 0.0  ;;  %v5304_v50 = vmul.f32 0.01, %v5240_v28 }
 0x2b7   : > { %v4708_v19 = vpop.f32.mrf.mxu3 }
 0x2b8   : > { %v4779_v5 = vadd.f32 %v4708_v19, %v13049_v7  ;;  %v5336_v10 = vsel %vm5272_vm1, %v5240_v28, %v5304_v50  ;;  %v4164_v7 = vld [vmem:[#allocation2 + $0xbc] sm:$0x1]  ;;  %v4608_v50 = vpack.c.b16 %v4589_v54, %v4588_v35  ;;  %v4500_v19 = vor.u32 %v4499_v51, %v4495_v17 }
 0x2b9   : > { %v5365_v38 = vpack.c.bf16 %v5336_v10, %v5335_v57  ;;  %v4965_v28 = vrot.slane %v4164_v7, 5  ;;  %v4165_v10 = vld [vmem:[#allocation2 + $0xc0] sm:$0xf] }
 0x2ba   : > { %v5205_v30 = vadd.f32 %v5134_v62, %v4779_v5  ;;  %v4503_v62 = vshll.u32 %v4164_v7, 16  ;;  %v4099_v5 = vadd.f32 %v13325_v11, %v13085_v23  ;;  %v4508_v54 = vshrl.u32 %v4165_v10, 16 }
 0x2bb   : > { %11265 = vmatmul.msk.bf16.gmra.mxu1 %vm5391_vm4, %v5365_v38  ;;  %v5139_v27 = vpop.f32.mrf.mxu0  ;;  %v4966_v43 = vsel %vm12106_vm12, %v4964_v46, %v4965_v28  ;;  %v4511_v45 = vshll.u32 %v4165_v10, 16  ;;  %v4517_v11 = vshll.u32 %v4166_v59, 16 }
 0x2bc   : > { %v5241_v63 = vadd.f32 %v13314_v16, %v5205_v30  ;;  %v4505_v0 = vrot.slane %v4503_v62, 5  ;;  %v5017_v41 = vunpack.c.l.b16 %v4966_v43  ;;  %v13382_v30 = vpop.f32.mrf.mxu2 }
 0x2be   : > { %11255 = vmatmul.msk.bf16.gmra.mxu0 %vm1594_vm3, %v5034_v15  ;;  %v5305_v42 = vmul.f32 0.01, %v5241_v63  ;;  %vm5273_vm7 = vcmp.gt.f32.partialorder %v5241_v63, 0.0  ;;  %v5016_v15 = vunpack.c.l.b16 %v4963_v47  ;;  %v4969_v47 = vrot.slane %v4166_v59, 5 }
 0x2bf   : > { %v4710_v53 = vpop.f32.mrf.mxu3 }
 0x2c0   : > { %v4780_v56 = vadd.f32 %v4710_v53, %v13071_v9  ;;  %v4491_v9 = vrot.slane %v4490_v26, 4  ;;  %v5337_v7 = vsel %vm5273_vm7, %v5241_v63, %v5305_v42  ;;  %v3785_v53 = vadd.f32 %v13033_v29, %v13092_v13 }
 0x2c1   : > { %v4513_v26 = vrot.slane %v4511_v45, 5  ;;  %v4523_v63 = vrot.slane %v4521_v22, 4 }
 0x2c2   : > { %v5206_v1 = vadd.f32 %v5136_v2, %v4780_v56  ;;  %v4501_v2 = vrot.slane %v4500_v19, 4  ;;  %v4496_v46 = vsel %vm12159_vm15, %v4491_v9, %v4495_v17  ;;  %v4510_v56 = vrot.slane %v4508_v54, 4  ;;  %v4167_v19 = vld [vmem:[#allocation2 + $0xc8] sm:$0x1]  ;;  %v4819_v17 = vld [vmem:[#allocation2 + $0xc0] sm:$0xe] }
 0x2c3   : > { %v5141_v57 = vpop.f32.mrf.mxu0  ;;  %v4100_v42 = vadd.f32 %v13334_v32, %v3785_v53  ;;  %v4527_v29 = vshll.u32 %v4167_v19, 16 }
 0x2c4   : > { %v5242_v38 = vadd.f32 %v13314_v16, %v5206_v1  ;;  %11199 = vmatmul.msk.bf16.gmra.mxu3 %vm1594_vm3, %v4608_v50  ;;  %v4506_v28 = vsel %vm12159_vm15, %v4501_v2, %v4505_v0  ;;  %v5035_v50 = vpack.c.b16 %v5017_v41, %v5016_v15  ;;  %v4519_v1 = vrot.slane %v4517_v11, 5  ;;  %v13394_v59 = vpop.f32.mrf.mxu2 }
 0x2c5   : > { %v4591_v10 = vunpack.c.l.b16 %v4506_v28  ;;  %v11217_v0 = vrot.slane %v4819_v17, 9  ;;  %v4971_v2 = vrot.slane %v4969_v47, 4  ;;  %v4972_v15 = vrot.slane %v4167_v19, 5 }
 0x2c6   : > { %vm5274_vm0 = vcmp.gt.f32.partialorder %v5242_v38, 0.0  ;;  %v5306_v35 = vmul.f32 0.01, %v5242_v38  ;;  %v4524_v9 = vor.u32 %v4523_v63, %v4519_v1  ;;  %v4529_v32 = vrot.slane %v4527_v29, 5 }
 0x2c7   : > { %v4713_v23 = vpop.f32.mrf.mxu3  ;;  %v4970_v22 = vsel %vm12106_vm12, %v11217_v0, %v4969_v47 }
 0x2c8   : > { %v4781_v55 = vadd.f32 %v4713_v23, %v4099_v5  ;;  %v5338_v51 = vsel %vm5274_vm0, %v5242_v38, %v5306_v35  ;;  %v4590_v5 = vunpack.c.l.b16 %v4496_v46  ;;  %v4514_v38 = vor.u32 %v4513_v26, %v4510_v56 }
 0x2c9   : > { %v5366_v8 = vpack.c.bf16 %v5338_v51, %v5337_v7  ;;  %v4525_v11 = vrot.slane %v4524_v9, 4  ;;  %v5018_v28 = vunpack.c.l.b16 %v4970_v22 }
 0x2ca   : > { %v5207_v43 = vadd.f32 %v5139_v27, %v4781_v55  ;;  %v4609_v54 = vpack.c.b16 %v4591_v10, %v4590_v5  ;;  %v4515_v45 = vrot.slane %v4514_v38, 4  ;;  %v4973_v55 = vsel %vm12106_vm12, %v4971_v2, %v4972_v15  ;;  %v4820_v15 = vld [vmem:[#allocation2 + $0xcc] sm:$0xe] }
 0x2cb   : > { %11266 = vmatmul.msk.bf16.gmra.mxu1 %vm5391_vm4, %v5366_v8  ;;  %v5144_v62 = vpop.f32.mrf.mxu0  ;;  %v4101_v8 = vadd.f32 %v13345_v24, %v13108_v37  ;;  %v5019_v53 = vunpack.c.l.b16 %v4973_v55  ;;  %v4530_v19 = vsel %vm12159_vm15, %v4525_v11, %v4529_v32  ;;  %v11218_v11 = vrot.slane %v4820_v15, 9 }
 0x2cc   : > { %v5243_v41 = vadd.f32 %v13314_v16, %v5207_v43  ;;  %v4520_v26 = vsel %vm12159_vm15, %v4515_v45, %v4519_v1  ;;  %v13410_v29 = vpop.f32.mrf.mxu2  ;;  %v4593_v2 = vunpack.c.l.b16 %v4530_v19 }
 0x2cd   : > { %v5036_v38 = vpack.c.b16 %v5019_v53, %v5018_v28  ;;  %v4592_v0 = vunpack.c.l.b16 %v4520_v26 }
 0x2ce   : > { %11256 = vmatmul.msk.bf16.gmra.mxu0 %vm1594_vm3, %v5035_v50  ;;  %v5307_v7 = vmul.f32 0.01, %v5243_v41  ;;  %vm5275_vm9 = vcmp.gt.f32.partialorder %v5243_v41, 0.0  ;;  %v4169_v50 = vld [vmem:[#allocation2 + $0xd0] sm:$0xf] }
 0x2cf   : > { %v4715_v13 = vpop.f32.mrf.mxu3  ;;  %v4541_v24 = vshll.u32 %v4169_v50, 16  ;;  %v4545_v17 = vshrl.u32 %v4169_v50, 16 }
 0x2d0   : > { %v4782_v35 = vadd.f32 %v4715_v13, %v4100_v42  ;;  %v5339_v47 = vsel %vm5275_vm9, %v5243_v41, %v5307_v7  ;;  %v3787_v42 = vadd.f32 %v13073_v52, %v13115_v21  ;;  %v4976_v13 = vrot.slane %v4169_v50, 5  ;;  %v4170_v52 = vld [vmem:[#allocation2 + $0xd4] sm:$0x1] }
 0x2d1   : > { %v4979_v22 = vrot.slane %v4170_v52, 5  ;;  %v4103_v50 = vadd.f32 %v13369_v61, %v13127_v25 }
 0x2d2   : > { %v5208_v27 = vadd.f32 %v5141_v57, %v4782_v35  ;;  %v4168_v57 = vld [vmem:[#allocation2 + $0xcc] sm:$0xf]  ;;  %v4102_v45 = vadd.f32 %v13355_v6, %v3787_v42  ;;  %v4978_v32 = vrot.slane %v4976_v13, 4  ;;  %v4977_v53 = vsel %vm12106_vm12, %v11218_v11, %v4976_v13 }
 0x2d3   : > { %v5146_v23 = vpop.f32.mrf.mxu0  ;;  %v4532_v5 = vshrl.u32 %v4168_v57, 16  ;;  %v4535_v37 = vshll.u32 %v4168_v57, 16  ;;  %v4551_v57 = vshll.u32 %v4170_v52, 16  ;;  %v3789_v13 = vadd.f32 %v13099_v36, %v13133_v20 }
 0x2d4   : > { %v5244_v51 = vadd.f32 %v13314_v16, %v5208_v27  ;;  %11200 = vmatmul.msk.bf16.gmra.mxu3 %vm1594_vm3, %v4609_v54  ;;  %v4543_v54 = vrot.slane %v4541_v24, 5  ;;  %v4547_v27 = vrot.slane %v4545_v17, 4  ;;  %v4980_v6 = vsel %vm12106_vm12, %v4978_v32, %v4979_v22  ;;  %v4051_v19 = vpop.f32.mrf.mxu2 }
 0x2d5   : > { %v4534_v41 = vrot.slane %v4532_v5, 4  ;;  %v4537_v35 = vrot.slane %v4535_v37, 5  ;;  %v5020_v5 = vunpack.c.l.b16 %v4977_v53 }
 0x2d6   : > { %vm5276_vm11 = vcmp.gt.f32.partialorder %v5244_v51, 0.0  ;;  %v5308_v46 = vmul.f32 0.01, %v5244_v51 }
 0x2d7   : > { %v4718_v56 = vpop.f32.mrf.mxu3 }
 0x2d8   : > { %v4783_v63 = vadd.f32 %v4718_v56, %v4101_v8  ;;  %v5340_v43 = vsel %vm5276_vm11, %v5244_v51, %v5308_v46  ;;  %v4538_v51 = vor.u32 %v4537_v35, %v4534_v41  ;;  %v4548_v8 = vor.u32 %v4547_v27, %v4543_v54 }
 0x2d9   : > { %v5367_v10 = vpack.c.bf16 %v5340_v43, %v5339_v47  ;;  %v4104_v35 = vadd.f32 %v13382_v30, %v3789_v13 }
 0x2da   : > { %v5209_v9 = vadd.f32 %v5144_v62, %v4783_v63  ;;  %v4610_v62 = vpack.c.b16 %v4593_v2, %v4592_v0  ;;  %v4539_v63 = vrot.slane %v4538_v51, 4  ;;  %v4549_v47 = vrot.slane %v4548_v8, 4 }
 0x2db   : > { %11267 = vmatmul.msk.bf16.gmra.mxu1 %vm5391_vm4, %v5367_v10  ;;  %v5149_v1 = vpop.f32.mrf.mxu0  ;;  %v5021_v10 = vunpack.c.l.b16 %v4980_v6 }
 0x2dc   : > { %v5245_v55 = vadd.f32 %v13314_v16, %v5209_v9  ;;  %v4544_v25 = vsel %vm12159_vm15, %v4539_v63, %v4543_v54  ;;  %v4053_v27 = vpop.f32.mrf.mxu2 }
 0x2dd   : > { %v5037_v9 = vpack.c.b16 %v5021_v10, %v5020_v5  ;;  %v4594_v15 = vunpack.c.l.b16 %v4544_v25 }
 0x2de   : > { %11257 = vmatmul.msk.bf16.gmra.mxu0 %vm1594_vm3, %v5036_v38  ;;  %v5309_v56 = vmul.f32 0.01, %v5245_v55  ;;  %vm5277_vm13 = vcmp.gt.f32.partialorder %v5245_v55, 0.0 }
 0x2df   : > { %v4720_v21 = vpop.f32.mrf.mxu3 }
 0x2e0   : > { %v4784_v7 = vadd.f32 %v4720_v21, %v4102_v45  ;;  %v5341_v17 = vsel %vm5277_vm13, %v5245_v55, %v5309_v56 }
 0x2e2   : > { %v5210_v46 = vadd.f32 %v5146_v23, %v4784_v7  ;;  %v4553_v23 = vrot.slane %v4551_v57, 5  ;;  %v3791_v57 = vadd.f32 %v13122_v39, %v13154_v49 }
 0x2e3   : > { %v5151_v28 = vpop.f32.mrf.mxu0 }
 0x2e4   : > { %v5246_v26 = vadd.f32 %v13314_v16, %v5210_v46  ;;  %11201 = vmatmul.msk.bf16.gmra.mxu3 %vm1594_vm3, %v4610_v62  ;;  %v4554_v61 = vsel %vm12159_vm15, %v4549_v47, %v4553_v23  ;;  %v4056_v51 = vpop.f32.mrf.mxu2  ;;  %v4106_v53 = vadd.f32 %v13410_v29, %v3791_v57  ;;  %v4107_v23 = vadd.f32 %v4051_v19, %v13169_v33 }
 0x2e5   : > { %v4595_v41 = vunpack.c.l.b16 %v4554_v61  ;;  %v13448_v61 = vpop.f32.mrf.mxu1 }
 0x2e6   : > { %vm5278_vm14 = vcmp.gt.f32.partialorder %v5246_v26, 0.0  ;;  %v5310_v43 = vmul.f32 0.01, %v5246_v26 }
 0x2e7   : > { %v4723_v37 = vpop.f32.mrf.mxu3  ;;  %v4611_v21 = vpack.c.b16 %v4595_v41, %v4594_v15 }
 0x2e8   : > { %v4785_v24 = vadd.f32 %v4723_v37, %v4103_v50  ;;  %v5342_v42 = vsel %vm5278_vm14, %v5246_v26, %v5310_v43  ;;  %v3793_v37 = vadd.f32 %v13140_v3, %v13173_v34  ;;  %v4109_v3 = vadd.f32 %v4056_v51, %v13188_v4 }
 0x2e9   : > { %v5368_v38 = vpack.c.bf16 %v5342_v42, %v5341_v17 }
 0x2ea   : > { %v5211_v2 = vadd.f32 %v5149_v1, %v4785_v24  ;;  %v4105_v1 = vadd.f32 %v13394_v59, %v13148_v60 }
 0x2eb   : > { %11268 = vmatmul.msk.bf16.gmra.mxu1 %vm5391_vm4, %v5368_v38  ;;  %v5154_v0 = vpop.f32.mrf.mxu0  ;;  %v4108_v38 = vadd.f32 %v4053_v27, %v3793_v37 }
 0x2ec   : > { %v5247_v54 = vadd.f32 %v13314_v16, %v5211_v2  ;;  %v4058_v56 = vpop.f32.mrf.mxu2 }
 0x2ee   : > { %11258 = vmatmul.msk.bf16.gmra.mxu0 %vm1594_vm3, %v5037_v9  ;;  %v5311_v36 = vmul.f32 0.01, %v5247_v54  ;;  %vm5279_vm1 = vcmp.gt.f32.partialorder %v5247_v54, 0.0 }
 0x2ef   : > { %v4725_v45 = vpop.f32.mrf.mxu3 }
 0x2f0   : > { %v4786_v52 = vadd.f32 %v4725_v45, %v4104_v35  ;;  %v5343_v7 = vsel %vm5279_vm1, %v5247_v54, %v5311_v36 }
 0x2f2   : > { %v5212_v11 = vadd.f32 %v5151_v28, %v4786_v52  ;;  %v13456_v52 = vld [vmem:[%s15660_s5] ss:$0 sm:$0xff] }
 0x2f3   : > { %v5156_v32 = vpop.f32.mrf.mxu0 }
 0x2f4   : > { %v5248_v20 = vadd.f32 %v13314_v16, %v5212_v11  ;;  %11202 = vmatmul.msk.bf16.gmra.mxu3 %vm1594_vm3, %v4611_v21  ;;  %v4061_v42 = vpop.f32.mrf.mxu2  ;;  %v3795_v11 = vadd.f32 %v13166_v14, %v13194_v58 }
 0x2f6   : > { %vm5280_vm7 = vcmp.gt.f32.partialorder %v5248_v20, 0.0  ;;  %v5312_v30 = vmul.f32 0.01, %v5248_v20 }
 0x2f7   : > { %v4728_v22 = vpop.f32.mrf.mxu3 }
 0x2f8   : > { %v4787_v55 = vadd.f32 %v4728_v22, %v4105_v1  ;;  %v5344_v62 = vsel %vm5280_vm7, %v5248_v20, %v5312_v30  ;;  %v4110_v20 = vadd.f32 %v4058_v56, %v3795_v11 }
 0x2f9   : > { %v5369_v8 = vpack.c.bf16 %v5344_v62, %v5343_v7 }
 0x2fa   : > { %v5213_v28 = vadd.f32 %v5154_v0, %v4787_v55 }
 0x2fb   : > { %11269 = vmatmul.msk.bf16.gmra.mxu1 %vm5391_vm4, %v5369_v8  ;;  %v5159_v46 = vpop.f32.mrf.mxu0 }
 0x2fc   : > { %v5249_v60 = vadd.f32 %v13314_v16, %v5213_v28  ;;  %v4063_v15 = vpop.f32.mrf.mxu2 }
 0x2fe   : > { %v5313_v63 = vmul.f32 0.01, %v5249_v60  ;;  %vm5281_vm3 = vcmp.gt.f32.partialorder %v5249_v60, 0.0 }
 0x2ff   : > { %v4730_v6 = vpop.f32.mrf.mxu3 }
 0x300   : > { %v4788_v59 = vadd.f32 %v4730_v6, %v4106_v53  ;;  %v5345_v5 = vsel %vm5281_vm3, %v5249_v60, %v5313_v63 }
 0x302   : > { %v5214_v50 = vadd.f32 %v5156_v32, %v4788_v59 }
 0x303   : > { %v5161_v26 = vpop.f32.mrf.mxu0 }
 0x304   : > { %v5250_v47 = vadd.f32 %v13314_v16, %v5214_v50  ;;  %v4066_v7 = vpop.f32.mrf.mxu2  ;;  %v4111_v50 = vadd.f32 %v4061_v42, %v13207_v40 }
 0x306   : > { %vm5282_vm0 = vcmp.gt.f32.partialorder %v5250_v47, 0.0  ;;  %v5314_v39 = vmul.f32 0.01, %v5250_v47 }
 0x307   : > { %v4733_v49 = vpop.f32.mrf.mxu3 }
 0x308   : > { %v4789_v43 = vadd.f32 %v4733_v49, %v4107_v23  ;;  %v5346_v10 = vsel %vm5282_vm0, %v5250_v47, %v5314_v39 }
 0x309   : > { %v5370_v29 = vpack.c.bf16 %v5346_v10, %v5345_v5  ;;  %v3797_v10 = vadd.f32 %v13191_v12, %v13211_v44 }
 0x30a   : > { %v5215_v17 = vadd.f32 %v5159_v46, %v4789_v43 }
 0x30b   : > { %11270 = vmatmul.msk.bf16.gmra.mxu1 %vm5391_vm4, %v5370_v29  ;;  %v5164_v24 = vpop.f32.mrf.mxu0 }
 0x30c   : > { %v5251_v33 = vadd.f32 %v13314_v16, %v5215_v17  ;;  %v4068_v29 = vpop.f32.mrf.mxu2 }
 0x30e   : > { %v5315_v0 = vmul.f32 0.01, %v5251_v33  ;;  %vm5283_vm9 = vcmp.gt.f32.partialorder %v5251_v33, 0.0 }
 0x30f   : > { %v4735_v25 = vpop.f32.mrf.mxu3 }
 0x310   : > { %v4790_v19 = vadd.f32 %v4735_v25, %v4108_v38  ;;  %v5347_v45 = vsel %vm5283_vm9, %v5251_v33, %v5315_v0  ;;  %v4112_v25 = vadd.f32 %v4063_v15, %v3797_v10 }
 0x312   : > { %v5216_v13 = vadd.f32 %v5161_v26, %v4790_v19 }
 0x313   : > { %v5166_v9 = vpop.f32.mrf.mxu0 }
 0x314   : > { %v5252_v2 = vadd.f32 %v13314_v16, %v5216_v13 }
 0x316   : > { %vm5284_vm11 = vcmp.gt.f32.partialorder %v5252_v2, 0.0  ;;  %v5316_v34 = vmul.f32 0.01, %v5252_v2 }
 0x317   : > { %v4738_v41 = vpop.f32.mrf.mxu3 }
 0x318   : > { %v4791_v35 = vadd.f32 %v4738_v41, %v4109_v3  ;;  %v5449_v27 = vpop.f32.mrf.mxu1  ;;  %v5348_v54 = vsel %vm5284_vm11, %v5252_v2, %v5316_v34 }
 0x319   : > { %v5371_v21 = vpack.c.bf16 %v5348_v54, %v5347_v45  ;;  %v5450_v36 = vadd.f32 %v13456_v52, %v5449_v27  ;;  %v4071_v45 = vpop.f32.mrf.mxu2  ;;  %v4113_v54 = vadd.f32 %v4066_v7, %v13225_v31 }
 0x31a   : > { %v5217_v32 = vadd.f32 %v5164_v24, %v4791_v35 }
 0x31b   : > { %11271 = vmatmul.msk.bf16.gmra.mxu1 %vm5391_vm4, %v5371_v21  ;;  %v5169_v4 = vpop.f32.mrf.mxu0  ;;  %v5806_v62 = vmul.f32 %v5450_v36, %v5450_v36  ;;  %v5736_v57 = vsel %vm5391_vm4, %v5450_v36, 0.0 }
 0x31c   : > { %v5253_v30 = vadd.f32 %v13314_v16, %v5217_v32 }
 0x31d   : > { %v5838_v60 = vsel %vm5391_vm4, %v5806_v62, 0.0  ;;  %v15724_v62 = vld [vmem:[#allocation17_spill] sm:$0xff] }
 0x31e   : > { %v5317_v28 = vmul.f32 0.01, %v5253_v30  ;;  %vm5285_vm13 = vcmp.gt.f32.partialorder %v5253_v30, 0.0 }
 0x31f   : > { %v4740_v1 = vpop.f32.mrf.mxu3 }
 0x320   : > { %v4792_v22 = vadd.f32 %v4740_v1, %v4110_v20  ;;  %v5451_v55 = vpop.f32.mrf.mxu1  ;;  %v5349_v39 = vsel %vm5285_vm13, %v5253_v30, %v5317_v28 }
 0x321   : > { %v5452_v51 = vadd.f32 %v13456_v52, %v5451_v55  ;;  %v15723_v55 = vld [vmem:[#allocation14_spill] sm:$0xff] }
 0x322   : > { %v5218_v8 = vadd.f32 %v5166_v9, %v4792_v22 }
 0x323   : > { %v5737_v14 = vsel %vm5391_vm4, %v5452_v51, 0.0  ;;  %v5807_v58 = vmul.f32 %v5452_v51, %v5452_v51  ;;  %v5171_v46 = vpop.f32.mrf.mxu0  ;;  %v3799_v51 = vadd.f32 %v15724_v62, %v15723_v55 }
 0x324   : > { %v5254_v53 = vadd.f32 %v13314_v16, %v5218_v8  ;;  %v5738_v6 = vadd.f32 %v5737_v14, %v5736_v57 }
 0x325   : > { %v5839_v59 = vsel %vm5391_vm4, %v5807_v58, 0.0 }
 0x326   : > { %vm5286_vm14 = vcmp.gt.f32.partialorder %v5254_v53, 0.0  ;;  %v5318_v56 = vmul.f32 0.01, %v5254_v53  ;;  %v5840_v26 = vadd.f32 %v5839_v59, %v5838_v60 }
 0x327   : > { %v4743_v63 = vpop.f32.mrf.mxu3 }
 0x328   : > { %v4793_v47 = vadd.f32 %v4743_v63, %v4111_v50  ;;  %v5454_v23 = vpop.f32.mrf.mxu1  ;;  %v5350_v49 = vsel %vm5286_vm14, %v5254_v53, %v5318_v56  ;;  %v11822_v53 = vld [vmem:[%s15661_s6 + $0x8] sm:$0xff] }
 0x329   : > { %v5455_v43 = vadd.f32 %v13456_v52, %v5454_v23  ;;  %v5372_v5 = vpack.c.bf16 %v5350_v49, %v5349_v39  ;;  %7021 = vmatpush.bf16.msra.mxu2 %v11822_v53 }
 0x32a   : > { %v5219_v17 = vadd.f32 %v5169_v4, %v4793_v47 }
 0x32b   : > { %v5739_v37 = vsel %vm5391_vm4, %v5455_v43, 0.0  ;;  %v5808_v24 = vmul.f32 %v5455_v43, %v5455_v43  ;;  %11272 = vmatmul.msk.bf16.gmra.mxu1 %vm5391_vm4, %v5372_v5  ;;  %v5174_v40 = vpop.f32.mrf.mxu0 }
 0x32c   : > { %v5740_v42 = vadd.f32 %v5739_v37, %v5738_v6  ;;  %v5255_v13 = vadd.f32 %v13314_v16, %v5219_v17  ;;  %v4073_v6 = vpop.f32.mrf.mxu2 }
 0x32d   : > { %v5841_v38 = vsel %vm5391_vm4, %v5808_v24, 0.0 }
 0x32e   : > { %v5842_v33 = vadd.f32 %v5841_v38, %v5840_v26  ;;  %v5319_v41 = vmul.f32 0.01, %v5255_v13  ;;  %vm5287_vm1 = vcmp.gt.f32.partialorder %v5255_v13, 0.0 }
 0x32f   : > { %v4745_v19 = vpop.f32.mrf.mxu3 }
 0x330   : > { %v4794_v9 = vadd.f32 %v4745_v19, %v4112_v25  ;;  %v5456_v0 = vpop.f32.mrf.mxu1  ;;  %v5351_v20 = vsel %vm5287_vm1, %v5255_v13, %v5319_v41 }
 0x331   : > { %v5457_v12 = vadd.f32 %v13456_v52, %v5456_v0  ;;  %v15727_v0 = vld [vmem:[#allocation18_spill] sm:$0xff] }
 0x332   : > { %v5220_v44 = vadd.f32 %v5171_v46, %v4794_v9  ;;  %v4114_v46 = vadd.f32 %v4068_v29, %v3799_v51  ;;  %v15725_v29 = vld [vmem:[#allocation8_spill] sm:$0xff] }
 0x333   : > { %v5741_v2 = vsel %vm5391_vm4, %v5457_v12, 0.0  ;;  %v5809_v3 = vmul.f32 %v5457_v12, %v5457_v12  ;;  %v5176_v34 = vpop.f32.mrf.mxu0  ;;  %v4115_v37 = vadd.f32 %v4071_v45, %v15725_v29 }
 0x334   : > { %v5256_v35 = vadd.f32 %v13314_v16, %v5220_v44  ;;  %v5742_v27 = vadd.f32 %v5741_v2, %v5740_v42  ;;  %v4076_v19 = vpop.f32.mrf.mxu2 }
 0x335   : > { %v5843_v15 = vsel %vm5391_vm4, %v5809_v3, 0.0 }
 0x336   : > { %vm5288_vm7 = vcmp.gt.f32.partialorder %v5256_v35, 0.0  ;;  %v5320_v21 = vmul.f32 0.01, %v5256_v35  ;;  %v5844_v11 = vadd.f32 %v5843_v15, %v5842_v33 }
 0x337   : > { %v4748_v4 = vpop.f32.mrf.mxu3 }
 0x338   : > { %v4795_v32 = vadd.f32 %v4748_v4, %v4113_v54  ;;  %v5459_v36 = vpop.f32.mrf.mxu1  ;;  %v5352_v1 = vsel %vm5288_vm7, %v5256_v35, %v5320_v21  ;;  %v13506_v54 = vld [vmem:[%s15658_s3] ss:$0 sm:$0xff] }
 0x339   : > { %v5460_v30 = vadd.f32 %v13456_v52, %v5459_v36  ;;  %v5373_v22 = vpack.c.bf16 %v5352_v1, %v5351_v20 }
 0x33a   : > { %v5221_v7 = vadd.f32 %v5174_v40, %v4795_v32 }
 0x33b   : > { %v5743_v8 = vsel %vm5391_vm4, %v5460_v30, 0.0  ;;  %v5810_v57 = vmul.f32 %v5460_v30, %v5460_v30  ;;  %11273 = vmatmul.msk.bf16.gmra.mxu1 %vm5391_vm4, %v5373_v22  ;;  %v5179_v31 = vpop.f32.mrf.mxu0 }
 0x33c   : > { %v5744_v14 = vadd.f32 %v5743_v8, %v5742_v27  ;;  %v5257_v59 = vadd.f32 %v13314_v16, %v5221_v7  ;;  %v4078_v20 = vpop.f32.mrf.mxu2  ;;  %v15728_v8 = vld [vmem:[#allocation19_spill] sm:$0xff] }
 0x33d   : > { %v5845_v58 = vsel %vm5391_vm4, %v5810_v57, 0.0  ;;  %v4117_v57 = vadd.f32 %v4076_v19, %v15728_v8 }
 0x33e   : > { %v5846_v28 = vadd.f32 %v5845_v58, %v5844_v11  ;;  %v5321_v39 = vmul.f32 0.01, %v5257_v59  ;;  %vm5289_vm3 = vcmp.gt.f32.partialorder %v5257_v59, 0.0 }
 0x33f   : > { %v4750_v60 = vpop.f32.mrf.mxu3 }
 0x340   : > { %v4796_v50 = vadd.f32 %v4750_v60, %v4114_v46  ;;  %v5461_v56 = vpop.f32.mrf.mxu1  ;;  %v5353_v25 = vsel %vm5289_vm3, %v5257_v59, %v5321_v39 }
 0x341   : > { %v5462_v26 = vadd.f32 %v13456_v52, %v5461_v56  ;;  %v15730_v56 = vld [vmem:[#allocation10_spill] sm:$0xff] }
 0x342   : > { %v5222_v63 = vadd.f32 %v5176_v34, %v4796_v50  ;;  %v15729_v50 = vld [vmem:[#allocation11_spill] sm:$0xff] }
 0x343   : > { %v5745_v47 = vsel %vm5391_vm4, %v5462_v26, 0.0  ;;  %v5811_v23 = vmul.f32 %v5462_v26, %v5462_v26  ;;  %v5181_v10 = vpop.f32.mrf.mxu0  ;;  %v3803_v26 = vadd.f32 %v15730_v56, %v15729_v50 }
 0x344   : > { %v5258_v49 = vadd.f32 %v13314_v16, %v5222_v63  ;;  %v5746_v43 = vadd.f32 %v5745_v47, %v5744_v14  ;;  %v15726_v16 = vld [vmem:[#allocation9_spill] sm:$0xff] }
 0x345   : > { %v5847_v5 = vsel %vm5391_vm4, %v5811_v23, 0.0  ;;  %v3801_v12 = vadd.f32 %v15727_v0, %v15726_v16 }
 0x346   : > { %vm5290_vm0 = vcmp.gt.f32.partialorder %v5258_v49, 0.0  ;;  %v5322_v24 = vmul.f32 0.01, %v5258_v49  ;;  %v5848_v40 = vadd.f32 %v5847_v5, %v5846_v28  ;;  %v4118_v5 = vadd.f32 %v4078_v20, %v3803_v26 }
 0x347   : > { %v4753_v17 = vpop.f32.mrf.mxu3  ;;  %v4116_v35 = vadd.f32 %v4073_v6, %v3801_v12 }
 0x348   : > { %v4797_v42 = vadd.f32 %v4753_v17, %v4115_v37  ;;  %v5464_v38 = vpop.f32.mrf.mxu1  ;;  %v5354_v33 = vsel %vm5290_vm0, %v5258_v49, %v5322_v24  ;;  %v4081_v49 = vpop.f32.mrf.mxu2 }
 0x349   : > { %v5465_v13 = vadd.f32 %v13456_v52, %v5464_v38  ;;  %v5374_v9 = vpack.c.bf16 %v5354_v33, %v5353_v25 }
 0x34a   : > { %v5223_v3 = vadd.f32 %v5179_v31, %v4797_v42 }
 0x34b   : > { %v5747_v44 = vsel %vm5391_vm4, %v5465_v13, 0.0  ;;  %v5812_v2 = vmul.f32 %v5465_v13, %v5465_v13  ;;  %11274 = vmatmul.msk.bf16.gmra.mxu1 %vm5391_vm4, %v5374_v9  ;;  %v5184_v15 = vpop.f32.mrf.mxu0  ;;  %v15731_v13 = vld [vmem:[#allocation12_spill] sm:$0xff] }
 0x34c   : > { %v5748_v34 = vadd.f32 %v5747_v44, %v5746_v43  ;;  %v5259_v21 = vadd.f32 %v13506_v54, %v5223_v3  ;;  %v4119_v9 = vadd.f32 %v4081_v49, %v15731_v13 }
 0x34d   : > { %v5849_v41 = vsel %vm5391_vm4, %v5812_v2, 0.0 }
 0x34e   : > { %v5850_v27 = vadd.f32 %v5849_v41, %v5848_v40  ;;  %v5323_v22 = vmul.f32 0.01, %v5259_v21  ;;  %vm5291_vm9 = vcmp.gt.f32.partialorder %v5259_v21, 0.0 }
 0x34f   : > { %v4755_v45 = vpop.f32.mrf.mxu3 }
 0x350   : > { %v4798_v11 = vadd.f32 %v4755_v45, %v4116_v35  ;;  %v5466_v4 = vpop.f32.mrf.mxu1  ;;  %v5355_v28 = vsel %vm5291_vm9, %v5259_v21, %v5323_v22  ;;  %v4083_v0 = vpop.f32.mrf.mxu2  ;;  %v15733_v21 = vld [vmem:[#allocation20_spill] sm:$0xff] }
 0x351   : > { %v5467_v32 = vadd.f32 %v13456_v52, %v5466_v4 }
 0x352   : > { %v5224_v36 = vadd.f32 %v5181_v10, %v4798_v11 }
 0x353   : > { %v5749_v1 = vsel %vm5391_vm4, %v5467_v32, 0.0  ;;  %v5813_v30 = vmul.f32 %v5467_v32, %v5467_v32  ;;  %v5186_v60 = vpop.f32.mrf.mxu0 }
 0x354   : > { %v5260_v55 = vadd.f32 %v13506_v54, %v5224_v36  ;;  %v5750_v62 = vadd.f32 %v5749_v1, %v5748_v34 }
 0x355   : > { %v5851_v51 = vsel %vm5391_vm4, %v5813_v30, 0.0 }
 0x356   : > { %vm5292_vm11 = vcmp.gt.f32.partialorder %v5260_v55, 0.0  ;;  %v5324_v31 = vmul.f32 0.01, %v5260_v55  ;;  %v5852_v7 = vadd.f32 %v5851_v51, %v5850_v27 }
 0x357   : > { %v4758_v14 = vpop.f32.mrf.mxu3 }
 0x358   : > { %v4799_v58 = vadd.f32 %v4758_v14, %v4117_v57  ;;  %v5469_v46 = vpop.f32.mrf.mxu1  ;;  %v5356_v53 = vsel %vm5292_vm11, %v5260_v55, %v5324_v31  ;;  %v4086_v14 = vpop.f32.mrf.mxu2 }
 0x359   : > { %v5470_v6 = vadd.f32 %v13456_v52, %v5469_v46  ;;  %v5375_v59 = vpack.c.bf16 %v5356_v53, %v5355_v28 }
 0x35a   : > { %v5225_v23 = vadd.f32 %v5184_v15, %v4799_v58  ;;  %v15732_v15 = vld [vmem:[#allocation13_spill] sm:$0xff] }
 0x35b   : > { %v5751_v63 = vsel %vm5391_vm4, %v5470_v6, 0.0  ;;  %v5814_v47 = vmul.f32 %v5470_v6, %v5470_v6  ;;  %11275 = vmatmul.msk.bf16.gmra.mxu1 %vm5391_vm4, %v5375_v59  ;;  %v5189_v38 = vpop.f32.mrf.mxu0  ;;  %v3805_v11 = vadd.f32 %v15733_v21, %v15732_v15 }
 0x35c   : > { %v5752_v39 = vadd.f32 %v5751_v63, %v5750_v62  ;;  %v5261_v37 = vadd.f32 %v13506_v54, %v5225_v23 }
 0x35d   : > { %v5853_v43 = vsel %vm5391_vm4, %v5814_v47, 0.0  ;;  %v4120_v62 = vadd.f32 %v4083_v0, %v3805_v11 }
 0x35e   : > { %v5854_v10 = vadd.f32 %v5853_v43, %v5852_v7  ;;  %v5325_v25 = vmul.f32 0.01, %v5261_v37  ;;  %vm5293_vm13 = vcmp.gt.f32.partialorder %v5261_v37, 0.0 }
 0x35f   : > { %v4760_v29 = vpop.f32.mrf.mxu3 }
 0x360   : > { %v4800_v24 = vadd.f32 %v4760_v29, %v4118_v5  ;;  %v5471_v40 = vpop.f32.mrf.mxu1  ;;  %v5357_v34 = vsel %vm5293_vm13, %v5261_v37, %v5325_v25  ;;  %v15735_v29 = vld [vmem:[#allocation16_spill] sm:$0xff] }
 0x361   : > { %v5472_v17 = vadd.f32 %v13456_v52, %v5471_v40  ;;  %v3807_v37 = vadd.f32 %v13448_v61, %v15735_v29  ;;  %v4088_v40 = vpop.f32.mrf.mxu2 }
 0x362   : > { %v5226_v42 = vadd.f32 %v5186_v60, %v4800_v24  ;;  %v15734_v60 = vld [vmem:[#allocation15_spill] sm:$0xff] }
 0x363   : > { %v5815_v19 = vmul.f32 %v5472_v17, %v5472_v17  ;;  %v5753_v12 = vsel %vm5391_vm4, %v5472_v17, 0.0  ;;  %v5191_v55 = vpop.f32.mrf.mxu0  ;;  %v4121_v59 = vadd.f32 %v4086_v14, %v15734_v60  ;;  %v4122_v13 = vadd.f32 %v4088_v40, %v3807_v37 }
 0x364   : > { %v5262_v33 = vadd.f32 %v13506_v54, %v5226_v42  ;;  %v5754_v4 = vadd.f32 %v5753_v12, %v5752_v39 }
 0x365   : > { %v5855_v35 = vsel %vm5391_vm4, %v5815_v19, 0.0 }
 0x366   : > { %vm5294_vm14 = vcmp.gt.f32.partialorder %v5262_v33, 0.0  ;;  %v5326_v16 = vmul.f32 0.01, %v5262_v33  ;;  %v5856_v20 = vadd.f32 %v5855_v35, %v5854_v10 }
 0x367   : > { %v4763_v44 = vpop.f32.mrf.mxu3 }
 0x368   : > { %v4801_v2 = vadd.f32 %v4763_v44, %v4119_v9  ;;  %v5474_v3 = vpop.f32.mrf.mxu1  ;;  %v5358_v41 = vsel %vm5294_vm14, %v5262_v33, %v5326_v16 }
 0x369   : > { %v5475_v27 = vadd.f32 %v13456_v52, %v5474_v3  ;;  %v5376_v45 = vpack.c.bf16 %v5358_v41, %v5357_v34 }
 0x36a   : > { %v5227_v1 = vadd.f32 %v5189_v38, %v4801_v2 }
 0x36b   : > { %v5755_v32 = vsel %vm5391_vm4, %v5475_v27, 0.0  ;;  %v5816_v36 = vmul.f32 %v5475_v27, %v5475_v27  ;;  %11276 = vmatmul.msk.bf16.gmra.mxu1 %vm5391_vm4, %v5376_v45  ;;  %v5194_v26 = vpop.f32.mrf.mxu0 }
 0x36c   : > { %v5756_v30 = vadd.f32 %v5755_v32, %v5754_v4  ;;  %v5263_v57 = vadd.f32 %v13506_v54, %v5227_v1 }
 0x36d   : > { %v5857_v22 = vsel %vm5391_vm4, %v5816_v36, 0.0 }
 0x36e   : > { %v5858_v51 = vadd.f32 %v5857_v22, %v5856_v20  ;;  %v5327_v28 = vmul.f32 0.01, %v5263_v57  ;;  %vm5295_vm1 = vcmp.gt.f32.partialorder %v5263_v57, 0.0 }
 0x36f   : > { %v4765_v8 = vpop.f32.mrf.mxu3 }
 0x370   : > { %v4802_v31 = vadd.f32 %v4765_v8, %v4120_v62  ;;  %v5476_v7 = vpop.f32.mrf.mxu1  ;;  %v5359_v39 = vsel %vm5295_vm1, %v5263_v57, %v5327_v28 }
 0x371   : > { %v5477_v58 = vadd.f32 %v13456_v52, %v5476_v7 }
 0x372   : > { %v5228_v46 = vadd.f32 %v5191_v55, %v4802_v31 }
 0x373   : > { %v5817_v6 = vmul.f32 %v5477_v58, %v5477_v58  ;;  %v5757_v56 = vsel %vm5391_vm4, %v5477_v58, 0.0  ;;  %v5196_v61 = vpop.f32.mrf.mxu0 }
 0x374   : > { %v5264_v53 = vadd.f32 %v13506_v54, %v5228_v46  ;;  %v5758_v24 = vadd.f32 %v5757_v56, %v5756_v30 }
 0x375   : > { %v5859_v43 = vsel %vm5391_vm4, %v5817_v6, 0.0 }
 0x376   : > { %vm5296_vm7 = vcmp.gt.f32.partialorder %v5264_v53, 0.0  ;;  %v5328_v50 = vmul.f32 0.01, %v5264_v53  ;;  %v5860_v38 = vadd.f32 %v5859_v43, %v5858_v51 }
 0x377   : > { %v4768_v63 = vpop.f32.mrf.mxu3 }
 0x378   : > { %v4803_v47 = vadd.f32 %v4768_v63, %v4121_v59  ;;  %v5479_v23 = vpop.f32.mrf.mxu1  ;;  %v5360_v49 = vsel %vm5296_vm7, %v5264_v53, %v5328_v50  ;;  %vm13905_vm7 = vmand %vm493_vm2, %vm443_vm5 }
 0x379   : > { %v5480_v5 = vadd.f32 %v13456_v52, %v5479_v23  ;;  %v5377_v10 = vpack.c.bf16 %v5360_v49, %v5359_v39 }
 0x37a   : > { %v5229_v25 = vadd.f32 %v5194_v26, %v4803_v47 }
 0x37b   : > { %v5759_v17 = vsel %vm5391_vm4, %v5480_v5, 0.0  ;;  %v5818_v42 = vmul.f32 %v5480_v5, %v5480_v5  ;;  %11277 = vmatmul.msk.bf16.gmra.mxu1 %vm5391_vm4, %v5377_v10 }
 0x37c   : > { %v5760_v33 = vadd.f32 %v5759_v17, %v5758_v24  ;;  %v5265_v0 = vadd.f32 %v13506_v54, %v5229_v25 }
 0x37d   : > { %v5861_v19 = vsel %vm5391_vm4, %v5818_v42, 0.0 }
 0x37e   : > { %v5862_v9 = vadd.f32 %v5861_v19, %v5860_v38  ;;  %v5329_v34 = vmul.f32 0.01, %v5265_v0  ;;  %vm5297_vm3 = vcmp.gt.f32.partialorder %v5265_v0, 0.0 }
 0x37f   : > { %v4770_v16 = vpop.f32.mrf.mxu3 }
 0x380   : > { %v4804_v12 = vadd.f32 %v4770_v16, %v4122_v13  ;;  %v5481_v44 = vpop.f32.mrf.mxu1  ;;  %v5361_v21 = vsel %vm5297_vm3, %v5265_v0, %v5329_v34  ;;  %v13576_v16 = vld [vmem:[%s13571_s12] sm:$0xff]  ;;  %v13579_v0 = vld [vmem:[%s13571_s12 + $0x8] sm:$0xff] }
 0x381   : > { %v5482_v2 = vadd.f32 %v13456_v52, %v5481_v44  ;;  %v5562_v44 = vsel %vm5391_vm4, %v13579_v0, 0.0 }
 0x382   : > { %v5230_v3 = vadd.f32 %v5196_v61, %v4804_v12  ;;  %v5561_v12 = vsel %vm5391_vm4, %v13576_v16, 0.0  ;;  %v5631_v61 = vmul.f32 %v13576_v16, %v13576_v16 }
 0x383   : > { %v5819_v35 = vmul.f32 %v5482_v2, %v5482_v2  ;;  %v5761_v45 = vsel %vm5391_vm4, %v5482_v2, 0.0  ;;  %v5632_v2 = vmul.f32 %v13579_v0, %v13579_v0 }
 0x384   : > { %v5266_v41 = vadd.f32 %v13506_v54, %v5230_v3  ;;  %v5762_v20 = vadd.f32 %v5761_v45, %v5760_v33 }
 0x385   : > { %v5863_v4 = vsel %vm5391_vm4, %v5819_v35, 0.0  ;;  %v13591_v35 = vld [vmem:[%s13571_s12 + $0x10] sm:$0xff] }
 0x386   : > { %vm5298_vm0 = vcmp.gt.f32.partialorder %v5266_v41, 0.0  ;;  %v5330_v27 = vmul.f32 0.01, %v5266_v41  ;;  %v5864_v54 = vadd.f32 %v5863_v4, %v5862_v9 }
 0x388   : > { %v5484_v15 = vpop.f32.mrf.mxu1  ;;  %v5362_v11 = vsel %vm5298_vm0, %v5266_v41, %v5330_v27  ;;  %v5563_v27 = vadd.f32 %v5562_v44, %v5561_v12  ;;  %v5539_v44 = vld [vmem:[%s13571_s12 + $0x50] sm:$0xff] }
 0x389   : > { %v5485_v32 = vadd.f32 %v13456_v52, %v5484_v15  ;;  %v5378_v36 = vpack.c.bf16 %v5362_v11, %v5361_v21  ;;  %v5564_v15 = vsel %vm5391_vm4, %v13591_v35, 0.0  ;;  %v5633_v21 = vmul.f32 %v13591_v35, %v13591_v35 }
 0x38a   : > { %v5663_v11 = vsel %vm5391_vm4, %v5631_v61, 0.0 }
 0x38b   : > { %v5763_v1 = vsel %vm5391_vm4, %v5485_v32, 0.0  ;;  %v5820_v30 = vmul.f32 %v5485_v32, %v5485_v32  ;;  %11278 = vmatmul.msk.bf16.gmra.mxu1 %vm5391_vm4, %v5378_v36  ;;  %v13602_v32 = vld [vmem:[%s13571_s12 + $0x18] sm:$0xff]  ;;  %v5565_v36 = vadd.f32 %v5564_v15, %v5563_v27 }
 0x38c   : > { %v5764_v22 = vadd.f32 %v5763_v1, %v5762_v20  ;;  %v5664_v20 = vsel %vm5391_vm4, %v5632_v2, 0.0  ;;  %v5580_v2 = vsel %vm5391_vm4, %v5539_v44, 0.0 }
 0x38d   : > { %v5865_v55 = vsel %vm5391_vm4, %v5820_v30, 0.0  ;;  %v5566_v30 = vsel %vm5391_vm4, %v13602_v32, 0.0 }
 0x38e   : > { %v5866_v62 = vadd.f32 %v5865_v55, %v5864_v54  ;;  %v5634_v54 = vmul.f32 %v13602_v32, %v13602_v32  ;;  %v13612_v55 = vld [vmem:[%s13571_s12 + $0x20] sm:$0xff] }
 0x390   : > { %v5486_v51 = vpop.f32.mrf.mxu1 }
 0x391   : > { %v5487_v8 = vadd.f32 %v13456_v52, %v5486_v51  ;;  %v5666_v51 = vsel %vm5391_vm4, %v5633_v21, 0.0 }
 0x393   : > { %v5821_v57 = vmul.f32 %v5487_v8, %v5487_v8  ;;  %v5765_v31 = vsel %vm5391_vm4, %v5487_v8, 0.0 }
 0x394   : > { %v5766_v46 = vadd.f32 %v5765_v31, %v5764_v22  ;;  %v5665_v22 = vadd.f32 %v5664_v20, %v5663_v11  ;;  %v5635_v31 = vmul.f32 %v13612_v55, %v13612_v55 }
 0x395   : > { %v5867_v14 = vsel %vm5391_vm4, %v5821_v57, 0.0  ;;  %v5568_v57 = vsel %vm5391_vm4, %v13612_v55, 0.0 }
 0x396   : > { %v5868_v6 = vadd.f32 %v5867_v14, %v5866_v62  ;;  %v5567_v62 = vadd.f32 %v5566_v30, %v5565_v36  ;;  %v5668_v14 = vsel %vm5391_vm4, %v5634_v54, 0.0  ;;  %v5541_v36 = vld [vmem:[%s13571_s12 + $0x60] sm:$0xff] }
 0x398   : > { %v5489_v7 = vpop.f32.mrf.mxu1 }
 0x399   : > { %v5490_v58 = vadd.f32 %v13456_v52, %v5489_v7  ;;  %v5667_v7 = vadd.f32 %v5666_v51, %v5665_v22  ;;  %v5584_v22 = vsel %vm5391_vm4, %v5541_v36, 0.0 }
 0x39b   : > { %v5767_v28 = vsel %vm5391_vm4, %v5490_v58, 0.0  ;;  %v5822_v53 = vmul.f32 %v5490_v58, %v5490_v58  ;;  %v13623_v58 = vld [vmem:[%s13571_s12 + $0x28] sm:$0xff] }
 0x39c   : > { %v5768_v60 = vadd.f32 %v5767_v28, %v5766_v46  ;;  %v5569_v46 = vadd.f32 %v5568_v57, %v5567_v62  ;;  %v5570_v28 = vsel %vm5391_vm4, %v13623_v58, 0.0  ;;  %v5643_v62 = vmul.f32 %v5541_v36, %v5541_v36 }
 0x39d   : > { %v5869_v59 = vsel %vm5391_vm4, %v5822_v53, 0.0  ;;  %v5636_v53 = vmul.f32 %v13623_v58, %v13623_v58 }
 0x39e   : > { %v5870_v50 = vadd.f32 %v5869_v59, %v5868_v6  ;;  %v5669_v6 = vadd.f32 %v5668_v14, %v5667_v7  ;;  %v13631_v59 = vld [vmem:[%s13571_s12 + $0x30] sm:$0xff] }
 0x3a0   : > { %v5491_v56 = vpop.f32.mrf.mxu1 }
 0x3a1   : > { %v5492_v26 = vadd.f32 %v13456_v52, %v5491_v56  ;;  %v5572_v56 = vsel %vm5391_vm4, %v13631_v59, 0.0 }
 0x3a3   : > { %v5823_v63 = vmul.f32 %v5492_v26, %v5492_v26  ;;  %v5769_v47 = vsel %vm5391_vm4, %v5492_v26, 0.0  ;;  %v5637_v26 = vmul.f32 %v13631_v59, %v13631_v59 }
 0x3a4   : > { %v5770_v43 = vadd.f32 %v5769_v47, %v5768_v60  ;;  %v5670_v60 = vsel %vm5391_vm4, %v5635_v31, 0.0  ;;  %v13638_v47 = vld [vmem:[%s13571_s12 + $0x38] sm:$0xff]  ;;  %v5542_v31 = vld [vmem:[%s13571_s12 + $0x68] sm:$0xff] }
 0x3a5   : > { %v5871_v39 = vsel %vm5391_vm4, %v5823_v63, 0.0  ;;  %v5671_v63 = vadd.f32 %v5670_v60, %v5669_v6  ;;  %v5586_v14 = vsel %vm5391_vm4, %v5542_v31, 0.0  ;;  %v5543_v6 = vld [vmem:[%s13571_s12 + $0x70] sm:$0xff] }
 0x3a6   : > { %v5872_v29 = vadd.f32 %v5871_v39, %v5870_v50  ;;  %v5571_v50 = vadd.f32 %v5570_v28, %v5569_v46  ;;  %v5672_v39 = vsel %vm5391_vm4, %v5636_v53, 0.0  ;;  %v5644_v46 = vmul.f32 %v5542_v31, %v5542_v31 }
 0x3a7   : > { %v5686_v53 = vsel %vm5391_vm4, %v5643_v62, 0.0 }
 0x3a8   : > { %v5494_v23 = vpop.f32.mrf.mxu1 }
 0x3a9   : > { %v5495_v49 = vadd.f32 %v13456_v52, %v5494_v23  ;;  %v5573_v23 = vadd.f32 %v5572_v56, %v5571_v50  ;;  %v5588_v50 = vsel %vm5391_vm4, %v5543_v6, 0.0  ;;  %v5645_v56 = vmul.f32 %v5543_v6, %v5543_v6 }
 0x3ab   : > { %v5771_v5 = vsel %vm5391_vm4, %v5495_v49, 0.0  ;;  %v5824_v10 = vmul.f32 %v5495_v49, %v5495_v49  ;;  %v5574_v49 = vsel %vm5391_vm4, %v13638_v47, 0.0 }
 0x3ac   : > { %v5772_v37 = vadd.f32 %v5771_v5, %v5770_v43  ;;  %v5638_v43 = vmul.f32 %v13638_v47, %v13638_v47  ;;  %v5673_v5 = vadd.f32 %v5672_v39, %v5671_v63  ;;  %v5544_v63 = vld [vmem:[%s13571_s12 + $0x78] sm:$0xff]  ;;  %v5688_v39 = vsel %vm5391_vm4, %v5644_v46, 0.0  ;;  %v5550_v46 = vld [vmem:[%s13571_s12 + $0xa8] sm:$0xff] }
 0x3ad   : > { %v5873_v24 = vsel %vm5391_vm4, %v5824_v10, 0.0  ;;  %v13646_v10 = vld [vmem:[%s13571_s12 + $0x40] sm:$0xff]  ;;  %v5652_v6 = vmul.f32 %v5550_v46, %v5550_v46 }
 0x3ae   : > { %v5874_v40 = vadd.f32 %v5873_v24, %v5872_v29  ;;  %v5575_v29 = vadd.f32 %v5574_v49, %v5573_v23  ;;  %v5590_v49 = vsel %vm5391_vm4, %v5544_v63, 0.0 }
 0x3b0   : > { %v5496_v17 = vpop.f32.mrf.mxu1 }
 0x3b1   : > { %v5497_v42 = vadd.f32 %v13456_v52, %v5496_v17  ;;  %v5639_v17 = vmul.f32 %v13646_v10, %v13646_v10 }
 0x3b3   : > { %v5825_v38 = vmul.f32 %v5497_v42, %v5497_v42  ;;  %v5773_v25 = vsel %vm5391_vm4, %v5497_v42, 0.0  ;;  %v5678_v12 = vsel %vm5391_vm4, %v5639_v17, 0.0 }
 0x3b4   : > { %v5774_v13 = vadd.f32 %v5773_v25, %v5772_v37  ;;  %v5674_v37 = vsel %vm5391_vm4, %v5637_v26, 0.0  ;;  %v5538_v25 = vld [vmem:[%s13571_s12 + $0x48] sm:$0xff] }
 0x3b5   : > { %v5875_v33 = vsel %vm5391_vm4, %v5825_v38, 0.0  ;;  %v5675_v42 = vadd.f32 %v5674_v37, %v5673_v5  ;;  %v5676_v38 = vsel %vm5391_vm4, %v5638_v43, 0.0  ;;  %v5646_v43 = vmul.f32 %v5544_v63, %v5544_v63 }
 0x3b6   : > { %v5876_v3 = vadd.f32 %v5875_v33, %v5874_v40  ;;  %v5576_v40 = vsel %vm5391_vm4, %v13646_v10, 0.0 }
 0x3b7   : > { %v5577_v33 = vadd.f32 %v5576_v40, %v5575_v29  ;;  %v5545_v29 = vld [vmem:[%s13571_s12 + $0x80] sm:$0xff]  ;;  %v5690_v40 = vsel %vm5391_vm4, %v5645_v56, 0.0  ;;  %v5551_v56 = vld [vmem:[%s13571_s12 + $0xb0] sm:$0xff] }
 0x3b8   : > { %v5499_v19 = vpop.f32.mrf.mxu1  ;;  %v5604_v63 = vsel %vm5391_vm4, %v5551_v56, 0.0 }
 0x3b9   : > { %v5500_v9 = vadd.f32 %v13456_v52, %v5499_v19  ;;  %v5578_v19 = vsel %vm5391_vm4, %v5538_v25, 0.0 }
 0x3ba   : > { %v5579_v61 = vadd.f32 %v5578_v19, %v5577_v33  ;;  %v5692_v33 = vsel %vm5391_vm4, %v5646_v43, 0.0  ;;  %v5546_v19 = vld [vmem:[%s13571_s12 + $0x88] sm:$0xff] }
 0x3bb   : > { %v5775_v34 = vsel %vm5391_vm4, %v5500_v9, 0.0  ;;  %v5826_v41 = vmul.f32 %v5500_v9, %v5500_v9  ;;  %v5677_v9 = vadd.f32 %v5676_v38, %v5675_v42  ;;  %v5592_v42 = vsel %vm5391_vm4, %v5545_v29, 0.0 }
 0x3bc   : > { %v13593_v45 = vadd.f32 %v5775_v34, %v5774_v13  ;;  %v5640_v13 = vmul.f32 %v5538_v25, %v5538_v25  ;;  %v5581_v27 = vadd.f32 %v5580_v2, %v5579_v61  ;;  %v5647_v38 = vmul.f32 %v5545_v29, %v5545_v29  ;;  %v5547_v2 = vld [vmem:[%s13571_s12 + $0x90] sm:$0xff] }
 0x3bd   : > { %v5877_v4 = vsel %vm5391_vm4, %v5826_v41, 0.0  ;;  %v5679_v34 = vadd.f32 %v5678_v12, %v5677_v9  ;;  %v5540_v41 = vld [vmem:[%s13571_s12 + $0x58] sm:$0xff]  ;;  %v5594_v9 = vsel %vm5391_vm4, %v5546_v19, 0.0  ;;  %v5648_v12 = vmul.f32 %v5546_v19, %v5546_v19 }
 0x3be   : > { %v13605_v1 = vadd.f32 %v5877_v4, %v5876_v3  ;;  %v5641_v3 = vmul.f32 %v5539_v44, %v5539_v44  ;;  %v5680_v15 = vsel %vm5391_vm4, %v5640_v13, 0.0  ;;  %v5582_v21 = vsel %vm5391_vm4, %v5540_v41, 0.0 }
 0x3bf   : > { %v5642_v11 = vmul.f32 %v5540_v41, %v5540_v41  ;;  %v5681_v4 = vadd.f32 %v5680_v15, %v5679_v34  ;;  %v5583_v20 = vadd.f32 %v5582_v21, %v5581_v27  ;;  %v5694_v61 = vsel %vm5391_vm4, %v5647_v38, 0.0  ;;  %v5548_v15 = vld [vmem:[%s13571_s12 + $0x98] sm:$0xff] }
 0x3c0   : > { %v13615_v8 = vpop.f32.mrf.mxu1  ;;  %v5682_v30 = vsel %vm5391_vm4, %v5641_v3, 0.0  ;;  %v5596_v34 = vsel %vm5391_vm4, %v5547_v2, 0.0  ;;  %v5649_v41 = vmul.f32 %v5547_v2, %v5547_v2  ;;  %v5650_v36 = vmul.f32 %v5548_v15, %v5548_v15 }
 0x3c1   : > { %v5683_v51 = vadd.f32 %v5682_v30, %v5681_v4  ;;  %v5684_v57 = vsel %vm5391_vm4, %v5642_v11, 0.0  ;;  %v5585_v7 = vadd.f32 %v5584_v22, %v5583_v20  ;;  %v5696_v11 = vsel %vm5391_vm4, %v5648_v12, 0.0  ;;  %v5549_v30 = vld [vmem:[%s13571_s12 + $0xa0] sm:$0xff] }
 0x3c2   : > { %v5598_v4 = vsel %vm5391_vm4, %v5548_v15, 0.0  ;;  %v5698_v62 = vsel %vm5391_vm4, %v5649_v41, 0.0  ;;  %v5651_v31 = vmul.f32 %v5549_v30, %v5549_v30 }
 0x3c3   : > { %v5685_v28 = vadd.f32 %v5684_v57, %v5683_v51  ;;  %v5587_v60 = vadd.f32 %v5586_v14, %v5585_v7  ;;  %v5600_v57 = vsel %vm5391_vm4, %v5549_v30, 0.0  ;;  %v5700_v14 = vsel %vm5391_vm4, %v5650_v36, 0.0 }
 0x3c5   : > { %v5687_v26 = vadd.f32 %v5686_v53, %v5685_v28  ;;  %v5589_v23 = vadd.f32 %v5588_v50, %v5587_v60  ;;  %v5602_v53 = vsel %vm5391_vm4, %v5550_v46, 0.0  ;;  %v5702_v50 = vsel %vm5391_vm4, %v5651_v31, 0.0 }
 0x3c7   : > { %v5689_v5 = vadd.f32 %v5688_v39, %v5687_v26  ;;  %v5591_v37 = vadd.f32 %v5590_v49, %v5589_v23  ;;  %v5653_v23 = vmul.f32 %v5551_v56, %v5551_v56  ;;  %v5552_v49 = vld [vmem:[%s13571_s12 + $0xb8] sm:$0xff] }
 0x3c8   : > { %v13649_v24 = vpop.f32.mrf.mxu1  ;;  %v5606_v29 = vsel %vm5391_vm4, %v5552_v49, 0.0 }
 0x3c9   : > { %v5691_v25 = vadd.f32 %v5690_v40, %v5689_v5  ;;  %v5593_v13 = vadd.f32 %v5592_v42, %v5591_v37  ;;  %v5704_v5 = vsel %vm5391_vm4, %v5652_v6, 0.0  ;;  %v5654_v37 = vmul.f32 %v5552_v49, %v5552_v49  ;;  %v5553_v42 = vld [vmem:[%s13571_s12 + $0xc0] sm:$0xff]  ;;  %v13741_v49 = vld [vmem:[%s13571_s12 + $0xf0] sm:$0xff] }
 0x3ca   : > { %v5608_v19 = vsel %vm5391_vm4, %v5553_v42, 0.0  ;;  %v5557_v6 = vld [vmem:[%s13571_s12 + $0xe0] sm:$0xff] }
 0x3cb   : > { %v5693_v44 = vadd.f32 %v5692_v33, %v5691_v25  ;;  %v5595_v3 = vadd.f32 %v5594_v9, %v5593_v13  ;;  %v5706_v25 = vsel %vm5391_vm4, %v5653_v23, 0.0  ;;  %v5655_v13 = vmul.f32 %v5553_v42, %v5553_v42 }
 0x3cc   : > { %v5708_v12 = vsel %vm5391_vm4, %v5654_v37, 0.0 }
 0x3cd   : > { %v5695_v27 = vadd.f32 %v5694_v61, %v5693_v44  ;;  %v5597_v21 = vadd.f32 %v5596_v34, %v5595_v3  ;;  %v5554_v44 = vld [vmem:[%s13571_s12 + $0xc8] sm:$0xff]  ;;  %v5710_v41 = vsel %vm5391_vm4, %v5655_v13, 0.0 }
 0x3ce   : > { %v5610_v2 = vsel %vm5391_vm4, %v5554_v44, 0.0  ;;  %v5656_v3 = vmul.f32 %v5554_v44, %v5554_v44  ;;  %v5661_v44 = vmul.f32 %v13741_v49, %v13741_v49 }
 0x3cf   : > { %v5697_v20 = vadd.f32 %v5696_v11, %v5695_v27  ;;  %v5599_v22 = vadd.f32 %v5598_v4, %v5597_v21  ;;  %v5555_v27 = vld [vmem:[%s13571_s12 + $0xd0] sm:$0xff]  ;;  %v13718_v4 = vld [vmem:[%s13571_s12 + $0xd8] sm:$0xff] }
 0x3d0   : > { %v13666_v54 = vpop.f32.mrf.mxu1  ;;  %v5612_v21 = vsel %vm5391_vm4, %v5555_v27, 0.0  ;;  %v5712_v30 = vsel %vm5391_vm4, %v5656_v3, 0.0 }
 0x3d1   : > { %v5699_v7 = vadd.f32 %v5698_v62, %v5697_v20  ;;  %v5601_v28 = vadd.f32 %v5600_v57, %v5599_v22  ;;  %v5657_v20 = vmul.f32 %v5555_v27, %v5555_v27  ;;  %v550_v22 = vld [vmem:[#allocation3 + $0xc0] sm:$0x1]  ;;  %v593_v62 = vld [vmem:[#allocation3 + $0xb0] sm:$0x1]  ;;  %v596_v57 = vld [vmem:[#allocation3 + $0xbc] sm:$0x1] }
 0x3d2   : > { %v594_v46 = vsel %vm12082_vm10, 0, %v593_v62  ;;  %v13770_v62 = vld [vmem:[%s15660_s5] ss:$0 sm:$0xff] }
 0x3d3   : > { %v5701_v60 = vadd.f32 %v5700_v14, %v5699_v7  ;;  %v5603_v26 = vadd.f32 %v5602_v53, %v5601_v28  ;;  %v551_v7 = vsel %vm12068_vm6, 0, %v550_v22  ;;  %v597_v28 = vsel %vm12082_vm10, 0, %v596_v57  ;;  %v599_v53 = vld [vmem:[#allocation3 + $0xc8] sm:$0x1]  ;;  %595 = vst [vmem:[#allocation3 + $0xb0] sm:$0x1] %v594_v46 }
 0x3d4   : > { %552 = vst [vmem:[#allocation3 + $0xc0] sm:$0x1] %v551_v7  ;;  %v600_v56 = vsel %vm12082_vm10, 0, %v599_v53 }
 0x3d5   : > { %v5703_v39 = vadd.f32 %v5702_v50, %v5701_v60  ;;  %v5605_v43 = vadd.f32 %v5604_v63, %v5603_v26  ;;  %v5658_v60 = vmul.f32 %v13718_v4, %v13718_v4  ;;  %v5614_v26 = vsel %vm5391_vm4, %v13718_v4, 0.0  ;;  %598 = vst [vmem:[#allocation3 + $0xbc] sm:$0x1] %v597_v28 }
 0x3d6   : > { %v5616_v63 = vsel %vm5391_vm4, %v5557_v6, 0.0  ;;  %601 = vst [vmem:[#allocation3 + $0xc8] sm:$0x1] %v600_v56 }
 0x3d7   : > { %v5705_v40 = vadd.f32 %v5704_v5, %v5703_v39  ;;  %v5607_v38 = vadd.f32 %v5606_v29, %v5605_v43  ;;  %v13738_v39 = vld [vmem:[%s13571_s12 + $0xe8] sm:$0xff]  ;;  %v5659_v5 = vmul.f32 %v5557_v6, %v5557_v6  ;;  %v5714_v29 = vsel %vm5391_vm4, %v5657_v20, 0.0 }
 0x3d8   : > { %v13680_v17 = vpop.f32.mrf.mxu1  ;;  %v5618_v37 = vsel %vm5391_vm4, %v13738_v39, 0.0  ;;  %v5716_v13 = vsel %vm5391_vm4, %v5658_v60, 0.0  ;;  %v5722_v20 = vsel %vm5391_vm4, %v5661_v44, 0.0 }
 0x3d9   : > { %v5707_v9 = vadd.f32 %v5706_v25, %v5705_v40  ;;  %v5609_v61 = vadd.f32 %v5608_v19, %v5607_v38  ;;  %v13747_v40 = vld [vmem:[%s13571_s12 + $0xf8] sm:$0xff]  ;;  %v5660_v38 = vmul.f32 %v13738_v39, %v13738_v39  ;;  %v5620_v25 = vsel %vm5391_vm4, %v13741_v49, 0.0 }
 0x3da   : > { %v5662_v27 = vmul.f32 %v13747_v40, %v13747_v40  ;;  %v5510_v53 = vadd.f32 %v13770_v62, %v13680_v17 }
 0x3db   : > { %v5709_v34 = vadd.f32 %v5708_v12, %v5707_v9  ;;  %v5611_v15 = vadd.f32 %v5610_v2, %v5609_v61  ;;  %v5502_v9 = vadd.f32 %v13456_v52, %v13615_v8  ;;  %v5718_v61 = vsel %vm5391_vm4, %v5659_v5, 0.0 }
 0x3dc   : > { %v5622_v2 = vsel %vm5391_vm4, %v13747_v40, 0.0  ;;  %v5724_v57 = vsel %vm5391_vm4, %v5662_v27, 0.0 }
 0x3dd   : > { %v5711_v11 = vadd.f32 %v5710_v41, %v5709_v34  ;;  %v5613_v36 = vadd.f32 %v5612_v21, %v5611_v15  ;;  %v5505_v34 = vadd.f32 %v13456_v52, %v13649_v24  ;;  %v5720_v15 = vsel %vm5391_vm4, %v5660_v38, 0.0 }
 0x3de   : > { %v5507_v52 = vadd.f32 %v13770_v62, %v13666_v54  ;;  %v5777_v46 = vsel %vm5391_vm4, %v5502_v9, 0.0  ;;  %v5830_v38 = vmul.f32 %v5510_v53, %v5510_v53 }
 0x3df   : > { %v5713_v23 = vadd.f32 %v5712_v30, %v5711_v11  ;;  %v5615_v43 = vadd.f32 %v5614_v26, %v5613_v36  ;;  %v5827_v11 = vmul.f32 %v5502_v9, %v5502_v9  ;;  %v5828_v22 = vmul.f32 %v5505_v34, %v5505_v34 }
 0x3e0   : > { %v13694_v51 = vpop.f32.mrf.mxu1  ;;  %v5779_v60 = vsel %vm5391_vm4, %v5505_v34, 0.0 }
 0x3e1   : > { %v5617_v42 = vadd.f32 %v5616_v63, %v5615_v43  ;;  %v5715_v19 = vadd.f32 %v5714_v29, %v5713_v23  ;;  %v5879_v28 = vsel %vm5391_vm4, %v5827_v11, 0.0  ;;  %v5881_v26 = vsel %vm5391_vm4, %v5828_v22, 0.0 }
 0x3e2   : > { %v5829_v63 = vmul.f32 %v5507_v52, %v5507_v52  ;;  %v5512_v54 = vadd.f32 %v13770_v62, %v13694_v51  ;;  %v5778_v43 = vadd.f32 %v5777_v46, %v13593_v45  ;;  %v5880_v5 = vadd.f32 %v5879_v28, %v13605_v1 }
 0x3e3   : > { %v5619_v12 = vadd.f32 %v5618_v37, %v5617_v42  ;;  %v5717_v3 = vadd.f32 %v5716_v13, %v5715_v19  ;;  %v5781_v42 = vsel %vm5391_vm4, %v5507_v52, 0.0  ;;  %v5783_v51 = vsel %vm5391_vm4, %v5510_v53, 0.0 }
 0x3e4   : > { %v5780_v19 = vadd.f32 %v5779_v60, %v5778_v43  ;;  %v5882_v13 = vadd.f32 %v5881_v26, %v5880_v5  ;;  %v5831_v44 = vmul.f32 %v5512_v54, %v5512_v54  ;;  %v5785_v34 = vsel %vm5391_vm4, %v5512_v54, 0.0 }
 0x3e5   : > { %v5621_v41 = vadd.f32 %v5620_v25, %v5619_v12  ;;  %v5719_v21 = vadd.f32 %v5718_v61, %v5717_v3  ;;  %v5883_v12 = vsel %vm5391_vm4, %v5829_v63, 0.0  ;;  %v5885_v3 = vsel %vm5391_vm4, %v5830_v38, 0.0 }
 0x3e6   : > { %v5782_v1 = vadd.f32 %v5781_v42, %v5780_v19  ;;  %v5884_v27 = vadd.f32 %v5883_v12, %v5882_v13  ;;  %v5887_v11 = vsel %vm5391_vm4, %v5831_v44, 0.0 }
 0x3e7   : > { %v5623_v36 = vadd.f32 %v5622_v2, %v5621_v41  ;;  %v5721_v30 = vadd.f32 %v5720_v15, %v5719_v21 }
 0x3e8   : > { %v13708_v33 = vpop.f32.mrf.mxu1  ;;  %v5784_v15 = vadd.f32 %v5783_v51, %v5782_v1 }
 0x3e9   : > { %v5624_v24 = vrot.slane %v5623_v36, 4  ;;  %v5723_v7 = vadd.f32 %v5722_v20, %v5721_v30  ;;  %v5515_v29 = vadd.f32 %v13770_v62, %v13708_v33  ;;  %v5886_v30 = vadd.f32 %v5885_v3, %v5884_v27 }
 0x3ea   : > { %v5786_v22 = vadd.f32 %v5785_v34, %v5784_v15 }
 0x3eb   : > { %v5625_v6 = vadd.f32 %v5624_v24, %v5623_v36  ;;  %v5725_v56 = vadd.f32 %v5724_v57, %v5723_v7  ;;  %v5832_v61 = vmul.f32 %v5515_v29, %v5515_v29  ;;  %v5787_v36 = vsel %vm5391_vm4, %v5515_v29, 0.0 }
 0x3ec   : > { %v5888_v53 = vadd.f32 %v5887_v11, %v5886_v30 }
 0x3ed   : > { %v5626_v23 = vrot.slane %v5625_v6, 2  ;;  %v5726_v17 = vrot.slane %v5725_v56, 4 }
 0x3ef   : > { %v5627_v25 = vadd.f32 %v5626_v23, %v5625_v6  ;;  %v5727_v9 = vadd.f32 %v5726_v17, %v5725_v56  ;;  %v5788_v6 = vadd.f32 %v5787_v36, %v5786_v22 }
 0x3f0   : > { %v13730_v50 = vpop.f32.mrf.mxu1 }
 0x3f1   : > { %v5517_v45 = vadd.f32 %v13770_v62, %v13730_v50  ;;  %v5728_v2 = vrot.slane %v5727_v9, 2  ;;  %v5628_v41 = vrot.slane %v5627_v25, 1 }
 0x3f3   : > { %v5729_v21 = vadd.f32 %v5728_v2, %v5727_v9  ;;  %v5833_v20 = vmul.f32 %v5517_v45, %v5517_v45  ;;  %v5789_v57 = vsel %vm5391_vm4, %v5517_v45, 0.0  ;;  %v5629_v46 = vadd.f32 %v5628_v41, %v5627_v25 }
 0x3f4   : > { %v5790_v54 = vadd.f32 %v5789_v57, %v5788_v6 }
 0x3f5   : > { %v5730_v28 = vrot.slane %v5729_v21, 1  ;;  %v5891_v60 = vsel %vm5391_vm4, %v5833_v20, 0.0  ;;  %v13805_v29 = vmul.f32 0.00390625, %v5629_v46 }
 0x3f7   : > { %v5733_v45 = vmul.f32 %v13805_v29, %v13805_v29 }
 0x3f8   : > { %v5519_v8 = vpop.f32.mrf.mxu1 }
 0x3f9   : > { %v5520_v33 = vadd.f32 %v13770_v62, %v5519_v8  ;;  %v5889_v8 = vsel %vm5391_vm4, %v5832_v61, 0.0 }
 0x3fa   : > { %v5890_v63 = vadd.f32 %v5889_v8, %v5888_v53 }
 0x3fb   : > { %v5834_v52 = vmul.f32 %v5520_v33, %v5520_v33  ;;  %v5791_v56 = vsel %vm5391_vm4, %v5520_v33, 0.0 }
 0x3fc   : > { %v5892_v17 = vadd.f32 %v5891_v60, %v5890_v63  ;;  %v5792_v42 = vadd.f32 %v5791_v56, %v5790_v54 }
 0x3fd   : > { %v5893_v23 = vsel %vm5391_vm4, %v5834_v52, 0.0 }
 0x3fe   : > { %v5894_v19 = vadd.f32 %v5893_v23, %v5892_v17  ;;  %v6475_v23 = vld [vmem:[#allocation3] sm:$0xf] }
 0x400   : > { %v5521_v37 = vpop.f32.mrf.mxu1 }
 0x401   : > { %v5522_v50 = vadd.f32 %v13770_v62, %v5521_v37  ;;  %v5731_v37 = vadd.f32 %v5730_v28, %v5729_v21 }
 0x403   : > { %v5835_v26 = vmul.f32 %v5522_v50, %v5522_v50  ;;  %v5793_v43 = vsel %vm5391_vm4, %v5522_v50, 0.0  ;;  %v5732_v44 = vmul.f32 0.00390625, %v5731_v37  ;;  %v6529_v37 = vshll.u32 %v6475_v23, 16 }
 0x404   : > { %v5794_v13 = vadd.f32 %v5793_v43, %v5792_v42  ;;  %v6476_v43 = vld [vmem:[#allocation3 + $0x4] sm:$0xf] }
 0x405   : > { %v5895_v38 = vsel %vm5391_vm4, %v5835_v26, 0.0  ;;  %v5734_v41 = vsub.f32 %v5732_v44, %v5733_v45  ;;  %v6535_v42 = vshll.u32 %v6476_v43, 16 }
 0x406   : > { %v5896_v1 = vadd.f32 %v5895_v38, %v5894_v19  ;;  %v6539_v38 = vshrl.u32 %v6476_v43, 16  ;;  %v6531_v19 = vrot.slane %v6529_v37, 5 }
 0x407   : > { %v5735_v20 = vmax.f32 %v5734_v41, 0.0 }
 0x408   : > { %v5524_v24 = vpop.f32.mrf.mxu1 }
 0x409   : > { %v5525_v7 = vadd.f32 %v13770_v62, %v5524_v24  ;;  %v13815_v8 = vadd.f32 1e-05, %v5735_v20  ;;  %v7376_v20 = vrot.slane %v6476_v43, 5 }
 0x40b   : > { %v5836_v5 = vmul.f32 %v5525_v7, %v5525_v7  ;;  %v5795_v25 = vsel %vm5391_vm4, %v5525_v7, 0.0  ;;  %11887 = vrsqrt.f32 %v13815_v8  ;;  %vm5931_vm9 = vweird.f32 %v13815_v8 }
 0x40c   : > { %v5796_v61 = vadd.f32 %v5795_v25, %v5794_v13  ;;  %v6509_v13 = vld [vmem:[#allocation3 + $0x8] sm:$0x1] }
 0x40d   : > { %v5897_v12 = vsel %vm5391_vm4, %v5836_v5, 0.0  ;;  %v6526_v5 = vshrl.u32 %v6475_v23, 16  ;;  %v6545_v45 = vshll.u32 %v6509_v13, 16 }
 0x40e   : > { %v5898_v3 = vadd.f32 %v5897_v12, %v5896_v1  ;;  %v6541_v12 = vrot.slane %v6539_v38, 4  ;;  %v508_v38 = vld [vmem:[#allocation3 + $0x18] sm:$0x1] }
 0x40f   : > { %v6528_v25 = vrot.slane %v6526_v5, 4  ;;  %v6547_v41 = vrot.slane %v6545_v45, 5  ;;  %v557_v45 = vld [vmem:[#allocation3 + $0x20] sm:$0x1] }
 0x410   : > { %v5526_v9 = vpop.f32.mrf.mxu1 }
 0x411   : > { %v5527_v51 = vadd.f32 %v13770_v62, %v5526_v9  ;;  %v13822_v56 = vpop.eup %11887  ;;  %v6537_v9 = vrot.slane %v6535_v42, 5  ;;  %v6532_v44 = vor.u32 %v6531_v19, %v6528_v25 }
 0x412   : > { %v5926_v54 = vmul.f32 %v13822_v56, %v13815_v8  ;;  %vm5932_vm11 = vweird.f32 %v13822_v56  ;;  %v554_v8 = vld [vmem:[#allocation3 + $0x14] sm:$0x1] }
 0x413   : > { %v5797_v33 = vsel %vm5391_vm4, %v5527_v51, 0.0  ;;  %v5837_v2 = vmul.f32 %v5527_v51, %v5527_v51  ;;  %v11821_v51 = vld [vmem:[%s15661_s6] sm:$0xff]  ;;  %vm13853_vm13 = vmor %vm5931_vm9, %vm5932_vm11  ;;  %v555_v42 = vsel %vm12082_vm10, 0, %v554_v8 }
 0x414   : > { %v5798_v34 = vadd.f32 %v5797_v33, %v5796_v61  ;;  %v5927_v17 = vmul.f32 %v13822_v56, %v5926_v54  ;;  %v6542_v33 = vor.u32 %v6541_v12, %v6537_v9  ;;  %7244 = vmatpush.bf16.msrb.mxu3 %v11821_v51  ;;  %556 = vst [vmem:[#allocation3 + $0x14] sm:$0x1] %v555_v42  ;;  %v509_v12 = vsel %vm12068_vm6, 0, %v508_v38 }
 0x415   : > { %v5899_v27 = vsel %vm5391_vm4, %v5837_v2, 0.0  ;;  %v505_v2 = vld [vmem:[#allocation3 + $0xc] sm:$0x1]  ;;  %510 = vst [vmem:[#allocation3 + $0x18] sm:$0x1] %v509_v12 }
 0x416   : > { %v5799_v15 = vrot.slane %v5798_v34, 4  ;;  %v5900_v21 = vadd.f32 %v5899_v27, %v5898_v3  ;;  %v5928_v61 = vmul.f32 0.5, %v5927_v17  ;;  %v506_v27 = vsel %vm12068_vm6, 0, %v505_v2 }
 0x417   : > { %507 = vst [vmem:[#allocation3 + $0xc] sm:$0x1] %v506_v27  ;;  %v5937_v2 = vstv %s13836_s9  ;;  %v511_v27 = vld [vmem:[#allocation3 + $0x24] sm:$0x1] }
 0x418   : > { %v5800_v11 = vadd.f32 %v5799_v15, %v5798_v34  ;;  %v5901_v36 = vrot.slane %v5900_v21, 4  ;;  %v6533_v34 = vrot.slane %v6532_v44, 4  ;;  %v11805_v15 = vld [vmem:[#allocation3] sm:$0xff] }
 0x419   : > { %11369 = vmatmul.msk.bf16.vlgmr.msrb.gmra.mxu3 %vm5391_vm4, %v11805_v15 }
 0x41a   : > { %v5801_v62 = vrot.slane %v5800_v11, 2  ;;  %v5902_v50 = vadd.f32 %v5901_v36, %v5900_v21  ;;  %v6543_v21 = vrot.slane %v6542_v33, 4  ;;  %v6538_v36 = vsel %vm12159_vm15, %v6533_v34, %v6537_v9  ;;  %v11840_v9 = vld [vmem:[%s15661_s6 + $0x18] sm:$0xff] }
 0x41b   : > { %7888 = vmatpush.bf16.msrb.mxu1 %v11840_v9  ;;  %v5940_v34 = vstv %s5939_s27 }
 0x41c   : > { %v5802_v30 = vadd.f32 %v5801_v62, %v5800_v11  ;;  %v5903_v22 = vrot.slane %v5902_v50, 2  ;;  %v5929_v62 = vsub.f32 1.5, %v5928_v61  ;;  %v558_v61 = vsel %vm12082_vm10, 0, %v557_v45  ;;  %v6472_v45 = vld [vmem:[#allocation3 + $0xc8] sm:$0x1] }
 0x41d   : > { %559 = vst [vmem:[#allocation3 + $0x20] sm:$0x1] %v558_v61 }
 0x41e   : > { %v5803_v52 = vrot.slane %v5802_v30, 1  ;;  %v5904_v24 = vadd.f32 %v5903_v22, %v5902_v50  ;;  %v6548_v50 = vsel %vm12159_vm15, %v6543_v21, %v6547_v41  ;;  %v7326_v22 = vld [vmem:[#allocation3] sm:$0xe]  ;;  %v5930_v54 = vmul.f32 %v13822_v56, %v5929_v62 }
 0x41f   : > { %v512_v21 = vsel %vm12068_vm6, 0, %v511_v27  ;;  %v560_v27 = vld [vmem:[#allocation3 + $0x2c] sm:$0x1] }
 0x420   : > { %v5804_v57 = vadd.f32 %v5803_v52, %v5802_v30  ;;  %v5905_v7 = vrot.slane %v5904_v24, 1  ;;  %v6912_v30 = vunpack.c.l.b16 %v6538_v36  ;;  %v5934_v44 = vsel %vm13853_vm13, %v13822_v56, %v5930_v54  ;;  %513 = vst [vmem:[#allocation3 + $0x24] sm:$0x1] %v512_v21 }
 0x422   : > { %v13818_v46 = vmul.f32 0.00390625, %v5804_v57  ;;  %v5906_v28 = vadd.f32 %v5905_v7, %v5904_v24  ;;  %v6913_v24 = vunpack.c.l.b16 %v6548_v50  ;;  %v11385_v57 = vrot.slane %v7326_v22, 9 }
 0x423   : > { %v7378_v7 = vrot.slane %v7376_v20, 4 }
 0x424   : > { %v5907_v53 = vmul.f32 0.00390625, %v5906_v28  ;;  %v5908_v6 = vmul.f32 %v13818_v46, %v13818_v46  ;;  %v7379_v28 = vrot.slane %v6509_v13, 5  ;;  %v11841_v13 = vld [vmem:[%s15661_s6 + $0x20] sm:$0xff] }
 0x425   : > { %8546 = vmatpush.bf16.msrb.mxu2 %v11841_v13 }
 0x426   : > { %v5909_v60 = vsub.f32 %v5907_v53, %v5908_v6  ;;  %v6944_v6 = vpack.c.b16 %v6913_v24, %v6912_v30  ;;  %v7380_v23 = vsel %vm12106_vm12, %v7378_v7, %v7379_v28 }
 0x427   : > { %v7490_v17 = vunpack.c.l.b16 %v7380_v23 }
 0x428   : > { %v5910_v26 = vmax.f32 %v5909_v60, 0.0  ;;  %v11823_v60 = vld [vmem:[%s15661_s6 + $0x10] sm:$0xff]  ;;  %11285 = vmatmul.msk.bf16.vlgmr.msra.gmra.mxu2 %vm5391_vm4, %v6944_v6  ;;  %v6458_v6 = vld [vmem:[#allocation3 + $0xb0] sm:$0x1] }
 0x429   : > { %7598 = vmatpush.bf16.msrb.mxu0 %v11823_v60 }
 0x42a   : > { %v13824_v63 = vadd.f32 1e-05, %v5910_v26  ;;  %v7377_v26 = vsel %vm12106_vm12, %v11385_v57, %v7376_v20 }
 0x42b   : > { %v7489_v43 = vunpack.c.l.b16 %v7377_v26 }
 0x42c   : > { %11889 = vrsqrt.f32 %v13824_v63  ;;  %vm5919_vm14 = vcmp.eq.f32.partialorder %v13824_v63, inf  ;;  %v5922_v51 = vand.u32 2147483648, %v13824_v63  ;;  %vm5921_vm1 = vcmp.eq.f32.partialorder %v13824_v63, 0.0 }
 0x42d   : > { %v7521_v19 = vpack.c.b16 %v7490_v17, %v7489_v43 }
 0x42f   : > { %11407 = vmatmul.msk.bf16.vlgmr.msrb.gmra.mxu0 %vm5391_vm4, %v7521_v19  ;;  %v6468_v19 = vld [vmem:[#allocation3 + $0xc0] sm:$0xf] }
 0x432   : > { %v11890_v1 = vpop.eup %11889 }
 0x433   : > { %v5913_v3 = vmul.f32 %v11890_v1, %v13824_v63 }
 0x435   : > { %v5914_v11 = vmul.f32 %v11890_v1, %v5913_v3 }
 0x437   : > { %v5915_v52 = vmul.f32 0.5, %v5914_v11 }
 0x439   : > { %v5916_v53 = vsub.f32 1.5, %v5915_v52 }
 0x43b   : > { %v5917_v5 = vmul.f32 %v11890_v1, %v5916_v53 }
 0x43d   : > { %v5918_v25 = vmul.f32 %v5917_v5, %v13824_v63  ;;  %v6465_v5 = vld [vmem:[#allocation3 + $0xbc] sm:$0x1] }
 0x43f   : > { %v5920_v1 = vsel %vm5919_vm14, %v13824_v63, %v5918_v25 }
 0x440   : > { %v5923_v33 = vsel %vm5921_vm1, %v5922_v51, %v5920_v1 }
 0x441   : > { %v5935_v3 = vmul.f32 %v5934_v44, %v5923_v33 }
 0x443   : > { %v5938_v41 = vmul.f32 %v5937_v2, %v5935_v3  ;;  %v5942_v56 = vmul.f32 %v5935_v3, %v13805_v29 }
 0x445   : > { %v13882_v15 = vadd.f32 %v5940_v34, %v5938_v41  ;;  %v5943_v63 = vsub.f32 %v13818_v46, %v5942_v56 }
 0x447   : > { %v13887_v11 = vmul.f32 %v5943_v63, %v5937_v2  ;;  %v5972_v36 = vmul.f32 %v13882_v15, %v13718_v4  ;;  %v5974_v20 = vmul.f32 %v13882_v15, %v13738_v39  ;;  %v5975_v29 = vmul.f32 %v13882_v15, %v13741_v49 }
 0x448   : > { %v5976_v62 = vmul.f32 %v13882_v15, %v13747_v40  ;;  %v5945_v51 = vmul.f32 %v13882_v15, %v13576_v16  ;;  %v5946_v1 = vmul.f32 %v13882_v15, %v13579_v0  ;;  %v5947_v61 = vmul.f32 %v13882_v15, %v13591_v35 }
 0x449   : > { %v6004_v46 = vadd.f32 %v5972_v36, %v13887_v11  ;;  %v6006_v50 = vadd.f32 %v5974_v20, %v13887_v11  ;;  %v6007_v30 = vadd.f32 %v5975_v29, %v13887_v11  ;;  %v5948_v33 = vmul.f32 %v13882_v15, %v13602_v32 }
 0x44a   : > { %v6008_v22 = vadd.f32 %v5976_v62, %v13887_v11  ;;  %v5977_v16 = vadd.f32 %v5945_v51, %v13887_v11  ;;  %v5978_v41 = vadd.f32 %v5946_v1, %v13887_v11  ;;  %v5979_v56 = vadd.f32 %v5947_v61, %v13887_v11  ;;  %v6374_v1 = vld [vmem:[#allocation3 + $0x20] sm:$0x1] }
 0x44b   : > { %v6036_v52 = vpack.c.bf16 %v6004_v46, %v6004_v46  ;;  %v6038_v24 = vpack.c.bf16 %v6006_v50, %v6006_v50  ;;  %v6039_v4 = vpack.c.bf16 %v6007_v30, %v6007_v30  ;;  %v5980_v0 = vadd.f32 %v5948_v33, %v13887_v11  ;;  %v514_v30 = vld [vmem:[#allocation3 + $0x30] sm:$0x1] }
 0x44c   : > { %v6040_v7 = vpack.c.bf16 %v6008_v22, %v6008_v22  ;;  %v5949_v35 = vmul.f32 %v13882_v15, %v13612_v55  ;;  %v6009_v36 = vpack.c.bf16 %v5977_v16, %v5977_v16  ;;  %v5950_v20 = vmul.f32 %v13882_v15, %v13623_v58  ;;  %v6377_v16 = vld [vmem:[#allocation3 + $0x24] sm:$0xf] }
 0x44d   : > { %v6271_v57 = vshrl.u32 %v6036_v52, 16  ;;  %v6274_v28 = vshll.u32 %v6036_v52, 16  ;;  %v6288_v53 = vshrl.u32 %v6038_v24, 16  ;;  %v6297_v49 = vshrl.u32 %v6039_v4, 16 }
 0x44e   : > { %v6291_v54 = vshll.u32 %v6038_v24, 16  ;;  %v6300_v43 = vshll.u32 %v6039_v4, 16  ;;  %v6305_v8 = vshrl.u32 %v6040_v7, 16  ;;  %v6308_v38 = vshll.u32 %v6040_v7, 16  ;;  %v6363_v7 = vld [vmem:[#allocation3 + $0xc] sm:$0xf] }
 0x44f   : > { %v6273_v39 = vrot.slane %v6271_v57, 7  ;;  %v6290_v26 = vrot.slane %v6288_v53, 7  ;;  %v6299_v23 = vrot.slane %v6297_v49, 7  ;;  %v6010_v29 = vpack.c.bf16 %v5978_v41, %v5978_v41  ;;  %v6367_v53 = vld [vmem:[#allocation3 + $0x14] sm:$0x1] }
 0x450   : > { %v6307_v12 = vrot.slane %v6305_v8, 7  ;;  %v6011_v62 = vpack.c.bf16 %v5979_v56, %v5979_v56  ;;  %v6012_v46 = vpack.c.bf16 %v5980_v0, %v5980_v0  ;;  %v5981_v50 = vadd.f32 %v5949_v35, %v13887_v11  ;;  %v563_v0 = vld [vmem:[#allocation3 + $0x38] sm:$0x1] }
 0x451   : > { %v13901_v60 = vor.u32 %v6274_v28, %v6273_v39  ;;  %v6278_v40 = vrot.slane %v6273_v39, 4  ;;  %v13909_v17 = vor.u32 %v6291_v54, %v6290_v26  ;;  %v6295_v42 = vrot.slane %v6290_v26, 4 }
 0x452   : > { %v6302_v13 = vor.u32 %v6300_v43, %v6299_v23  ;;  %v6303_v9 = vrot.slane %v6299_v23, 4  ;;  %v6310_v2 = vor.u32 %v6308_v38, %v6307_v12  ;;  %v6312_v3 = vrot.slane %v6307_v12, 4  ;;  %v6370_v23 = vld [vmem:[#allocation3 + $0x18] sm:$0xf] }
 0x453   : > { %v6459_v25 = vsel %vm12068_vm6, %v6278_v40, %v6458_v6  ;;  %v6466_v44 = vsel %vm12068_vm6, %v6295_v42, %v6465_v5  ;;  %v6042_v55 = vshrl.u32 %v6009_v36, 16  ;;  %v6045_v22 = vshll.u32 %v6009_v36, 16  ;;  %v13957_v36 = vld [vmem:[#allocation3 + $0x3c] sm:$0x1] }
 0x454   : > { %6460 = vst [vmem:[#allocation3 + $0xb0] sm:$0x1] %v6459_v25  ;;  %v6469_v34 = vsel %vm13905_vm7, %v6302_v13, %v6468_v19  ;;  %v6311_v63 = vsel %vm12192_vm8, %v6303_v9, %v6310_v2  ;;  %v6473_v21 = vsel %vm12068_vm6, %v6312_v3, %v6472_v45  ;;  %v5982_v52 = vadd.f32 %v5950_v20, %v13887_v11 }
 0x455   : > { %6467 = vst [vmem:[#allocation3 + $0xbc] sm:$0x1] %v6466_v44  ;;  %v561_v24 = vsel %vm12082_vm10, 0, %v560_v27  ;;  %v6050_v4 = vshrl.u32 %v6010_v29, 16  ;;  %v6053_v57 = vshll.u32 %v6010_v29, 16  ;;  %v6059_v58 = vshrl.u32 %v6011_v62, 16 }
 0x456   : > { %6470 = vst [vmem:[#allocation3 + $0xc0] sm:$0xf] %v6469_v34  ;;  %v6062_v39 = vshll.u32 %v6011_v62, 16  ;;  %v6044_v28 = vrot.slane %v6042_v55, 7  ;;  %v6067_v49 = vshrl.u32 %v6012_v46, 16  ;;  %v6070_v6 = vshll.u32 %v6012_v46, 16 }
 0x457   : > { %6474 = vst [vmem:[#allocation3 + $0xc8] sm:$0x1] %v6473_v21  ;;  %v6013_v40 = vpack.c.bf16 %v5981_v50, %v5981_v50  ;;  %v6052_v26 = vrot.slane %v6050_v4, 7  ;;  %v6061_v54 = vrot.slane %v6059_v58, 7  ;;  %v6014_v43 = vpack.c.bf16 %v5982_v52, %v5982_v52 }
 0x458   : > { %6471 = vst.msk [vmem:[#allocation3 + $0xc4] sm:$0xf] %vm493_vm2, %v6311_v63  ;;  %v515_v8 = vsel %vm12068_vm6, 0, %v514_v30  ;;  %v6047_v5 = vor.u32 %v6045_v22, %v6044_v28  ;;  %v6048_v42 = vrot.slane %v6044_v28, 4  ;;  %v6069_v38 = vrot.slane %v6067_v49, 7 }
 0x459   : > { %562 = vst [vmem:[#allocation3 + $0x2c] sm:$0x1] %v561_v24  ;;  %v6076_v25 = vshrl.u32 %v6013_v40, 16  ;;  %v6055_v19 = vor.u32 %v6053_v57, %v6052_v26  ;;  %v6057_v13 = vrot.slane %v6052_v26, 4  ;;  %v6064_v9 = vor.u32 %v6062_v39, %v6061_v54  ;;  %v566_v57 = vld [vmem:[#allocation3 + $0x44] sm:$0x1] }
 0x45a   : > { %516 = vst [vmem:[#allocation3 + $0x30] sm:$0x1] %v515_v8  ;;  %v6065_v12 = vrot.slane %v6061_v54, 4  ;;  %v6364_v51 = vsel %vm13905_vm7, %v6047_v5, %v6363_v7  ;;  %v6072_v44 = vor.u32 %v6070_v6, %v6069_v38  ;;  %v6074_v45 = vrot.slane %v6069_v38, 4 }
 0x45b   : > { %v6078_v61 = vrot.slane %v6076_v25, 7  ;;  %v6056_v33 = vsel %vm12192_vm8, %v6048_v42, %v6055_v19  ;;  %6365 = vst [vmem:[#allocation3 + $0xc] sm:$0xf] %v6364_v51  ;;  %v6368_v2 = vsel %vm12068_vm6, %v6057_v13, %v6367_v53  ;;  %v6371_v3 = vsel %vm13905_vm7, %v6064_v9, %v6370_v23  ;;  %v520_v42 = vld [vmem:[#allocation3 + $0x48] sm:$0x1] }
 0x45c   : > { %v6079_v34 = vshll.u32 %v6013_v40, 16  ;;  %6366 = vst.msk [vmem:[#allocation3 + $0x10] sm:$0xf] %vm493_vm2, %v6056_v33  ;;  %v6073_v41 = vsel %vm12192_vm8, %v6065_v12, %v6072_v44  ;;  %v6084_v56 = vshrl.u32 %v6014_v43, 16  ;;  %v6375_v35 = vsel %vm12068_vm6, %v6074_v45, %v6374_v1  ;;  %v11901_v45 = vld [vmem:[%s13571_s12 + $0x48] sm:$0xff] }
 0x45d   : > { %6369 = vst [vmem:[#allocation3 + $0x14] sm:$0x1] %v6368_v2  ;;  %v6087_v21 = vshll.u32 %v6014_v43, 16  ;;  %v6082_v20 = vrot.slane %v6078_v61, 4  ;;  %v5951_v62 = vmul.f32 %v13882_v15, %v13631_v59  ;;  %v564_v46 = vsel %vm12082_vm10, 0, %v563_v0 }
 0x45e   : > { %v6081_v27 = vor.u32 %v6079_v34, %v6078_v61  ;;  %6372 = vst [vmem:[#allocation3 + $0x18] sm:$0xf] %v6371_v3  ;;  %v6086_v63 = vrot.slane %v6084_v56, 7  ;;  %v518_v22 = vsel %vm12068_vm6, 0, %v13957_v36  ;;  %v5952_v4 = vmul.f32 %v13882_v15, %v13638_v47 }
 0x45f   : > { %6373 = vst.msk [vmem:[#allocation3 + $0x1c] sm:$0xf] %vm493_vm2, %v6073_v41  ;;  %v13973_v59 = vmul.f32 %v13882_v15, %v13646_v10  ;;  %v5983_v6 = vadd.f32 %v5951_v62, %v13887_v11  ;;  %v5954_v1 = vmul.f32 %v11901_v45, %v13882_v15  ;;  %v567_v61 = vsel %vm12082_vm10, 0, %v566_v57 }
 0x460   : > { %v6378_v29 = vsel %vm13905_vm7, %v6081_v27, %v6377_v16  ;;  %6376 = vst [vmem:[#allocation3 + $0x20] sm:$0x1] %v6375_v35  ;;  %v6089_v50 = vor.u32 %v6087_v21, %v6086_v63  ;;  %v6091_v30 = vrot.slane %v6086_v63, 4  ;;  %v6381_v55 = vld [vmem:[#allocation3 + $0x2c] sm:$0x1]  ;;  %v5984_v44 = vadd.f32 %v5952_v4, %v13887_v11 }
 0x461   : > { %6379 = vst [vmem:[#allocation3 + $0x24] sm:$0xf] %v6378_v29  ;;  %v521_v16 = vsel %vm12068_vm6, 0, %v520_v42 }
 0x462   : > { %v7327_v52 = vld [vmem:[#allocation3 + $0xc] sm:$0xe]  ;;  %565 = vst [vmem:[#allocation3 + $0x38] sm:$0x1] %v564_v46  ;;  %v6090_v49 = vsel %vm12192_vm8, %v6082_v20, %v6089_v50  ;;  %v6382_v5 = vsel %vm12068_vm6, %v6091_v30, %v6381_v55 }
 0x463   : > { %v6477_v24 = vld [vmem:[#allocation3 + $0xc] sm:$0xf]  ;;  %v6478_v39 = vld [vmem:[#allocation3 + $0x10] sm:$0xf]  ;;  %v11386_v28 = vrot.slane %v7327_v52, 9 }
 0x464   : > { %v11806_v7 = vld [vmem:[#allocation3 + $0xc] sm:$0xff]  ;;  %v6550_v53 = vshrl.u32 %v6477_v24, 16  ;;  %v6510_v40 = vld [vmem:[#allocation3 + $0x14] sm:$0x1]  ;;  %v7383_v26 = vrot.slane %v6478_v39, 5  ;;  %v6553_v54 = vshll.u32 %v6477_v24, 16 }
 0x465   : > { %v11824_v58 = vld [vmem:[#allocation3 + $0xc] sm:$0xff]  ;;  %v6559_v47 = vshll.u32 %v6478_v39, 16  ;;  %v6563_v23 = vshrl.u32 %v6478_v39, 16  ;;  %11370 = vmatmul.msk.bf16.gmra.mxu3 %vm5391_vm4, %v11806_v7  ;;  %v7386_v10 = vrot.slane %v6510_v40, 5  ;;  %v6569_v8 = vshll.u32 %v6510_v40, 16 }
 0x466   : > { %11493 = vmatmul.msk.bf16.vlgmr.msrb.gmra.mxu1 %vm5391_vm4, %v11824_v58  ;;  %v6552_v43 = vrot.slane %v6550_v53, 4  ;;  %v7384_v38 = vsel %vm12106_vm12, %v11386_v28, %v7383_v26  ;;  %v7385_v25 = vrot.slane %v7383_v26, 4  ;;  %v6555_v19 = vrot.slane %v6553_v54, 5  ;;  %v6480_v12 = vld [vmem:[#allocation3 + $0x1c] sm:$0xf] }
 0x467   : > { %v6561_v13 = vrot.slane %v6559_v47, 5  ;;  %v6565_v9 = vrot.slane %v6563_v23, 4  ;;  %v7328_v51 = vld [vmem:[#allocation3 + $0x18] sm:$0xe]  ;;  %v7390_v3 = vrot.slane %v6480_v12, 5  ;;  %v7491_v41 = vunpack.c.l.b16 %v7384_v38 }
 0x468   : > { %v7387_v33 = vsel %vm12106_vm12, %v7385_v25, %v7386_v10  ;;  %v6556_v2 = vor.u32 %v6555_v19, %v6552_v43  ;;  %v6479_v34 = vld [vmem:[#allocation3 + $0x18] sm:$0xf]  ;;  %6380 = vst.msk [vmem:[#allocation3 + $0x28] sm:$0xf] %vm493_vm2, %v6090_v49  ;;  %v6511_v35 = vld [vmem:[#allocation3 + $0x20] sm:$0x1]  ;;  %v6015_v58 = vpack.c.bf16 %v5983_v6, %v5983_v6  ;;  %v5985_v40 = vadd.f32 %v13973_v59, %v13887_v11 }
 0x469   : > { %v7492_v56 = vunpack.c.l.b16 %v7387_v33  ;;  %v6566_v0 = vor.u32 %v6565_v9, %v6561_v13  ;;  %v6574_v27 = vshrl.u32 %v6479_v34, 16  ;;  %6383 = vst [vmem:[#allocation3 + $0x2c] sm:$0x1] %v6382_v5  ;;  %v6571_v21 = vrot.slane %v6569_v8, 5  ;;  %v11902_v6 = vld [vmem:[%s13571_s12 + $0x50] sm:$0xff]  ;;  %v11903_v19 = vld [vmem:[%s13571_s12 + $0x58] sm:$0xff] }
 0x46a   : > { %v6557_v63 = vrot.slane %v6556_v2, 4  ;;  %v7392_v36 = vrot.slane %v7390_v3, 4  ;;  %v6577_v20 = vshll.u32 %v6479_v34, 16  ;;  %v11387_v46 = vrot.slane %v7328_v51, 9  ;;  %519 = vst [vmem:[#allocation3 + $0x3c] sm:$0x1] %v518_v22 }
 0x46b   : > { %v7522_v29 = vpack.c.b16 %v7492_v56, %v7491_v41  ;;  %v6567_v62 = vrot.slane %v6566_v0, 4  ;;  %v6576_v50 = vrot.slane %v6574_v27, 4  ;;  %v7393_v55 = vrot.slane %v6511_v35, 5  ;;  %568 = vst [vmem:[#allocation3 + $0x44] sm:$0x1] %v567_v61  ;;  %v11807_v9 = vld [vmem:[#allocation3 + $0x18] sm:$0xff] }
 0x46c   : > { %v6562_v30 = vsel %vm12159_vm15, %v6557_v63, %v6561_v13  ;;  %v6579_v52 = vrot.slane %v6577_v20, 5  ;;  %v6583_v24 = vshll.u32 %v6480_v12, 16  ;;  %v6587_v7 = vshrl.u32 %v6480_v12, 16  ;;  %522 = vst [vmem:[#allocation3 + $0x48] sm:$0x1] %v521_v16  ;;  %v11825_v12 = vld [vmem:[#allocation3 + $0x18] sm:$0xff] }
 0x46d   : > { %11408 = vmatmul.msk.bf16.gmra.mxu0 %vm5391_vm4, %v7522_v29  ;;  %v6572_v4 = vsel %vm12159_vm15, %v6567_v62, %v6571_v21  ;;  %v6914_v57 = vunpack.c.l.b16 %v6562_v30  ;;  %v7394_v22 = vsel %vm12106_vm12, %v7392_v36, %v7393_v55  ;;  %v5986_v26 = vadd.f32 %v5954_v1, %v13887_v11  ;;  %v6481_v42 = vld [vmem:[#allocation3 + $0x24] sm:$0xf]  ;;  %v11920_v48 = vld [vmem:[#allocation3 + $0x1c] sm:$0xf] }
 0x46e   : > { %v6915_v39 = vunpack.c.l.b16 %v6572_v4  ;;  %v6580_v28 = vor.u32 %v6579_v52, %v6576_v50  ;;  %v6585_v53 = vrot.slane %v6583_v24, 5  ;;  %v6589_v49 = vrot.slane %v6587_v7, 4  ;;  %v14009_v25 = vld [vmem:[#allocation3 + $0x24] sm:$0xe]  ;;  %v6384_v50 = vld [vmem:[#allocation3 + $0x30] sm:$0xf] }
 0x46f   : > { %v7391_v47 = vsel %vm12106_vm12, %v11387_v46, %v7390_v3  ;;  %v5955_v10 = vmul.f32 %v11902_v6, %v13882_v15  ;;  %v7494_v43 = vunpack.c.l.b16 %v7394_v22  ;;  %v6593_v5 = vshll.u32 %v6511_v35, 16  ;;  %v14013_v1 = vld [vmem:[#allocation3 + $0x28] sm:$0xf] }
 0x470   : > { %v6945_v54 = vpack.c.b16 %v6915_v39, %v6914_v57  ;;  %v6581_v23 = vrot.slane %v6580_v28, 4  ;;  %v6590_v8 = vor.u32 %v6589_v49, %v6585_v53  ;;  %v6093_v38 = vshrl.u32 %v6015_v58, 16  ;;  %v14017_v3 = vld [vmem:[#allocation3 + $0x2c] sm:$0x1] }
 0x471   : > { %v6016_v59 = vpack.c.bf16 %v5984_v44, %v5984_v44  ;;  %v5956_v13 = vmul.f32 %v11903_v19, %v13882_v15  ;;  %v7493_v51 = vunpack.c.l.b16 %v7391_v47  ;;  %v6017_v61 = vpack.c.bf16 %v5985_v40, %v5985_v40 }
 0x472   : > { %11286 = vmatmul.msk.bf16.gmra.mxu2 %vm5391_vm4, %v6945_v54  ;;  %v6591_v45 = vrot.slane %v6590_v8, 4  ;;  %v6018_v33 = vpack.c.bf16 %v5986_v26, %v5986_v26  ;;  %v6586_v2 = vsel %vm12159_vm15, %v6581_v23, %v6585_v53  ;;  %v6598_v34 = vshrl.u32 %v6481_v42, 16  ;;  %v6388_v53 = vld [vmem:[#allocation3 + $0x38] sm:$0x1]  ;;  %v6395_v19 = vld [vmem:[#allocation3 + $0x44] sm:$0x1] }
 0x473   : > { %v6601_v16 = vshll.u32 %v6481_v42, 16  ;;  %v5987_v44 = vadd.f32 %v5955_v10, %v13887_v11  ;;  %v7523_v41 = vpack.c.b16 %v7494_v43, %v7493_v51  ;;  %v6595_v56 = vrot.slane %v6593_v5, 5  ;;  %v6391_v43 = vld [vmem:[#allocation3 + $0x3c] sm:$0xf] }
 0x474   : > { %v11388_v0 = vrot.slane %v14009_v25, 9  ;;  %v6095_v35 = vrot.slane %v6093_v38, 7  ;;  %v7397_v27 = vrot.slane %v14013_v1, 5  ;;  %v6607_v63 = vshll.u32 %v14013_v1, 16 }
 0x475   : > { %11371 = vmatmul.msk.bf16.gmra.mxu3 %vm5391_vm4, %v11807_v9  ;;  %v6096_v21 = vshll.u32 %v6015_v58, 16  ;;  %v5988_v36 = vadd.f32 %v5956_v13, %v13887_v11  ;;  %v6596_v20 = vsel %vm12159_vm15, %v6591_v45, %v6595_v56  ;;  %v6916_v29 = vunpack.c.l.b16 %v6586_v2  ;;  %v569_v13 = vld [vmem:[#allocation3 + $0x50] sm:$0x1] }
 0x476   : > { %11494 = vmatmul.msk.bf16.gmra.mxu1 %vm5391_vm4, %v11825_v12  ;;  %v7400_v62 = vrot.slane %v14017_v3, 5  ;;  %v6101_v46 = vshrl.u32 %v6016_v59, 16  ;;  %v14029_v30 = vrot.slane %v6598_v34, 4  ;;  %v14031_v55 = vrot.slane %v6601_v16, 5 }
 0x477   : > { %v6611_v52 = vshrl.u32 %v14013_v1, 16  ;;  %v6098_v24 = vor.u32 %v6096_v21, %v6095_v35  ;;  %v6099_v4 = vrot.slane %v6095_v35, 4  ;;  %v6104_v7 = vshll.u32 %v6016_v59, 16  ;;  %v11904_v1 = vld [vmem:[%s13571_s12 + $0x60] sm:$0xff] }
 0x478   : > { %v6103_v57 = vrot.slane %v6101_v46, 7  ;;  %v6110_v58 = vshrl.u32 %v6017_v61, 16  ;;  %v6917_v39 = vunpack.c.l.b16 %v6596_v20  ;;  %v14034_v22 = vrot.slane %v6607_v63, 5  ;;  %v11826_v46 = vld [vmem:[#allocation3 + $0x24] sm:$0xff] }
 0x479   : > { %v6385_v28 = vsel %vm13905_vm7, %v6098_v24, %v6384_v50  ;;  %v6118_v49 = vshrl.u32 %v6018_v33, 16  ;;  %v6113_v47 = vshll.u32 %v6017_v61, 16  ;;  %v6613_v23 = vrot.slane %v6611_v52, 4  ;;  %v523_v61 = vld [vmem:[#allocation3 + $0x54] sm:$0x1] }
 0x47a   : > { %v6106_v40 = vor.u32 %v6104_v7, %v6103_v57  ;;  %v6108_v26 = vrot.slane %v6103_v57, 4  ;;  %6386 = vst [vmem:[#allocation3 + $0x30] sm:$0xf] %v6385_v28  ;;  %v6112_v54 = vrot.slane %v6110_v58, 7  ;;  %v6121_v10 = vshll.u32 %v6018_v33, 16 }
 0x47b   : > { %v6120_v6 = vrot.slane %v6118_v49, 7  ;;  %v6019_v8 = vpack.c.bf16 %v5987_v44, %v5987_v44  ;;  %v7399_v5 = vrot.slane %v7397_v27, 4  ;;  %v6020_v45 = vpack.c.bf16 %v5988_v36, %v5988_v36  ;;  %v6398_v57 = vld [vmem:[#allocation3 + $0x48] sm:$0xf] }
 0x47c   : > { %v6107_v42 = vsel %vm12192_vm8, %v6099_v4, %v6106_v40  ;;  %v6389_v38 = vsel %vm12068_vm6, %v6108_v26, %v6388_v53  ;;  %v6115_v59 = vor.u32 %v6113_v47, %v6112_v54  ;;  %v6116_v9 = vrot.slane %v6112_v54, 4 }
 0x47d   : > { %11409 = vmatmul.msk.bf16.gmra.mxu0 %vm5391_vm4, %v7523_v41  ;;  %6387 = vst.msk [vmem:[#allocation3 + $0x34] sm:$0xf] %vm493_vm2, %v6107_v42  ;;  %v6123_v12 = vor.u32 %v6121_v10, %v6120_v6  ;;  %v6125_v51 = vrot.slane %v6120_v6, 4  ;;  %v6946_v33 = vpack.c.b16 %v6917_v39, %v6916_v29  ;;  %v6604_v2 = vor.u32 %v14031_v55, %v14029_v30  ;;  %v11808_v29 = vld [vmem:[#allocation3 + $0x24] sm:$0xff] }
 0x47e   : > { %6390 = vst [vmem:[#allocation3 + $0x38] sm:$0x1] %v6389_v38  ;;  %v6392_v34 = vsel %vm13905_vm7, %v6115_v59, %v6391_v43  ;;  %v6127_v16 = vshrl.u32 %v6019_v8, 16  ;;  %v6614_v44 = vor.u32 %v6613_v23, %v14034_v22  ;;  %v6135_v35 = vshrl.u32 %v6020_v45, 16 }
 0x47f   : > { %v6124_v41 = vsel %vm12192_vm8, %v6116_v9, %v6123_v12  ;;  %6393 = vst [vmem:[#allocation3 + $0x3c] sm:$0xf] %v6392_v34  ;;  %v6396_v56 = vsel %vm12068_vm6, %v6125_v51, %v6395_v19  ;;  %v6130_v21 = vshll.u32 %v6019_v8, 16  ;;  %v570_v36 = vsel %vm12082_vm10, 0, %v569_v13  ;;  %v11905_v9 = vld [vmem:[%s13571_s12 + $0x68] sm:$0xff] }
 0x480   : > { %6394 = vst.msk [vmem:[#allocation3 + $0x40] sm:$0xf] %vm493_vm2, %v6124_v41  ;;  %v6129_v63 = vrot.slane %v6127_v16, 7  ;;  %v524_v20 = vsel %vm12068_vm6, 0, %v523_v61  ;;  %v7401_v50 = vsel %vm12106_vm12, %v7399_v5, %v7400_v62  ;;  %v6617_v30 = vshll.u32 %v14017_v3, 16 }
 0x481   : > { %6397 = vst [vmem:[#allocation3 + $0x44] sm:$0x1] %v6396_v56  ;;  %v6483_v55 = vld [vmem:[#allocation3 + $0x30] sm:$0xf]  ;;  %v6137_v24 = vrot.slane %v6135_v35, 7  ;;  %v6138_v4 = vshll.u32 %v6020_v45, 16  ;;  %v7398_v62 = vsel %vm12106_vm12, %v11388_v0, %v7397_v27  ;;  %v7496_v28 = vunpack.c.l.b16 %v7401_v50 }
 0x482   : > { %11287 = vmatmul.msk.bf16.gmra.mxu2 %vm5391_vm4, %v6946_v33  ;;  %v6132_v52 = vor.u32 %v6130_v21, %v6129_v63  ;;  %571 = vst [vmem:[#allocation3 + $0x50] sm:$0x1] %v570_v36  ;;  %v6605_v3 = vrot.slane %v6604_v2, 4  ;;  %v6615_v7 = vrot.slane %v6614_v44, 4  ;;  %v6133_v39 = vrot.slane %v6129_v63, 4  ;;  %v11906_v36 = vld [vmem:[%s13571_s12 + $0x70] sm:$0xff] }
 0x483   : > { %525 = vst [vmem:[#allocation3 + $0x54] sm:$0x1] %v524_v20  ;;  %v6622_v53 = vshrl.u32 %v6483_v55, 16  ;;  %v6625_v49 = vshll.u32 %v6483_v55, 16  ;;  %v6140_v40 = vor.u32 %v6138_v4, %v6137_v24  ;;  %v6619_v26 = vrot.slane %v6617_v30, 5 }
 0x484   : > { %v14072_v58 = vld [vmem:[#allocation3 + $0x34] sm:$0xf]  ;;  %v6399_v25 = vsel %vm13905_vm7, %v6132_v52, %v6398_v57  ;;  %v5957_v0 = vmul.f32 %v11904_v1, %v13882_v15  ;;  %v7495_v27 = vunpack.c.l.b16 %v7398_v62  ;;  %v6610_v23 = vsel %vm12159_vm15, %v6605_v3, %v14034_v22  ;;  %v7330_v45 = vld [vmem:[#allocation3 + $0x30] sm:$0xe] }
 0x485   : > { %11372 = vmatmul.msk.bf16.gmra.mxu3 %vm5391_vm4, %v11808_v29  ;;  %v6631_v54 = vshll.u32 %v14072_v58, 16  ;;  %v6635_v47 = vshrl.u32 %v14072_v58, 16  ;;  %v6620_v6 = vsel %vm12159_vm15, %v6615_v7, %v6619_v26  ;;  %v6141_v10 = vsel %vm12192_vm8, %v6133_v39, %v6140_v40  ;;  %6400 = vst [vmem:[#allocation3 + $0x48] sm:$0xf] %v6399_v25  ;;  %v6513_v51 = vld [vmem:[#allocation3 + $0x38] sm:$0x1] }
 0x486   : > { %11495 = vmatmul.msk.bf16.gmra.mxu1 %vm5391_vm4, %v11826_v46  ;;  %v6624_v43 = vrot.slane %v6622_v53, 4  ;;  %v6627_v8 = vrot.slane %v6625_v49, 5  ;;  %v7524_v5 = vpack.c.b16 %v7496_v28, %v7495_v27  ;;  %v7404_v42 = vrot.slane %v14072_v58, 5  ;;  %6401 = vst.msk [vmem:[#allocation3 + $0x4c] sm:$0xf] %vm493_vm2, %v6141_v10  ;;  %v11809_v29 = vld [vmem:[#allocation3 + $0x30] sm:$0xff] }
 0x487   : > { %v6633_v38 = vrot.slane %v6631_v54, 5  ;;  %v6637_v59 = vrot.slane %v6635_v47, 4  ;;  %v6918_v19 = vunpack.c.l.b16 %v6610_v23  ;;  %v6919_v13 = vunpack.c.l.b16 %v6620_v6  ;;  %v14097_v50 = vld [vmem:[#allocation3 + $0x3c] sm:$0xe]  ;;  %v11827_v52 = vld [vmem:[#allocation3 + $0x30] sm:$0xff]  ;;  %v11907_v7 = vld [vmem:[%s13571_s12 + $0x78] sm:$0xff] }
 0x488   : > { %v5958_v22 = vmul.f32 %v11905_v9, %v13882_v15  ;;  %v5989_v12 = vadd.f32 %v5957_v0, %v13887_v11  ;;  %v6628_v61 = vor.u32 %v6627_v8, %v6624_v43  ;;  %v7406_v33 = vrot.slane %v7404_v42, 4  ;;  %v6485_v30 = vld [vmem:[#allocation3 + $0x3c] sm:$0xf]  ;;  %v14103_v57 = vld [vmem:[#allocation3 + $0x40] sm:$0xf] }
 0x489   : > { %v6638_v2 = vor.u32 %v6637_v59, %v6633_v38  ;;  %v6402_v34 = vld [vmem:[#allocation3 + $0x50] sm:$0x1]  ;;  %v6947_v16 = vpack.c.b16 %v6919_v13, %v6918_v19  ;;  %v6142_v44 = vrot.slane %v6137_v24, 4  ;;  %v11389_v35 = vrot.slane %v7330_v45, 9  ;;  %v572_v49 = vld [vmem:[#allocation3 + $0x5c] sm:$0x1] }
 0x48a   : > { %v5990_v41 = vadd.f32 %v5958_v22, %v13887_v11  ;;  %v6021_v56 = vpack.c.bf16 %v5989_v12, %v5989_v12  ;;  %v7407_v63 = vrot.slane %v6513_v51, 5  ;;  %v6641_v21 = vshll.u32 %v6513_v51, 16  ;;  %v526_v6 = vld [vmem:[#allocation3 + $0x60] sm:$0x1]  ;;  %v6405_v13 = vld [vmem:[#allocation3 + $0x54] sm:$0xf] }
 0x48b   : > { %v5959_v20 = vmul.f32 %v11906_v36, %v13882_v15  ;;  %v6629_v46 = vrot.slane %v6628_v61, 4  ;;  %v6403_v55 = vsel %vm12068_vm6, %v6142_v44, %v6402_v34  ;;  %v6639_v4 = vrot.slane %v6638_v2, 4  ;;  %v14122_v9 = vld [vmem:[#allocation3 + $0x44] sm:$0x1]  ;;  %v575_v61 = vld [vmem:[#allocation3 + $0x68] sm:$0x1] }
 0x48c   : > { %v7408_v24 = vsel %vm12106_vm12, %v7406_v33, %v7407_v63  ;;  %6404 = vst [vmem:[#allocation3 + $0x50] sm:$0x1] %v6403_v55  ;;  %v6022_v62 = vpack.c.bf16 %v5990_v41, %v5990_v41  ;;  %v6144_v3 = vshrl.u32 %v6021_v56, 16  ;;  %v5960_v58 = vmul.f32 %v11907_v7, %v13882_v15  ;;  %v529_v44 = vld [vmem:[#allocation3 + $0x6c] sm:$0x1] }
 0x48d   : > { %11410 = vmatmul.msk.bf16.gmra.mxu0 %vm5391_vm4, %v7524_v5  ;;  %v7405_v39 = vsel %vm12106_vm12, %v11389_v35, %v7404_v42  ;;  %v6643_v28 = vrot.slane %v6641_v21, 5  ;;  %v11390_v53 = vrot.slane %v14097_v50, 9  ;;  %v5991_v40 = vadd.f32 %v5959_v20, %v13887_v11 }
 0x48e   : > { %v7498_v26 = vunpack.c.l.b16 %v7408_v24  ;;  %v6634_v54 = vsel %vm12159_vm15, %v6629_v46, %v6633_v38  ;;  %v7411_v47 = vrot.slane %v14103_v57, 5  ;;  %v6646_v25 = vshrl.u32 %v6485_v30, 16  ;;  %v578_v24 = vld [vmem:[#allocation3 + $0x74] sm:$0x1] }
 0x48f   : > { %v6644_v1 = vsel %vm12159_vm15, %v6639_v4, %v6643_v28  ;;  %v6649_v0 = vshll.u32 %v6485_v30, 16  ;;  %v6655_v27 = vshll.u32 %v14103_v57, 16  ;;  %v6146_v23 = vrot.slane %v6144_v3, 7 }
 0x490   : > { %v6659_v10 = vshrl.u32 %v14103_v57, 16  ;;  %v6147_v43 = vshll.u32 %v6021_v56, 16  ;;  %v6152_v8 = vshrl.u32 %v6022_v62, 16  ;;  %v573_v5 = vsel %vm12082_vm10, 0, %v572_v49 }
 0x491   : > { %v7497_v42 = vunpack.c.l.b16 %v7405_v39  ;;  %v6920_v38 = vunpack.c.l.b16 %v6634_v54  ;;  %v6150_v59 = vrot.slane %v6146_v23, 4  ;;  %v6155_v19 = vshll.u32 %v6022_v62, 16  ;;  %574 = vst [vmem:[#allocation3 + $0x5c] sm:$0x1] %v573_v5  ;;  %v14156_v5 = vld [vmem:[#allocation3 + $0x4c] sm:$0xf] }
 0x492   : > { %11288 = vmatmul.msk.bf16.gmra.mxu2 %vm5391_vm4, %v6947_v16  ;;  %v6149_v22 = vor.u32 %v6147_v43, %v6146_v23  ;;  %v6154_v12 = vrot.slane %v6152_v8, 7  ;;  %v527_v51 = vsel %vm12068_vm6, 0, %v526_v6  ;;  %v5992_v45 = vadd.f32 %v5960_v58, %v13887_v11  ;;  %v532_v58 = vld [vmem:[#allocation3 + $0x78] sm:$0x1] }
 0x493   : > { %v7525_v33 = vpack.c.b16 %v7498_v26, %v7497_v42  ;;  %v6921_v2 = vunpack.c.l.b16 %v6644_v1  ;;  %v6648_v34 = vrot.slane %v6646_v25, 4  ;;  %v6651_v16 = vrot.slane %v6649_v0, 5  ;;  %528 = vst [vmem:[#allocation3 + $0x60] sm:$0x1] %v527_v51  ;;  %v11908_v26 = vld [vmem:[%s13571_s12 + $0x80] sm:$0xff]  ;;  %v11810_v25 = vld [vmem:[#allocation3 + $0x3c] sm:$0xff] }
 0x494   : > { %v14127_v41 = vrot.slane %v6655_v27, 5  ;;  %v6661_v56 = vrot.slane %v6659_v10, 4  ;;  %v6157_v35 = vor.u32 %v6155_v19, %v6154_v12  ;;  %v6406_v63 = vsel %vm13905_vm7, %v6149_v22, %v6405_v13  ;;  %v11828_v1 = vld [vmem:[#allocation3 + $0x3c] sm:$0xff]  ;;  %v6487_v0 = vld [vmem:[#allocation3 + $0x48] sm:$0xf]  ;;  %v11909_v10 = vld [vmem:[%s13571_s12 + $0x88] sm:$0xff] }
 0x495   : > { %11373 = vmatmul.msk.bf16.gmra.mxu3 %vm5391_vm4, %v11809_v29  ;;  %v7414_v21 = vrot.slane %v14122_v9, 5  ;;  %v6159_v36 = vrot.slane %v6154_v12, 4  ;;  %6407 = vst [vmem:[#allocation3 + $0x54] sm:$0xf] %v6406_v63  ;;  %v6023_v20 = vpack.c.bf16 %v5991_v40, %v5991_v40  ;;  %v6024_v29 = vpack.c.bf16 %v5992_v45, %v5992_v45 }
 0x496   : > { %11496 = vmatmul.msk.bf16.gmra.mxu1 %vm5391_vm4, %v11827_v52  ;;  %v7413_v46 = vrot.slane %v7411_v47, 4  ;;  %v6158_v30 = vsel %vm12192_vm8, %v6150_v59, %v6157_v35  ;;  %v576_v55 = vsel %vm12082_vm10, 0, %v575_v61  ;;  %v530_v52 = vsel %vm12068_vm6, 0, %v529_v44 }
 0x497   : > { %v6948_v4 = vpack.c.b16 %v6921_v2, %v6920_v38  ;;  %v6652_v62 = vor.u32 %v6651_v16, %v6648_v34  ;;  %6408 = vst.msk [vmem:[#allocation3 + $0x58] sm:$0xf] %vm493_vm2, %v6158_v30  ;;  %v6161_v3 = vshrl.u32 %v6023_v20, 16  ;;  %v6169_v7 = vshrl.u32 %v6024_v29, 16 }
 0x498   : > { %v6662_v39 = vor.u32 %v6661_v56, %v14127_v41  ;;  %v6409_v28 = vld [vmem:[#allocation3 + $0x5c] sm:$0x1]  ;;  %v6164_v49 = vshll.u32 %v6023_v20, 16  ;;  %v6172_v40 = vshll.u32 %v6024_v29, 16  ;;  %577 = vst [vmem:[#allocation3 + $0x68] sm:$0x1] %v576_v55  ;;  %v5961_v54 = vmul.f32 %v11908_v26, %v13882_v15 }
 0x499   : > { %v6410_v27 = vsel %vm12068_vm6, %v6159_v36, %v6409_v28  ;;  %v6163_v23 = vrot.slane %v6161_v3, 7  ;;  %v6171_v6 = vrot.slane %v6169_v7, 7  ;;  %531 = vst [vmem:[#allocation3 + $0x6c] sm:$0x1] %v530_v52  ;;  %v5962_v43 = vmul.f32 %v11909_v10, %v13882_v15  ;;  %v11912_v10 = vld [vmem:[%s13571_s12 + $0x98] sm:$0xff] }
 0x49a   : > { %v7412_v8 = vsel %vm12106_vm12, %v11390_v53, %v7411_v47  ;;  %6411 = vst [vmem:[#allocation3 + $0x5c] sm:$0x1] %v6410_v27  ;;  %v5993_v42 = vadd.f32 %v5961_v54, %v13887_v11  ;;  %v579_v38 = vsel %vm12082_vm10, 0, %v578_v24  ;;  %v533_v59 = vsel %vm12068_vm6, 0, %v532_v58  ;;  %v6412_v50 = vld [vmem:[#allocation3 + $0x60] sm:$0xf] }
 0x49b   : > { %v6665_v19 = vshll.u32 %v14122_v9, 16  ;;  %v6166_v13 = vor.u32 %v6164_v49, %v6163_v23  ;;  %v6167_v57 = vrot.slane %v6163_v23, 4  ;;  %v6174_v22 = vor.u32 %v6172_v40, %v6171_v6  ;;  %580 = vst [vmem:[#allocation3 + $0x74] sm:$0x1] %v579_v38 }
 0x49c   : > { %v7415_v53 = vsel %vm12106_vm12, %v7413_v46, %v7414_v21  ;;  %v6670_v47 = vshrl.u32 %v6487_v0, 16  ;;  %v5994_v12 = vadd.f32 %v5962_v43, %v13887_v11  ;;  %v6025_v51 = vpack.c.bf16 %v5993_v42, %v5993_v42  ;;  %534 = vst [vmem:[#allocation3 + $0x78] sm:$0x1] %v533_v59  ;;  %v11910_v21 = vld [vmem:[%s13571_s12 + $0xa0] sm:$0xff]  ;;  %v11913_v59 = vld [vmem:[%s13571_s12 + $0xb0] sm:$0xff] }
 0x49d   : > { %11411 = vmatmul.msk.bf16.gmra.mxu0 %vm5391_vm4, %v7525_v33  ;;  %v6653_v45 = vrot.slane %v6652_v62, 4  ;;  %v6663_v9 = vrot.slane %v6662_v39, 4  ;;  %v6673_v61 = vshll.u32 %v6487_v0, 16  ;;  %v6175_v33 = vsel %vm12192_vm8, %v6167_v57, %v6174_v22  ;;  %v6515_v0 = vld [vmem:[#allocation3 + $0x50] sm:$0x1] }
 0x49e   : > { %v6679_v2 = vshll.u32 %v14156_v5, 16  ;;  %v6683_v34 = vshrl.u32 %v14156_v5, 16  ;;  %v6413_v16 = vsel %vm13905_vm7, %v6166_v13, %v6412_v50  ;;  %6415 = vst.msk [vmem:[#allocation3 + $0x64] sm:$0xf] %vm493_vm2, %v6175_v33  ;;  %v6026_v44 = vpack.c.bf16 %v5994_v12, %v5994_v12  ;;  %v11914_v13 = vld [vmem:[%s13571_s12 + $0xc0] sm:$0xff]  ;;  %v11915_v22 = vld [vmem:[%s13571_s12 + $0xc8] sm:$0xff] }
 0x49f   : > { %v7500_v56 = vunpack.c.l.b16 %v7415_v53  ;;  %v6667_v35 = vrot.slane %v6665_v19, 5  ;;  %v6176_v63 = vrot.slane %v6171_v6, 4  ;;  %6414 = vst [vmem:[#allocation3 + $0x60] sm:$0xf] %v6413_v16  ;;  %v14178_v36 = vmul.f32 %v11910_v21, %v13882_v15  ;;  %v6416_v20 = vld [vmem:[#allocation3 + $0x68] sm:$0x1] }
 0x4a0   : > { %v6178_v29 = vshrl.u32 %v6025_v51, 16  ;;  %v6186_v46 = vshrl.u32 %v6026_v44, 16  ;;  %v7499_v30 = vunpack.c.l.b16 %v7412_v8  ;;  %v6658_v55 = vsel %vm12159_vm15, %v6653_v45, %v14127_v41  ;;  %v6419_v45 = vld [vmem:[#allocation3 + $0x6c] sm:$0xf] }
 0x4a1   : > { %v6668_v52 = vsel %vm12159_vm15, %v6663_v9, %v6667_v35  ;;  %v7418_v24 = vrot.slane %v14156_v5, 5  ;;  %v6672_v62 = vrot.slane %v6670_v47, 4  ;;  %v6675_v3 = vrot.slane %v6673_v61, 5  ;;  %v11916_v61 = vld [vmem:[%s13571_s12 + $0xb8] sm:$0xff]  ;;  %v11811_v16 = vld [vmem:[#allocation3 + $0x48] sm:$0xff] }
 0x4a2   : > { %11289 = vmatmul.msk.bf16.gmra.mxu2 %vm5391_vm4, %v6948_v4  ;;  %v7332_v4 = vld [vmem:[#allocation3 + $0x48] sm:$0xe]  ;;  %v14186_v7 = vrot.slane %v6679_v2, 5  ;;  %v6685_v58 = vrot.slane %v6683_v34, 4  ;;  %v7526_v39 = vpack.c.b16 %v7500_v56, %v7499_v30  ;;  %v6417_v28 = vsel %vm12068_vm6, %v6176_v63, %v6416_v20  ;;  %v11917_v2 = vld [vmem:[%s13571_s12 + $0xd0] sm:$0xff] }
 0x4a3   : > { %v6180_v49 = vrot.slane %v6178_v29, 7  ;;  %v14190_v40 = vrot.slane %v6186_v46, 7  ;;  %v6922_v41 = vunpack.c.l.b16 %v6658_v55  ;;  %v6923_v26 = vunpack.c.l.b16 %v6668_v52  ;;  %6418 = vst [vmem:[#allocation3 + $0x68] sm:$0x1] %v6417_v28  ;;  %v6423_v29 = vld [vmem:[#allocation3 + $0x74] sm:$0x1] }
 0x4a4   : > { %v6189_v54 = vshll.u32 %v6026_v44, 16  ;;  %v11391_v27 = vrot.slane %v7332_v4, 9  ;;  %v7420_v23 = vrot.slane %v7418_v24, 4  ;;  %v6181_v6 = vshll.u32 %v6025_v51, 16  ;;  %v581_v46 = vld [vmem:[#allocation3 + $0x80] sm:$0x1] }
 0x4a5   : > { %11374 = vmatmul.msk.bf16.gmra.mxu3 %vm5391_vm4, %v11810_v25  ;;  %v11911_v25 = vld [vmem:[%s13571_s12 + $0x90] sm:$0xff]  ;;  %v5964_v43 = vmul.f32 %v11912_v10, %v13882_v15  ;;  %v6676_v8 = vor.u32 %v6675_v3, %v6672_v62  ;;  %v6686_v5 = vor.u32 %v6685_v58, %v14186_v7  ;;  %v6184_v42 = vrot.slane %v6180_v49, 4  ;;  %v11918_v30 = vld [vmem:[%s13571_s12 + $0xe0] sm:$0xff]  ;;  %v6489_v4 = vld [vmem:[#allocation3 + $0x54] sm:$0xf] }
 0x4a6   : > { %11497 = vmatmul.msk.bf16.gmra.mxu1 %vm5391_vm4, %v11828_v1  ;;  %v5963_v1 = vmul.f32 %v11911_v25, %v13882_v15  ;;  %v6191_v38 = vor.u32 %v6189_v54, %v14190_v40  ;;  %v14201_v19 = vmul.f32 %v11913_v59, %v13882_v15  ;;  %v5969_v57 = vmul.f32 %v11914_v13, %v13882_v15 }
 0x4a7   : > { %v5970_v50 = vmul.f32 %v11915_v22, %v13882_v15  ;;  %v6183_v53 = vor.u32 %v6181_v6, %v6180_v49  ;;  %v6949_v47 = vpack.c.b16 %v6923_v26, %v6922_v41  ;;  %v7421_v12 = vrot.slane %v6515_v0, 5  ;;  %v14234_v49 = vld [vmem:[#allocation3 + $0x58] sm:$0xf] }
 0x4a8   : > { %v6689_v51 = vshll.u32 %v6515_v0, 16  ;;  %v5995_v9 = vadd.f32 %v5963_v1, %v13887_v11  ;;  %v14210_v33 = vmul.f32 %v11916_v61, %v13882_v15  ;;  %v14214_v34 = vmul.f32 %v11917_v2, %v13882_v15 }
 0x4a9   : > { %v7419_v44 = vsel %vm12106_vm12, %v11391_v27, %v7418_v24  ;;  %v5996_v56 = vadd.f32 %v5964_v43, %v13887_v11  ;;  %v7422_v35 = vsel %vm12106_vm12, %v7420_v23, %v7421_v12  ;;  %v6677_v63 = vrot.slane %v6676_v8, 4  ;;  %v11829_v24 = vld [vmem:[#allocation3 + $0x48] sm:$0xff]  ;;  %v7246_v23 = vpop.f32.mrf.mxu3  ;;  %v535_v12 = vld [vmem:[#allocation3 + $0x84] sm:$0x1] }
 0x4aa   : > { %v6687_v21 = vrot.slane %v6686_v5, 4  ;;  %v6192_v20 = vsel %vm12192_vm8, %v6184_v42, %v6191_v38  ;;  %v14226_v55 = vmul.f32 %v11918_v30, %v13882_v15  ;;  %v6001_v52 = vadd.f32 %v5969_v57, %v13887_v11  ;;  %v6516_v30 = vld [vmem:[#allocation3 + $0x5c] sm:$0x1] }
 0x4ab   : > { %v6193_v62 = vrot.slane %v14190_v40, 4  ;;  %v6420_v3 = vsel %vm13905_vm7, %v6183_v53, %v6419_v45  ;;  %6422 = vst.msk [vmem:[#allocation3 + $0x70] sm:$0xf] %vm493_vm2, %v6192_v20  ;;  %v6002_v58 = vadd.f32 %v5970_v50, %v13887_v11  ;;  %v6691_v28 = vrot.slane %v6689_v51, 5  ;;  %v7023_v6 = vpop.f32.mrf.mxu2 }
 0x4ac   : > { %6421 = vst [vmem:[#allocation3 + $0x6c] sm:$0xf] %v6420_v3  ;;  %v6027_v41 = vpack.c.bf16 %v5995_v9, %v5995_v9  ;;  %v7502_v26 = vunpack.c.l.b16 %v7422_v35  ;;  %v6028_v54 = vpack.c.bf16 %v5996_v56, %v5996_v56  ;;  %v582_v25 = vsel %vm12082_vm10, 0, %v581_v46 }
 0x4ad   : > { %11412 = vmatmul.msk.bf16.gmra.mxu0 %vm5391_vm4, %v7526_v39  ;;  %v7501_v39 = vunpack.c.l.b16 %v7419_v44  ;;  %v6424_v40 = vsel %vm12068_vm6, %v6193_v62, %v6423_v29  ;;  %v6682_v1 = vsel %vm12159_vm15, %v6677_v63, %v14186_v7  ;;  %v6692_v0 = vsel %vm12159_vm15, %v6687_v21, %v6691_v28  ;;  %583 = vst [vmem:[#allocation3 + $0x80] sm:$0x1] %v582_v25  ;;  %v11919_v29 = vld [vmem:[%s13571_s12 + $0xa8] sm:$0xff] }
 0x4ae   : > { %v6694_v27 = vshrl.u32 %v6489_v4, 16  ;;  %6425 = vst [vmem:[#allocation3 + $0x74] sm:$0x1] %v6424_v40  ;;  %v6195_v10 = vshrl.u32 %v6027_v41, 16  ;;  %v6697_v43 = vshll.u32 %v6489_v4, 16  ;;  %v6703_v8 = vshll.u32 %v14234_v49, 16 }
 0x4af   : > { %v7247_v5 = vadd.f32 %v7246_v23, %v7023_v6  ;;  %v6203_v42 = vshrl.u32 %v6028_v54, 16  ;;  %v14248_v38 = vpack.c.bf16 %v6001_v52, %v6001_v52  ;;  %v6707_v59 = vshrl.u32 %v14234_v49, 16  ;;  %v7333_v52 = vld [vmem:[#allocation3 + $0x54] sm:$0xe] }
 0x4b0   : > { %v6197_v13 = vrot.slane %v6195_v10, 7  ;;  %v6198_v7 = vshll.u32 %v6027_v41, 16  ;;  %v7527_v57 = vpack.c.b16 %v7502_v26, %v7501_v39  ;;  %v6924_v22 = vunpack.c.l.b16 %v6682_v1  ;;  %v584_v39 = vld [vmem:[#allocation3 + $0x8c] sm:$0x1]  ;;  %v538_v26 = vld [vmem:[#allocation3 + $0x90] sm:$0x1]  ;;  %v7600_v1 = vpop.f32.mrf.mxu0 }
 0x4b1   : > { %v6205_v50 = vrot.slane %v6203_v42, 7  ;;  %v6206_v53 = vshll.u32 %v6028_v54, 16  ;;  %v6925_v51 = vunpack.c.l.b16 %v6692_v0  ;;  %v7425_v45 = vrot.slane %v14234_v49, 5  ;;  %v11812_v23 = vld [vmem:[#allocation3 + $0x54] sm:$0xff] }
 0x4b2   : > { %11290 = vmatmul.msk.bf16.gmra.mxu2 %vm5391_vm4, %v6949_v47  ;;  %v6426_v47 = vld [vmem:[#allocation3 + $0x78] sm:$0xf]  ;;  %v6696_v9 = vrot.slane %v6694_v27, 4  ;;  %v6200_v61 = vor.u32 %v6198_v7, %v6197_v13  ;;  %v6699_v2 = vrot.slane %v6697_v43, 5  ;;  %v6201_v44 = vrot.slane %v6197_v13, 4 }
 0x4b3   : > { %v6208_v56 = vor.u32 %v6206_v53, %v6205_v50  ;;  %v6709_v35 = vrot.slane %v6707_v59, 4  ;;  %v6210_v63 = vrot.slane %v6205_v50, 4  ;;  %v536_v20 = vsel %vm12068_vm6, 0, %v535_v12  ;;  %v11830_v6 = vld [vmem:[#allocation3 + $0x54] sm:$0xff]  ;;  %v14296_v7 = vld [vmem:[#allocation3 + $0x64] sm:$0xf] }
 0x4b4   : > { %v6427_v21 = vsel %vm13905_vm7, %v6200_v61, %v6426_v47  ;;  %v5966_v46 = vmul.f32 %v11919_v29, %v13882_v15  ;;  %v5999_v4 = vadd.f32 %v14201_v19, %v13887_v11  ;;  %v14267_v62 = vadd.f32 %v14210_v33, %v13887_v11  ;;  %v6430_v33 = vld [vmem:[#allocation3 + $0x80] sm:$0x1]  ;;  %537 = vst [vmem:[#allocation3 + $0x84] sm:$0x1] %v536_v20  ;;  %v6493_v14 = vld [vmem:[#allocation3 + $0x6c] sm:$0xf] }
 0x4b5   : > { %11375 = vmatmul.msk.bf16.gmra.mxu3 %vm5391_vm4, %v11811_v16  ;;  %v14252_v16 = vrot.slane %v6703_v8, 5  ;;  %v6003_v3 = vadd.f32 %v14214_v34, %v13887_v11  ;;  %v7427_v15 = vrot.slane %v7425_v45, 4  ;;  %6428 = vst [vmem:[#allocation3 + $0x78] sm:$0xf] %v6427_v21  ;;  %v14275_v28 = vadd.f32 %v14226_v55, %v13887_v11  ;;  %v6491_v47 = vld [vmem:[#allocation3 + $0x60] sm:$0xf] }
 0x4b6   : > { %11498 = vmatmul.msk.bf16.gmra.mxu1 %vm5391_vm4, %v11829_v24  ;;  %v5997_v24 = vadd.f32 %v14178_v36, %v13887_v11  ;;  %v14277_v36 = vpack.c.bf16 %v6002_v58, %v6002_v58  ;;  %v6700_v41 = vor.u32 %v6699_v2, %v6696_v9  ;;  %v6209_v19 = vsel %vm12192_vm8, %v6201_v44, %v6208_v56 }
 0x4b7   : > { %v6246_v34 = vshrl.u32 %v14248_v38, 16  ;;  %v6950_v40 = vpack.c.b16 %v6925_v51, %v6924_v22  ;;  %v6710_v54 = vor.u32 %v6709_v35, %v14252_v16  ;;  %6429 = vst.msk [vmem:[#allocation3 + $0x7c] sm:$0xf] %vm493_vm2, %v6209_v19  ;;  %v6431_v55 = vsel %vm12068_vm6, %v6210_v63, %v6430_v33 }
 0x4b8   : > { %v11392_v25 = vrot.slane %v7333_v52, 9  ;;  %v7428_v58 = vrot.slane %v6516_v30, 5  ;;  %6432 = vst [vmem:[#allocation3 + $0x80] sm:$0x1] %v6431_v55  ;;  %v5998_v0 = vadd.f32 %v5966_v46, %v13887_v11  ;;  %v6029_v27 = vpack.c.bf16 %v5997_v24, %v5997_v24 }
 0x4b9   : > { %v6713_v10 = vshll.u32 %v6516_v30, 16  ;;  %v14288_v43 = vadd.f32 %v7600_v1, %v7247_v5  ;;  %v585_v8 = vsel %vm12082_vm10, 0, %v584_v39  ;;  %v539_v42 = vsel %vm12068_vm6, 0, %v538_v26  ;;  %v14323_v39 = vld [vmem:[#allocation3 + $0x60] sm:$0xe] }
 0x4ba   : > { %v7429_v59 = vsel %vm12106_vm12, %v7427_v15, %v7428_v58  ;;  %v6701_v13 = vrot.slane %v6700_v41, 4  ;;  %v6030_v11 = vpack.c.bf16 %v5998_v0, %v5998_v0  ;;  %586 = vst [vmem:[#allocation3 + $0x8c] sm:$0x1] %v585_v8  ;;  %v14298_v22 = vpack.c.bf16 %v5999_v4, %v5999_v4 }
 0x4bb   : > { %v14300_v50 = vpack.c.bf16 %v6003_v3, %v6003_v3  ;;  %v6249_v5 = vshll.u32 %v14248_v38, 16  ;;  %v6711_v53 = vrot.slane %v6710_v54, 4  ;;  %540 = vst [vmem:[#allocation3 + $0x90] sm:$0x1] %v539_v42  ;;  %v6254_v12 = vshrl.u32 %v14277_v36, 16 }
 0x4bc   : > { %v7426_v51 = vsel %vm12106_vm12, %v11392_v25, %v7425_v45  ;;  %v6220_v61 = vshrl.u32 %v6030_v11, 16  ;;  %v7504_v2 = vunpack.c.l.b16 %v7429_v59  ;;  %v6715_v44 = vrot.slane %v6713_v10, 5  ;;  %v6433_v33 = vld [vmem:[#allocation3 + $0x84] sm:$0xf]  ;;  %v6517_v54 = vld [vmem:[#allocation3 + $0x68] sm:$0x1] }
 0x4bd   : > { %11413 = vmatmul.msk.bf16.gmra.mxu0 %vm5391_vm4, %v7527_v57  ;;  %v6212_v57 = vshrl.u32 %v6029_v27, 16  ;;  %v6727_v56 = vshll.u32 %v14296_v7, 16  ;;  %v6731_v35 = vshrl.u32 %v14296_v7, 16  ;;  %v6706_v63 = vsel %vm12159_vm15, %v6701_v13, %v14252_v16  ;;  %v587_v42 = vld [vmem:[#allocation3 + $0x98] sm:$0x1] }
 0x4be   : > { %v6718_v21 = vshrl.u32 %v6491_v47, 16  ;;  %v6721_v20 = vshll.u32 %v6491_v47, 16  ;;  %v6215_v29 = vshll.u32 %v6029_v27, 16  ;;  %v6257_v49 = vshll.u32 %v14277_v36, 16 }
 0x4bf   : > { %v6214_v9 = vrot.slane %v6212_v57, 7  ;;  %v6263_v46 = vshrl.u32 %v14300_v50, 16  ;;  %v6716_v45 = vsel %vm12159_vm15, %v6711_v53, %v6715_v44  ;;  %v6222_v30 = vrot.slane %v6220_v61, 7  ;;  %v541_v53 = vld [vmem:[#allocation3 + $0x9c] sm:$0x1] }
 0x4c0   : > { %v7503_v52 = vunpack.c.l.b16 %v7426_v51  ;;  %v7432_v24 = vrot.slane %v14296_v7, 5  ;;  %v6229_v3 = vshrl.u32 %v14298_v22, 16  ;;  %v6032_v16 = vpack.c.bf16 %v14267_v62, %v14267_v62 }
 0x4c1   : > { %v6217_v4 = vor.u32 %v6215_v29, %v6214_v9  ;;  %v6926_v15 = vunpack.c.l.b16 %v6706_v63  ;;  %v14325_v41 = vrot.slane %v6727_v56, 5  ;;  %v6733_v19 = vrot.slane %v6731_v35, 4  ;;  %v6437_v58 = vld [vmem:[#allocation3 + $0x8c] sm:$0x1]  ;;  %v11813_v29 = vld [vmem:[#allocation3 + $0x60] sm:$0xff] }
 0x4c2   : > { %11291 = vmatmul.msk.bf16.gmra.mxu2 %vm5391_vm4, %v6950_v40  ;;  %v7528_v26 = vpack.c.b16 %v7504_v2, %v7503_v52  ;;  %v6927_v40 = vunpack.c.l.b16 %v6716_v45  ;;  %v6720_v55 = vrot.slane %v6718_v21, 4  ;;  %v6723_v25 = vrot.slane %v6721_v20, 5  ;;  %v6440_v61 = vld [vmem:[#allocation3 + $0x90] sm:$0xf]  ;;  %v590_v2 = vld [vmem:[#allocation3 + $0xa4] sm:$0x1] }
 0x4c3   : > { %v14327_v1 = vrot.slane %v6254_v12, 7  ;;  %v6218_v0 = vrot.slane %v6214_v9, 4  ;;  %v6223_v27 = vshll.u32 %v6030_v11, 16  ;;  %v11393_v62 = vrot.slane %v14323_v39, 9  ;;  %v14359_v39 = vld [vmem:[#allocation3 + $0x70] sm:$0xf] }
 0x4c4   : > { %v6434_v10 = vsel %vm13905_vm7, %v6217_v4, %v6433_v33  ;;  %v6231_v8 = vrot.slane %v6229_v3, 7  ;;  %v7435_v59 = vrot.slane %v6517_v54, 5  ;;  %v6232_v11 = vshll.u32 %v14298_v22, 16  ;;  %v11831_v3 = vld [vmem:[#allocation3 + $0x60] sm:$0xff] }
 0x4c5   : > { %11376 = vmatmul.msk.bf16.gmra.mxu3 %vm5391_vm4, %v11812_v23  ;;  %v6227_v23 = vrot.slane %v6222_v30, 4  ;;  %v6225_v13 = vor.u32 %v6223_v27, %v6222_v30  ;;  %6435 = vst [vmem:[#allocation3 + $0x84] sm:$0xf] %v6434_v10  ;;  %v14340_v47 = vpack.c.bf16 %v14275_v28, %v14275_v28  ;;  %v6951_v12 = vpack.c.b16 %v6927_v40, %v6926_v15 }
 0x4c6   : > { %11499 = vmatmul.msk.bf16.gmra.mxu1 %vm5391_vm4, %v11830_v6  ;;  %v7434_v6 = vrot.slane %v7432_v24, 4  ;;  %v6724_v51 = vor.u32 %v6723_v25, %v6720_v55  ;;  %v6734_v9 = vor.u32 %v6733_v19, %v14325_v41  ;;  %v6737_v44 = vshll.u32 %v6517_v54, 16 }
 0x4c7   : > { %v6438_v57 = vsel %vm12068_vm6, %v6227_v23, %v6437_v58  ;;  %v6226_v56 = vsel %vm12192_vm8, %v6218_v0, %v6225_v13  ;;  %v6234_v35 = vor.u32 %v6232_v11, %v6231_v8  ;;  %v6237_v63 = vshrl.u32 %v6032_v16, 16  ;;  %v544_v0 = vld [vmem:[#allocation3 + $0xa8] sm:$0x1] }
 0x4c8   : > { %6439 = vst [vmem:[#allocation3 + $0x8c] sm:$0x1] %v6438_v57  ;;  %v6235_v22 = vrot.slane %v6231_v8, 4  ;;  %v588_v28 = vsel %vm12082_vm10, 0, %v587_v42  ;;  %v542_v21 = vsel %vm12068_vm6, 0, %v541_v53  ;;  %v6248_v20 = vrot.slane %v6246_v34, 7 }
 0x4c9   : > { %6436 = vst.msk [vmem:[#allocation3 + $0x88] sm:$0xf] %vm493_vm2, %v6226_v56  ;;  %v6239_v45 = vrot.slane %v6237_v63, 7  ;;  %v6240_v30 = vshll.u32 %v6032_v16, 16  ;;  %v6441_v52 = vsel %vm13905_vm7, %v6234_v35, %v6440_v61  ;;  %v591_v4 = vsel %vm12082_vm10, 0, %v590_v2 }
 0x4ca   : > { %589 = vst [vmem:[#allocation3 + $0x98] sm:$0x1] %v588_v28  ;;  %v7436_v15 = vsel %vm12106_vm12, %v7434_v6, %v7435_v59  ;;  %v6252_v34 = vrot.slane %v6248_v20, 4  ;;  %v6259_v19 = vor.u32 %v6257_v49, %v14327_v1  ;;  %v14366_v16 = vrot.slane %v6263_v46, 7  ;;  %v547_v56 = vld [vmem:[#allocation3 + $0xb4] sm:$0x1] }
 0x4cb   : > { %6442 = vst [vmem:[#allocation3 + $0x90] sm:$0xf] %v6441_v52  ;;  %v6280_v33 = vshrl.u32 %v14340_v47, 16  ;;  %v7433_v40 = vsel %vm12106_vm12, %v11393_v62, %v7432_v24  ;;  %v6725_v36 = vrot.slane %v6724_v51, 4  ;;  %v6735_v49 = vrot.slane %v6734_v9, 4 }
 0x4cc   : > { %543 = vst [vmem:[#allocation3 + $0x9c] sm:$0x1] %v542_v21  ;;  %v6739_v54 = vrot.slane %v6737_v44, 5  ;;  %v7506_v46 = vunpack.c.l.b16 %v7436_v15  ;;  %v6751_v55 = vshll.u32 %v14359_v39, 16  ;;  %v6244_v58 = vrot.slane %v6239_v45, 4 }
 0x4cd   : > { %11414 = vmatmul.msk.bf16.gmra.mxu0 %vm5391_vm4, %v7528_v26  ;;  %v6242_v26 = vor.u32 %v6240_v30, %v6239_v45  ;;  %592 = vst [vmem:[#allocation3 + $0xa4] sm:$0x1] %v591_v4  ;;  %v6742_v27 = vshrl.u32 %v6493_v14, 16  ;;  %v6745_v23 = vshll.u32 %v6493_v14, 16  ;;  %v6755_v6 = vshrl.u32 %v14359_v39, 16 }
 0x4ce   : > { %v6260_v7 = vsel %vm12192_vm8, %v6252_v34, %v6259_v19  ;;  %v14382_v24 = vrot.slane %v6280_v33, 7  ;;  %v7505_v62 = vunpack.c.l.b16 %v7433_v40  ;;  %v6261_v10 = vrot.slane %v14327_v1, 4  ;;  %v6518_v28 = vld [vmem:[#allocation3 + $0x74] sm:$0x1]  ;;  %v11814_v40 = vld [vmem:[#allocation3 + $0x6c] sm:$0xff] }
 0x4cf   : > { %v6243_v25 = vsel %vm12192_vm8, %v6235_v22, %v6242_v26  ;;  %v6730_v8 = vsel %vm12159_vm15, %v6725_v36, %v14325_v41  ;;  %v6740_v42 = vsel %vm12159_vm15, %v6735_v49, %v6739_v54  ;;  %v6251_v13 = vor.u32 %v6249_v5, %v6248_v20  ;;  %6450 = vst.msk [vmem:[#allocation3 + $0xa0] sm:$0xf] %vm493_vm2, %v6260_v7  ;;  %v14405_v22 = vpop.f32.mrf.mxu3  ;;  %v11832_v36 = vld [vmem:[#allocation3 + $0x6c] sm:$0xff] }
 0x4d0   : > { %6443 = vst.msk [vmem:[#allocation3 + $0x94] sm:$0xf] %vm493_vm2, %v6243_v25  ;;  %v7529_v57 = vpack.c.b16 %v7506_v46, %v7505_v62  ;;  %v545_v1 = vsel %vm12068_vm6, 0, %v544_v0  ;;  %v6269_v53 = vrot.slane %v14366_v16, 4  ;;  %v6747_v41 = vrot.slane %v6745_v23, 5 }
 0x4d1   : > { %v6444_v59 = vld [vmem:[#allocation3 + $0x98] sm:$0x1]  ;;  %v14398_v51 = vrot.slane %v6751_v55, 5  ;;  %v6757_v9 = vrot.slane %v6755_v6, 4  ;;  %v6286_v38 = vrot.slane %v14382_v24, 4  ;;  %v6928_v5 = vunpack.c.l.b16 %v6730_v8 }
 0x4d2   : > { %11292 = vmatmul.msk.bf16.gmra.mxu2 %vm5391_vm4, %v6951_v12  ;;  %v6445_v11 = vsel %vm12068_vm6, %v6244_v58, %v6444_v59  ;;  %v6744_v12 = vrot.slane %v6742_v27, 4  ;;  %v6929_v61 = vunpack.c.l.b16 %v6740_v42  ;;  %v7439_v2 = vrot.slane %v14359_v39, 5  ;;  %546 = vst [vmem:[#allocation3 + $0xa8] sm:$0x1] %v545_v1  ;;  %v6496_v46 = vld [vmem:[#allocation3 + $0x7c] sm:$0xf] }
 0x4d3   : > { %6446 = vst [vmem:[#allocation3 + $0x98] sm:$0x1] %v6445_v11  ;;  %v6447_v44 = vld [vmem:[#allocation3 + $0x9c] sm:$0xf]  ;;  %v6277_v20 = vsel %vm12192_vm8, %v6269_v53, %v13901_v60  ;;  %v6758_v30 = vor.u32 %v6757_v9, %v14398_v51  ;;  %v548_v52 = vsel %vm12068_vm6, 0, %v547_v56  ;;  %v6294_v39 = vsel %vm12192_vm8, %v6286_v38, %v13909_v17  ;;  %v14445_v38 = vpop.f32.mrf.mxu2 }
 0x4d4   : > { %v6448_v35 = vsel %vm13905_vm7, %v6251_v13, %v6447_v44  ;;  %v6451_v63 = vld [vmem:[#allocation3 + $0xa4] sm:$0x1]  ;;  %v6748_v45 = vor.u32 %v6747_v41, %v6744_v12  ;;  %v6952_v4 = vpack.c.b16 %v6929_v61, %v6928_v5  ;;  %v7441_v15 = vrot.slane %v7439_v2, 4  ;;  %6457 = vst.msk [vmem:[#allocation3 + $0xac] sm:$0xf] %vm493_vm2, %v6277_v20 }
 0x4d5   : > { %11377 = vmatmul.msk.bf16.gmra.mxu3 %vm5391_vm4, %v11813_v29  ;;  %v6452_v21 = vsel %vm12068_vm6, %v6261_v10, %v6451_v63  ;;  %v7335_v29 = vld [vmem:[#allocation3 + $0x6c] sm:$0xe]  ;;  %6449 = vst [vmem:[#allocation3 + $0x9c] sm:$0xf] %v6448_v35  ;;  %v6266_v34 = vshll.u32 %v14300_v50, 16  ;;  %v6761_v60 = vshll.u32 %v6518_v28, 16 }
 0x4d6   : > { %11500 = vmatmul.msk.bf16.gmra.mxu1 %vm5391_vm4, %v11831_v3  ;;  %v14415_v3 = vpop.f32.mrf.mxu0  ;;  %6453 = vst [vmem:[#allocation3 + $0xa4] sm:$0x1] %v6452_v21  ;;  %v11394_v33 = vrot.slane %v7335_v29, 9  ;;  %v7442_v31 = vrot.slane %v6518_v28, 5  ;;  %v6749_v32 = vrot.slane %v6748_v45, 4  ;;  %v6759_v17 = vrot.slane %v6758_v30, 4 }
 0x4d7   : > { %549 = vst [vmem:[#allocation3 + $0xb4] sm:$0x1] %v548_v52  ;;  %v6268_v14 = vor.u32 %v6266_v34, %v14366_v16  ;;  %v6763_v54 = vrot.slane %v6761_v60, 5  ;;  %v6495_v16 = vld [vmem:[#allocation3 + $0x78] sm:$0xf]  ;;  %v6775_v62 = vshll.u32 %v6496_v46, 16 }
 0x4d8   : > { %6464 = vst.msk [vmem:[#allocation3 + $0xb8] sm:$0xf] %vm493_vm2, %v6294_v39  ;;  %v7443_v50 = vsel %vm12106_vm12, %v7441_v15, %v7442_v31  ;;  %v7440_v55 = vsel %vm12106_vm12, %v11394_v33, %v7439_v2  ;;  %v6754_v58 = vsel %vm12159_vm15, %v6749_v32, %v14398_v51  ;;  %v6766_v6 = vshrl.u32 %v6495_v16, 16  ;;  %v7336_v5 = vld [vmem:[#allocation3 + $0x78] sm:$0xe] }
 0x4d9   : > { %v6454_v49 = vld [vmem:[#allocation3 + $0xa8] sm:$0xf]  ;;  %v7508_v25 = vunpack.c.l.b16 %v7443_v50  ;;  %v6764_v0 = vsel %vm12159_vm15, %v6759_v17, %v6763_v54  ;;  %v6769_v7 = vshll.u32 %v6495_v16, 16  ;;  %v6779_v10 = vshrl.u32 %v6496_v46, 16  ;;  %v6519_v61 = vld [vmem:[#allocation3 + $0x80] sm:$0x1] }
 0x4da   : > { %v6455_v27 = vsel %vm13905_vm7, %v6268_v14, %v6454_v49  ;;  %v7507_v8 = vunpack.c.l.b16 %v7440_v55  ;;  %v6930_v11 = vunpack.c.l.b16 %v6754_v58  ;;  %v6931_v1 = vunpack.c.l.b16 %v6764_v0  ;;  %v11815_v30 = vld [vmem:[#allocation3 + $0x78] sm:$0xff]  ;;  %v6498_v33 = vld [vmem:[#allocation3 + $0x88] sm:$0xf]  ;;  %v6497_v31 = vld [vmem:[#allocation3 + $0x84] sm:$0xf] }
 0x4db   : > { %6456 = vst [vmem:[#allocation3 + $0xa8] sm:$0xf] %v6455_v27  ;;  %v7446_v53 = vrot.slane %v6496_v46, 5  ;;  %v6768_v12 = vrot.slane %v6766_v6, 4  ;;  %v6771_v41 = vrot.slane %v6769_v7, 5  ;;  %v6777_v51 = vrot.slane %v6775_v62, 5 }
 0x4dc   : > { %v6781_v9 = vrot.slane %v6779_v10, 4  ;;  %v6953_v2 = vpack.c.b16 %v6931_v1, %v6930_v11  ;;  %v11395_v28 = vrot.slane %v7336_v5, 9  ;;  %v7449_v29 = vrot.slane %v6519_v61, 5  ;;  %v11833_v52 = vld [vmem:[#allocation3 + $0x78] sm:$0xff]  ;;  %v11816_v5 = vld [vmem:[#allocation3 + $0x84] sm:$0xff] }
 0x4dd   : > { %11415 = vmatmul.msk.bf16.gmra.mxu0 %vm5391_vm4, %v7529_v57  ;;  %v7530_v57 = vpack.c.b16 %v7508_v25, %v7507_v8  ;;  %v7448_v56 = vrot.slane %v7446_v53, 4  ;;  %v6772_v35 = vor.u32 %v6771_v41, %v6768_v12  ;;  %v6785_v45 = vshll.u32 %v6519_v61, 16  ;;  %v7337_v8 = vld [vmem:[#allocation3 + $0x84] sm:$0xe] }
 0x4de   : > { %v6461_v13 = vld [vmem:[#allocation3 + $0xb4] sm:$0xf]  ;;  %v6782_v63 = vor.u32 %v6781_v9, %v6777_v51  ;;  %v7447_v34 = vsel %vm12106_vm12, %v11395_v28, %v7446_v53  ;;  %v6790_v49 = vshrl.u32 %v6497_v31, 16  ;;  %v6793_v54 = vshll.u32 %v6497_v31, 16  ;;  %v11834_v61 = vld [vmem:[#allocation3 + $0x84] sm:$0xff] }
 0x4df   : > { %v7450_v37 = vsel %vm12106_vm12, %v7448_v56, %v7449_v29  ;;  %v7509_v32 = vunpack.c.l.b16 %v7447_v34  ;;  %v6799_v46 = vshll.u32 %v6498_v33, 16  ;;  %v6803_v16 = vshrl.u32 %v6498_v33, 16  ;;  %v6499_v56 = vld [vmem:[#allocation3 + $0x90] sm:$0xf] }
 0x4e0   : > { %v6783_v15 = vrot.slane %v6782_v63, 4  ;;  %v7510_v14 = vunpack.c.l.b16 %v7450_v37  ;;  %v7453_v27 = vrot.slane %v6498_v33, 5  ;;  %v6792_v6 = vrot.slane %v6790_v49, 4 }
 0x4e1   : > { %v6795_v7 = vrot.slane %v6793_v54, 5  ;;  %v6801_v62 = vrot.slane %v6799_v46, 5  ;;  %v6805_v10 = vrot.slane %v6803_v16, 4  ;;  %v11396_v53 = vrot.slane %v7337_v8, 9 }
 0x4e2   : > { %11293 = vmatmul.msk.bf16.gmra.mxu2 %vm5391_vm4, %v6952_v4  ;;  %v6773_v4 = vrot.slane %v6772_v35, 4  ;;  %v7531_v25 = vpack.c.b16 %v7510_v14, %v7509_v32  ;;  %v7455_v1 = vrot.slane %v7453_v27, 4  ;;  %v6814_v37 = vshrl.u32 %v6499_v56, 16 }
 0x4e3   : > { %v7890_v19 = vpop.f32.mrf.mxu1  ;;  %v6796_v12 = vor.u32 %v6795_v7, %v6792_v6  ;;  %v6806_v41 = vor.u32 %v6805_v10, %v6801_v62  ;;  %v7454_v63 = vsel %vm12106_vm12, %v11396_v53, %v7453_v27  ;;  %v6817_v34 = vshll.u32 %v6499_v56, 16  ;;  %v6521_v27 = vld [vmem:[#allocation3 + $0x98] sm:$0x1]  ;;  %v11817_v53 = vld [vmem:[#allocation3 + $0x90] sm:$0xff]  ;;  %v6501_v56 = vld [vmem:[#allocation3 + $0x9c] sm:$0xf] }
 0x4e4   : > { %v14425_v26 = vadd.f32 %v7890_v19, %v14288_v43  ;;  %v6283_v43 = vshll.u32 %v14340_v47, 16  ;;  %v6787_v19 = vrot.slane %v6785_v45, 5  ;;  %v6778_v17 = vsel %vm12159_vm15, %v6773_v4, %v6777_v51  ;;  %v6500_v45 = vld [vmem:[#allocation3 + $0x94] sm:$0xf] }
 0x4e5   : > { %11378 = vmatmul.msk.bf16.gmra.mxu3 %vm5391_vm4, %v11814_v40  ;;  %v6932_v58 = vunpack.c.l.b16 %v6778_v17  ;;  %v6797_v28 = vrot.slane %v6796_v12, 4  ;;  %v6823_v33 = vshll.u32 %v6500_v45, 16  ;;  %v6827_v31 = vshrl.u32 %v6500_v45, 16  ;;  %v11835_v12 = vld [vmem:[#allocation3 + $0x90] sm:$0xff] }
 0x4e6   : > { %11501 = vmatmul.msk.bf16.gmra.mxu1 %vm5391_vm4, %v11832_v36  ;;  %v6285_v47 = vor.u32 %v6283_v43, %v14382_v24  ;;  %v6788_v50 = vsel %vm12159_vm15, %v6783_v15, %v6787_v19  ;;  %v6816_v17 = vrot.slane %v6814_v37, 4  ;;  %v7460_v54 = vrot.slane %v6500_v45, 5 }
 0x4e7   : > { %v6933_v0 = vunpack.c.l.b16 %v6788_v50  ;;  %v6819_v46 = vrot.slane %v6817_v34, 5  ;;  %v6838_v37 = vshrl.u32 %v6501_v56, 16 }
 0x4e8   : > { %v7251_v23 = vpop.f32.mrf.mxu3  ;;  %v6462_v24 = vsel %vm13905_vm7, %v6285_v47, %v6461_v13 }
 0x4e9   : > { %6463 = vst [vmem:[#allocation3 + $0xb4] sm:$0xf] %v6462_v24  ;;  %v6820_v10 = vor.u32 %v6819_v46, %v6816_v17  ;;  %v6840_v17 = vrot.slane %v6838_v37, 4 }
 0x4ea   : > { %v7605_v42 = vpop.f32.mrf.mxu0 }
 0x4eb   : > { %v14443_v59 = vpop.f32.mrf.mxu1 }
 0x4ed   : > { %11416 = vmatmul.msk.bf16.gmra.mxu0 %vm5391_vm4, %v7530_v57  ;;  %v6954_v57 = vpack.c.b16 %v6933_v0, %v6932_v58  ;;  %v7338_v0 = vld [vmem:[#allocation3 + $0x90] sm:$0xe] }
 0x4f0   : > { %v7253_v44 = vpop.f32.mrf.mxu3 }
 0x4f2   : > { %11294 = vmatmul.msk.bf16.gmra.mxu2 %vm5391_vm4, %v6953_v2  ;;  %v7607_v21 = vpop.f32.mrf.mxu0 }
 0x4f3   : > { %v14451_v20 = vpop.f32.mrf.mxu1 }
 0x4f5   : > { %v7028_v39 = vpop.f32.mrf.mxu2  ;;  %11379 = vmatmul.msk.bf16.gmra.mxu3 %vm5391_vm4, %v11815_v30 }
 0x4f6   : > { %11502 = vmatmul.msk.bf16.gmra.mxu1 %vm5391_vm4, %v11833_v52  ;;  %v7252_v60 = vadd.f32 %v7251_v23, %v7028_v39  ;;  %v7511_v39 = vunpack.c.l.b16 %v7454_v63 }
 0x4f8   : > { %v14459_v40 = vadd.f32 %v7605_v42, %v7252_v60  ;;  %v7256_v36 = vpop.f32.mrf.mxu3  ;;  %v6520_v42 = vld [vmem:[#allocation3 + $0x8c] sm:$0x1]  ;;  %v6802_v60 = vsel %vm12159_vm15, %v6797_v28, %v6801_v62  ;;  %v7462_v62 = vrot.slane %v7460_v54, 4 }
 0x4f9   : > { %v7456_v24 = vrot.slane %v6520_v42, 5  ;;  %v6809_v2 = vshll.u32 %v6520_v42, 16  ;;  %v6934_v50 = vunpack.c.l.b16 %v6802_v60 }
 0x4fa   : > { %v7610_v43 = vpop.f32.mrf.mxu0 }
 0x4fb   : > { %v14465_v55 = vpop.f32.mrf.mxu1  ;;  %v6811_v52 = vrot.slane %v6809_v2, 5  ;;  %v6502_v2 = vld [vmem:[#allocation3 + $0xa0] sm:$0xf] }
 0x4fc   : > { %v6851_v34 = vshrl.u32 %v6502_v2, 16 }
 0x4fd   : > { %v7030_v23 = vpop.f32.mrf.mxu2  ;;  %11417 = vmatmul.msk.bf16.gmra.mxu0 %vm5391_vm4, %v7531_v25  ;;  %v6829_v25 = vrot.slane %v6827_v31, 4 }
 0x4fe   : > { %v7254_v47 = vadd.f32 %v7253_v44, %v7030_v23  ;;  %v7457_v44 = vsel %vm12106_vm12, %v7455_v1, %v7456_v24  ;;  %v7463_v1 = vrot.slane %v6521_v27, 5 }
 0x4ff   : > { %v7512_v30 = vunpack.c.l.b16 %v7457_v44 }
 0x500   : > { %v14468_v13 = vadd.f32 %v7607_v21, %v7254_v47  ;;  %v7258_v11 = vpop.f32.mrf.mxu3  ;;  %v6807_v21 = vrot.slane %v6806_v41, 4  ;;  %v11397_v47 = vrot.slane %v7338_v0, 9  ;;  %v6833_v41 = vshll.u32 %v6521_v27, 16 }
 0x502   : > { %11295 = vmatmul.msk.bf16.gmra.mxu2 %vm5391_vm4, %v6954_v57  ;;  %v7612_v51 = vpop.f32.mrf.mxu0  ;;  %v6812_v19 = vsel %vm12159_vm15, %v6807_v21, %v6811_v52  ;;  %v6835_v63 = vrot.slane %v6833_v41, 5 }
 0x503   : > { %v14471_v9 = vpop.f32.mrf.mxu1  ;;  %v6935_v49 = vunpack.c.l.b16 %v6812_v19 }
 0x505   : > { %v7033_v35 = vpop.f32.mrf.mxu2  ;;  %11380 = vmatmul.msk.bf16.gmra.mxu3 %vm5391_vm4, %v11816_v5  ;;  %v6955_v6 = vpack.c.b16 %v6935_v49, %v6934_v50  ;;  %v7461_v5 = vsel %vm12106_vm12, %v11397_v47, %v7460_v54  ;;  %v6853_v54 = vrot.slane %v6851_v34, 4 }
 0x506   : > { %11503 = vmatmul.msk.bf16.gmra.mxu1 %vm5391_vm4, %v11834_v61  ;;  %v7257_v29 = vadd.f32 %v7256_v36, %v7033_v35  ;;  %v7532_v36 = vpack.c.b16 %v7512_v30, %v7511_v39  ;;  %v6847_v30 = vshll.u32 %v6502_v2, 16  ;;  %v6841_v39 = vshll.u32 %v6501_v56, 16 }
 0x508   : > { %v14479_v4 = vadd.f32 %v7610_v43, %v7257_v29  ;;  %v7261_v15 = vpop.f32.mrf.mxu3  ;;  %v6825_v43 = vrot.slane %v6823_v33, 5  ;;  %v7513_v29 = vunpack.c.l.b16 %v7461_v5  ;;  %v6843_v50 = vrot.slane %v6841_v39, 5  ;;  %v6504_v5 = vld [vmem:[#allocation3 + $0xac] sm:$0xf] }
 0x509   : > { %v6849_v49 = vrot.slane %v6847_v30, 5  ;;  %v6875_v30 = vshrl.u32 %v6504_v5, 16 }
 0x50a   : > { %v7615_v14 = vpop.f32.mrf.mxu0  ;;  %v6830_v8 = vor.u32 %v6829_v25, %v6825_v43 }
 0x50b   : > { %v14485_v32 = vpop.f32.mrf.mxu1 }
 0x50c   : > { %v6831_v61 = vrot.slane %v6830_v8, 4 }
 0x50d   : > { %v7035_v16 = vpop.f32.mrf.mxu2  ;;  %11418 = vmatmul.msk.bf16.gmra.mxu0 %vm5391_vm4, %v7532_v36 }
 0x50e   : > { %v7259_v58 = vadd.f32 %v7258_v11, %v7035_v16  ;;  %v7464_v11 = vsel %vm12106_vm12, %v7462_v62, %v7463_v1  ;;  %v6836_v52 = vsel %vm12159_vm15, %v6831_v61, %v6835_v63  ;;  %v7339_v16 = vld [vmem:[#allocation3 + $0x9c] sm:$0xe]  ;;  %v6844_v62 = vor.u32 %v6843_v50, %v6840_v17 }
 0x50f   : > { %v7514_v35 = vunpack.c.l.b16 %v7464_v11  ;;  %v6937_v31 = vunpack.c.l.b16 %v6836_v52 }
 0x510   : > { %v14488_v23 = vadd.f32 %v7612_v51, %v7259_v58  ;;  %v7263_v7 = vpop.f32.mrf.mxu3  ;;  %v6821_v51 = vrot.slane %v6820_v10, 4  ;;  %v6854_v10 = vor.u32 %v6853_v54, %v6849_v49 }
 0x512   : > { %11296 = vmatmul.msk.bf16.gmra.mxu2 %vm5391_vm4, %v6955_v6  ;;  %v7617_v42 = vpop.f32.mrf.mxu0  ;;  %v6826_v45 = vsel %vm12159_vm15, %v6821_v51, %v6825_v43  ;;  %v6522_v43 = vld [vmem:[#allocation3 + $0xa4] sm:$0x1]  ;;  %v11398_v6 = vrot.slane %v7339_v16, 9  ;;  %v6845_v51 = vrot.slane %v6844_v62, 4  ;;  %v7340_v16 = vld [vmem:[#allocation3 + $0xa8] sm:$0xe] }
 0x513   : > { %v14491_v57 = vpop.f32.mrf.mxu1  ;;  %v6936_v33 = vunpack.c.l.b16 %v6826_v45  ;;  %v7470_v1 = vrot.slane %v6522_v43, 5  ;;  %v6857_v41 = vshll.u32 %v6522_v43, 16  ;;  %v6871_v45 = vshll.u32 %v6504_v5, 16  ;;  %v6523_v43 = vld [vmem:[#allocation3 + $0xb0] sm:$0x1] }
 0x514   : > { %v6850_v52 = vsel %vm12159_vm15, %v6845_v51, %v6849_v49 }
 0x515   : > { %v7038_v24 = vpop.f32.mrf.mxu2  ;;  %11381 = vmatmul.msk.bf16.gmra.mxu3 %vm5391_vm4, %v11817_v53  ;;  %v6956_v58 = vpack.c.b16 %v6937_v31, %v6936_v33  ;;  %v11818_v53 = vld [vmem:[#allocation3 + $0x9c] sm:$0xff]  ;;  %v6859_v56 = vrot.slane %v6857_v41, 5  ;;  %v6938_v31 = vunpack.c.l.b16 %v6850_v52  ;;  %v6873_v54 = vrot.slane %v6871_v45, 5 }
 0x516   : > { %11504 = vmatmul.msk.bf16.gmra.mxu1 %vm5391_vm4, %v11835_v12  ;;  %v7262_v44 = vadd.f32 %v7261_v15, %v7038_v24  ;;  %v7533_v15 = vpack.c.b16 %v7514_v35, %v7513_v29  ;;  %v11836_v12 = vld [vmem:[#allocation3 + $0x9c] sm:$0xff]  ;;  %v6855_v24 = vrot.slane %v6854_v10, 4  ;;  %v11399_v10 = vrot.slane %v7340_v16, 9 }
 0x517   : > { %v7477_v41 = vrot.slane %v6523_v43, 5 }
 0x518   : > { %v14499_v28 = vadd.f32 %v7615_v14, %v7262_v44  ;;  %v7266_v21 = vpop.f32.mrf.mxu3  ;;  %v7467_v14 = vrot.slane %v6502_v2, 5  ;;  %v6503_v2 = vld [vmem:[#allocation3 + $0xa8] sm:$0xf]  ;;  %v6860_v37 = vsel %vm12159_vm15, %v6855_v24, %v6859_v56 }
 0x519   : > { %v6862_v39 = vshrl.u32 %v6503_v2, 16  ;;  %v6865_v34 = vshll.u32 %v6503_v2, 16 }
 0x51a   : > { %v7620_v60 = vpop.f32.mrf.mxu0  ;;  %v7469_v27 = vrot.slane %v7467_v14, 4  ;;  %v7468_v11 = vsel %vm12106_vm12, %v11398_v6, %v7467_v14  ;;  %v6939_v14 = vunpack.c.l.b16 %v6860_v37 }
 0x51b   : > { %v14505_v19 = vpop.f32.mrf.mxu1  ;;  %v7515_v29 = vunpack.c.l.b16 %v7468_v11  ;;  %v6864_v17 = vrot.slane %v6862_v39, 4  ;;  %v6867_v50 = vrot.slane %v6865_v34, 5  ;;  %v11837_v11 = vld [vmem:[#allocation3 + $0xa8] sm:$0xff] }
 0x51d   : > { %v7040_v36 = vpop.f32.mrf.mxu2  ;;  %11419 = vmatmul.msk.bf16.gmra.mxu0 %vm5391_vm4, %v7533_v15 }
 0x51e   : > { %v7264_v46 = vadd.f32 %v7263_v7, %v7040_v36  ;;  %v7471_v7 = vsel %vm12106_vm12, %v7469_v27, %v7470_v1  ;;  %v6957_v27 = vpack.c.b16 %v6939_v14, %v6938_v31  ;;  %v6868_v1 = vor.u32 %v6867_v50, %v6864_v17 }
 0x51f   : > { %v7516_v44 = vunpack.c.l.b16 %v7471_v7  ;;  %v11842_v7 = vld [vmem:[%s15661_s6 + $0x28] sm:$0xff] }
 0x520   : > { %v14508_v25 = vadd.f32 %v7617_v42, %v7264_v46  ;;  %v7268_v0 = vpop.f32.mrf.mxu3  ;;  %v6877_v46 = vrot.slane %v6875_v30, 4  ;;  %8948 = vmatpush.bf16.msra.mxu3 %v11842_v7 }
 0x522   : > { %11297 = vmatmul.msk.bf16.gmra.mxu2 %vm5391_vm4, %v6956_v58  ;;  %v7622_v47 = vpop.f32.mrf.mxu0 }
 0x523   : > { %v14511_v8 = vpop.f32.mrf.mxu1 }
 0x525   : > { %v7043_v42 = vpop.f32.mrf.mxu2  ;;  %11382 = vmatmul.msk.bf16.gmra.mxu3 %vm5391_vm4, %v11818_v53  ;;  %v6878_v53 = vor.u32 %v6877_v46, %v6873_v54 }
 0x526   : > { %11505 = vmatmul.msk.bf16.gmra.mxu1 %vm5391_vm4, %v11836_v12  ;;  %v7267_v61 = vadd.f32 %v7266_v21, %v7043_v42  ;;  %v7534_v21 = vpack.c.b16 %v7516_v44, %v7515_v29  ;;  %v6506_v44 = vld [vmem:[#allocation3 + $0xb8] sm:$0xf]  ;;  %v6505_v29 = vld [vmem:[#allocation3 + $0xb4] sm:$0xf] }
 0x527   : > { %v6879_v2 = vrot.slane %v6878_v53, 4  ;;  %v6895_v34 = vshll.u32 %v6506_v44, 16  ;;  %v6524_v53 = vld [vmem:[#allocation3 + $0xbc] sm:$0x1] }
 0x528   : > { %v14519_v35 = vadd.f32 %v7620_v60, %v7267_v61  ;;  %v7271_v63 = vpop.f32.mrf.mxu3  ;;  %v7474_v60 = vrot.slane %v6504_v5, 5  ;;  %v6869_v61 = vrot.slane %v6868_v1, 4 }
 0x52a   : > { %v7625_v15 = vpop.f32.mrf.mxu0  ;;  %v7476_v62 = vrot.slane %v7474_v60, 4  ;;  %v7475_v5 = vsel %vm12106_vm12, %v11399_v10, %v7474_v60  ;;  %v6874_v31 = vsel %vm12159_vm15, %v6869_v61, %v6873_v54  ;;  %v6886_v60 = vshrl.u32 %v6505_v29, 16 }
 0x52b   : > { %v14525_v33 = vpop.f32.mrf.mxu1  ;;  %v7517_v39 = vunpack.c.l.b16 %v7475_v5  ;;  %v6940_v46 = vunpack.c.l.b16 %v6874_v31  ;;  %v7484_v5 = vrot.slane %v6524_v53, 5 }
 0x52c   : > { %v7478_v51 = vsel %vm12106_vm12, %v7476_v62, %v7477_v41  ;;  %v6888_v54 = vrot.slane %v6886_v60, 4  ;;  %v6897_v62 = vrot.slane %v6895_v34, 5  ;;  %v7341_v41 = vld [vmem:[#allocation3 + $0xb4] sm:$0xe]  ;;  %v8002_v34 = vld [vmem:[#allocation3 + $0xc] sm:$0xf] }
 0x52d   : > { %v7045_v36 = vpop.f32.mrf.mxu2  ;;  %11420 = vmatmul.msk.bf16.gmra.mxu0 %vm5391_vm4, %v7534_v21  ;;  %v7518_v45 = vunpack.c.l.b16 %v7478_v51  ;;  %v6899_v21 = vshrl.u32 %v6506_v44, 16 }
 0x52e   : > { %v7269_v49 = vadd.f32 %v7268_v0, %v7045_v36  ;;  %v11819_v0 = vld [vmem:[#allocation3 + $0xa8] sm:$0xff]  ;;  %v6889_v36 = vshll.u32 %v6505_v29, 16  ;;  %v11820_v29 = vld [vmem:[#allocation3 + $0xb4] sm:$0xff] }
 0x52f   : > { %v7535_v50 = vpack.c.b16 %v7518_v45, %v7517_v39  ;;  %v6901_v10 = vrot.slane %v6899_v21, 4  ;;  %v11838_v45 = vld [vmem:[#allocation3 + $0xb4] sm:$0xff]  ;;  %v6905_v39 = vshll.u32 %v6524_v53, 16 }
 0x530   : > { %v14528_v58 = vadd.f32 %v7622_v47, %v7269_v49  ;;  %v7273_v6 = vpop.f32.mrf.mxu3  ;;  %v6881_v47 = vshll.u32 %v6523_v43, 16 }
 0x532   : > { %11298 = vmatmul.msk.bf16.gmra.mxu2 %vm5391_vm4, %v6957_v27  ;;  %v7627_v12 = vpop.f32.mrf.mxu0  ;;  %v6883_v30 = vrot.slane %v6881_v47, 5  ;;  %v6891_v27 = vrot.slane %v6889_v36, 5  ;;  %v14572_v36 = vld [vmem:[#allocation3 + $0x14] sm:$0x1] }
 0x533   : > { %v14534_v42 = vpop.f32.mrf.mxu1 }
 0x534   : > { %v6884_v14 = vsel %vm12159_vm15, %v6879_v2, %v6883_v30  ;;  %v6892_v61 = vor.u32 %v6891_v27, %v6888_v54  ;;  %v6902_v2 = vor.u32 %v6901_v10, %v6897_v62  ;;  %v8660_v54 = vld [vmem:[#allocation3 + $0xc] sm:$0xe]  ;;  %v8051_v27 = vshrl.u32 %v8002_v34, 16 }
 0x535   : > { %v7048_v24 = vpop.f32.mrf.mxu2  ;;  %11383 = vmatmul.msk.bf16.gmra.mxu3 %vm5391_vm4, %v11819_v0  ;;  %v6941_v49 = vunpack.c.l.b16 %v6884_v14  ;;  %v14554_v0 = vld [vmem:[#allocation3 + $0x10] sm:$0xf]  ;;  %v8054_v10 = vshll.u32 %v8002_v34, 16 }
 0x536   : > { %11506 = vmatmul.msk.bf16.gmra.mxu1 %vm5391_vm4, %v11837_v11  ;;  %v7272_v56 = vadd.f32 %v7271_v63, %v7048_v24  ;;  %v11859_v63 = vld [vmem:[%s15661_s6 + $0x30] sm:$0xff]  ;;  %v11400_v24 = vrot.slane %v7341_v41, 9  ;;  %v6893_v14 = vrot.slane %v6892_v61, 4  ;;  %v6903_v60 = vrot.slane %v6902_v2, 4 }
 0x537   : > { %9239 = vmatpush.bf16.msra.mxu0 %v11859_v63  ;;  %v6958_v47 = vpack.c.b16 %v6941_v49, %v6940_v46  ;;  %v9354_v61 = vld [vmem:[#allocation3 + $0x1c] sm:$0xf] }
 0x538   : > { %v14542_v52 = vadd.f32 %v7625_v15, %v7272_v56  ;;  %v7276_v37 = vpop.f32.mrf.mxu3  ;;  %v7481_v15 = vrot.slane %v6506_v44, 5  ;;  %v8726_v56 = vrot.slane %v14554_v0, 5 }
 0x53a   : > { %v7630_v17 = vpop.f32.mrf.mxu0  ;;  %v7483_v7 = vrot.slane %v7481_v15, 4  ;;  %v7482_v31 = vsel %vm12106_vm12, %v11400_v24, %v7481_v15  ;;  %v8728_v46 = vrot.slane %v8726_v56, 4  ;;  %v9353_v15 = vld [vmem:[#allocation3 + $0x18] sm:$0xf]  ;;  %v8060_v24 = vshll.u32 %v14554_v0, 16 }
 0x53b   : > { %v14551_v16 = vpop.f32.mrf.mxu1  ;;  %v7519_v41 = vunpack.c.l.b16 %v7482_v31  ;;  %v9415_v31 = vshrl.u32 %v9354_v61, 16 }
 0x53c   : > { %15743 = vst [vmem:[#allocation14_spill] sm:$0xff] %v14551_v16  ;;  %v7485_v30 = vsel %vm12106_vm12, %v7483_v7, %v7484_v5  ;;  %v8729_v7 = vrot.slane %v14572_v36, 5  ;;  %v8064_v5 = vshrl.u32 %v14554_v0, 16 }
 0x53d   : > { %v7050_v43 = vpop.f32.mrf.mxu2  ;;  %11421 = vmatmul.msk.bf16.gmra.mxu0 %vm5391_vm4, %v7535_v50  ;;  %v7520_v50 = vunpack.c.l.b16 %v7485_v30  ;;  %v9402_v30 = vshrl.u32 %v9353_v15, 16 }
 0x53e   : > { %v7274_v1 = vadd.f32 %v7273_v6, %v7050_v43  ;;  %v11861_v6 = vld [vmem:[%s15661_s6 + $0x40] sm:$0xff]  ;;  %v6907_v43 = vrot.slane %v6905_v39, 5  ;;  %v9405_v39 = vshll.u32 %v9353_v15, 16  ;;  %v8066_v0 = vrot.slane %v8064_v5, 4 }
 0x53f   : > { %10299 = vmatpush.bf16.msra.mxu2 %v11861_v6  ;;  %v7536_v6 = vpack.c.b16 %v7520_v50, %v7519_v41 }
 0x540   : > { %v14556_v11 = vadd.f32 %v7627_v12, %v7274_v1  ;;  %v7278_v51 = vpop.f32.mrf.mxu3  ;;  %v11860_v12 = vld [vmem:[%s15661_s6 + $0x38] sm:$0xff] }
 0x541   : > { %9897 = vmatpush.bf16.msra.mxu1 %v11860_v12  ;;  %v8730_v12 = vsel %vm12106_vm12, %v8728_v46, %v8729_v7  ;;  %v14590_v46 = vld [vmem:[#allocation3 + $0x1c] sm:$0xf] }
 0x542   : > { %11299 = vmatmul.msk.bf16.gmra.mxu2 %vm5391_vm4, %v6958_v47  ;;  %v7632_v44 = vpop.f32.mrf.mxu0  ;;  %v6898_v47 = vsel %vm12159_vm15, %v6893_v14, %v6897_v62  ;;  %v8733_v5 = vrot.slane %v14590_v46, 5 }
 0x543   : > { %v14574_v49 = vpop.f32.mrf.mxu1  ;;  %v6942_v34 = vunpack.c.l.b16 %v6898_v47 }
 0x544   : > { %15744 = vst [vmem:[#allocation17_spill] sm:$0xff] %v14574_v49 }
 0x545   : > { %v7053_v21 = vpop.f32.mrf.mxu2  ;;  %11384 = vmatmul.msk.bf16.gmra.mxu3 %vm5391_vm4, %v11820_v29  ;;  %v8053_v29 = vrot.slane %v8051_v27, 4  ;;  %v9404_v27 = vrot.slane %v9402_v30, 4 }
 0x546   : > { %11507 = vmatmul.msk.bf16.gmra.mxu1 %vm5391_vm4, %v11838_v45  ;;  %v7277_v63 = vadd.f32 %v7276_v37, %v7053_v21  ;;  %v6908_v37 = vsel %vm12159_vm15, %v6903_v60, %v6907_v43  ;;  %v8056_v45 = vrot.slane %v8054_v10, 5  ;;  %v9411_v21 = vshll.u32 %v9354_v61, 16 }
 0x547   : > { %v6943_v62 = vunpack.c.l.b16 %v6908_v37  ;;  %v8062_v60 = vrot.slane %v8060_v24, 5  ;;  %v8840_v43 = vunpack.c.l.b16 %v8730_v12  ;;  %v9407_v10 = vrot.slane %v9405_v39, 5 }
 0x548   : > { %v14576_v1 = vadd.f32 %v7630_v17, %v7277_v63  ;;  %v7281_v53 = vpop.f32.mrf.mxu3  ;;  %v11531_v17 = vrot.slane %v8660_v54, 9  ;;  %v8057_v54 = vor.u32 %v8056_v45, %v8053_v29  ;;  %v14594_v47 = vrot.slane %v9411_v21, 5  ;;  %v9355_v45 = vld [vmem:[#allocation3 + $0x20] sm:$0x1] }
 0x549   : > { %v6959_v7 = vpack.c.b16 %v6943_v62, %v6942_v34  ;;  %v9417_v37 = vrot.slane %v9415_v31, 4  ;;  %v8070_v29 = vshll.u32 %v14572_v36, 16  ;;  %v9408_v30 = vor.u32 %v9407_v10, %v9404_v27  ;;  %v14606_v21 = vld [vmem:[#allocation3 + $0x20] sm:$0x1] }
 0x54a   : > { %15745 = vst [vmem:[#allocation8_spill] sm:$0xff] %v14576_v1  ;;  %v7635_v2 = vpop.f32.mrf.mxu0  ;;  %v8727_v50 = vsel %vm12106_vm12, %v11531_v17, %v8726_v56  ;;  %v11839_v17 = vld [vmem:[#allocation3 + $0xc0] sm:$0xff]  ;;  %v8084_v36 = vshll.u32 %v14590_v46, 16 }
 0x54b   : > { %v14596_v61 = vpop.f32.mrf.mxu1  ;;  %v8839_v24 = vunpack.c.l.b16 %v8727_v50  ;;  %v9418_v39 = vor.u32 %v9417_v37, %v14594_v47  ;;  %v8735_v50 = vrot.slane %v8733_v5, 4  ;;  %v8072_v27 = vrot.slane %v8070_v29, 5 }
 0x54c   : > { %15747 = vst [vmem:[#allocation18_spill] sm:$0xff] %v14596_v61  ;;  %v9409_v10 = vrot.slane %v9408_v30, 4  ;;  %v9357_v61 = vld [vmem:[#allocation3 + $0x28] sm:$0xf]  ;;  %v14623_v29 = vrot.slane %v8084_v36, 5 }
 0x54d   : > { %v7055_v14 = vpop.f32.mrf.mxu2  ;;  %11422 = vmatmul.msk.bf16.gmra.mxu0 %vm5391_vm4, %v7536_v6  ;;  %v8005_v6 = vld [vmem:[#allocation3 + $0x18] sm:$0xf]  ;;  %v8871_v12 = vpack.c.b16 %v8840_v43, %v8839_v24  ;;  %v9421_v43 = vshll.u32 %v9355_v45, 16 }
 0x54e   : > { %v7279_v63 = vadd.f32 %v7278_v51, %v7055_v14  ;;  %v8067_v51 = vor.u32 %v8066_v0, %v8062_v60  ;;  %v8075_v31 = vshrl.u32 %v8005_v6, 16  ;;  %v8078_v14 = vshll.u32 %v8005_v6, 16 }
 0x54f   : > { %v9419_v6 = vrot.slane %v9418_v39, 4  ;;  %v11843_v39 = vld [vmem:[#allocation3 + $0x18] sm:$0xff] }
 0x550   : > { %v14592_v41 = vadd.f32 %v7632_v44, %v7279_v63  ;;  %v7283_v15 = vpop.f32.mrf.mxu3  ;;  %v8058_v44 = vrot.slane %v8057_v54, 4  ;;  %v8068_v62 = vrot.slane %v8067_v51, 4  ;;  %v8661_v63 = vld [vmem:[#allocation3 + $0x18] sm:$0xe]  ;;  %v8736_v51 = vrot.slane %v14606_v21, 5 }
 0x551   : > { %v8077_v45 = vrot.slane %v8075_v31, 4 }
 0x552   : > { %15746 = vst [vmem:[#allocation9_spill] sm:$0xff] %v14592_v41  ;;  %11300 = vmatmul.msk.bf16.gmra.mxu2 %vm5391_vm4, %v6959_v7  ;;  %v14599_v56 = vpop.f32.mrf.mxu0  ;;  %v8063_v54 = vsel %vm12159_vm15, %v8058_v44, %v8062_v60  ;;  %v8088_v7 = vshrl.u32 %v14590_v46, 16  ;;  %v9423_v46 = vrot.slane %v9421_v43, 5 }
 0x553   : > { %v8437_v44 = vunpack.c.l.b16 %v8063_v54  ;;  %v14625_v30 = vpop.f32.mrf.mxu1 }
 0x554   : > { %15749 = vst [vmem:[#allocation11_spill] sm:$0xff] %v14625_v30  ;;  %v9424_v54 = vsel %vm12159_vm15, %v9419_v6, %v9423_v46 }
 0x555   : > { %v7058_v34 = vpop.f32.mrf.mxu2  ;;  %11553 = vmatmul.msk.bf16.vlgmr.msra.gmra.mxu3 %vm5391_vm4, %v8871_v12  ;;  %v11532_v12 = vrot.slane %v8661_v63, 9 }
 0x556   : > { %11508 = vmatmul.msk.bf16.gmra.mxu1 %vm5391_vm4, %v11839_v17  ;;  %v7282_v0 = vadd.f32 %v7281_v53, %v7058_v34  ;;  %v9356_v53 = vld [vmem:[#allocation3 + $0x24] sm:$0xf]  ;;  %v8073_v17 = vsel %vm12159_vm15, %v8068_v62, %v8072_v27  ;;  %v8080_v34 = vrot.slane %v8078_v14, 5  ;;  %v9414_v62 = vsel %vm12159_vm15, %v9409_v10, %v14594_v47  ;;  %v14635_v47 = vld [vmem:[#allocation3 + $0x28] sm:$0xf] }
 0x557   : > { %v9426_v31 = vshrl.u32 %v9356_v53, 16  ;;  %v9429_v14 = vshll.u32 %v9356_v53, 16  ;;  %v8438_v63 = vunpack.c.l.b16 %v8073_v17  ;;  %v9435_v27 = vshll.u32 %v9357_v61, 16 }
 0x558   : > { %v14612_v37 = vadd.f32 %v7635_v2, %v7282_v0  ;;  %v14614_v24 = vpop.f32.mrf.mxu3  ;;  %v8737_v2 = vsel %vm12106_vm12, %v8735_v50, %v8736_v51  ;;  %v8090_v0 = vrot.slane %v8088_v7, 4  ;;  %v8081_v43 = vor.u32 %v8080_v34, %v8077_v45 }
 0x559   : > { %v8734_v51 = vsel %vm12106_vm12, %v11532_v12, %v8733_v5  ;;  %v8842_v30 = vunpack.c.l.b16 %v8737_v2  ;;  %v9788_v41 = vunpack.c.l.b16 %v9414_v62  ;;  %v9789_v10 = vunpack.c.l.b16 %v9424_v54  ;;  %v14646_v62 = vld [vmem:[#allocation3 + $0x2c] sm:$0x1] }
 0x55a   : > { %15748 = vst [vmem:[#allocation19_spill] sm:$0xff] %v14612_v37  ;;  %v14619_v60 = vpop.f32.mrf.mxu0  ;;  %v9439_v37 = vshrl.u32 %v9357_v61, 16  ;;  %v8091_v7 = vor.u32 %v8090_v0, %v14623_v29  ;;  %v9428_v53 = vrot.slane %v9426_v31, 4  ;;  %v9431_v17 = vrot.slane %v9429_v14, 5  ;;  %v9358_v14 = vld [vmem:[#allocation3 + $0x2c] sm:$0x1] }
 0x55b   : > { %v8469_v46 = vpack.c.b16 %v8438_v63, %v8437_v44  ;;  %v8841_v45 = vunpack.c.l.b16 %v8734_v51  ;;  %v8082_v34 = vrot.slane %v8081_v43, 4  ;;  %v8094_v5 = vshll.u32 %v14606_v21, 16  ;;  %v8008_v44 = vld [vmem:[#allocation3 + $0x24] sm:$0xf] }
 0x55c   : > { %v8740_v12 = vrot.slane %v14635_v47, 5  ;;  %v9820_v31 = vpack.c.b16 %v9789_v10, %v9788_v41  ;;  %v9432_v54 = vor.u32 %v9431_v17, %v9428_v53  ;;  %v8743_v41 = vrot.slane %v14646_v62, 5 }
 0x55d   : > { %v7060_v50 = vpop.f32.mrf.mxu2  ;;  %11639 = vmatmul.msk.bf16.vlgmr.msra.gmra.mxu0 %vm5391_vm4, %v11843_v39  ;;  %v14641_v39 = vrot.slane %v9435_v27, 5  ;;  %v8872_v0 = vpack.c.b16 %v8842_v30, %v8841_v45  ;;  %v8087_v21 = vsel %vm12159_vm15, %v8082_v34, %v14623_v29  ;;  %v9445_v51 = vshll.u32 %v9358_v14, 16  ;;  %v9360_v14 = vld [vmem:[#allocation3 + $0x34] sm:$0xf] }
 0x55e   : > { %v7284_v36 = vadd.f32 %v7283_v15, %v7060_v50  ;;  %v9441_v15 = vrot.slane %v9439_v37, 4  ;;  %v14649_v37 = vpop.f32.mrf.mxu1  ;;  %v8096_v50 = vrot.slane %v8094_v5, 5  ;;  %v8742_v30 = vrot.slane %v8740_v12, 4  ;;  %v9359_v5 = vld [vmem:[#allocation3 + $0x30] sm:$0xf] }
 0x55f   : > { %15751 = vst [vmem:[#allocation12_spill] sm:$0xff] %v14649_v37  ;;  %v8099_v10 = vshrl.u32 %v8008_v44, 16  ;;  %v9433_v17 = vrot.slane %v9432_v54, 4  ;;  %v11844_v37 = vld [vmem:[#allocation3 + $0x24] sm:$0xff] }
 0x560   : > { %v14639_v6 = vadd.f32 %v14599_v56, %v7284_v36  ;;  %v7288_v61 = vpop.f32.mrf.mxu3  ;;  %v8092_v56 = vrot.slane %v8091_v7, 4  ;;  %v9442_v63 = vor.u32 %v9441_v15, %v14641_v39  ;;  %v8662_v36 = vld [vmem:[#allocation3 + $0x24] sm:$0xe]  ;;  %v8102_v7 = vshll.u32 %v8008_v44, 16 }
 0x561   : > { %v8112_v15 = vshrl.u32 %v14635_v47, 16  ;;  %v8101_v54 = vrot.slane %v8099_v10, 4 }
 0x562   : > { %15750 = vst [vmem:[#allocation10_spill] sm:$0xff] %v14639_v6  ;;  %11515 = vmatmul.msk.bf16.vlgmr.msrb.gmra.mxu2 %vm5391_vm4, %v8469_v46  ;;  %v7642_v2 = vpop.f32.mrf.mxu0  ;;  %v8097_v53 = vsel %vm12159_vm15, %v8092_v56, %v8096_v50  ;;  %v8108_v46 = vshll.u32 %v14635_v47, 16  ;;  %v9443_v34 = vrot.slane %v9442_v63, 4  ;;  %v9447_v56 = vrot.slane %v9445_v51, 5 }
 0x563   : > { %v8104_v50 = vrot.slane %v8102_v7, 5  ;;  %v8114_v63 = vrot.slane %v8112_v15, 4 }
 0x564   : > { %v14670_v47 = vrot.slane %v8108_v46, 5 }
 0x565   : > { %v7063_v27 = vpop.f32.mrf.mxu2  ;;  %11554 = vmatmul.msk.bf16.gmra.mxu3 %vm5391_vm4, %v8872_v0  ;;  %v8439_v0 = vunpack.c.l.b16 %v8087_v21  ;;  %v9448_v21 = vsel %vm12159_vm15, %v9443_v34, %v9447_v56  ;;  %v14682_v56 = vld [vmem:[#allocation3 + $0x34] sm:$0xf] }
 0x566   : > { %11661 = vmatmul.msk.bf16.vlgmr.msra.gmra.mxu1 %vm5391_vm4, %v9820_v31  ;;  %v7287_v43 = vadd.f32 %v14614_v24, %v7063_v27  ;;  %v11533_v24 = vrot.slane %v8662_v36, 9  ;;  %v8744_v31 = vsel %vm12106_vm12, %v8742_v30, %v8743_v41  ;;  %v8440_v27 = vunpack.c.l.b16 %v8097_v53 }
 0x567   : > { %v9453_v36 = vshll.u32 %v9359_v5, 16  ;;  %v9459_v30 = vshll.u32 %v9360_v14, 16  ;;  %v9463_v41 = vshrl.u32 %v9360_v14, 16  ;;  %v8844_v53 = vunpack.c.l.b16 %v8744_v31 }
 0x568   : > { %v14663_v29 = vadd.f32 %v14619_v60, %v7287_v43  ;;  %v7291_v45 = vpop.f32.mrf.mxu3  ;;  %v9438_v60 = vsel %vm12159_vm15, %v9433_v17, %v14641_v39  ;;  %v9450_v43 = vshrl.u32 %v9359_v5, 16  ;;  %v8741_v51 = vsel %vm12106_vm12, %v11533_v24, %v8740_v12  ;;  %v14677_v17 = vpop.f32.mrf.mxu1  ;;  %v8011_v24 = vld [vmem:[#allocation3 + $0x30] sm:$0xf] }
 0x569   : > { %v8470_v7 = vpack.c.b16 %v8440_v27, %v8439_v0  ;;  %v8105_v39 = vor.u32 %v8104_v50, %v8101_v54  ;;  %15753 = vst [vmem:[#allocation20_spill] sm:$0xff] %v14677_v17  ;;  %v9790_v46 = vunpack.c.l.b16 %v9438_v60  ;;  %v9791_v15 = vunpack.c.l.b16 %v9448_v21  ;;  %v9361_v50 = vld [vmem:[#allocation3 + $0x38] sm:$0x1] }
 0x56a   : > { %15752 = vst [vmem:[#allocation13_spill] sm:$0xff] %v14663_v29  ;;  %v7645_v44 = vpop.f32.mrf.mxu0  ;;  %v8115_v6 = vor.u32 %v8114_v63, %v14670_v47  ;;  %v9452_v34 = vrot.slane %v9450_v43, 4  ;;  %v14684_v49 = vrot.slane %v9459_v30, 5  ;;  %v9465_v12 = vrot.slane %v9463_v41, 4 }
 0x56b   : > { %v8118_v0 = vshll.u32 %v14646_v62, 16  ;;  %v9821_v27 = vpack.c.b16 %v9791_v15, %v9790_v46  ;;  %v8106_v54 = vrot.slane %v8105_v39, 4  ;;  %v8126_v30 = vshll.u32 %v8011_v24, 16  ;;  %v9362_v15 = vld [vmem:[#allocation3 + $0x3c] sm:$0xf] }
 0x56c   : > { %v8116_v60 = vrot.slane %v8115_v6, 4  ;;  %v9466_v43 = vor.u32 %v9465_v12, %v14684_v49  ;;  %v8132_v39 = vshll.u32 %v14682_v56, 16  ;;  %v8136_v46 = vshrl.u32 %v14682_v56, 16 }
 0x56d   : > { %v7065_v29 = vpop.f32.mrf.mxu2  ;;  %11640 = vmatmul.msk.bf16.gmra.mxu0 %vm5391_vm4, %v11844_v37  ;;  %v9455_v37 = vrot.slane %v9453_v36, 5  ;;  %v8123_v36 = vshrl.u32 %v8011_v24, 16  ;;  %v8120_v62 = vrot.slane %v8118_v0, 5  ;;  %v8111_v6 = vsel %vm12159_vm15, %v8106_v54, %v14670_v47  ;;  %v9363_v54 = vld [vmem:[#allocation3 + $0x40] sm:$0xf] }
 0x56e   : > { %v7289_v10 = vadd.f32 %v7288_v61, %v7065_v29  ;;  %v8843_v61 = vunpack.c.l.b16 %v8741_v51  ;;  %v14694_v51 = vld [vmem:[#allocation3 + $0x38] sm:$0x1] }
 0x56f   : > { %v9456_v63 = vor.u32 %v9455_v37, %v9452_v34  ;;  %v8750_v47 = vrot.slane %v14694_v51, 5 }
 0x570   : > { %v14680_v5 = vadd.f32 %v7642_v2, %v7289_v10  ;;  %v7293_v14 = vpop.f32.mrf.mxu3  ;;  %v8873_v31 = vpack.c.b16 %v8844_v53, %v8843_v61  ;;  %v8747_v2 = vrot.slane %v14682_v56, 5  ;;  %v8663_v10 = vld [vmem:[#allocation3 + $0x30] sm:$0xe]  ;;  %v9467_v61 = vrot.slane %v9466_v43, 4  ;;  %v14707_v0 = vpop.f32.mrf.mxu1 }
 0x571   : > { %v9457_v12 = vrot.slane %v9456_v63, 4  ;;  %15756 = vst [vmem:[#allocation5_spill] sm:$0xff] %v14707_v0  ;;  %v11534_v24 = vrot.slane %v8663_v10, 9  ;;  %v8441_v56 = vunpack.c.l.b16 %v8111_v6  ;;  %v8134_v63 = vrot.slane %v8132_v39, 5 }
 0x572   : > { %15754 = vst [vmem:[#allocation15_spill] sm:$0xff] %v14680_v5  ;;  %11516 = vmatmul.msk.bf16.gmra.mxu2 %vm5391_vm4, %v8470_v7  ;;  %v14687_v29 = vpop.f32.mrf.mxu0  ;;  %v9469_v7 = vshll.u32 %v9361_v50, 16  ;;  %v8749_v53 = vrot.slane %v8747_v2, 4  ;;  %v8138_v43 = vrot.slane %v8136_v46, 4  ;;  %v9487_v10 = vshrl.u32 %v9363_v54, 16 }
 0x575   : > { %v7068_v21 = vpop.f32.mrf.mxu2  ;;  %11555 = vmatmul.msk.bf16.gmra.mxu3 %vm5391_vm4, %v8873_v31  ;;  %v8125_v31 = vrot.slane %v8123_v36, 4 }
 0x576   : > { %11662 = vmatmul.msk.bf16.gmra.mxu1 %vm5391_vm4, %v9821_v27  ;;  %v7292_v41 = vadd.f32 %v7291_v45, %v7068_v21  ;;  %v8121_v45 = vsel %vm12159_vm15, %v8116_v60, %v8120_v62  ;;  %v8128_v27 = vrot.slane %v8126_v30, 5  ;;  %v9471_v21 = vrot.slane %v9469_v7, 5 }
 0x577   : > { %v8442_v5 = vunpack.c.l.b16 %v8121_v45  ;;  %v8751_v60 = vsel %vm12106_vm12, %v8749_v53, %v8750_v47  ;;  %v9462_v62 = vsel %vm12159_vm15, %v9457_v12, %v14684_v49  ;;  %v9483_v30 = vshll.u32 %v9363_v54, 16  ;;  %v14720_v53 = vld [vmem:[#allocation3 + $0x40] sm:$0xf] }
 0x578   : > { %v14701_v34 = vadd.f32 %v7645_v44, %v7292_v41  ;;  %v14703_v37 = vpop.f32.mrf.mxu3  ;;  %v9474_v44 = vshrl.u32 %v9362_v15, 16  ;;  %v9477_v41 = vshll.u32 %v9362_v15, 16  ;;  %v9472_v36 = vsel %vm12159_vm15, %v9467_v61, %v9471_v21 }
 0x579   : > { %v8129_v7 = vor.u32 %v8128_v27, %v8125_v31  ;;  %v8748_v45 = vsel %vm12106_vm12, %v11534_v24, %v8747_v2  ;;  %v8846_v47 = vunpack.c.l.b16 %v8751_v60  ;;  %v9792_v0 = vunpack.c.l.b16 %v9462_v62  ;;  %v14730_v60 = vpop.f32.mrf.mxu1 }
 0x57a   : > { %15755 = vst [vmem:[#allocation16_spill] sm:$0xff] %v14701_v34  ;;  %v7650_v50 = vpop.f32.mrf.mxu0  ;;  %v11845_v34 = vld [vmem:[#allocation3 + $0x30] sm:$0xff]  ;;  %v9476_v39 = vrot.slane %v9474_v44, 4  ;;  %v9479_v46 = vrot.slane %v9477_v41, 5  ;;  %v9793_v49 = vunpack.c.l.b16 %v9472_v36  ;;  %v8139_v12 = vor.u32 %v8138_v43, %v8134_v63  ;;  %v14728_v44 = vld [vmem:[#allocation3 + $0x44] sm:$0x1] }
 0x57b   : > { %v8471_v21 = vpack.c.b16 %v8442_v5, %v8441_v56  ;;  %v9485_v17 = vrot.slane %v9483_v30, 5  ;;  %v8845_v31 = vunpack.c.l.b16 %v8748_v45  ;;  %v8142_v27 = vshll.u32 %v14694_v51, 16  ;;  %15758 = vst [vmem:[#allocation7_spill] sm:$0xff] %v14730_v60  ;;  %v9364_v5 = vld [vmem:[#allocation3 + $0x44] sm:$0x1] }
 0x57c   : > { %v8754_v2 = vrot.slane %v14720_v53, 5  ;;  %v9480_v41 = vor.u32 %v9479_v46, %v9476_v39  ;;  %v9822_v43 = vpack.c.b16 %v9793_v49, %v9792_v0  ;;  %v8140_v62 = vrot.slane %v8139_v12, 4  ;;  %v8014_v56 = vld [vmem:[#allocation3 + $0x3c] sm:$0xf] }
 0x57d   : > { %v7070_v6 = vpop.f32.mrf.mxu2  ;;  %11641 = vmatmul.msk.bf16.gmra.mxu0 %vm5391_vm4, %v11845_v34  ;;  %v9489_v34 = vrot.slane %v9487_v10, 4  ;;  %v8144_v10 = vrot.slane %v8142_v27, 5  ;;  %v8664_v45 = vld [vmem:[#allocation3 + $0x3c] sm:$0xe]  ;;  %v9493_v39 = vshll.u32 %v9364_v5, 16  ;;  %v8147_v46 = vshrl.u32 %v8014_v56, 16 }
 0x57e   : > { %v7294_v15 = vadd.f32 %v7293_v14, %v7070_v6  ;;  %v8130_v14 = vrot.slane %v8129_v7, 4  ;;  %v8756_v6 = vrot.slane %v8754_v2, 4  ;;  %v8757_v7 = vrot.slane %v14728_v44, 5 }
 0x57f   : > { %v9490_v36 = vor.u32 %v9489_v34, %v9485_v17  ;;  %v9481_v0 = vrot.slane %v9480_v41, 4  ;;  %v8150_v49 = vshll.u32 %v8014_v56, 16  ;;  %v8156_v12 = vshll.u32 %v14720_v53, 16  ;;  %v9366_v41 = vld [vmem:[#allocation3 + $0x4c] sm:$0xf] }
 0x580   : > { %v14723_v61 = vadd.f32 %v14687_v29, %v7294_v15  ;;  %v7298_v54 = vpop.f32.mrf.mxu3  ;;  %v8874_v29 = vpack.c.b16 %v8846_v47, %v8845_v31  ;;  %v8135_v51 = vsel %vm12159_vm15, %v8130_v14, %v8134_v63  ;;  %v8145_v47 = vsel %vm12159_vm15, %v8140_v62, %v8144_v10  ;;  %v9365_v14 = vld [vmem:[#allocation3 + $0x48] sm:$0xf]  ;;  %v11846_v10 = vld [vmem:[#allocation3 + $0x3c] sm:$0xff] }
 0x581   : > { %v9491_v31 = vrot.slane %v9490_v36, 4  ;;  %v8443_v27 = vunpack.c.l.b16 %v8135_v51  ;;  %v8444_v5 = vunpack.c.l.b16 %v8145_v47  ;;  %v9486_v62 = vsel %vm12159_vm15, %v9481_v0, %v9485_v17 }
 0x582   : > { %15757 = vst [vmem:[#allocation6_spill] sm:$0xff] %v14723_v61  ;;  %11517 = vmatmul.msk.bf16.gmra.mxu2 %vm5391_vm4, %v8471_v21  ;;  %v7652_v24 = vpop.f32.mrf.mxu0  ;;  %v8160_v21 = vshrl.u32 %v14720_v53, 16  ;;  %v9495_v56 = vrot.slane %v9493_v39, 5  ;;  %v8152_v53 = vrot.slane %v8150_v49, 5  ;;  %v9498_v36 = vshrl.u32 %v9365_v14, 16 }
 0x583   : > { %v8472_v39 = vpack.c.b16 %v8444_v5, %v8443_v27  ;;  %v9794_v49 = vunpack.c.l.b16 %v9486_v62  ;;  %v8017_v27 = vld [vmem:[#allocation3 + $0x48] sm:$0xf]  ;;  %v9367_v62 = vld [vmem:[#allocation3 + $0x50] sm:$0x1] }
 0x584   : > { %v9496_v51 = vsel %vm12159_vm15, %v9491_v31, %v9495_v56  ;;  %v9500_v31 = vrot.slane %v9498_v36, 4  ;;  %v14760_v56 = vld [vmem:[#allocation3 + $0x4c] sm:$0xf] }
 0x585   : > { %v7073_v30 = vpop.f32.mrf.mxu2  ;;  %11556 = vmatmul.msk.bf16.gmra.mxu3 %vm5391_vm4, %v8874_v29  ;;  %v11535_v29 = vrot.slane %v8664_v45, 9  ;;  %v9501_v45 = vshll.u32 %v9365_v14, 16 }
 0x586   : > { %11663 = vmatmul.msk.bf16.gmra.mxu1 %vm5391_vm4, %v9822_v43  ;;  %v7297_v15 = vadd.f32 %v14703_v37, %v7073_v30  ;;  %v8758_v37 = vsel %vm12106_vm12, %v8756_v6, %v8757_v7  ;;  %v8149_v30 = vrot.slane %v8147_v46, 4  ;;  %v9511_v6 = vshrl.u32 %v9366_v41, 16  ;;  %v14752_v7 = vpop.f32.mrf.mxu1 }
 0x587   : > { %15760 = vst [vmem:[#allocation22_spill] sm:$0xff] %v14752_v7  ;;  %v8755_v17 = vsel %vm12106_vm12, %v11535_v29, %v8754_v2  ;;  %v8848_v46 = vunpack.c.l.b16 %v8758_v37  ;;  %v9503_v7 = vrot.slane %v9501_v45, 5  ;;  %v8166_v2 = vshll.u32 %v14728_v44, 16 }
 0x588   : > { %v14742_v34 = vadd.f32 %v7650_v50, %v7297_v15  ;;  %v7301_v63 = vpop.f32.mrf.mxu3  ;;  %v14748_v50 = vrot.slane %v8156_v12, 5  ;;  %v8162_v15 = vrot.slane %v8160_v21, 4  ;;  %v9795_v12 = vunpack.c.l.b16 %v9496_v51 }
 0x589   : > { %v8153_v21 = vor.u32 %v8152_v53, %v8149_v30  ;;  %v8847_v1 = vunpack.c.l.b16 %v8755_v17  ;;  %v14769_v53 = vld [vmem:[#allocation3 + $0x50] sm:$0x1]  ;;  %v8171_v51 = vshrl.u32 %v8017_v27, 16  ;;  %v8174_v44 = vshll.u32 %v8017_v27, 16 }
 0x58a   : > { %15759 = vst [vmem:[#allocation21_spill] sm:$0xff] %v14742_v34  ;;  %v7655_v43 = vpop.f32.mrf.mxu0  ;;  %v9507_v34 = vshll.u32 %v9366_v41, 16  ;;  %v8163_v61 = vor.u32 %v8162_v15, %v14748_v50  ;;  %v9823_v37 = vpack.c.b16 %v9795_v12, %v9794_v49  ;;  %v8184_v45 = vshrl.u32 %v14760_v56, 16  ;;  %v9368_v49 = vld [vmem:[#allocation3 + $0x54] sm:$0xf] }
 0x58b   : > { %v8875_v29 = vpack.c.b16 %v8848_v46, %v8847_v1  ;;  %v8154_v5 = vrot.slane %v8153_v21, 4  ;;  %v8180_v1 = vshll.u32 %v14760_v56, 16  ;;  %v9517_v17 = vshll.u32 %v9367_v62, 16 }
 0x58c   : > { %v14762_v60 = vrot.slane %v9507_v34, 5  ;;  %v8164_v30 = vrot.slane %v8163_v61, 4  ;;  %v9504_v34 = vor.u32 %v9503_v7, %v9500_v31  ;;  %v8764_v46 = vrot.slane %v14769_v53, 5 }
 0x58d   : > { %v7075_v47 = vpop.f32.mrf.mxu2  ;;  %11642 = vmatmul.msk.bf16.gmra.mxu0 %vm5391_vm4, %v11846_v10  ;;  %v9513_v10 = vrot.slane %v9511_v6, 4  ;;  %v8159_v7 = vsel %vm12159_vm15, %v8154_v5, %v14748_v50  ;;  %v14786_v27 = vrot.slane %v8180_v1, 5  ;;  %v9519_v62 = vrot.slane %v9517_v17, 5 }
 0x58e   : > { %v7299_v0 = vadd.f32 %v7298_v54, %v7075_v47  ;;  %v8168_v47 = vrot.slane %v8166_v2, 5  ;;  %v14776_v61 = vpop.f32.mrf.mxu1  ;;  %v8176_v2 = vrot.slane %v8174_v44, 5 }
 0x58f   : > { %v9514_v15 = vor.u32 %v9513_v10, %v14762_v60  ;;  %15762 = vst [vmem:[#allocation24_spill] sm:$0xff] %v14776_v61  ;;  %v8173_v10 = vrot.slane %v8171_v51, 4  ;;  %v11847_v61 = vld [vmem:[#allocation3 + $0x48] sm:$0xff] }
 0x590   : > { %v14758_v14 = vadd.f32 %v7652_v24, %v7299_v0  ;;  %v7303_v41 = vpop.f32.mrf.mxu3  ;;  %v8761_v24 = vrot.slane %v14760_v56, 5  ;;  %v8665_v0 = vld [vmem:[#allocation3 + $0x48] sm:$0xe]  ;;  %v8169_v31 = vsel %vm12159_vm15, %v8164_v30, %v8168_v47 }
 0x591   : > { %v9515_v56 = vrot.slane %v9514_v15, 4  ;;  %v11536_v5 = vrot.slane %v8665_v0, 9  ;;  %v8177_v1 = vor.u32 %v8176_v2, %v8173_v10 }
 0x592   : > { %15761 = vst [vmem:[#allocation23_spill] sm:$0xff] %v14758_v14  ;;  %11518 = vmatmul.msk.bf16.gmra.mxu2 %vm5391_vm4, %v8472_v39  ;;  %v14765_v54 = vpop.f32.mrf.mxu0  ;;  %v8763_v39 = vrot.slane %v8761_v24, 4  ;;  %v9525_v14 = vshll.u32 %v9368_v49, 16 }
 0x593   : > { %v8762_v17 = vsel %vm12106_vm12, %v11536_v5, %v8761_v24  ;;  %v8178_v24 = vrot.slane %v8177_v1, 4 }
 0x595   : > { %v7078_v36 = vpop.f32.mrf.mxu2  ;;  %11557 = vmatmul.msk.bf16.gmra.mxu3 %vm5391_vm4, %v8875_v29  ;;  %v8186_v29 = vrot.slane %v8184_v45, 4 }
 0x596   : > { %11664 = vmatmul.msk.bf16.gmra.mxu1 %vm5391_vm4, %v9823_v37  ;;  %v7302_v6 = vadd.f32 %v7301_v63, %v7078_v36  ;;  %v9505_v63 = vrot.slane %v9504_v34, 4  ;;  %v9369_v37 = vld [vmem:[#allocation3 + $0x58] sm:$0xf]  ;;  %v9522_v36 = vshrl.u32 %v9368_v49, 16  ;;  %v9520_v34 = vsel %vm12159_vm15, %v9515_v56, %v9519_v62 }
 0x597   : > { %v9531_v15 = vshll.u32 %v9369_v37, 16  ;;  %v9535_v51 = vshrl.u32 %v9369_v37, 16  ;;  %v8187_v45 = vor.u32 %v8186_v29, %v14786_v27  ;;  %v9797_v49 = vunpack.c.l.b16 %v9520_v34 }
 0x598   : > { %v14782_v12 = vadd.f32 %v7655_v43, %v7302_v6  ;;  %v7306_v21 = vpop.f32.mrf.mxu3  ;;  %v8445_v43 = vunpack.c.l.b16 %v8159_v7  ;;  %v8446_v6 = vunpack.c.l.b16 %v8169_v31  ;;  %v9510_v30 = vsel %vm12159_vm15, %v9505_v63, %v14762_v60  ;;  %v14799_v7 = vld [vmem:[#allocation3 + $0x58] sm:$0xf] }
 0x599   : > { %v9524_v0 = vrot.slane %v9522_v36, 4  ;;  %v8190_v31 = vshll.u32 %v14769_v53, 16  ;;  %v9533_v10 = vrot.slane %v9531_v15, 5  ;;  %v9537_v2 = vrot.slane %v9535_v51, 4  ;;  %v14816_v51 = vld [vmem:[#allocation3 + $0x5c] sm:$0x1] }
 0x59a   : > { %15763 = vst [vmem:[#allocation25_spill] sm:$0xff] %v14782_v12  ;;  %v7660_v50 = vpop.f32.mrf.mxu0  ;;  %v8765_v12 = vsel %vm12106_vm12, %v8763_v39, %v8764_v46  ;;  %v9527_v39 = vrot.slane %v9525_v14, 5  ;;  %v9796_v46 = vunpack.c.l.b16 %v9510_v30  ;;  %v8473_v56 = vpack.c.b16 %v8446_v6, %v8445_v43  ;;  %v8020_v30 = vld [vmem:[#allocation3 + $0x54] sm:$0xf] }
 0x59b   : > { %v8850_v60 = vunpack.c.l.b16 %v8765_v12  ;;  %v8849_v29 = vunpack.c.l.b16 %v8762_v17  ;;  %v8188_v37 = vrot.slane %v8187_v45, 4  ;;  %v8768_v5 = vrot.slane %v14799_v7, 5  ;;  %v8666_v45 = vld [vmem:[#allocation3 + $0x54] sm:$0xe] }
 0x59c   : > { %v9528_v14 = vor.u32 %v9527_v39, %v9524_v0  ;;  %v9824_v53 = vpack.c.b16 %v9797_v49, %v9796_v46  ;;  %v8192_v36 = vrot.slane %v8190_v31, 5  ;;  %v9538_v34 = vor.u32 %v9537_v2, %v9533_v10  ;;  %v9371_v2 = vld [vmem:[#allocation3 + $0x60] sm:$0xf] }
 0x59d   : > { %v7080_v44 = vpop.f32.mrf.mxu2  ;;  %11643 = vmatmul.msk.bf16.gmra.mxu0 %vm5391_vm4, %v11847_v61  ;;  %v8876_v62 = vpack.c.b16 %v8850_v60, %v8849_v29  ;;  %v8183_v6 = vsel %vm12159_vm15, %v8178_v24, %v14786_v27  ;;  %v8195_v0 = vshrl.u32 %v8020_v30, 16  ;;  %v8198_v39 = vshll.u32 %v8020_v30, 16 }
 0x59e   : > { %v7304_v47 = vadd.f32 %v7303_v41, %v7080_v44  ;;  %v14805_v41 = vpop.f32.mrf.mxu1  ;;  %v8193_v15 = vsel %vm12159_vm15, %v8188_v37, %v8192_v36  ;;  %v8770_v44 = vrot.slane %v8768_v5, 4  ;;  %v8204_v60 = vshll.u32 %v14799_v7, 16 }
 0x59f   : > { %15765 = vst [vmem:[#allocation27_spill] sm:$0xff] %v14805_v41  ;;  %v8208_v46 = vshrl.u32 %v14799_v7, 16  ;;  %v8771_v27 = vrot.slane %v14816_v51, 5  ;;  %v8447_v29 = vunpack.c.l.b16 %v8183_v6  ;;  %v8448_v24 = vunpack.c.l.b16 %v8193_v15 }
 0x5a0   : > { %v14803_v63 = vadd.f32 %v14765_v54, %v7304_v47  ;;  %v7308_v61 = vpop.f32.mrf.mxu3  ;;  %v9370_v54 = vld [vmem:[#allocation3 + $0x5c] sm:$0x1]  ;;  %v9529_v47 = vrot.slane %v9528_v14, 4  ;;  %v11537_v37 = vrot.slane %v8666_v45, 9  ;;  %v8197_v36 = vrot.slane %v8195_v0, 4 }
 0x5a1   : > { %v9541_v17 = vshll.u32 %v9370_v54, 16  ;;  %v8772_v14 = vsel %vm12106_vm12, %v8770_v44, %v8771_v27  ;;  %v8200_v54 = vrot.slane %v8198_v39, 5  ;;  %v14829_v30 = vrot.slane %v8204_v60, 5 }
 0x5a2   : > { %15764 = vst [vmem:[#allocation26_spill] sm:$0xff] %v14803_v63  ;;  %11519 = vmatmul.msk.bf16.gmra.mxu2 %vm5391_vm4, %v8473_v56  ;;  %v7662_v12 = vpop.f32.mrf.mxu0  ;;  %v9539_v56 = vrot.slane %v9538_v34, 4  ;;  %v8210_v34 = vrot.slane %v8208_v46, 4  ;;  %v9549_v15 = vshll.u32 %v9371_v2, 16  ;;  %v8852_v0 = vunpack.c.l.b16 %v8772_v14 }
 0x5a3   : > { %v8201_v46 = vor.u32 %v8200_v54, %v8197_v36  ;;  %v14846_v36 = vld [vmem:[#allocation3 + $0x68] sm:$0x1] }
 0x5a5   : > { %v7083_v43 = vpop.f32.mrf.mxu2  ;;  %11558 = vmatmul.msk.bf16.gmra.mxu3 %vm5391_vm4, %v8876_v62  ;;  %v9534_v62 = vsel %vm12159_vm15, %v9529_v47, %v9533_v10  ;;  %v8769_v10 = vsel %vm12106_vm12, %v11537_v37, %v8768_v5  ;;  %v8023_v5 = vld [vmem:[#allocation3 + $0x60] sm:$0xf]  ;;  %v8202_v37 = vrot.slane %v8201_v46, 4 }
 0x5a6   : > { %11665 = vmatmul.msk.bf16.gmra.mxu1 %vm5391_vm4, %v9824_v53  ;;  %v7307_v1 = vadd.f32 %v7306_v21, %v7083_v43  ;;  %v9372_v21 = vld [vmem:[#allocation3 + $0x64] sm:$0xf]  ;;  %v9543_v53 = vrot.slane %v9541_v17, 5  ;;  %v14827_v7 = vpop.f32.mrf.mxu1  ;;  %v9546_v43 = vshrl.u32 %v9371_v2, 16  ;;  %v8474_v17 = vpack.c.b16 %v8448_v24, %v8447_v29 }
 0x5a7   : > { %15767 = vst [vmem:[#allocation29_spill] sm:$0xff] %v14827_v7  ;;  %v9559_v45 = vshrl.u32 %v9372_v21, 16  ;;  %v9798_v39 = vunpack.c.l.b16 %v9534_v62  ;;  %v8851_v41 = vunpack.c.l.b16 %v8769_v10 }
 0x5a8   : > { %v14820_v49 = vadd.f32 %v7660_v50, %v7307_v1  ;;  %v7311_v31 = vpop.f32.mrf.mxu3  ;;  %v11848_v50 = vld [vmem:[#allocation3 + $0x54] sm:$0xff]  ;;  %v9544_v6 = vsel %vm12159_vm15, %v9539_v56, %v9543_v53  ;;  %v9555_v1 = vshll.u32 %v9372_v21, 16  ;;  %v9548_v63 = vrot.slane %v9546_v43, 4  ;;  %v14839_v21 = vld [vmem:[#allocation3 + $0x64] sm:$0xf] }
 0x5a9   : > { %v9799_v60 = vunpack.c.l.b16 %v9544_v6  ;;  %v9551_v53 = vrot.slane %v9549_v15, 5  ;;  %v8877_v29 = vpack.c.b16 %v8852_v0, %v8851_v41  ;;  %v8775_v14 = vrot.slane %v14839_v21, 5 }
 0x5aa   : > { %15766 = vst [vmem:[#allocation28_spill] sm:$0xff] %v14820_v49  ;;  %v7665_v44 = vpop.f32.mrf.mxu0  ;;  %v8211_v49 = vor.u32 %v8210_v34, %v14829_v30  ;;  %v14841_v7 = vrot.slane %v9555_v1, 5  ;;  %v8222_v41 = vshll.u32 %v8023_v5, 16  ;;  %v8228_v15 = vshll.u32 %v14839_v21, 16 }
 0x5ab   : > { %v9825_v24 = vpack.c.b16 %v9799_v60, %v9798_v39  ;;  %v9552_v54 = vor.u32 %v9551_v53, %v9548_v63  ;;  %v8232_v1 = vshrl.u32 %v14839_v21, 16  ;;  %v8207_v63 = vsel %vm12159_vm15, %v8202_v37, %v14829_v30  ;;  %v9374_v39 = vld [vmem:[#allocation3 + $0x6c] sm:$0xf]  ;;  %v9375_v30 = vld [vmem:[#allocation3 + $0x70] sm:$0xf] }
 0x5ac   : > { %v8212_v62 = vrot.slane %v8211_v49, 4  ;;  %v8778_v0 = vrot.slane %v14846_v36, 5 }
 0x5ad   : > { %v7085_v27 = vpop.f32.mrf.mxu2  ;;  %11644 = vmatmul.msk.bf16.gmra.mxu0 %vm5391_vm4, %v11848_v50  ;;  %v9561_v50 = vrot.slane %v9559_v45, 4 }
 0x5ae   : > { %v7309_v47 = vadd.f32 %v7308_v61, %v7085_v27  ;;  %v8214_v61 = vshll.u32 %v14816_v51, 16  ;;  %v14849_v43 = vpop.f32.mrf.mxu1  ;;  %v8219_v51 = vshrl.u32 %v8023_v5, 16  ;;  %v14865_v5 = vrot.slane %v8228_v15, 5 }
 0x5af   : > { %v9562_v34 = vor.u32 %v9561_v50, %v14841_v7  ;;  %15769 = vst [vmem:[#allocation31_spill] sm:$0xff] %v14849_v43 }
 0x5b0   : > { %v14837_v56 = vadd.f32 %v7662_v12, %v7309_v47  ;;  %v7313_v2 = vpop.f32.mrf.mxu3  ;;  %v9373_v12 = vld [vmem:[#allocation3 + $0x68] sm:$0x1]  ;;  %v8216_v49 = vrot.slane %v8214_v61, 5  ;;  %v8667_v47 = vld [vmem:[#allocation3 + $0x60] sm:$0xe]  ;;  %v8221_v50 = vrot.slane %v8219_v51, 4 }
 0x5b1   : > { %v9565_v27 = vshll.u32 %v9373_v12, 16  ;;  %v9563_v53 = vrot.slane %v9562_v34, 4  ;;  %v8224_v61 = vrot.slane %v8222_v41, 5  ;;  %v9570_v12 = vshrl.u32 %v9374_v39, 16 }
 0x5b2   : > { %15768 = vst [vmem:[#allocation30_spill] sm:$0xff] %v14837_v56  ;;  %11520 = vmatmul.msk.bf16.gmra.mxu2 %vm5391_vm4, %v8474_v17  ;;  %v7667_v10 = vpop.f32.mrf.mxu0  ;;  %v8777_v17 = vrot.slane %v8775_v14, 4  ;;  %v8217_v21 = vsel %vm12159_vm15, %v8212_v62, %v8216_v49  ;;  %v11849_v56 = vld [vmem:[#allocation3 + $0x60] sm:$0xff]  ;;  %v9579_v34 = vshll.u32 %v9375_v30, 16  ;;  %v9583_v51 = vshrl.u32 %v9375_v30, 16 }
 0x5b3   : > { %v9567_v37 = vrot.slane %v9565_v27, 5  ;;  %v8225_v15 = vor.u32 %v8224_v61, %v8221_v50 }
 0x5b4   : > { %v14885_v61 = vrot.slane %v9579_v34, 5  ;;  %v9377_v34 = vld [vmem:[#allocation3 + $0x78] sm:$0xf] }
 0x5b5   : > { %v7088_v6 = vpop.f32.mrf.mxu2  ;;  %11559 = vmatmul.msk.bf16.gmra.mxu3 %vm5391_vm4, %v8877_v29  ;;  %v8234_v29 = vrot.slane %v8232_v1, 4 }
 0x5b6   : > { %11666 = vmatmul.msk.bf16.gmra.mxu1 %vm5391_vm4, %v9825_v24  ;;  %v7312_v45 = vadd.f32 %v7311_v31, %v7088_v6  ;;  %v9553_v31 = vrot.slane %v9552_v54, 4  ;;  %v11538_v24 = vrot.slane %v8667_v47, 9  ;;  %v9573_v6 = vshll.u32 %v9374_v39, 16 }
 0x5b7   : > { %v9568_v54 = vsel %vm12159_vm15, %v9563_v53, %v9567_v37  ;;  %v8235_v1 = vor.u32 %v8234_v29, %v14865_v5  ;;  %v9572_v47 = vrot.slane %v9570_v12, 4  ;;  %v8026_v53 = vld [vmem:[#allocation3 + $0x6c] sm:$0xf]  ;;  %v8226_v37 = vrot.slane %v8225_v15, 4 }
 0x5b8   : > { %v14859_v60 = vadd.f32 %v7665_v44, %v7312_v45  ;;  %v14861_v46 = vpop.f32.mrf.mxu3  ;;  %v8449_v44 = vunpack.c.l.b16 %v8207_v63  ;;  %v8450_v45 = vunpack.c.l.b16 %v8217_v21  ;;  %v9558_v62 = vsel %vm12159_vm15, %v9553_v31, %v14841_v7  ;;  %v8027_v63 = vld [vmem:[#allocation3 + $0x70] sm:$0xf] }
 0x5b9   : > { %v8776_v27 = vsel %vm12106_vm12, %v11538_v24, %v8775_v14  ;;  %v9800_v39 = vunpack.c.l.b16 %v9558_v62  ;;  %v9801_v21 = vunpack.c.l.b16 %v9568_v54  ;;  %v8238_v31 = vshll.u32 %v14846_v36, 16  ;;  %v9376_v36 = vld [vmem:[#allocation3 + $0x74] sm:$0x1] }
 0x5ba   : > { %15770 = vst [vmem:[#allocation32_spill] sm:$0xff] %v14859_v60  ;;  %v8779_v60 = vsel %vm12106_vm12, %v8777_v17, %v8778_v0  ;;  %v9575_v17 = vrot.slane %v9573_v6, 5  ;;  %v14878_v0 = vpop.f32.mrf.mxu1  ;;  %v8475_v50 = vpack.c.b16 %v8450_v45, %v8449_v44  ;;  %v9585_v14 = vrot.slane %v9583_v51, 4  ;;  %v7670_v29 = vpop.f32.mrf.mxu0  ;;  %v14887_v6 = vld [vmem:[#allocation3 + $0x74] sm:$0x1] }
 0x5bb   : > { %15771 = vst [vmem:[#allocation33_spill] sm:$0xff] %v14878_v0  ;;  %v8854_v7 = vunpack.c.l.b16 %v8779_v60  ;;  %v8853_v24 = vunpack.c.l.b16 %v8776_v27  ;;  %v8236_v12 = vrot.slane %v8235_v1, 4  ;;  %v8782_v60 = vrot.slane %v8027_v63, 5 }
 0x5bc   : > { %v9576_v62 = vor.u32 %v9575_v17, %v9572_v47  ;;  %v8246_v54 = vshll.u32 %v8026_v53, 16  ;;  %v8240_v44 = vrot.slane %v8238_v31, 5  ;;  %v8785_v51 = vrot.slane %v14887_v6, 5 }
 0x5bd   : > { %v7090_v41 = vpop.f32.mrf.mxu2  ;;  %11645 = vmatmul.msk.bf16.gmra.mxu0 %vm5391_vm4, %v11849_v56  ;;  %v9586_v27 = vor.u32 %v9585_v14, %v14885_v61  ;;  %v8252_v15 = vshll.u32 %v8027_v63, 16  ;;  %v8256_v1 = vshrl.u32 %v8027_v63, 16  ;;  %v8231_v47 = vsel %vm12159_vm15, %v8226_v37, %v14865_v5 }
 0x5be   : > { %v7314_v49 = vadd.f32 %v7313_v2, %v7090_v41  ;;  %v8668_v2 = vld [vmem:[#allocation3 + $0x6c] sm:$0xe]  ;;  %v8878_v41 = vpack.c.b16 %v8854_v7, %v8853_v24  ;;  %v8241_v17 = vsel %vm12159_vm15, %v8236_v12, %v8240_v44  ;;  %v8784_v7 = vrot.slane %v8782_v60, 4 }
 0x5bf   : > { %v11539_v45 = vrot.slane %v8668_v2, 9  ;;  %v9577_v31 = vrot.slane %v9576_v62, 4  ;;  %v8248_v63 = vrot.slane %v8246_v54, 5  ;;  %v9594_v2 = vshrl.u32 %v9377_v34, 16 }
 0x5c0   : > { %v14881_v30 = vadd.f32 %v7667_v10, %v7314_v49  ;;  %v14883_v56 = vpop.f32.mrf.mxu3  ;;  %v8243_v10 = vshrl.u32 %v8026_v53, 16  ;;  %v9826_v49 = vpack.c.b16 %v9801_v21, %v9800_v39  ;;  %v9589_v39 = vshll.u32 %v9376_v36, 16 }
 0x5c1   : > { %v9597_v14 = vshll.u32 %v9377_v34, 16  ;;  %v9587_v5 = vrot.slane %v9586_v27, 4  ;;  %v14906_v37 = vrot.slane %v8252_v15, 5  ;;  %v8258_v12 = vrot.slane %v8256_v1, 4  ;;  %v11850_v27 = vld [vmem:[#allocation3 + $0x6c] sm:$0xff] }
 0x5c2   : > { %15772 = vst [vmem:[#allocation34_spill] sm:$0xff] %v14881_v30  ;;  %11521 = vmatmul.msk.bf16.gmra.mxu2 %vm5391_vm4, %v8475_v50  ;;  %v9378_v30 = vld [vmem:[#allocation3 + $0x7c] sm:$0xf]  ;;  %v8245_v53 = vrot.slane %v8243_v10, 4  ;;  %v14908_v36 = vpop.f32.mrf.mxu1  ;;  %v8783_v62 = vsel %vm12106_vm12, %v11539_v45, %v8782_v60  ;;  %v8786_v10 = vsel %vm12106_vm12, %v8784_v7, %v8785_v51  ;;  %v7672_v34 = vpop.f32.mrf.mxu0  ;;  %v9596_v15 = vrot.slane %v9594_v2, 4 }
 0x5c3   : > { %v14900_v50 = vld [vmem:[#allocation3 + $0x7c] sm:$0xf]  ;;  %v9603_v24 = vshll.u32 %v9378_v30, 16  ;;  %15774 = vst [vmem:[#allocation36_spill] sm:$0xff] %v14908_v36  ;;  %v9599_v1 = vrot.slane %v9597_v14, 5  ;;  %v8259_v45 = vor.u32 %v8258_v12, %v14906_v37  ;;  %v8855_v7 = vunpack.c.l.b16 %v8783_v62 }
 0x5c4   : > { %v8249_v54 = vor.u32 %v8248_v63, %v8245_v53  ;;  %v8789_v44 = vrot.slane %v14900_v50, 5  ;;  %v8262_v2 = vshll.u32 %v14887_v6, 16  ;;  %v9379_v14 = vld [vmem:[#allocation3 + $0x80] sm:$0x1] }
 0x5c5   : > { %v7093_v0 = vpop.f32.mrf.mxu2  ;;  %11560 = vmatmul.msk.bf16.gmra.mxu3 %vm5391_vm4, %v8878_v41  ;;  %v9607_v41 = vshrl.u32 %v9378_v30, 16  ;;  %v9582_v30 = vsel %vm12159_vm15, %v9577_v31, %v14885_v61  ;;  %v9600_v12 = vor.u32 %v9599_v1, %v9596_v15  ;;  %v9613_v6 = vshll.u32 %v9379_v14, 16  ;;  %v9380_v14 = vld [vmem:[#allocation3 + $0x84] sm:$0xf] }
 0x5c6   : > { %11667 = vmatmul.msk.bf16.gmra.mxu1 %vm5391_vm4, %v9826_v49  ;;  %v7317_v21 = vadd.f32 %v14861_v46, %v7093_v0  ;;  %v8451_v46 = vunpack.c.l.b16 %v8231_v47  ;;  %v8452_v0 = vunpack.c.l.b16 %v8241_v17  ;;  %v14918_v47 = vrot.slane %v9603_v24, 5 }
 0x5c7   : > { %v9609_v17 = vrot.slane %v9607_v41, 4  ;;  %v9802_v53 = vunpack.c.l.b16 %v9582_v30  ;;  %v8250_v63 = vrot.slane %v8249_v54, 4  ;;  %v14926_v41 = vld [vmem:[#allocation3 + $0x80] sm:$0x1]  ;;  %v8264_v54 = vrot.slane %v8262_v2, 5 }
 0x5c8   : > { %v14902_v49 = vadd.f32 %v7670_v29, %v7317_v21  ;;  %v14904_v43 = vpop.f32.mrf.mxu3  ;;  %v9591_v29 = vrot.slane %v9589_v39, 5  ;;  %v8476_v61 = vpack.c.b16 %v8452_v0, %v8451_v46  ;;  %v8856_v39 = vunpack.c.l.b16 %v8786_v10  ;;  %v8029_v21 = vld [vmem:[#allocation3 + $0x78] sm:$0xf] }
 0x5c9   : > { %v8260_v0 = vrot.slane %v8259_v45, 4  ;;  %v8267_v62 = vshrl.u32 %v8029_v21, 16  ;;  %v7249_v10 = vadd.f32 %v14405_v22, %v14445_v38  ;;  %v8792_v15 = vrot.slane %v14926_v41, 5 }
 0x5ca   : > { %15773 = vst [vmem:[#allocation35_spill] sm:$0xff] %v14902_v49  ;;  %v9592_v60 = vsel %vm12159_vm15, %v9587_v5, %v9591_v29  ;;  %v8669_v5 = vld [vmem:[#allocation3 + $0x78] sm:$0xe]  ;;  %v8791_v29 = vrot.slane %v8789_v44, 4  ;;  %v9610_v49 = vor.u32 %v9609_v17, %v14918_v47  ;;  %v8879_v30 = vpack.c.b16 %v8856_v39, %v8855_v7  ;;  %v14937_v1 = vpop.f32.mrf.mxu1  ;;  %v7675_v39 = vpop.f32.mrf.mxu0 }
 0x5cb   : > { %v9803_v24 = vunpack.c.l.b16 %v9592_v60  ;;  %v11540_v60 = vrot.slane %v8669_v5, 9  ;;  %15776 = vst [vmem:[#allocation38_spill] sm:$0xff] %v14937_v1  ;;  %v8255_v17 = vsel %vm12159_vm15, %v8250_v63, %v14906_v37  ;;  %v9601_v45 = vrot.slane %v9600_v12, 4 }
 0x5cc   : > { %v8265_v22 = vsel %vm12159_vm15, %v8260_v0, %v8264_v54  ;;  %v8793_v38 = vsel %vm12106_vm12, %v8791_v29, %v8792_v15  ;;  %v8280_v37 = vshrl.u32 %v14900_v50, 16  ;;  %v14951_v63 = vunpack.c.l.b16 %v8255_v17  ;;  %v9381_v0 = vld [vmem:[#allocation3 + $0x88] sm:$0xf]  ;;  %v14971_v15 = vld [vmem:[#allocation3 + $0xac] sm:$0xf] }
 0x5cd   : > { %v7095_v51 = vpop.f32.mrf.mxu2  ;;  %11646 = vmatmul.msk.bf16.gmra.mxu0 %vm5391_vm4, %v11850_v27  ;;  %v8790_v2 = vsel %vm12106_vm12, %v11540_v60, %v8789_v44  ;;  %v8858_v5 = vunpack.c.l.b16 %v8793_v38  ;;  %v9606_v29 = vsel %vm12159_vm15, %v9601_v45, %v14918_v47  ;;  %v10023_v44 = vld [vmem:[#allocation3 + $0xa8] sm:$0xe]  ;;  %v9618_v47 = vshrl.u32 %v9380_v14, 16  ;;  %v14977_v45 = vld [vmem:[#allocation3 + $0xb8] sm:$0xf] }
 0x5ce   : > { %v7319_v31 = vadd.f32 %v14883_v56, %v7095_v51  ;;  %v8270_v56 = vshll.u32 %v8029_v21, 16  ;;  %v9611_v51 = vrot.slane %v9610_v49, 4  ;;  %v8282_v60 = vrot.slane %v8280_v37, 4  ;;  %v14984_v37 = vld [vmem:[#allocation3 + $0xb0] sm:$0x1] }
 0x5d0   : > { %v14929_v27 = vadd.f32 %v7672_v34, %v7319_v31  ;;  %v14931_v46 = vpop.f32.mrf.mxu3  ;;  %v9827_v34 = vpack.c.b16 %v9803_v24, %v9802_v53  ;;  %v8272_v7 = vrot.slane %v8270_v56, 5  ;;  %v9615_v31 = vrot.slane %v9613_v6, 5  ;;  %v14965_v56 = vld [vmem:[#allocation3 + $0x88] sm:$0xf] }
 0x5d1   : > { %v8276_v53 = vshll.u32 %v14900_v50, 16  ;;  %v8454_v24 = vunpack.c.l.b16 %v8265_v22  ;;  %v14961_v50 = vadd.f32 %v14415_v3, %v7249_v10  ;;  %v9621_v3 = vshll.u32 %v9380_v14, 16  ;;  %v11851_v22 = vld [vmem:[#allocation3 + $0x78] sm:$0xff] }
 0x5d2   : > { %15775 = vst [vmem:[#allocation37_spill] sm:$0xff] %v14929_v27  ;;  %11522 = vmatmul.msk.bf16.gmra.mxu2 %vm5391_vm4, %v8476_v61  ;;  %v8269_v61 = vrot.slane %v8267_v62, 4  ;;  %v9616_v12 = vsel %vm12159_vm15, %v9611_v51, %v9615_v31  ;;  %v9627_v10 = vshll.u32 %v9381_v0, 16  ;;  %v10024_v51 = vld [vmem:[#allocation3 + $0xb4] sm:$0xe] }
 0x5d3   : > { %v14969_v54 = vrot.slane %v8276_v53, 5  ;;  %v14975_v17 = vunpack.c.l.b16 %v9616_v12  ;;  %v8477_v38 = vpack.c.b16 %v8454_v24, %v14951_v63  ;;  %v9631_v53 = vshrl.u32 %v9381_v0, 16  ;;  %v10025_v31 = vld [vmem:[#allocation3 + $0xc0] sm:$0xe] }
 0x5d4   : > { %v8273_v62 = vor.u32 %v8272_v7, %v8269_v61  ;;  %v8286_v7 = vshll.u32 %v14926_v41, 16  ;;  %v9620_v24 = vrot.slane %v9618_v47, 4  ;;  %v11690_v41 = vrot.slane %v10024_v51, 9 }
 0x5d5   : > { %v7098_v21 = vpop.f32.mrf.mxu2  ;;  %11561 = vmatmul.msk.bf16.gmra.mxu3 %vm5391_vm4, %v8879_v30  ;;  %v8857_v30 = vunpack.c.l.b16 %v8790_v2  ;;  %v14987_v2 = vpop.f32.mrf.mxu1  ;;  %v8283_v63 = vor.u32 %v8282_v60, %v14969_v54  ;;  %v10164_v51 = vrot.slane %v14984_v37, 5 }
 0x5d6   : > { %11668 = vmatmul.msk.bf16.gmra.mxu1 %vm5391_vm4, %v9827_v34  ;;  %v7322_v49 = vadd.f32 %v14904_v43, %v7098_v21  ;;  %v14973_v34 = vunpack.c.l.b16 %v9606_v29  ;;  %v14981_v21 = vrot.slane %v8273_v62, 4  ;;  %15778 = vst [vmem:[#allocation40_spill] sm:$0xff] %v14987_v2  ;;  %v10168_v29 = vrot.slane %v14977_v45, 5 }
 0x5d7   : > { %v8880_v61 = vpack.c.b16 %v8858_v5, %v8857_v30  ;;  %v14991_v5 = vld [vmem:[#allocation3 + $0xbc] sm:$0x1]  ;;  %v9623_v62 = vrot.slane %v9621_v3, 5  ;;  %v14999_v30 = vld [vmem:[#allocation3 + $0xc4] sm:$0xf]  ;;  %v11691_v2 = vrot.slane %v10025_v31, 9 }
 0x5d8   : > { %v14963_v43 = vadd.f32 %v7675_v39, %v7322_v49  ;;  %v14967_v6 = vpop.f32.mrf.mxu3  ;;  %v11689_v39 = vrot.slane %v10023_v44, 9  ;;  %v10161_v49 = vrot.slane %v14971_v15, 5  ;;  %v9828_v0 = vpack.c.b16 %v14975_v17, %v14973_v34  ;;  %v15008_v34 = vld [vmem:[#allocation3 + $0xc8] sm:$0x1] }
 0x5d9   : > { %v14997_v44 = vrot.slane %v9627_v10, 5  ;;  %v10170_v17 = vrot.slane %v10168_v29, 4  ;;  %v10171_v3 = vrot.slane %v14991_v5, 5  ;;  %v8284_v10 = vrot.slane %v8283_v63, 4 }
 0x5da   : > { %15777 = vst [vmem:[#allocation39_spill] sm:$0xff] %v14963_v43  ;;  %v10162_v60 = vsel %vm12106_vm12, %v11689_v39, %v10161_v49  ;;  %v10163_v47 = vrot.slane %v10161_v49, 4  ;;  %v10169_v43 = vsel %vm12106_vm12, %v11690_v41, %v10168_v29  ;;  %v10175_v39 = vrot.slane %v14999_v30, 5  ;;  %v15015_v49 = vld [vmem:[#allocation3 + $0x8c] sm:$0x1] }
 0x5db   : > { %v10214_v41 = vunpack.c.l.b16 %v10162_v60  ;;  %v8288_v1 = vrot.slane %v8286_v7, 5  ;;  %v8032_v60 = vld [vmem:[#allocation3 + $0x84] sm:$0xf] }
 0x5dc   : > { %v10165_v27 = vsel %vm12106_vm12, %v10163_v47, %v10164_v51  ;;  %v10176_v47 = vsel %vm12106_vm12, %v11691_v2, %v10175_v39  ;;  %v10177_v31 = vrot.slane %v10175_v39, 4  ;;  %v10178_v51 = vrot.slane %v15008_v34, 5 }
 0x5dd   : > { %v7100_v14 = vpop.f32.mrf.mxu2  ;;  %11647 = vmatmul.msk.bf16.gmra.mxu0 %vm5391_vm4, %v11851_v22  ;;  %v7677_v22 = vpop.f32.mrf.mxu0  ;;  %v8799_v2 = vrot.slane %v15015_v49, 5  ;;  %v10218_v39 = vunpack.c.l.b16 %v10176_v47 }
 0x5de   : > { %v7324_v12 = vadd.f32 %v14931_v46, %v7100_v14  ;;  %v9633_v14 = vrot.slane %v9631_v53, 4  ;;  %v10172_v53 = vsel %vm12106_vm12, %v10170_v17, %v10171_v3  ;;  %v10179_v7 = vsel %vm12106_vm12, %v10177_v31, %v10178_v51  ;;  %v9384_v31 = vld [vmem:[#allocation3 + $0x94] sm:$0xf] }
 0x5df   : > { %v10217_v63 = vunpack.c.l.b16 %v10172_v53  ;;  %v8670_v53 = vld [vmem:[#allocation3 + $0x84] sm:$0xe]  ;;  %v8300_v51 = vshll.u32 %v14965_v56, 16 }
 0x5e0   : > { %v15006_v46 = vadd.f32 %v7677_v22, %v7324_v12  ;;  %v10215_v12 = vunpack.c.l.b16 %v10165_v27  ;;  %v10216_v22 = vunpack.c.l.b16 %v10169_v43  ;;  %v15019_v29 = vpop.f32.mrf.mxu3  ;;  %v9634_v36 = vor.u32 %v9633_v14, %v14997_v44  ;;  %v9383_v14 = vld [vmem:[#allocation3 + $0x90] sm:$0xf] }
 0x5e1   : > { %v15781_v43 = vrot.slane %v14965_v56, 5 }
 0x5e2   : > { %15779 = vst [vmem:[#allocation41_spill] sm:$0xff] %v15006_v46  ;;  %11523 = vmatmul.msk.bf16.gmra.mxu2 %vm5391_vm4, %v8477_v38  ;;  %v9382_v46 = vld [vmem:[#allocation3 + $0x8c] sm:$0x1]  ;;  %v9624_v38 = vor.u32 %v9623_v62, %v9620_v24  ;;  %v15025_v27 = vpack.c.b16 %v10215_v12, %v10214_v41  ;;  %v15032_v3 = vpack.c.b16 %v10217_v63, %v10216_v22  ;;  %v10219_v41 = vunpack.c.l.b16 %v10179_v7  ;;  %v15037_v12 = vpop.f32.mrf.mxu1 }
 0x5e3   : > { %v8798_v17 = vrot.slane %v15781_v43, 4  ;;  %v9637_v62 = vshll.u32 %v9382_v46, 16  ;;  %v8291_v22 = vshrl.u32 %v8032_v60, 16  ;;  %v8294_v63 = vshll.u32 %v8032_v60, 16 }
 0x5e4   : > { %15780 = vst [vmem:[#allocation42_spill] sm:$0xff] %v15025_v27  ;;  %v9635_v46 = vrot.slane %v9634_v36, 4  ;;  %v15048_v47 = vpack.c.b16 %v10219_v41, %v10218_v39  ;;  %v8304_v43 = vshrl.u32 %v14965_v56, 16  ;;  %v9642_v7 = vshrl.u32 %v9383_v14, 16  ;;  %v11852_v27 = vld [vmem:[#allocation3 + $0x84] sm:$0xff] }
 0x5e5   : > { %v8548_v16 = vpop.f32.mrf.mxu2  ;;  %11562 = vmatmul.msk.bf16.gmra.mxu3 %vm5391_vm4, %v8880_v61  ;;  %15782 = vst [vmem:[#allocation43_spill] sm:$0xff] %v15032_v3  ;;  %v8279_v61 = vsel %vm12159_vm15, %v14981_v21, %v14969_v54  ;;  %v9645_v54 = vshll.u32 %v9383_v14, 16  ;;  %v11541_v21 = vrot.slane %v8670_v53, 9  ;;  %v9639_v3 = vrot.slane %v9637_v62, 5 }
 0x5e6   : > { %11669 = vmatmul.msk.bf16.gmra.mxu1 %vm5391_vm4, %v9828_v0  ;;  %v8628_v24 = vadd.f32 %v8548_v16, %v14425_v26  ;;  %v8289_v0 = vsel %vm12159_vm15, %v8284_v10, %v8288_v1  ;;  %v9625_v16 = vrot.slane %v9624_v38, 4  ;;  %15783 = vst [vmem:[#allocation44_spill] sm:$0xff] %v15048_v47  ;;  %v9651_v1 = vshll.u32 %v9384_v31, 16  ;;  %v11854_v47 = vld [vmem:[#allocation3 + $0x9c] sm:$0xff] }
 0x5e7   : > { %v9655_v10 = vshrl.u32 %v9384_v31, 16  ;;  %v7971_v60 = vadd.f32 %v14443_v59, %v14961_v50  ;;  %v8800_v36 = vsel %vm12106_vm12, %v8798_v17, %v8799_v2  ;;  %v9640_v14 = vsel %vm12159_vm15, %v9635_v46, %v9639_v3 }
 0x5e8   : > { %v15046_v26 = vadd.f32 %v14967_v6, %v8628_v24  ;;  %v8455_v6 = vunpack.c.l.b16 %v8279_v61  ;;  %v8456_v24 = vunpack.c.l.b16 %v8289_v0  ;;  %v9630_v38 = vsel %vm12159_vm15, %v9625_v16, %v14997_v44  ;;  %v8955_v41 = vpop.f32.mrf.mxu3  ;;  %v15064_v61 = vld [vmem:[#allocation3 + $0x94] sm:$0xf] }
 0x5e9   : > { %v8293_v39 = vrot.slane %v8291_v22, 4  ;;  %v8296_v62 = vrot.slane %v8294_v63, 5  ;;  %v15062_v59 = vrot.slane %v8300_v51, 5  ;;  %v8306_v50 = vrot.slane %v8304_v43, 4 }
 0x5ea   : > { %v9644_v0 = vrot.slane %v9642_v7, 4  ;;  %v9647_v17 = vrot.slane %v9645_v54, 5  ;;  %v15784_v31 = vrot.slane %v14965_v56, 5  ;;  %v15070_v3 = vrot.slane %v9651_v1, 5  ;;  %v15076_v54 = vpop.f32.mrf.mxu1 }
 0x5eb   : > { %v9657_v22 = vrot.slane %v9655_v10, 4  ;;  %v8860_v63 = vunpack.c.l.b16 %v8800_v36  ;;  %v9806_v16 = vunpack.c.l.b16 %v9630_v38  ;;  %v9807_v46 = vunpack.c.l.b16 %v9640_v14  ;;  %v8035_v10 = vld [vmem:[#allocation3 + $0x90] sm:$0xf]  ;;  %v15084_v14 = vld [vmem:[#allocation3 + $0x98] sm:$0x1] }
 0x5ec   : > { %v8797_v44 = vsel %vm12106_vm12, %v11541_v21, %v15784_v31  ;;  %v8478_v51 = vpack.c.b16 %v8456_v24, %v8455_v6  ;;  %v8297_v43 = vor.u32 %v8296_v62, %v8293_v39  ;;  %v8803_v7 = vrot.slane %v15064_v61, 5 }
 0x5ed   : > { %v8550_v53 = vpop.f32.mrf.mxu2  ;;  %11648 = vmatmul.msk.bf16.gmra.mxu0 %vm5391_vm4, %v11852_v27  ;;  %v8307_v56 = vor.u32 %v8306_v50, %v15062_v59  ;;  %v9648_v21 = vor.u32 %v9647_v17, %v9644_v0  ;;  %v9658_v1 = vor.u32 %v9657_v22, %v15070_v3  ;;  %v9829_v38 = vpack.c.b16 %v9807_v46, %v9806_v16  ;;  %v8671_v17 = vld [vmem:[#allocation3 + $0x90] sm:$0xe] }
 0x5ee   : > { %v8629_v2 = vadd.f32 %v8550_v53, %v7971_v60  ;;  %v8859_v60 = vunpack.c.l.b16 %v8797_v44  ;;  %v9385_v53 = vld [vmem:[#allocation3 + $0x98] sm:$0x1]  ;;  %v7972_v6 = vadd.f32 %v14451_v20, %v14459_v40  ;;  %v8298_v24 = vrot.slane %v8297_v43, 4 }
 0x5ef   : > { %v8805_v39 = vrot.slane %v8803_v7, 4  ;;  %v9661_v62 = vshll.u32 %v9385_v53, 16  ;;  %v8308_v0 = vrot.slane %v8307_v56, 4  ;;  %v8315_v31 = vshrl.u32 %v8035_v10, 16  ;;  %v9386_v53 = vld [vmem:[#allocation3 + $0x9c] sm:$0xf] }
 0x5f0   : > { %v15073_v27 = vadd.f32 %v15019_v29, %v8629_v2  ;;  %v8881_v36 = vpack.c.b16 %v8860_v63, %v8859_v60  ;;  %v8310_v29 = vshll.u32 %v15015_v49, 16  ;;  %v9649_v2 = vrot.slane %v9648_v21, 4  ;;  %v8957_v40 = vpop.f32.mrf.mxu3  ;;  %v9387_v21 = vld [vmem:[#allocation3 + $0xa0] sm:$0xf] }
 0x5f1   : > { %v8318_v44 = vshll.u32 %v8035_v10, 16  ;;  %v9659_v49 = vrot.slane %v9658_v1, 4  ;;  %v8324_v63 = vshll.u32 %v15064_v61, 16  ;;  %v8328_v20 = vshrl.u32 %v15064_v61, 16 }
 0x5f2   : > { %11524 = vmatmul.msk.bf16.gmra.mxu2 %vm5391_vm4, %v8478_v51  ;;  %v8312_v16 = vrot.slane %v8310_v29, 5  ;;  %v8806_v46 = vrot.slane %v15084_v14, 5  ;;  %v8303_v43 = vsel %vm12159_vm15, %v8298_v24, %v15062_v59  ;;  %v11542_v60 = vrot.slane %v8671_v17, 9  ;;  %v11853_v24 = vld [vmem:[#allocation3 + $0x90] sm:$0xff] }
 0x5f3   : > { %v9663_v56 = vrot.slane %v9661_v62, 5  ;;  %v8317_v10 = vrot.slane %v8315_v31, 4  ;;  %v15105_v59 = vrot.slane %v8324_v63, 5  ;;  %v8330_v29 = vrot.slane %v8328_v20, 4 }
 0x5f4   : > { %v8313_v1 = vsel %vm12159_vm15, %v8308_v0, %v8312_v16  ;;  %v8807_v61 = vsel %vm12106_vm12, %v8805_v39, %v8806_v46  ;;  %v9666_v62 = vshrl.u32 %v9386_v53, 16  ;;  %v9675_v0 = vshll.u32 %v9387_v21, 16 }
 0x5f5   : > { %v8553_v50 = vpop.f32.mrf.mxu2  ;;  %11563 = vmatmul.msk.bf16.gmra.mxu3 %vm5391_vm4, %v8881_v36  ;;  %v8320_v36 = vrot.slane %v8318_v44, 5  ;;  %v9679_v17 = vshrl.u32 %v9387_v21, 16  ;;  %v7973_v39 = vadd.f32 %v14465_v55, %v14468_v13  ;;  %v8457_v31 = vunpack.c.l.b16 %v8303_v43 }
 0x5f6   : > { %11670 = vmatmul.msk.bf16.gmra.mxu1 %vm5391_vm4, %v9829_v38  ;;  %v8630_v22 = vadd.f32 %v8553_v50, %v7972_v6  ;;  %v9664_v38 = vsel %vm12159_vm15, %v9659_v49, %v9663_v56  ;;  %v15107_v6 = vpop.f32.mrf.mxu1  ;;  %v9669_v50 = vshll.u32 %v9386_v53, 16  ;;  %v8458_v44 = vunpack.c.l.b16 %v8313_v1  ;;  %v15115_v56 = vld [vmem:[#allocation3 + $0xa0] sm:$0xf] }
 0x5f7   : > { %v8321_v49 = vor.u32 %v8320_v36, %v8317_v10  ;;  %v9809_v16 = vunpack.c.l.b16 %v9664_v38  ;;  %v8331_v46 = vor.u32 %v8330_v29, %v15105_v59  ;;  %v9668_v53 = vrot.slane %v9666_v62, 4  ;;  %v9388_v38 = vld [vmem:[#allocation3 + $0xa4] sm:$0x1] }
 0x5f8   : > { %v15091_v51 = vadd.f32 %v8955_v41, %v8630_v22  ;;  %v9654_v41 = vsel %vm12159_vm15, %v9649_v2, %v15070_v3  ;;  %v8804_v3 = vsel %vm12106_vm12, %v11542_v60, %v8803_v7  ;;  %v8862_v2 = vunpack.c.l.b16 %v8807_v61  ;;  %v8960_v60 = vpop.f32.mrf.mxu3 }
 0x5f9   : > { %v9808_v20 = vunpack.c.l.b16 %v9654_v41  ;;  %v9671_v21 = vrot.slane %v9669_v50, 5  ;;  %v15117_v55 = vrot.slane %v9675_v0, 5  ;;  %v9681_v13 = vrot.slane %v9679_v17, 4  ;;  %v15124_v41 = vld [vmem:[#allocation3 + $0xa4] sm:$0x1] }
 0x5fa   : > { %v8479_v1 = vpack.c.b16 %v8458_v44, %v8457_v31  ;;  %v8334_v7 = vshll.u32 %v15084_v14, 16  ;;  %v8322_v61 = vrot.slane %v8321_v49, 4  ;;  %v8810_v10 = vrot.slane %v15115_v56, 5  ;;  %v8038_v0 = vld [vmem:[#allocation3 + $0x9c] sm:$0xf] }
 0x5fb   : > { %v9830_v29 = vpack.c.b16 %v9809_v16, %v9808_v20  ;;  %v8332_v62 = vrot.slane %v8331_v46, 4  ;;  %v9672_v50 = vor.u32 %v9671_v21, %v9668_v53  ;;  %v7974_v17 = vadd.f32 %v14471_v9, %v14479_v4  ;;  %v15138_v16 = vpop.f32.mrf.mxu0 }
 0x5fc   : > { %v8336_v14 = vrot.slane %v8334_v7, 5  ;;  %v8327_v44 = vsel %vm12159_vm15, %v8322_v61, %v15105_v59  ;;  %v8339_v20 = vshrl.u32 %v8038_v0, 16  ;;  %v8342_v9 = vshll.u32 %v8038_v0, 16 }
 0x5fd   : > { %v8555_v22 = vpop.f32.mrf.mxu2  ;;  %11649 = vmatmul.msk.bf16.gmra.mxu0 %vm5391_vm4, %v11853_v24  ;;  %v8861_v24 = vunpack.c.l.b16 %v8804_v3  ;;  %v8813_v3 = vrot.slane %v15124_v41, 5  ;;  %v8348_v4 = vshll.u32 %v15115_v56, 16  ;;  %v9673_v53 = vrot.slane %v9672_v50, 4 }
 0x5fe   : > { %v8631_v63 = vadd.f32 %v8555_v22, %v7973_v39  ;;  %v15129_v39 = vpop.f32.mrf.mxu1  ;;  %v8812_v22 = vrot.slane %v8810_v10, 4  ;;  %v8337_v46 = vsel %vm12159_vm15, %v8332_v62, %v8336_v14  ;;  %v8344_v0 = vrot.slane %v8342_v9, 5 }
 0x5ff   : > { %v8882_v36 = vpack.c.b16 %v8862_v2, %v8861_v24  ;;  %v9685_v2 = vshll.u32 %v9388_v38, 16  ;;  %v8459_v24 = vunpack.c.l.b16 %v8327_v44  ;;  %v8460_v38 = vunpack.c.l.b16 %v8337_v46 }
 0x600   : > { %v15119_v43 = vadd.f32 %v8957_v40, %v8631_v63  ;;  %v9682_v40 = vor.u32 %v9681_v13, %v15117_v55  ;;  %v8672_v63 = vld [vmem:[#allocation3 + $0x9c] sm:$0xe]  ;;  %v8352_v13 = vshrl.u32 %v15115_v56, 16  ;;  %v8814_v61 = vsel %vm12106_vm12, %v8812_v22, %v8813_v3 }
 0x601   : > { %v11543_v7 = vrot.slane %v8672_v63, 9  ;;  %v9678_v62 = vsel %vm12159_vm15, %v9673_v53, %v15117_v55  ;;  %v9699_v44 = vshll.u32 %v14971_v15, 16  ;;  %v9703_v22 = vshrl.u32 %v14971_v15, 16 }
 0x602   : > { %11525 = vmatmul.msk.bf16.gmra.mxu2 %vm5391_vm4, %v8479_v1  ;;  %v9683_v21 = vrot.slane %v9682_v40, 4  ;;  %v9389_v1 = vld [vmem:[#allocation3 + $0xa8] sm:$0xf]  ;;  %v7975_v40 = vadd.f32 %v14485_v32, %v14488_v23  ;;  %v8864_v63 = vunpack.c.l.b16 %v8814_v61  ;;  %v8042_v23 = vld [vmem:[#allocation3 + $0xac] sm:$0xf] }
 0x603   : > { %v9690_v50 = vshrl.u32 %v9389_v1, 16  ;;  %v9693_v14 = vshll.u32 %v9389_v1, 16  ;;  %v15165_v1 = vpop.f32.mrf.mxu0  ;;  %v8817_v61 = vrot.slane %v8042_v23, 5 }
 0x605   : > { %v8558_v31 = vpop.f32.mrf.mxu2  ;;  %11564 = vmatmul.msk.bf16.gmra.mxu3 %vm5391_vm4, %v8882_v36  ;;  %v9687_v36 = vrot.slane %v9685_v2, 5  ;;  %v8811_v2 = vsel %vm12106_vm12, %v11543_v7, %v8810_v10  ;;  %v9692_v53 = vrot.slane %v9690_v50, 4  ;;  %v9695_v15 = vrot.slane %v9693_v14, 5 }
 0x606   : > { %11671 = vmatmul.msk.bf16.gmra.mxu1 %vm5391_vm4, %v9830_v29  ;;  %v8632_v49 = vadd.f32 %v8558_v31, %v7974_v17  ;;  %v8341_v29 = vrot.slane %v8339_v20, 4  ;;  %v8350_v17 = vrot.slane %v8348_v4, 5  ;;  %v8962_v31 = vpop.f32.mrf.mxu3  ;;  %v15159_v9 = vpop.f32.mrf.mxu1  ;;  %v9810_v4 = vunpack.c.l.b16 %v9678_v62 }
 0x607   : > { %v9688_v56 = vsel %vm12159_vm15, %v9683_v21, %v9687_v36  ;;  %v8863_v10 = vunpack.c.l.b16 %v8811_v2  ;;  %v9696_v62 = vor.u32 %v9695_v15, %v9692_v53  ;;  %v8372_v15 = vshll.u32 %v8042_v23, 16 }
 0x608   : > { %v15143_v59 = vadd.f32 %v8960_v60, %v8632_v49  ;;  %v8354_v60 = vrot.slane %v8352_v13, 4  ;;  %v8480_v49 = vpack.c.b16 %v8460_v38, %v8459_v24  ;;  %v8345_v20 = vor.u32 %v8344_v0, %v8341_v29 }
 0x609   : > { %v9811_v46 = vunpack.c.l.b16 %v9688_v56  ;;  %v15163_v13 = vrot.slane %v9699_v44, 5  ;;  %v8358_v24 = vshll.u32 %v15124_v41, 16  ;;  %v8883_v36 = vpack.c.b16 %v8864_v63, %v8863_v10 }
 0x60a   : > { %v8355_v32 = vor.u32 %v8354_v60, %v8350_v17  ;;  %v8346_v7 = vrot.slane %v8345_v20, 4  ;;  %v7976_v0 = vadd.f32 %v14491_v57, %v14499_v28  ;;  %v8041_v60 = vld [vmem:[#allocation3 + $0xa8] sm:$0xf]  ;;  %v9709_v57 = vshll.u32 %v14984_v37, 16 }
 0x60b   : > { %v9831_v38 = vpack.c.b16 %v9811_v46, %v9810_v4  ;;  %v8360_v41 = vrot.slane %v8358_v24, 5  ;;  %v9697_v20 = vrot.slane %v9696_v62, 4  ;;  %v8366_v46 = vshll.u32 %v8041_v60, 16 }
 0x60c   : > { %v8356_v29 = vrot.slane %v8355_v32, 4  ;;  %v8351_v44 = vsel %vm12159_vm15, %v8346_v7, %v8350_v17  ;;  %v9711_v10 = vrot.slane %v9709_v57, 5  ;;  %v9723_v62 = vshll.u32 %v14977_v45, 16 }
 0x60d   : > { %v8560_v3 = vpop.f32.mrf.mxu2  ;;  %11650 = vmatmul.msk.bf16.gmra.mxu0 %vm5391_vm4, %v11854_v47  ;;  %v9705_v47 = vrot.slane %v9703_v22, 4  ;;  %v8673_v22 = vld [vmem:[#allocation3 + $0xa8] sm:$0xe]  ;;  %v8461_v53 = vunpack.c.l.b16 %v8351_v44  ;;  %v15202_v44 = vrot.slane %v8372_v15, 5 }
 0x60e   : > { %v8633_v55 = vadd.f32 %v8560_v3, %v7975_v40  ;;  %v8965_v50 = vpop.f32.mrf.mxu3  ;;  %v8819_v3 = vrot.slane %v8817_v61, 4  ;;  %v8361_v28 = vsel %vm12159_vm15, %v8356_v29, %v8360_v41  ;;  %v15184_v32 = vpop.f32.mrf.mxu1  ;;  %v11544_v17 = vrot.slane %v8673_v22, 9  ;;  %v15204_v22 = vld [vmem:[#allocation3 + $0xb8] sm:$0xf] }
 0x60f   : > { %v9706_v56 = vor.u32 %v9705_v47, %v15163_v13  ;;  %v8376_v47 = vshrl.u32 %v8042_v23, 16  ;;  %v8462_v29 = vunpack.c.l.b16 %v8361_v28  ;;  %v9702_v23 = vsel %vm12159_vm15, %v9697_v20, %v15163_v13 }
 0x610   : > { %v15161_v21 = vadd.f32 %v8962_v31, %v8633_v55  ;;  %v15171_v31 = vld [vmem:[#allocation3 + $0xb0] sm:$0x1]  ;;  %v8363_v55 = vshrl.u32 %v8041_v60, 16  ;;  %v7977_v60 = vadd.f32 %v14505_v19, %v14508_v25  ;;  %v9812_v28 = vunpack.c.l.b16 %v9702_v23 }
 0x611   : > { %v8820_v2 = vrot.slane %v15171_v31, 5  ;;  %v9707_v4 = vrot.slane %v9706_v56, 4  ;;  %v9727_v56 = vshrl.u32 %v14977_v45, 16  ;;  %v8378_v45 = vrot.slane %v8376_v47, 4  ;;  %v15212_v47 = vld [vmem:[#allocation3 + $0xbc] sm:$0x1] }
 0x612   : > { %11526 = vmatmul.msk.bf16.gmra.mxu2 %vm5391_vm4, %v8480_v49  ;;  %v9392_v49 = vld [vmem:[#allocation3 + $0xb4] sm:$0xf] }
 0x613   : > { %v8821_v37 = vsel %vm12106_vm12, %v8819_v3, %v8820_v2  ;;  %v9714_v24 = vshrl.u32 %v9392_v49, 16  ;;  %v9717_v7 = vshll.u32 %v9392_v49, 16  ;;  %v9729_v49 = vrot.slane %v9727_v56, 4 }
 0x614   : > { %v8866_v25 = vunpack.c.l.b16 %v8821_v37  ;;  %v8379_v15 = vor.u32 %v8378_v45, %v15202_v44 }
 0x615   : > { %v8563_v40 = vpop.f32.mrf.mxu2  ;;  %11565 = vmatmul.msk.bf16.gmra.mxu3 %vm5391_vm4, %v8883_v36  ;;  %v15188_v36 = vpop.f32.mrf.mxu0  ;;  %v9716_v3 = vrot.slane %v9714_v24, 4  ;;  %v9719_v57 = vrot.slane %v9717_v7, 5 }
 0x616   : > { %11672 = vmatmul.msk.bf16.gmra.mxu1 %vm5391_vm4, %v9831_v38  ;;  %v8634_v14 = vadd.f32 %v8563_v40, %v7976_v0  ;;  %v11855_v38 = vld [vmem:[#allocation3 + $0xa8] sm:$0xff]  ;;  %v8365_v0 = vrot.slane %v8363_v55, 4  ;;  %v8368_v40 = vrot.slane %v8366_v46, 5  ;;  %v8967_v13 = vpop.f32.mrf.mxu3  ;;  %v15206_v55 = vrot.slane %v9723_v62, 5  ;;  %v15215_v24 = vpop.f32.mrf.mxu1 }
 0x617   : > { %v9720_v37 = vor.u32 %v9719_v57, %v9716_v3  ;;  %v8382_v62 = vshll.u32 %v15171_v31, 16  ;;  %v9733_v31 = vshll.u32 %v14991_v5, 16 }
 0x618   : > { %v15182_v63 = vadd.f32 %v8965_v50, %v8634_v14  ;;  %v9712_v50 = vsel %vm12159_vm15, %v9707_v4, %v9711_v10  ;;  %v8818_v14 = vsel %vm12106_vm12, %v11544_v17, %v8817_v61  ;;  %v8481_v4 = vpack.c.b16 %v8462_v29, %v8461_v53  ;;  %v8044_v10 = vld [vmem:[#allocation3 + $0xb4] sm:$0xf] }
 0x619   : > { %v9813_v2 = vunpack.c.l.b16 %v9712_v50  ;;  %v8369_v46 = vor.u32 %v8368_v40, %v8365_v0  ;;  %v8824_v61 = vrot.slane %v15204_v22, 5  ;;  %v8865_v17 = vunpack.c.l.b16 %v8818_v14 }
 0x61a   : > { %v9730_v53 = vor.u32 %v9729_v49, %v15206_v55  ;;  %v7978_v29 = vadd.f32 %v14511_v8, %v14519_v35  ;;  %v8380_v40 = vrot.slane %v8379_v15, 4  ;;  %v8387_v14 = vshrl.u32 %v8044_v10, 16 }
 0x61b   : > { %v8884_v7 = vpack.c.b16 %v8866_v25, %v8865_v17  ;;  %v8370_v0 = vrot.slane %v8369_v46, 4  ;;  %v8826_v56 = vrot.slane %v8824_v61, 4  ;;  %v8390_v45 = vshll.u32 %v8044_v10, 16 }
 0x61c   : > { %v9721_v8 = vrot.slane %v9720_v37, 4  ;;  %v8396_v35 = vshll.u32 %v15204_v22, 16  ;;  %v8400_v25 = vshrl.u32 %v15204_v22, 16  ;;  %v8384_v3 = vrot.slane %v8382_v62, 5 }
 0x61d   : > { %v8565_v41 = vpop.f32.mrf.mxu2  ;;  %11651 = vmatmul.msk.bf16.gmra.mxu0 %vm5391_vm4, %v11855_v38  ;;  %v9832_v38 = vpack.c.b16 %v9813_v2, %v9812_v28  ;;  %v15222_v23 = vpop.f32.mrf.mxu0  ;;  %v9731_v57 = vrot.slane %v9730_v53, 4  ;;  %v8375_v28 = vsel %vm12159_vm15, %v8370_v0, %v15202_v44  ;;  %v8389_v46 = vrot.slane %v8387_v14, 4 }
 0x61e   : > { %v8635_v19 = vadd.f32 %v8565_v41, %v7977_v60  ;;  %v8827_v60 = vrot.slane %v15212_v47, 5  ;;  %v8674_v41 = vld [vmem:[#allocation3 + $0xb4] sm:$0xe]  ;;  %v8385_v49 = vsel %vm12159_vm15, %v8380_v40, %v8384_v3  ;;  %v8392_v17 = vrot.slane %v8390_v45, 5 }
 0x61f   : > { %v11545_v2 = vrot.slane %v8674_v41, 9  ;;  %v9726_v22 = vsel %vm12159_vm15, %v9721_v8, %v15206_v55  ;;  %v8398_v15 = vrot.slane %v8396_v35, 5  ;;  %v8402_v37 = vrot.slane %v8400_v25, 4 }
 0x620   : > { %v15208_v20 = vadd.f32 %v8967_v13, %v8635_v19  ;;  %v9395_v13 = vld [vmem:[#allocation3 + $0xc0] sm:$0xf]  ;;  %v8828_v5 = vsel %vm12106_vm12, %v8826_v56, %v8827_v60  ;;  %v9747_v62 = vshll.u32 %v14999_v30, 16  ;;  %v9751_v53 = vshrl.u32 %v14999_v30, 16  ;;  %v15247_v60 = vpop.f32.mrf.mxu1 }
 0x621   : > { %v9738_v10 = vshrl.u32 %v9395_v13, 16  ;;  %v8463_v0 = vunpack.c.l.b16 %v8375_v28  ;;  %v8464_v56 = vunpack.c.l.b16 %v8385_v49  ;;  %v8868_v40 = vunpack.c.l.b16 %v8828_v5 }
 0x622   : > { %11527 = vmatmul.msk.bf16.gmra.mxu2 %vm5391_vm4, %v8481_v4  ;;  %v9735_v4 = vrot.slane %v9733_v31, 5  ;;  %v8393_v41 = vor.u32 %v8392_v17, %v8389_v46  ;;  %v9814_v14 = vunpack.c.l.b16 %v9726_v22  ;;  %v8403_v30 = vor.u32 %v8402_v37, %v8398_v15  ;;  %v8047_v37 = vld [vmem:[#allocation3 + $0xc0] sm:$0xf] }
 0x623   : > { %v9749_v25 = vrot.slane %v9747_v62, 5  ;;  %v9753_v3 = vrot.slane %v9751_v53, 4  ;;  %v8406_v28 = vshll.u32 %v15212_v47, 16  ;;  %v7980_v22 = vadd.f32 %v14534_v42, %v14542_v52  ;;  %v15267_v62 = vld [vmem:[#allocation3 + $0xc8] sm:$0x1] }
 0x624   : > { %v9736_v44 = vsel %vm12159_vm15, %v9731_v57, %v9735_v4  ;;  %v8482_v57 = vpack.c.b16 %v8464_v56, %v8463_v0  ;;  %v8404_v4 = vrot.slane %v8403_v30, 4  ;;  %v9757_v47 = vshll.u32 %v15008_v34, 16  ;;  %v8675_v53 = vld [vmem:[#allocation3 + $0xc0] sm:$0xe] }
 0x625   : > { %v8568_v50 = vpop.f32.mrf.mxu2  ;;  %11566 = vmatmul.msk.bf16.gmra.mxu3 %vm5391_vm4, %v8884_v7  ;;  %v11856_v7 = vld [vmem:[#allocation3 + $0xb4] sm:$0xff]  ;;  %v9815_v45 = vunpack.c.l.b16 %v9736_v44  ;;  %v15254_v8 = vpop.f32.mrf.mxu0  ;;  %v9754_v17 = vor.u32 %v9753_v3, %v9749_v25 }
 0x626   : > { %11673 = vmatmul.msk.bf16.gmra.mxu1 %vm5391_vm4, %v9832_v38  ;;  %v15227_v19 = vadd.f32 %v8568_v50, %v7978_v29  ;;  %v9741_v38 = vshll.u32 %v9395_v13, 16  ;;  %v7979_v29 = vadd.f32 %v14525_v33, %v14528_v58  ;;  %v8825_v50 = vsel %vm12106_vm12, %v11545_v2, %v8824_v61  ;;  %v8048_v33 = vld [vmem:[#allocation3 + $0xc4] sm:$0xf] }
 0x627   : > { %v9740_v58 = vrot.slane %v9738_v10, 4  ;;  %v8867_v13 = vunpack.c.l.b16 %v8825_v50  ;;  %v8394_v2 = vrot.slane %v8393_v41, 4  ;;  %v8831_v5 = vrot.slane %v8048_v33, 5 }
 0x628   : > { %v9743_v35 = vrot.slane %v9741_v38, 5  ;;  %v9833_v49 = vpack.c.b16 %v9815_v45, %v9814_v14  ;;  %v15269_v0 = vpop.f32.mrf.mxu1  ;;  %v9755_v56 = vrot.slane %v9754_v17, 4  ;;  %v8414_v50 = vshll.u32 %v8047_v37, 16 }
 0x629   : > { %v8885_v61 = vpack.c.b16 %v8868_v40, %v8867_v13  ;;  %v8399_v38 = vsel %vm12159_vm15, %v8394_v2, %v8398_v15  ;;  %v8420_v40 = vshll.u32 %v8048_v33, 16  ;;  %v8424_v34 = vshrl.u32 %v8048_v33, 16  ;;  %v15785_v33 = vld [vmem:[#allocation14_spill] sm:$0xff] }
 0x62a   : > { %v9744_v46 = vor.u32 %v9743_v35, %v9740_v58  ;;  %v11546_v14 = vrot.slane %v8675_v53, 9  ;;  %v8834_v15 = vrot.slane %v15267_v62, 5  ;;  %v9759_v45 = vrot.slane %v9757_v47, 5  ;;  %v11857_v35 = vld [vmem:[#allocation3 + $0xc0] sm:$0xff] }
 0x62b   : > { %v8465_v30 = vunpack.c.l.b16 %v8399_v38  ;;  %v8416_v2 = vrot.slane %v8414_v50, 5 }
 0x62c   : > { %v9745_v52 = vrot.slane %v9744_v46, 4  ;;  %v9760_v13 = vsel %vm12159_vm15, %v9755_v56, %v9759_v45  ;;  %v8832_v17 = vsel %vm12106_vm12, %v11546_v14, %v8831_v5  ;;  %v8430_v14 = vshll.u32 %v15267_v62, 16 }
 0x62d   : > { %v8570_v55 = vpop.f32.mrf.mxu2  ;;  %11652 = vmatmul.msk.bf16.gmra.mxu0 %vm5391_vm4, %v11856_v7  ;;  %v8408_v7 = vrot.slane %v8406_v28, 5  ;;  %v15273_v41 = vpop.f32.mrf.mxu0  ;;  %v8869_v47 = vunpack.c.l.b16 %v8832_v17 }
 0x62e   : > { %v15252_v31 = vadd.f32 %v8570_v55, %v7979_v29  ;;  %v8833_v29 = vrot.slane %v8831_v5, 4  ;;  %v8411_v55 = vshrl.u32 %v8047_v37, 16 }
 0x62f   : > { %v8409_v42 = vsel %vm12159_vm15, %v8404_v4, %v8408_v7  ;;  %v8426_v4 = vrot.slane %v8424_v34, 4 }
 0x630   : > { %v8466_v58 = vunpack.c.l.b16 %v8409_v42  ;;  %v8835_v3 = vsel %vm12106_vm12, %v8833_v29, %v8834_v15  ;;  %v8413_v28 = vrot.slane %v8411_v55, 4  ;;  %v9398_v29 = vld [vmem:[#allocation3 + $0xcc] sm:$0xf]  ;;  %v15291_v42 = vld [vmem:[#allocation3 + $0xd4] sm:$0x1] }
 0x631   : > { %v8870_v37 = vunpack.c.l.b16 %v8835_v3  ;;  %v9762_v56 = vshrl.u32 %v9398_v29, 16  ;;  %v9765_v55 = vshll.u32 %v9398_v29, 16  ;;  %v9781_v15 = vshll.u32 %v15291_v42, 16  ;;  %v11858_v29 = vld [vmem:[#allocation3 + $0xcc] sm:$0xff] }
 0x632   : > { %11528 = vmatmul.msk.bf16.gmra.mxu2 %vm5391_vm4, %v8482_v57  ;;  %v9750_v57 = vsel %vm12159_vm15, %v9745_v52, %v9749_v25  ;;  %v8483_v7 = vpack.c.b16 %v8466_v58, %v8465_v30  ;;  %v8417_v38 = vor.u32 %v8416_v2, %v8413_v28  ;;  %v15293_v52 = vpop.f32.mrf.mxu1 }
 0x633   : > { %v9816_v25 = vunpack.c.l.b16 %v9750_v57  ;;  %v9764_v30 = vrot.slane %v9762_v56, 4  ;;  %v9767_v58 = vrot.slane %v9765_v55, 5  ;;  %v15786_v57 = vld [vmem:[#allocation8_spill] sm:$0xff]  ;;  %v9783_v17 = vrot.slane %v9781_v15, 5  ;;  %v15788_v55 = vld [vmem:[#allocation9_spill] sm:$0xff] }
 0x635   : > { %v8573_v10 = vpop.f32.mrf.mxu2  ;;  %11567 = vmatmul.msk.bf16.gmra.mxu3 %vm5391_vm4, %v8885_v61  ;;  %v7981_v61 = vadd.f32 %v15785_v33, %v14556_v11  ;;  %v15289_v11 = vld [vmem:[#allocation3 + $0xd0] sm:$0xf]  ;;  %v15300_v45 = vpop.f32.mrf.mxu0 }
 0x636   : > { %11674 = vmatmul.msk.bf16.gmra.mxu1 %vm5391_vm4, %v9833_v49  ;;  %v15263_v44 = vadd.f32 %v8573_v10, %v7980_v22  ;;  %v8422_v49 = vrot.slane %v8420_v40, 5  ;;  %v9817_v10 = vunpack.c.l.b16 %v9760_v13  ;;  %v9771_v5 = vshll.u32 %v15289_v11, 16  ;;  %v15787_v13 = vld [vmem:[#allocation17_spill] sm:$0xff] }
 0x637   : > { %v9775_v50 = vshrl.u32 %v15289_v11, 16  ;;  %v8886_v40 = vpack.c.b16 %v8870_v37, %v8869_v47  ;;  %v7982_v28 = vadd.f32 %v15787_v13, %v15786_v57  ;;  %v8432_v37 = vrot.slane %v8430_v14, 5  ;;  %v15790_v13 = vld [vmem:[#allocation19_spill] sm:$0xff] }
 0x638   : > { %v8427_v53 = vor.u32 %v8426_v4, %v8422_v49  ;;  %v9834_v34 = vpack.c.b16 %v9817_v10, %v9816_v25  ;;  %v9768_v4 = vor.u32 %v9767_v58, %v9764_v30  ;;  %v10077_v57 = vrot.slane %v11920_v48, 5  ;;  %v10012_v48 = vld [vmem:[#allocation3 + $0x24] sm:$0xe] }
 0x639   : > { %v9777_v3 = vrot.slane %v9775_v50, 4 }
 0x63a   : > { %v8428_v2 = vrot.slane %v8427_v53, 4  ;;  %v9769_v25 = vrot.slane %v9768_v4, 4  ;;  %v15316_v53 = vpop.f32.mrf.mxu1 }
 0x63c   : > { %v8433_v47 = vsel %vm12159_vm15, %v8428_v2, %v8432_v37 }
 0x63d   : > { %v8575_v46 = vpop.f32.mrf.mxu2  ;;  %11653 = vmatmul.msk.bf16.gmra.mxu0 %vm5391_vm4, %v11857_v35  ;;  %v9773_v35 = vrot.slane %v9771_v5, 5  ;;  %v15789_v5 = vld [vmem:[#allocation18_spill] sm:$0xff]  ;;  %v15320_v14 = vpop.f32.mrf.mxu0 }
 0x63e   : > { %v15287_v22 = vadd.f32 %v8575_v46, %v7981_v61  ;;  %v8418_v61 = vrot.slane %v8417_v38, 4  ;;  %v7983_v50 = vadd.f32 %v15789_v5, %v15788_v55 }
 0x63f   : > { %v9778_v62 = vor.u32 %v9777_v3, %v9773_v35  ;;  %v9774_v56 = vsel %vm12159_vm15, %v9769_v25, %v9773_v35  ;;  %v11921_v25 = vld [vmem:[#allocation3 + $0x20] sm:$0x1] }
 0x640   : > { %v9818_v15 = vunpack.c.l.b16 %v9774_v56  ;;  %v15793_v56 = vld [vmem:[#allocation12_spill] sm:$0xff] }
 0x641   : > { %v9779_v10 = vrot.slane %v9778_v62, 4  ;;  %v10079_v62 = vrot.slane %v10077_v57, 4 }
 0x642   : > { %11529 = vmatmul.msk.bf16.gmra.mxu2 %vm5391_vm4, %v8483_v7  ;;  %v8423_v7 = vsel %vm12159_vm15, %v8418_v61, %v8422_v49  ;;  %v10011_v61 = vld [vmem:[#allocation3 + $0x18] sm:$0xe]  ;;  %v15328_v2 = vpop.f32.mrf.mxu1 }
 0x643   : > { %v9784_v38 = vsel %vm12159_vm15, %v9779_v10, %v9783_v17  ;;  %v11677_v37 = vrot.slane %v10011_v61, 9  ;;  %v10080_v10 = vrot.slane %v11921_v25, 5  ;;  %v11923_v61 = vld [vmem:[#allocation3 + $0x2c] sm:$0x1] }
 0x644   : > { %v9819_v30 = vunpack.c.l.b16 %v9784_v38  ;;  %v15796_v25 = vld [vmem:[#allocation15_spill] sm:$0xff] }
 0x645   : > { %v8578_v33 = vpop.f32.mrf.mxu2  ;;  %11568 = vmatmul.msk.bf16.gmra.mxu3 %vm5391_vm4, %v8886_v40  ;;  %v8467_v40 = vunpack.c.l.b16 %v8423_v7  ;;  %v10081_v7 = vsel %vm12106_vm12, %v10079_v62, %v10080_v10  ;;  %v15797_v10 = vld [vmem:[#allocation5_spill] sm:$0xff] }
 0x646   : > { %11675 = vmatmul.msk.bf16.gmra.mxu1 %vm5391_vm4, %v9834_v34  ;;  %v15306_v46 = vadd.f32 %v8578_v33, %v7982_v28  ;;  %v8468_v34 = vunpack.c.l.b16 %v8433_v47  ;;  %v9835_v3 = vpack.c.b16 %v9819_v30, %v9818_v15  ;;  %v15791_v28 = vld [vmem:[#allocation11_spill] sm:$0xff]  ;;  %v10078_v47 = vsel %vm12106_vm12, %v11677_v37, %v10077_v57  ;;  %v15794_v30 = vld [vmem:[#allocation13_spill] sm:$0xff] }
 0x647   : > { %v7984_v33 = vadd.f32 %v15791_v28, %v15790_v13  ;;  %v10191_v55 = vunpack.c.l.b16 %v10081_v7  ;;  %v7987_v7 = vadd.f32 %v15797_v10, %v15796_v25 }
 0x648   : > { %v8484_v35 = vpack.c.b16 %v8468_v34, %v8467_v40  ;;  %v10190_v40 = vunpack.c.l.b16 %v10078_v47 }
 0x64a   : > { %v10222_v34 = vpack.c.b16 %v10191_v55, %v10190_v40 }
 0x64d   : > { %v8580_v49 = vpop.f32.mrf.mxu2  ;;  %11654 = vmatmul.msk.bf16.gmra.mxu0 %vm5391_vm4, %v11858_v29  ;;  %v15792_v29 = vld [vmem:[#allocation10_spill] sm:$0xff] }
 0x64e   : > { %v15323_v58 = vadd.f32 %v8580_v49, %v7983_v50  ;;  %v7985_v38 = vadd.f32 %v15793_v56, %v15792_v29  ;;  %v11922_v49 = vld [vmem:[#allocation3 + $0x28] sm:$0xf] }
 0x64f   : > { %v10084_v15 = vrot.slane %v11922_v49, 5  ;;  %v15799_v49 = vld [vmem:[#allocation7_spill] sm:$0xff] }
 0x651   : > { %v10086_v28 = vrot.slane %v10084_v15, 4 }
 0x652   : > { %11530 = vmatmul.msk.bf16.gmra.mxu2 %vm5391_vm4, %v8484_v35  ;;  %v15795_v35 = vld [vmem:[#allocation20_spill] sm:$0xff] }
 0x655   : > { %v8583_v4 = vpop.f32.mrf.mxu2 }
 0x656   : > { %11676 = vmatmul.msk.bf16.gmra.mxu1 %vm5391_vm4, %v9835_v3  ;;  %v15331_v17 = vadd.f32 %v8583_v4, %v7984_v33  ;;  %v7986_v3 = vadd.f32 %v15795_v35, %v15794_v30  ;;  %v11678_v33 = vrot.slane %v10012_v48, 9  ;;  %v10087_v4 = vrot.slane %v11923_v61, 5  ;;  %v10013_v35 = vld [vmem:[#allocation3 + $0x30] sm:$0xe] }
 0x658   : > { %v10088_v62 = vsel %vm12106_vm12, %v10086_v28, %v10087_v4  ;;  %v10085_v37 = vsel %vm12106_vm12, %v11678_v33, %v10084_v15  ;;  %v11925_v28 = vld [vmem:[#allocation3 + $0x38] sm:$0x1] }
 0x659   : > { %v10193_v47 = vunpack.c.l.b16 %v10088_v62  ;;  %v10094_v33 = vrot.slane %v11925_v28, 5  ;;  %v15800_v62 = vld [vmem:[#allocation6_spill] sm:$0xff] }
 0x65a   : > { %v11927_v28 = vld [vmem:[#allocation3 + $0x44] sm:$0x1] }
 0x65d   : > { %v8585_v5 = vpop.f32.mrf.mxu2 }
 0x65e   : > { %v15339_v50 = vadd.f32 %v8585_v5, %v7985_v38  ;;  %v10192_v38 = vunpack.c.l.b16 %v10085_v37  ;;  %v11924_v5 = vld [vmem:[#allocation3 + $0x34] sm:$0xf]  ;;  %v15801_v37 = vld [vmem:[#allocation22_spill] sm:$0xff] }
 0x65f   : > { %v10091_v40 = vrot.slane %v11924_v5, 5  ;;  %v7989_v25 = vadd.f32 %v15801_v37, %v15800_v62  ;;  %v15804_v62 = vld [vmem:[#allocation23_spill] sm:$0xff] }
 0x660   : > { %v10223_v55 = vpack.c.b16 %v10193_v47, %v10192_v38  ;;  %v15805_v37 = vld [vmem:[#allocation27_spill] sm:$0xff] }
 0x661   : > { %v10093_v48 = vrot.slane %v10091_v40, 4 }
 0x662   : > { %11699 = vmatmul.msk.bf16.vlgmr.msra.gmra.mxu2 %vm5391_vm4, %v10222_v34  ;;  %v15798_v34 = vld [vmem:[#allocation16_spill] sm:$0xff] }
 0x663   : > { %v7988_v30 = vadd.f32 %v15799_v49, %v15798_v34  ;;  %v10095_v61 = vsel %vm12106_vm12, %v10093_v48, %v10094_v33  ;;  %v15802_v34 = vld [vmem:[#allocation21_spill] sm:$0xff]  ;;  %v15803_v49 = vld [vmem:[#allocation24_spill] sm:$0xff]  ;;  %v10101_v33 = vrot.slane %v11927_v28, 5 }
 0x664   : > { %v10195_v10 = vunpack.c.l.b16 %v10095_v61 }
 0x665   : > { %v8588_v13 = vpop.f32.mrf.mxu2 }
 0x666   : > { %v15344_v57 = vadd.f32 %v8588_v13, %v7986_v3  ;;  %v11679_v13 = vrot.slane %v10013_v35, 9  ;;  %v10014_v35 = vld [vmem:[#allocation3 + $0x3c] sm:$0xe] }
 0x668   : > { %v10092_v4 = vsel %vm12106_vm12, %v11679_v13, %v10091_v40  ;;  %v11680_v13 = vrot.slane %v10014_v35, 9  ;;  %v15808_v35 = vld [vmem:[#allocation29_spill] sm:$0xff] }
 0x66d   : > { %v8590_v29 = vpop.f32.mrf.mxu2 }
 0x66e   : > { %v15352_v56 = vadd.f32 %v8590_v29, %v7987_v7  ;;  %v10194_v29 = vunpack.c.l.b16 %v10092_v4 }
 0x670   : > { %v10224_v38 = vpack.c.b16 %v10195_v10, %v10194_v29 }
 0x672   : > { %11700 = vmatmul.msk.bf16.gmra.mxu2 %vm5391_vm4, %v10223_v55  ;;  %v11926_v55 = vld [vmem:[#allocation3 + $0x40] sm:$0xf] }
 0x673   : > { %v10098_v5 = vrot.slane %v11926_v55, 5 }
 0x675   : > { %v8593_v3 = vpop.f32.mrf.mxu2  ;;  %v10100_v48 = vrot.slane %v10098_v5, 4  ;;  %v10099_v4 = vsel %vm12106_vm12, %v11680_v13, %v10098_v5 }
 0x676   : > { %v15357_v15 = vadd.f32 %v8593_v3, %v7988_v30  ;;  %v7990_v30 = vadd.f32 %v15803_v49, %v15802_v34  ;;  %v11928_v34 = vld [vmem:[#allocation3 + $0x4c] sm:$0xf] }
 0x677   : > { %v10102_v61 = vsel %vm12106_vm12, %v10100_v48, %v10101_v33  ;;  %v10105_v49 = vrot.slane %v11928_v34, 5  ;;  %v10015_v48 = vld [vmem:[#allocation3 + $0x48] sm:$0xe] }
 0x678   : > { %v10197_v10 = vunpack.c.l.b16 %v10102_v61  ;;  %v11681_v13 = vrot.slane %v10015_v48, 9  ;;  %v15813_v48 = vld [vmem:[#allocation28_spill] sm:$0xff] }
 0x679   : > { %v10107_v33 = vrot.slane %v10105_v49, 4 }
 0x67d   : > { %v8595_v7 = vpop.f32.mrf.mxu2 }
 0x67e   : > { %v15365_v47 = vadd.f32 %v8595_v7, %v7989_v25  ;;  %v7991_v25 = vadd.f32 %v15805_v37, %v15804_v62  ;;  %v11929_v62 = vld [vmem:[#allocation3 + $0x50] sm:$0x1] }
 0x67f   : > { %v10108_v61 = vrot.slane %v11929_v62, 5  ;;  %v15814_v62 = vld [vmem:[#allocation33_spill] sm:$0xff] }
 0x681   : > { %v10109_v37 = vsel %vm12106_vm12, %v10107_v33, %v10108_v61  ;;  %v10016_v33 = vld [vmem:[#allocation3 + $0x54] sm:$0xe] }
 0x682   : > { %11701 = vmatmul.msk.bf16.gmra.mxu2 %vm5391_vm4, %v10224_v38  ;;  %v10196_v38 = vunpack.c.l.b16 %v10099_v4  ;;  %v10106_v4 = vsel %vm12106_vm12, %v11681_v13, %v10105_v49  ;;  %v11682_v13 = vrot.slane %v10016_v33, 9  ;;  %v15818_v33 = vld [vmem:[#allocation32_spill] sm:$0xff] }
 0x684   : > { %v10225_v55 = vpack.c.b16 %v10197_v10, %v10196_v38  ;;  %v15811_v10 = vld [vmem:[#allocation31_spill] sm:$0xff]  ;;  %v10199_v38 = vunpack.c.l.b16 %v10109_v37 }
 0x685   : > { %v8598_v3 = vpop.f32.mrf.mxu2 }
 0x686   : > { %v15370_v40 = vadd.f32 %v8598_v3, %v7990_v30  ;;  %v15807_v30 = vld [vmem:[#allocation25_spill] sm:$0xff] }
 0x687   : > { %v7992_v3 = vadd.f32 %v15808_v35, %v15807_v30  ;;  %v10198_v30 = vunpack.c.l.b16 %v10106_v4 }
 0x689   : > { %v10226_v35 = vpack.c.b16 %v10199_v38, %v10198_v30  ;;  %v15817_v38 = vld [vmem:[#allocation36_spill] sm:$0xff] }
 0x68d   : > { %v8600_v7 = vpop.f32.mrf.mxu2 }
 0x68e   : > { %v15378_v29 = vadd.f32 %v8600_v7, %v7991_v25  ;;  %v15810_v25 = vld [vmem:[#allocation26_spill] sm:$0xff] }
 0x68f   : > { %v7993_v7 = vadd.f32 %v15811_v10, %v15810_v25  ;;  %v11931_v25 = vld [vmem:[#allocation3 + $0x5c] sm:$0x1] }
 0x690   : > { %15806 = vst [vmem:[#allocation14_spill] sm:$0xff] %v15378_v29  ;;  %v10115_v37 = vrot.slane %v11931_v25, 5  ;;  %v15819_v25 = vld [vmem:[#allocation38_spill] sm:$0xff] }
 0x692   : > { %11702 = vmatmul.msk.bf16.gmra.mxu2 %vm5391_vm4, %v10225_v55 }
 0x695   : > { %v8603_v28 = vpop.f32.mrf.mxu2 }
 0x696   : > { %v15383_v5 = vadd.f32 %v8603_v28, %v7992_v3  ;;  %v11930_v3 = vld [vmem:[#allocation3 + $0x58] sm:$0xf] }
 0x697   : > { %v10112_v28 = vrot.slane %v11930_v3, 5 }
 0x698   : > { %15809 = vst [vmem:[#allocation8_spill] sm:$0xff] %v15383_v5  ;;  %v7994_v5 = vadd.f32 %v15814_v62, %v15813_v48 }
 0x699   : > { %v10114_v29 = vrot.slane %v10112_v28, 4  ;;  %v10113_v4 = vsel %vm12106_vm12, %v11682_v13, %v10112_v28 }
 0x69a   : > { %v10200_v48 = vunpack.c.l.b16 %v10113_v4 }
 0x69b   : > { %v10116_v10 = vsel %vm12106_vm12, %v10114_v29, %v10115_v37  ;;  %v10017_v29 = vld [vmem:[#allocation3 + $0x60] sm:$0xe] }
 0x69c   : > { %v10201_v30 = vunpack.c.l.b16 %v10116_v10  ;;  %v11683_v13 = vrot.slane %v10017_v29, 9  ;;  %v15823_v29 = vld [vmem:[#allocation35_spill] sm:$0xff] }
 0x69d   : > { %v8605_v55 = vpop.f32.mrf.mxu2 }
 0x69e   : > { %v15391_v34 = vadd.f32 %v8605_v55, %v7993_v7  ;;  %v15816_v7 = vld [vmem:[#allocation30_spill] sm:$0xff]  ;;  %v10227_v62 = vpack.c.b16 %v10201_v30, %v10200_v48  ;;  %v15822_v30 = vld [vmem:[#allocation40_spill] sm:$0xff] }
 0x69f   : > { %v7995_v55 = vadd.f32 %v15817_v38, %v15816_v7  ;;  %v11933_v7 = vld [vmem:[#allocation3 + $0x68] sm:$0x1] }
 0x6a0   : > { %15812 = vst [vmem:[#allocation17_spill] sm:$0xff] %v15391_v34  ;;  %v10122_v10 = vrot.slane %v11933_v7, 5  ;;  %v7998_v7 = vadd.f32 %v15037_v12, %v15823_v29  ;;  %v11936_v29 = vld [vmem:[#allocation3 + $0x7c] sm:$0xf] }
 0x6a2   : > { %11703 = vmatmul.msk.bf16.gmra.mxu2 %vm5391_vm4, %v10226_v35 }
 0x6a5   : > { %v8608_v61 = vpop.f32.mrf.mxu2 }
 0x6a6   : > { %v15396_v49 = vadd.f32 %v8608_v61, %v7994_v5  ;;  %v11932_v5 = vld [vmem:[#allocation3 + $0x64] sm:$0xf] }
 0x6a7   : > { %v10119_v61 = vrot.slane %v11932_v5, 5 }
 0x6a8   : > { %15815 = vst [vmem:[#allocation9_spill] sm:$0xff] %v15396_v49  ;;  %v7996_v49 = vadd.f32 %v15819_v25, %v15818_v33 }
 0x6a9   : > { %v10121_v34 = vrot.slane %v10119_v61, 4  ;;  %v10120_v4 = vsel %vm12106_vm12, %v11683_v13, %v10119_v61 }
 0x6aa   : > { %v10202_v33 = vunpack.c.l.b16 %v10120_v4 }
 0x6ab   : > { %v10123_v38 = vsel %vm12106_vm12, %v10121_v34, %v10122_v10  ;;  %v10018_v34 = vld [vmem:[#allocation3 + $0x6c] sm:$0xe] }
 0x6ac   : > { %v10203_v48 = vunpack.c.l.b16 %v10123_v38  ;;  %v11684_v13 = vrot.slane %v10018_v34, 9  ;;  %v15825_v34 = vld [vmem:[#allocation39_spill] sm:$0xff] }
 0x6ad   : > { %v8610_v35 = vpop.f32.mrf.mxu2 }
 0x6ae   : > { %v15404_v3 = vadd.f32 %v8610_v35, %v7995_v55  ;;  %v15821_v55 = vld [vmem:[#allocation34_spill] sm:$0xff]  ;;  %v10228_v25 = vpack.c.b16 %v10203_v48, %v10202_v33 }
 0x6af   : > { %v7997_v35 = vadd.f32 %v15822_v30, %v15821_v55  ;;  %v11935_v55 = vld [vmem:[#allocation3 + $0x74] sm:$0x1] }
 0x6b0   : > { %v10129_v38 = vrot.slane %v11935_v55, 5 }
 0x6b2   : > { %11704 = vmatmul.msk.bf16.gmra.mxu2 %vm5391_vm4, %v10227_v62 }
 0x6b5   : > { %v8613_v37 = vpop.f32.mrf.mxu2 }
 0x6b6   : > { %v15409_v28 = vadd.f32 %v8613_v37, %v7996_v49  ;;  %v11934_v49 = vld [vmem:[#allocation3 + $0x70] sm:$0xf] }
 0x6b7   : > { %v10126_v37 = vrot.slane %v11934_v49, 5 }
 0x6b8   : > { %15820 = vst [vmem:[#allocation18_spill] sm:$0xff] %v15409_v28 }
 0x6b9   : > { %v10128_v28 = vrot.slane %v10126_v37, 4  ;;  %v10127_v4 = vsel %vm12106_vm12, %v11684_v13, %v10126_v37 }
 0x6bb   : > { %v10130_v30 = vsel %vm12106_vm12, %v10128_v28, %v10129_v38  ;;  %v10019_v28 = vld [vmem:[#allocation3 + $0x78] sm:$0xe] }
 0x6bc   : > { %v11685_v13 = vrot.slane %v10019_v28, 9 }
 0x6bd   : > { %v8615_v62 = vpop.f32.mrf.mxu2 }
 0x6be   : > { %v15417_v5 = vadd.f32 %v8615_v62, %v7997_v35  ;;  %v15824_v35 = vld [vmem:[#allocation37_spill] sm:$0xff]  ;;  %v10205_v62 = vunpack.c.l.b16 %v10130_v30 }
 0x6bf   : > { %v7999_v48 = vadd.f32 %v15076_v54, %v15824_v35  ;;  %v11937_v54 = vld [vmem:[#allocation3 + $0x80] sm:$0x1] }
 0x6c0   : > { %v10136_v30 = vrot.slane %v11937_v54, 5 }
 0x6c2   : > { %11705 = vmatmul.msk.bf16.gmra.mxu2 %vm5391_vm4, %v10228_v25  ;;  %v10204_v25 = vunpack.c.l.b16 %v10127_v4 }
 0x6c4   : > { %v10229_v49 = vpack.c.b16 %v10205_v62, %v10204_v25 }
 0x6c5   : > { %v8618_v10 = vpop.f32.mrf.mxu2 }
 0x6c6   : > { %v15422_v61 = vadd.f32 %v8618_v10, %v7998_v7  ;;  %v10133_v7 = vrot.slane %v11936_v29, 5  ;;  %v8000_v10 = vadd.f32 %v15107_v6, %v15825_v34  ;;  %v9321_v34 = vadd.f32 %v15138_v16, %v15046_v26  ;;  %v11939_v16 = vld [vmem:[#allocation3 + $0x8c] sm:$0x1] }
 0x6c8   : > { %v10135_v38 = vrot.slane %v10133_v7, 4  ;;  %v10134_v4 = vsel %vm12106_vm12, %v11685_v13, %v10133_v7  ;;  %v15452_v7 = vld [vmem:[%s15662_s7] ss:$0 sm:$0xff] }
 0x6ca   : > { %v10137_v35 = vsel %vm12106_vm12, %v10135_v38, %v10136_v30  ;;  %v15457_v30 = vld [vmem:[%s15663_s8] ss:$0 sm:$0xff] }
 0x6cd   : > { %v8620_v33 = vpop.f32.mrf.mxu2 }
 0x6ce   : > { %v15430_v12 = vadd.f32 %v8620_v33, %v7999_v48  ;;  %v15826_v48 = vld [vmem:[#allocation41_spill] sm:$0xff]  ;;  %v10207_v33 = vunpack.c.l.b16 %v10137_v35  ;;  %v10143_v35 = vrot.slane %v11939_v16, 5 }
 0x6cf   : > { %v8001_v62 = vadd.f32 %v15129_v39, %v15826_v48  ;;  %v10020_v39 = vld [vmem:[#allocation3 + $0x84] sm:$0xe] }
 0x6d0   : > { %v11686_v26 = vrot.slane %v10020_v39, 9 }
 0x6d2   : > { %11706 = vmatmul.msk.bf16.gmra.mxu2 %vm5391_vm4, %v10229_v49  ;;  %v10206_v49 = vunpack.c.l.b16 %v10134_v4 }
 0x6d4   : > { %v10230_v29 = vpack.c.b16 %v10207_v33, %v10206_v49 }
 0x6d5   : > { %v8623_v55 = vpop.f32.mrf.mxu2 }
 0x6d6   : > { %v15435_v37 = vadd.f32 %v8623_v55, %v8000_v10  ;;  %v11938_v10 = vld [vmem:[#allocation3 + $0x88] sm:$0xf]  ;;  %v9979_v55 = vadd.f32 %v15159_v9, %v9321_v34  ;;  %v9322_v9 = vadd.f32 %v15165_v1, %v15073_v27  ;;  %v15468_v34 = vpop.f32.mrf.mxu3 }
 0x6d7   : > { %v10140_v28 = vrot.slane %v11938_v10, 5 }
 0x6d9   : > { %v10142_v13 = vrot.slane %v10140_v28, 4  ;;  %v10141_v33 = vsel %vm12106_vm12, %v11686_v26, %v10140_v28 }
 0x6da   : > { %v10208_v27 = vunpack.c.l.b16 %v10141_v33 }
 0x6db   : > { %v10144_v48 = vsel %vm12106_vm12, %v10142_v13, %v10143_v35  ;;  %v15473_v13 = vpop.f32.mrf.mxu0  ;;  %v10021_v35 = vld [vmem:[#allocation3 + $0x90] sm:$0xe] }
 0x6dd   : > { %v8625_v25 = vpop.f32.mrf.mxu2 }
 0x6de   : > { %v15443_v6 = vadd.f32 %v8625_v25, %v8001_v62  ;;  %v9980_v25 = vadd.f32 %v15184_v32, %v9322_v9  ;;  %v15478_v9 = vpop.f32.mrf.mxu1  ;;  %v15480_v33 = vpop.f32.mrf.mxu3 }
 0x6e2   : > { %11707 = vmatmul.msk.bf16.gmra.mxu2 %vm5391_vm4, %v10230_v29  ;;  %v10209_v29 = vunpack.c.l.b16 %v10144_v48 }
 0x6e4   : > { %v10231_v39 = vpack.c.b16 %v10209_v29, %v10208_v27  ;;  %v9324_v29 = vadd.f32 %v15222_v23, %v15119_v43 }
 0x6e5   : > { %v10301_v38 = vpop.f32.mrf.mxu2 }
 0x6e6   : > { %v10381_v54 = vadd.f32 %v10301_v38, %v9979_v55  ;;  %v9323_v38 = vadd.f32 %v15188_v36, %v15091_v51  ;;  %v11687_v51 = vrot.slane %v10021_v35, 9  ;;  %v11941_v36 = vld [vmem:[#allocation3 + $0x98] sm:$0x1]  ;;  %v9325_v35 = vadd.f32 %v15254_v8, %v15143_v59  ;;  %v11943_v59 = vld [vmem:[#allocation3 + $0xa4] sm:$0x1] }
 0x6e7   : > { %v10157_v8 = vrot.slane %v11943_v59, 5 }
 0x6e8   : > { %v10417_v4 = vmul.f32 %v15452_v7, %v10381_v54  ;;  %v11940_v54 = vld [vmem:[#allocation3 + $0x94] sm:$0xf]  ;;  %v9981_v26 = vadd.f32 %v15215_v24, %v9323_v38 }
 0x6e9   : > { %v10147_v28 = vrot.slane %v11940_v54, 5 }
 0x6ea   : > { %v10453_v62 = vadd.f32 %v15457_v30, %v10417_v4 }
 0x6eb   : > { %v10149_v48 = vrot.slane %v10147_v28, 4  ;;  %v10148_v27 = vsel %vm12106_vm12, %v11687_v51, %v10147_v28 }
 0x6ec   : > { %v10485_v49 = vmax.f32 %v10453_v62, 0.0 }
 0x6ed   : > { %v10303_v10 = vpop.f32.mrf.mxu2 }
 0x6ee   : > { %v10382_v55 = vadd.f32 %v10303_v10, %v9980_v25  ;;  %10517 = vxpose.xlu0.b32.start [1/16] (narrow) %v10485_v49, 32  ;;  %v10150_v25 = vrot.slane %v11941_v36, 5  ;;  %v10022_v36 = vld [vmem:[#allocation3 + $0x9c] sm:$0xe] }
 0x6f0   : > { %v10418_v1 = vmul.f32 %v15452_v7, %v10382_v55  ;;  %v10151_v24 = vsel %vm12106_vm12, %v10149_v48, %v10150_v25  ;;  %v15488_v55 = vpop.f32.mrf.mxu0  ;;  %v11942_v48 = vld [vmem:[#allocation3 + $0xa0] sm:$0xf] }
 0x6f1   : > { %v10211_v38 = vunpack.c.l.b16 %v10151_v24  ;;  %v10154_v28 = vrot.slane %v11942_v48, 5 }
 0x6f2   : > { %11708 = vmatmul.msk.bf16.gmra.mxu2 %vm5391_vm4, %v10231_v39  ;;  %v10454_v32 = vadd.f32 %v15457_v30, %v10418_v1  ;;  %v9982_v1 = vadd.f32 %v15247_v60, %v9324_v29 }
 0x6f3   : > { %v10156_v29 = vrot.slane %v10154_v28, 4 }
 0x6f4   : > { %v10486_v16 = vmax.f32 %v10454_v32, 0.0 }
 0x6f5   : > { %v10306_v4 = vpop.f32.mrf.mxu2 }
 0x6f6   : > { %v10383_v62 = vadd.f32 %v10306_v4, %v9981_v26  ;;  %10518 = vxpose.xlu0.b32.cont [2/16] (narrow) %v10486_v16, 32  ;;  %v10210_v26 = vunpack.c.l.b16 %v10148_v27  ;;  %v15493_v16 = vpop.f32.mrf.mxu1  ;;  %v15498_v4 = vpop.f32.mrf.mxu3 }
 0x6f8   : > { %v10419_v49 = vmul.f32 %v15452_v7, %v10383_v62  ;;  %v10232_v23 = vpack.c.b16 %v10211_v38, %v10210_v26  ;;  %v9983_v62 = vadd.f32 %v15269_v0, %v9325_v35  ;;  %v15503_v25 = vpop.f32.mrf.mxu0  ;;  %v10158_v0 = vsel %vm12106_vm12, %v10156_v29, %v10157_v8 }
 0x6f9   : > { %v9328_v8 = vadd.f32 %v15320_v14, %v15208_v20  ;;  %v15827_v20 = vld [vmem:[#allocation42_spill] sm:$0xff] }
 0x6fa   : > { %v10455_v10 = vadd.f32 %v15457_v30, %v10419_v49 }
 0x6fc   : > { %v10487_v39 = vmax.f32 %v10455_v10, 0.0  ;;  %v11688_v10 = vrot.slane %v10022_v36, 9 }
 0x6fd   : > { %v10308_v54 = vpop.f32.mrf.mxu2 }
 0x6fe   : > { %v10384_v32 = vadd.f32 %v10308_v54, %v9982_v1  ;;  %10519 = vxpose.xlu0.b32.cont [3/16] (narrow) %v10487_v39, 32  ;;  %v9326_v1 = vadd.f32 %v15273_v41, %v15161_v21  ;;  %v15508_v39 = vpop.f32.mrf.mxu1  ;;  %v15513_v54 = vpop.f32.mrf.mxu3 }
 0x700   : > { %v10420_v43 = vmul.f32 %v15452_v7, %v10384_v32  ;;  %v10155_v32 = vsel %vm12106_vm12, %v11688_v10, %v10154_v28  ;;  %v9984_v26 = vadd.f32 %v15293_v52, %v9326_v1  ;;  %v9268_v41 = vpop.f32.mrf.mxu0  ;;  %v9986_v1 = vadd.f32 %v15328_v2, %v9328_v8 }
 0x701   : > { %v10212_v21 = vunpack.c.l.b16 %v10155_v32 }
 0x702   : > { %11709 = vmatmul.msk.bf16.gmra.mxu2 %vm5391_vm4, %v10232_v23  ;;  %v10456_v60 = vadd.f32 %v15457_v30, %v10420_v43  ;;  %v10213_v23 = vunpack.c.l.b16 %v10158_v0 }
 0x704   : > { %v10488_v51 = vmax.f32 %v10456_v60, 0.0 }
 0x705   : > { %v10311_v49 = vpop.f32.mrf.mxu2 }
 0x706   : > { %v10385_v24 = vadd.f32 %v10311_v49, %v9983_v62  ;;  %10520 = vxpose.xlu0.b32.cont [4/16] (narrow) %v10488_v51, 32  ;;  %v10233_v62 = vpack.c.b16 %v10213_v23, %v10212_v21  ;;  %v9327_v51 = vadd.f32 %v15300_v45, %v15182_v63  ;;  %v9926_v28 = vpop.f32.mrf.mxu1  ;;  %v8980_v29 = vpop.f32.mrf.mxu3  ;;  %v9038_v45 = vadd.f32 %v15468_v34, %v15227_v19 }
 0x707   : > { %v9039_v19 = vadd.f32 %v15480_v33, %v15252_v31 }
 0x708   : > { %v10421_v27 = vmul.f32 %v15452_v7, %v10385_v24  ;;  %v9985_v52 = vadd.f32 %v15316_v53, %v9327_v51  ;;  %v9329_v23 = vadd.f32 %v15473_v13, %v9038_v45 }
 0x70a   : > { %v10457_v38 = vadd.f32 %v15457_v30, %v10421_v27  ;;  %v9271_v27 = vpop.f32.mrf.mxu0  ;;  %v9987_v2 = vadd.f32 %v15478_v9, %v9329_v23 }
 0x70c   : > { %v10489_v43 = vmax.f32 %v10457_v38, 0.0 }
 0x70d   : > { %v10313_v35 = vpop.f32.mrf.mxu2 }
 0x70e   : > { %v10386_v48 = vadd.f32 %v10313_v35, %v9984_v26  ;;  %10521 = vxpose.xlu0.b32.cont [5/16] (narrow) %v10489_v43, 32  ;;  %v15531_v53 = vpop.f32.mrf.mxu1  ;;  %v8982_v26 = vpop.f32.mrf.mxu3 }
 0x710   : > { %v10422_v60 = vmul.f32 %v15452_v7, %v10386_v48 }
 0x712   : > { %11710 = vmatmul.msk.bf16.gmra.mxu2 %vm5391_vm4, %v10233_v62  ;;  %v10458_v36 = vadd.f32 %v15457_v30, %v10422_v60  ;;  %v15538_v35 = vpop.f32.mrf.mxu0  ;;  %v9330_v62 = vadd.f32 %v15488_v55, %v9039_v19  ;;  %v15828_v55 = vld [vmem:[#allocation43_spill] sm:$0xff] }
 0x714   : > { %v10490_v49 = vmax.f32 %v10458_v36, 0.0  ;;  %v9988_v31 = vadd.f32 %v15493_v16, %v9330_v62  ;;  %v15829_v62 = vld [vmem:[#allocation44_spill] sm:$0xff] }
 0x715   : > { %v10316_v24 = vpop.f32.mrf.mxu2 }
 0x716   : > { %v10387_v10 = vadd.f32 %v10316_v24, %v9985_v52  ;;  %10522 = vxpose.xlu0.b32.cont [6/16] (narrow) %v10490_v49, 32  ;;  %v15543_v60 = vpop.f32.mrf.mxu1  ;;  %v8985_v51 = vpop.f32.mrf.mxu3  ;;  %v9040_v52 = vadd.f32 %v15498_v4, %v15263_v44  ;;  %v9041_v44 = vadd.f32 %v15513_v54, %v15287_v22 }
 0x718   : > { %v10423_v59 = vmul.f32 %v15452_v7, %v10387_v10 }
 0x71a   : > { %v10459_v63 = vadd.f32 %v15457_v30, %v10423_v59  ;;  %v15551_v9 = vpop.f32.mrf.mxu0  ;;  %v9331_v59 = vadd.f32 %v15503_v25, %v9040_v52  ;;  %v9332_v25 = vadd.f32 %v9268_v41, %v9041_v44 }
 0x71c   : > { %v10491_v0 = vmax.f32 %v10459_v63, 0.0  ;;  %v9989_v16 = vadd.f32 %v15508_v39, %v9331_v59  ;;  %v10182_v39 = vrot.slane %v15289_v11, 5 }
 0x71d   : > { %v10318_v38 = vpop.f32.mrf.mxu2 }
 0x71e   : > { %v10388_v32 = vadd.f32 %v10318_v38, %v9986_v1  ;;  %10523 = vxpose.xlu0.b32.cont [7/16] (narrow) %v10491_v0, 32  ;;  %v9934_v8 = vpop.f32.mrf.mxu1  ;;  %v8987_v45 = vpop.f32.mrf.mxu3 }
 0x720   : > { %v10424_v43 = vmul.f32 %v15452_v7, %v10388_v32 }
 0x722   : > { %11711 = vmatmul.msk.bf16.gmra.mxu2 %vm5391_vm4, %v15827_v20  ;;  %v10460_v14 = vadd.f32 %v15457_v30, %v10424_v43  ;;  %v9278_v38 = vpop.f32.mrf.mxu0  ;;  %v9042_v20 = vadd.f32 %v8980_v29, %v15306_v46  ;;  %v10184_v46 = vrot.slane %v10182_v39, 4  ;;  %v9043_v29 = vadd.f32 %v8982_v26, %v15323_v58 }
 0x724   : > { %v10492_v34 = vmax.f32 %v10460_v14, 0.0  ;;  %v9990_v14 = vadd.f32 %v9926_v28, %v9332_v25  ;;  %v10185_v28 = vrot.slane %v15291_v42, 5  ;;  %v9334_v42 = vadd.f32 %v15538_v35, %v9043_v29 }
 0x725   : > { %v10321_v48 = vpop.f32.mrf.mxu2 }
 0x726   : > { %v10389_v21 = vadd.f32 %v10321_v48, %v9987_v2  ;;  %10524 = vxpose.xlu0.b32.cont [8/16] (narrow) %v10492_v34, 32  ;;  %v9936_v23 = vpop.f32.mrf.mxu1  ;;  %v8990_v2 = vpop.f32.mrf.mxu3  ;;  %v9333_v48 = vadd.f32 %v9271_v27, %v9042_v20  ;;  %v9992_v44 = vadd.f32 %v15543_v60, %v9334_v42  ;;  %v9045_v20 = vadd.f32 %v8987_v45, %v15339_v50 }
 0x728   : > { %v10425_v13 = vmul.f32 %v15452_v7, %v10389_v21  ;;  %v10026_v21 = vld [vmem:[#allocation3 + $0xcc] sm:$0xe]  ;;  %v9991_v52 = vadd.f32 %v15531_v53, %v9333_v48  ;;  %v9046_v48 = vadd.f32 %v8990_v2, %v15344_v57 }
 0x72a   : > { %v10461_v36 = vadd.f32 %v15457_v30, %v10425_v13  ;;  %v9281_v13 = vpop.f32.mrf.mxu0 }
 0x72b   : > { %v9337_v45 = vadd.f32 %v9281_v13, %v9046_v48 }
 0x72c   : > { %v10493_v33 = vmax.f32 %v10461_v36, 0.0  ;;  %v11692_v36 = vrot.slane %v10026_v21, 9 }
 0x72d   : > { %v10323_v49 = vpop.f32.mrf.mxu2 }
 0x72e   : > { %v10390_v24 = vadd.f32 %v10323_v49, %v9988_v31  ;;  %10525 = vxpose.xlu0.b32.cont [9/16] (narrow) %v10493_v33, 32  ;;  %v9939_v11 = vpop.f32.mrf.mxu1  ;;  %v8992_v27 = vpop.f32.mrf.mxu3 }
 0x72f   : > { %v9995_v29 = vadd.f32 %v9939_v11, %v9337_v45  ;;  %v15831_v45 = vld [vmem:[#allocation8_spill] sm:$0xff] }
 0x730   : > { %v10426_v10 = vmul.f32 %v15452_v7, %v10390_v24  ;;  %v10183_v24 = vsel %vm12106_vm12, %v11692_v36, %v10182_v39 }
 0x731   : > { %v10220_v26 = vunpack.c.l.b16 %v10183_v24 }
 0x732   : > { %11712 = vmatmul.msk.bf16.gmra.mxu2 %vm5391_vm4, %v15828_v55  ;;  %v10462_v63 = vadd.f32 %v15457_v30, %v10426_v10  ;;  %v10186_v10 = vsel %vm12106_vm12, %v10184_v46, %v10185_v28  ;;  %v9283_v55 = vpop.f32.mrf.mxu0 }
 0x733   : > { %v10221_v53 = vunpack.c.l.b16 %v10186_v10 }
 0x734   : > { %v10494_v4 = vmax.f32 %v10462_v63, 0.0  ;;  %v9044_v63 = vadd.f32 %v8985_v51, %v15331_v17 }
 0x735   : > { %v10326_v1 = vpop.f32.mrf.mxu2 }
 0x736   : > { %v10391_v0 = vadd.f32 %v10326_v1, %v9989_v16  ;;  %10526 = vxpose.xlu0.b32.cont [10/16] (narrow) %v10494_v4, 32  ;;  %v9941_v18 = vpop.f32.mrf.mxu1  ;;  %v9335_v25 = vadd.f32 %v15551_v9, %v9044_v63  ;;  %v8995_v35 = vpop.f32.mrf.mxu3 }
 0x737   : > { %v9048_v10 = vadd.f32 %v8995_v35, %v15357_v15 }
 0x738   : > { %v10427_v32 = vmul.f32 %v15452_v7, %v10391_v0  ;;  %v10237_v0 = vpack.c.b16 %v10221_v53, %v10220_v26  ;;  %v9993_v17 = vadd.f32 %v9934_v8, %v9335_v25 }
 0x73a   : > { %v10463_v43 = vadd.f32 %v15457_v30, %v10427_v32  ;;  %v9286_v60 = vpop.f32.mrf.mxu0 }
 0x73c   : > { %v10495_v19 = vmax.f32 %v10463_v43, 0.0 }
 0x73d   : > { %v10328_v34 = vpop.f32.mrf.mxu2 }
 0x73e   : > { %v10392_v22 = vadd.f32 %v10328_v34, %v9990_v14  ;;  %10527 = vxpose.xlu0.b32.cont [11/16] (narrow) %v10495_v19, 32  ;;  %v9944_v39 = vpop.f32.mrf.mxu1  ;;  %v8997_v9 = vpop.f32.mrf.mxu3 }
 0x73f   : > { %v9049_v63 = vadd.f32 %v8997_v9, %v15365_v47 }
 0x740   : > { %v10428_v54 = vmul.f32 %v15452_v7, %v10392_v22  ;;  %v9336_v22 = vadd.f32 %v9278_v38, %v9045_v20  ;;  %v9047_v38 = vadd.f32 %v8992_v27, %v15352_v56  ;;  %v9339_v27 = vadd.f32 %v9286_v60, %v9048_v10 }
 0x742   : > { %11713 = vmatmul.msk.bf16.gmra.mxu2 %vm5391_vm4, %v15829_v62  ;;  %v10464_v41 = vadd.f32 %v15457_v30, %v10428_v54  ;;  %v9994_v21 = vadd.f32 %v9936_v23, %v9336_v22  ;;  %v9288_v50 = vpop.f32.mrf.mxu0  ;;  %v9338_v57 = vadd.f32 %v9283_v55, %v9047_v38 }
 0x744   : > { %v10496_v31 = vmax.f32 %v10464_v41, 0.0  ;;  %v9996_v13 = vadd.f32 %v9941_v18, %v9338_v57  ;;  %v9340_v18 = vadd.f32 %v9288_v50, %v9049_v63 }
 0x745   : > { %v10331_v33 = vpop.f32.mrf.mxu2 }
 0x746   : > { %v10393_v49 = vadd.f32 %v10331_v33, %v9991_v52  ;;  %10528 = vxpose.xlu0.b32.cont [12/16] (narrow) %v10496_v31, 32  ;;  %v9946_v28 = vpop.f32.mrf.mxu1  ;;  %v9000_v31 = vpop.f32.mrf.mxu3 }
 0x747   : > { %v9050_v35 = vadd.f32 %v9000_v31, %v15370_v40 }
 0x748   : > { %v10429_v59 = vmul.f32 %v15452_v7, %v10393_v49 }
 0x74a   : > { %v10465_v58 = vadd.f32 %v15457_v30, %v10429_v59  ;;  %v9291_v2 = vpop.f32.mrf.mxu0 }
 0x74c   : > { %v10497_v16 = vmax.f32 %v10465_v58, 0.0 }
 0x74d   : > { %v10333_v4 = vpop.f32.mrf.mxu2 }
 0x74e   : > { %v10394_v1 = vadd.f32 %v10333_v4, %v9992_v44  ;;  %10529 = vxpose.xlu0.b32.cont [13/16] (narrow) %v10497_v16, 32  ;;  %v9949_v42 = vpop.f32.mrf.mxu1  ;;  %v9002_v56 = vpop.f32.mrf.mxu3  ;;  %v9997_v44 = vadd.f32 %v9944_v39, %v9339_v27  ;;  %v15830_v39 = vld [vmem:[#allocation14_spill] sm:$0xff] }
 0x750   : > { %v10430_v32 = vmul.f32 %v15452_v7, %v10394_v1 }
 0x752   : > { %11714 = vmatmul.msk.bf16.gmra.mxu2 %vm5391_vm4, %v10237_v0  ;;  %v10466_v43 = vadd.f32 %v15457_v30, %v10430_v32  ;;  %v9293_v55 = vpop.f32.mrf.mxu0 }
 0x754   : > { %v10498_v51 = vmax.f32 %v10466_v43, 0.0  ;;  %v9998_v43 = vadd.f32 %v9946_v28, %v9340_v18 }
 0x755   : > { %v10336_v14 = vpop.f32.mrf.mxu2 }
 0x756   : > { %v10395_v19 = vadd.f32 %v10336_v14, %v9993_v17  ;;  %10530 = vxpose.xlu0.b32.cont [14/16] (narrow) %v10498_v51, 32  ;;  %v9951_v15 = vpop.f32.mrf.mxu1  ;;  %v9005_v32 = vpop.f32.mrf.mxu3  ;;  %v9341_v14 = vadd.f32 %v9291_v2, %v9050_v35  ;;  %v15832_v2 = vld [vmem:[#allocation17_spill] sm:$0xff] }
 0x758   : > { %v10431_v34 = vmul.f32 %v15452_v7, %v10395_v19  ;;  %v9999_v9 = vadd.f32 %v9949_v42, %v9341_v14 }
 0x75a   : > { %v10467_v54 = vadd.f32 %v15457_v30, %v10431_v34  ;;  %v9296_v17 = vpop.f32.mrf.mxu0 }
 0x75c   : > { %v10499_v62 = vmax.f32 %v10467_v54, 0.0  ;;  %v9051_v54 = vadd.f32 %v9002_v56, %v15830_v39  ;;  %v15834_v39 = vld [vmem:[#allocation18_spill] sm:$0xff] }
 0x75d   : > { %v10338_v41 = vpop.f32.mrf.mxu2 }
 0x75e   : > { %v10396_v36 = vadd.f32 %v10338_v41, %v9994_v21  ;;  %10531 = vxpose.xlu0.b32.cont [15/16] (narrow) %v10499_v62, 32  ;;  %v9954_v19 = vpop.f32.mrf.mxu1  ;;  %v9007_v22 = vpop.f32.mrf.mxu3 }
 0x760   : > { %v10432_v8 = vmul.f32 %v15452_v7, %v10396_v36  ;;  %v9342_v36 = vadd.f32 %v9293_v55, %v9051_v54  ;;  %v15833_v55 = vld [vmem:[#allocation9_spill] sm:$0xff] }
 0x762   : > { %v10468_v46 = vadd.f32 %v15457_v30, %v10432_v8  ;;  %v9298_v40 = vpop.f32.mrf.mxu0  ;;  %v10000_v28 = vadd.f32 %v9951_v15, %v9342_v36 }
 0x764   : > { %v10500_v52 = vmax.f32 %v10468_v46, 0.0  ;;  %v9052_v46 = vadd.f32 %v9005_v32, %v15831_v45 }
 0x765   : > { %v10341_v33 = vpop.f32.mrf.mxu2 }
 0x766   : > { %v10397_v49 = vadd.f32 %v10341_v33, %v9995_v29  ;;  %10532 = vxpose.xlu0.b32.end [16/16] (narrow) %v10500_v52, 32  ;;  %v9956_v8 = vpop.f32.mrf.mxu1  ;;  %v9010_v29 = vpop.f32.mrf.mxu3 }
 0x767   : > { %v9054_v63 = vadd.f32 %v9010_v29, %v15833_v55 }
 0x768   : > { %v10433_v23 = vmul.f32 %v15452_v7, %v10397_v49  ;;  %v9343_v49 = vadd.f32 %v9296_v17, %v9052_v46 }
 0x76a   : > { %v10469_v24 = vadd.f32 %v15457_v30, %v10433_v23  ;;  %v9301_v57 = vpop.f32.mrf.mxu0  ;;  %v10001_v10 = vadd.f32 %v9954_v19, %v9343_v49 }
 0x76b   : > { %v9345_v18 = vadd.f32 %v9301_v57, %v9054_v63 }
 0x76c   : > { %v10501_v59 = vmax.f32 %v10469_v24, 0.0  ;;  %v9053_v24 = vadd.f32 %v9007_v22, %v15832_v2 }
 0x76d   : > { %v10343_v58 = vpop.f32.mrf.mxu2 }
 0x76e   : > { %v10398_v26 = vadd.f32 %v10343_v58, %v9996_v13  ;;  %10549 = vxpose.xlu1.b32.start [1/16] (narrow) %v10501_v59, 32  ;;  %v9959_v59 = vpop.f32.mrf.mxu1 }
 0x770   : > { %v10434_v11 = vmul.f32 %v15452_v7, %v10398_v26  ;;  %v9012_v26 = vpop.f32.mrf.mxu3 }
 0x771   : > { %v9055_v35 = vadd.f32 %v9012_v26, %v15404_v3 }
 0x772   : > { %v10470_v53 = vadd.f32 %v15457_v30, %v10434_v11  ;;  %v9344_v11 = vadd.f32 %v9298_v40, %v9053_v24 }
 0x774   : > { %v10502_v16 = vmax.f32 %v10470_v53, 0.0  ;;  %v9303_v53 = vpop.f32.mrf.mxu0 }
 0x775   : > { %v10346_v4 = vpop.f32.mrf.mxu2  ;;  %v9346_v14 = vadd.f32 %v9303_v53, %v9055_v35 }
 0x776   : > { %v10399_v1 = vadd.f32 %v10346_v4, %v9997_v44  ;;  %10550 = vxpose.xlu1.b32.cont [2/16] (narrow) %v10502_v16, 32  ;;  %v10002_v44 = vadd.f32 %v9956_v8, %v9344_v11  ;;  %v9961_v15 = vpop.f32.mrf.mxu1 }
 0x778   : > { %v10435_v0 = vmul.f32 %v15452_v7, %v10399_v1  ;;  %v9015_v32 = vpop.f32.mrf.mxu3 }
 0x779   : > { %v9056_v54 = vadd.f32 %v9015_v32, %v15834_v39 }
 0x77a   : > { %v10471_v25 = vadd.f32 %v15457_v30, %v10435_v0 }
 0x77c   : > { %v10503_v20 = vmax.f32 %v10471_v25, 0.0  ;;  %v9306_v17 = vpop.f32.mrf.mxu0 }
 0x77d   : > { %v10348_v51 = vpop.f32.mrf.mxu2 }
 0x77e   : > { %v10400_v60 = vadd.f32 %v10348_v51, %v9998_v43  ;;  %10551 = vxpose.xlu1.b32.cont [3/16] (narrow) %v10503_v20, 32  ;;  %v10003_v43 = vadd.f32 %v9959_v59, %v9345_v18  ;;  %v9964_v19 = vpop.f32.mrf.mxu1 }
 0x780   : > { %v10436_v47 = vmul.f32 %v15452_v7, %v10400_v60  ;;  %v9017_v22 = vpop.f32.mrf.mxu3 }
 0x781   : > { %v9057_v8 = vadd.f32 %v9017_v22, %v15417_v5 }
 0x782   : > { %v10472_v34 = vadd.f32 %v15457_v30, %v10436_v47 }
 0x784   : > { %v10504_v48 = vmax.f32 %v10472_v34, 0.0  ;;  %v9308_v3 = vpop.f32.mrf.mxu0 }
 0x785   : > { %v10351_v21 = vpop.f32.mrf.mxu2 }
 0x786   : > { %v10401_v62 = vadd.f32 %v10351_v21, %v9999_v9  ;;  %10552 = vxpose.xlu1.b32.cont [4/16] (narrow) %v10504_v48, 32  ;;  %v10004_v9 = vadd.f32 %v9961_v15, %v9346_v14 }
 0x788   : > { %v10437_v41 = vmul.f32 %v15452_v7, %v10401_v62 }
 0x78a   : > { %v10473_v50 = vadd.f32 %v15457_v30, %v10437_v41  ;;  %v9347_v41 = vadd.f32 %v9306_v17, %v9056_v54 }
 0x78c   : > { %v10505_v38 = vmax.f32 %v10473_v50, 0.0  ;;  %v9966_v50 = vpop.f32.mrf.mxu1  ;;  %v10005_v45 = vadd.f32 %v9964_v19, %v9347_v41 }
 0x78d   : > { %v10353_v52 = vpop.f32.mrf.mxu2 }
 0x78e   : > { %v10402_v31 = vadd.f32 %v10353_v52, %v10000_v28  ;;  %10553 = vxpose.xlu1.b32.cont [5/16] (narrow) %v10505_v38, 32  ;;  %v9020_v28 = vpop.f32.mrf.mxu3 }
 0x78f   : > { %v9058_v57 = vadd.f32 %v9020_v28, %v15422_v61 }
 0x790   : > { %v10438_v33 = vmul.f32 %v15452_v7, %v10402_v31  ;;  %v9348_v31 = vadd.f32 %v9308_v3, %v9057_v8 }
 0x792   : > { %v10474_v23 = vadd.f32 %v15457_v30, %v10438_v33  ;;  %v9311_v33 = vpop.f32.mrf.mxu0  ;;  %v10533_v55 = vpop.trf.xlu0 }
 0x793   : > { %10581 = vst [vmem:[%s15632_s21] sm:$0xff] %v10533_v55 }
 0x794   : > { %v10506_v13 = vmax.f32 %v10474_v23, 0.0  ;;  %v10006_v23 = vadd.f32 %v9966_v50, %v9348_v31  ;;  %v9969_v24 = vpop.f32.mrf.mxu1 }
 0x795   : > { %v10356_v42 = vpop.f32.mrf.mxu2 }
 0x796   : > { %v10403_v58 = vadd.f32 %v10356_v42, %v10001_v10  ;;  %10554 = vxpose.xlu1.b32.cont [6/16] (narrow) %v10506_v13, 32  ;;  %v9022_v13 = vpop.f32.mrf.mxu3  ;;  %v9349_v42 = vadd.f32 %v9311_v33, %v9058_v57 }
 0x798   : > { %v10439_v56 = vmul.f32 %v15452_v7, %v10403_v58  ;;  %v10007_v11 = vadd.f32 %v9969_v24, %v9349_v42 }
 0x79a   : > { %v10475_v27 = vadd.f32 %v15457_v30, %v10439_v56  ;;  %v9313_v26 = vpop.f32.mrf.mxu0  ;;  %v9059_v56 = vadd.f32 %v9022_v13, %v15430_v12 }
 0x79c   : > { %v10507_v16 = vmax.f32 %v10475_v27, 0.0  ;;  %v9971_v63 = vpop.f32.mrf.mxu1 }
 0x79d   : > { %v10358_v4 = vpop.f32.mrf.mxu2 }
 0x79e   : > { %v10404_v1 = vadd.f32 %v10358_v4, %v10002_v44  ;;  %10555 = vxpose.xlu1.b32.cont [7/16] (narrow) %v10507_v16, 32  ;;  %v9350_v16 = vadd.f32 %v9313_v26, %v9059_v56  ;;  %v9025_v4 = vpop.f32.mrf.mxu3 }
 0x79f   : > { %v9060_v15 = vadd.f32 %v9025_v4, %v15435_v37 }
 0x7a0   : > { %v10440_v0 = vmul.f32 %v15452_v7, %v10404_v1 }
 0x7a2   : > { %v10476_v25 = vadd.f32 %v15457_v30, %v10440_v0  ;;  %v9316_v1 = vpop.f32.mrf.mxu0  ;;  %v10008_v0 = vadd.f32 %v9971_v63, %v9350_v16 }
 0x7a4   : > { %v10508_v20 = vmax.f32 %v10476_v25, 0.0  ;;  %v9974_v35 = vpop.f32.mrf.mxu1 }
 0x7a5   : > { %v10361_v51 = vpop.f32.mrf.mxu2 }
 0x7a6   : > { %v10405_v60 = vadd.f32 %v10361_v51, %v10003_v43  ;;  %10556 = vxpose.xlu1.b32.cont [8/16] (narrow) %v10508_v20, 32  ;;  %v9351_v43 = vadd.f32 %v9316_v1, %v9060_v15  ;;  %v9027_v51 = vpop.f32.mrf.mxu3 }
 0x7a8   : > { %v10441_v47 = vmul.f32 %v15452_v7, %v10405_v60  ;;  %v10009_v60 = vadd.f32 %v9974_v35, %v9351_v43 }
 0x7aa   : > { %v10477_v34 = vadd.f32 %v15457_v30, %v10441_v47  ;;  %v9061_v47 = vadd.f32 %v9027_v51, %v15443_v6  ;;  %v9318_v19 = vpop.f32.mrf.mxu0 }
 0x7ac   : > { %v10509_v48 = vmax.f32 %v10477_v34, 0.0  ;;  %v9352_v37 = vadd.f32 %v9318_v19, %v9061_v47  ;;  %v9976_v54 = vpop.f32.mrf.mxu1 }
 0x7ad   : > { %v10363_v21 = vpop.f32.mrf.mxu2 }
 0x7ae   : > { %v10406_v62 = vadd.f32 %v10363_v21, %v10004_v9  ;;  %10557 = vxpose.xlu1.b32.cont [9/16] (narrow) %v10509_v48, 32  ;;  %v10010_v48 = vadd.f32 %v9976_v54, %v9352_v37 }
 0x7b0   : > { %v10442_v40 = vmul.f32 %v15452_v7, %v10406_v62 }
 0x7b2   : > { %v10478_v36 = vadd.f32 %v15457_v30, %v10442_v40 }
 0x7b4   : > { %v10510_v46 = vmax.f32 %v10478_v36, 0.0  ;;  %v10534_v36 = vpop.trf.xlu0 }
 0x7b5   : > { %v10366_v38 = vpop.f32.mrf.mxu2  ;;  %10583 = vst [vmem:[%s15632_s21 + $0x10] sm:$0xff] %v10534_v36 }
 0x7b6   : > { %v10407_v29 = vadd.f32 %v10366_v38, %v10005_v45  ;;  %10558 = vxpose.xlu1.b32.cont [10/16] (narrow) %v10510_v46, 32 }
 0x7b8   : > { %v10443_v52 = vmul.f32 %v15452_v7, %v10407_v29 }
 0x7ba   : > { %v10479_v49 = vadd.f32 %v15457_v30, %v10443_v52 }
 0x7bc   : > { %v10511_v2 = vmax.f32 %v10479_v49, 0.0  ;;  %v10535_v50 = vpop.trf.xlu0 }
 0x7bd   : > { %v10368_v10 = vpop.f32.mrf.mxu2  ;;  %10585 = vst [vmem:[%s15632_s21 + $0x20] sm:$0xff] %v10535_v50 }
 0x7be   : > { %v10408_v5 = vadd.f32 %v10368_v10, %v10006_v23  ;;  %10559 = vxpose.xlu1.b32.cont [11/16] (narrow) %v10511_v2, 32 }
 0x7c0   : > { %v10444_v59 = vmul.f32 %v15452_v7, %v10408_v5 }
 0x7c2   : > { %v10480_v58 = vadd.f32 %v15457_v30, %v10444_v59 }
 0x7c4   : > { %v10512_v27 = vmax.f32 %v10480_v58, 0.0  ;;  %v10536_v8 = vpop.trf.xlu0 }
 0x7c5   : > { %v10371_v61 = vpop.f32.mrf.mxu2  ;;  %10587 = vst [vmem:[%s15632_s21 + $0x30] sm:$0xff] %v10536_v8 }
 0x7c6   : > { %v10409_v53 = vadd.f32 %v10371_v61, %v10007_v11  ;;  %10560 = vxpose.xlu1.b32.cont [12/16] (narrow) %v10512_v27, 32 }
 0x7c8   : > { %v10445_v44 = vmul.f32 %v15452_v7, %v10409_v53 }
 0x7ca   : > { %v10481_v12 = vadd.f32 %v15457_v30, %v10445_v44 }
 0x7cc   : > { %v10513_v18 = vmax.f32 %v10481_v12, 0.0 }
 0x7cd   : > { %v10373_v32 = vpop.f32.mrf.mxu2 }
 0x7ce   : > { %v10410_v25 = vadd.f32 %v10373_v32, %v10008_v0  ;;  %10561 = vxpose.xlu1.b32.cont [13/16] (narrow) %v10513_v18, 32 }
 0x7d0   : > { %v10446_v20 = vmul.f32 %v15452_v7, %v10410_v25 }
 0x7d2   : > { %v10482_v17 = vadd.f32 %v15457_v30, %v10446_v20 }
 0x7d4   : > { %v10514_v14 = vmax.f32 %v10482_v17, 0.0 }
 0x7d5   : > { %v10376_v34 = vpop.f32.mrf.mxu2 }
 0x7d6   : > { %v10411_v22 = vadd.f32 %v10376_v34, %v10009_v60  ;;  %10562 = vxpose.xlu1.b32.cont [14/16] (narrow) %v10514_v14, 32 }
 0x7d8   : > { %v10447_v39 = vmul.f32 %v15452_v7, %v10411_v22 }
 0x7da   : > { %v10483_v9 = vadd.f32 %v15457_v30, %v10447_v39 }
 0x7dc   : > { %v10515_v21 = vmax.f32 %v10483_v9, 0.0 }
 0x7dd   : > { %v10378_v62 = vpop.f32.mrf.mxu2 }
 0x7de   : > { %v10412_v6 = vadd.f32 %v10378_v62, %v10010_v48  ;;  %10563 = vxpose.xlu1.b32.cont [15/16] (narrow) %v10515_v21, 32 }
 0x7e0   : > { %v10448_v3 = vmul.f32 %v15452_v7, %v10412_v6 }
 0x7e2   : > { %v10484_v40 = vadd.f32 %v15457_v30, %v10448_v3 }
 0x7e4   : > { %v10516_v41 = vmax.f32 %v10484_v40, 0.0 }
 0x7e6   : > { %10564 = vxpose.xlu1.b32.end [16/16] (narrow) %v10516_v41, 32 }
 0x812   : > { %v10565_v45 = vpop.trf.xlu1 }
 0x813   : > { %10582 = vst [vmem:[%s15632_s21 + $0x8] sm:$0xff] %v10565_v45 }
 0x81a   : > { %v10566_v46 = vpop.trf.xlu1 }
 0x81b   : > { %10584 = vst [vmem:[%s15632_s21 + $0x18] sm:$0xff] %v10566_v46 }
 0x822   : > { %v10567_v28 = vpop.trf.xlu1 }
 0x823   : > { %10586 = vst [vmem:[%s15632_s21 + $0x28] sm:$0xff] %v10567_v28 }
 0x82a   : > { %v10568_v38 = vpop.trf.xlu1 }
 0x82b   : > { %10588 = vst [vmem:[%s15632_s21 + $0x38] sm:$0xff] %v10568_v38 }
 0x82c PF: > { %s21_s15 = sadd.s32 1, %s11950_s15  }
 0x82d   : > { %p18_p4 = scmp.ge.s32.totalorder %s21_s15, 4  }
 0x82f   :  { %20 = sbr.rel (!%p18_p4) target bundleno = 2 (0x2), region = 115 }

</bundles_post_ra>
